<compile_context>
chip_gen: v7x
topology: tpu7x:2x2x1
jax: 0.10.0
libtpu: 0.0.40
codegen_flags: <defaults>
</compile_context>

<pallas_src>
import functools

import jax
import jax.numpy as jnp
from jax.experimental import pallas as pl
from jax.experimental.pallas import tpu as pltpu

AFFINE_EPS = 1e-4
_HI = jax.lax.Precision.HIGHEST


# --------------------------------------------------------------------------- #
# helpers (pure layout plumbing, no FLOPs)
# --------------------------------------------------------------------------- #
def _pick_lane_block(p_total, max_block=2048):
    """Largest multiple-of-128 block dividing p_total, preferring >= 2 grid steps
    (feeds both TensorCores on the parallel axis)."""
    cands = [c for c in (2048, 1024, 512, 256, 128) if c <= max_block and p_total % c == 0]
    if not cands:
        return p_total
    for c in cands:
        if p_total // c >= 2:
            return c
    return cands[-1]


def _pick_block(total, max_block=1024):
    """Largest multiple-of-128 block dividing total (no multi-step preference)."""
    for c in (2048, 1024, 512, 256, 128):
        if c <= max_block and total % c == 0:
            return c
    return total


def _im2col_3x3(x_nchw):
    """(N,C,H,W) -> patches^T of shape (C*9, N*H*W) for a 3x3 conv, padding=1.

    K order = (c_in, kh, kw), matching weight.reshape(C_out, C_in*9).
    Pixel order = (n, h, w).
    """
    n, c, h, w = x_nchw.shape
    xp = jnp.pad(x_nchw, ((0, 0), (0, 0), (1, 1), (1, 1)))
    cols = [xp[:, :, kh:kh + h, kw:kw + w] for kh in range(3) for kw in range(3)]
    pat = jnp.stack(cols, axis=2)                       # (N, C, 9, H, W)
    return pat.transpose(1, 2, 0, 3, 4).reshape(c * 9, n * h * w)


# --------------------------------------------------------------------------- #
# Kernel A: fused ActNorm2d + InvertibleConv1x1 (per-pixel CxC matmul)
# --------------------------------------------------------------------------- #
def _actnorm_invconv_kernel(z_ref, bias_ref, logs_ref, w_ref, o_ref):
    z = z_ref[...]                                            # (C, PBLK)
    zc = (z + bias_ref[...]) * jnp.exp(logs_ref[...])         # broadcast (C,1)
    o_ref[...] = jnp.dot(w_ref[...], zc,
                         preferred_element_type=jnp.float32).astype(o_ref.dtype)


def actnorm_invconv(x_nchw, an_bias, an_logs, inv_w):
    """Returns transformed tensor as (C, N*H*W) (lane-dense, pixel order (n,h,w))."""
    n, c, h, w = x_nchw.shape
    p = n * h * w
    zt = x_nchw.transpose(1, 0, 2, 3).reshape(c, p)           # (C, N*H*W)
    pblk = _pick_lane_block(p)
    return pl.pallas_call(
        _actnorm_invconv_kernel,
        out_shape=jax.ShapeDtypeStruct((c, p), x_nchw.dtype),
        grid=(p // pblk,),
        in_specs=[
            pl.BlockSpec((c, pblk), lambda i: (0, i)),
            pl.BlockSpec((c, 1), lambda i: (0, 0)),
            pl.BlockSpec((c, 1), lambda i: (0, 0)),
            pl.BlockSpec((c, c), lambda i: (0, 0)),
        ],
        out_specs=pl.BlockSpec((c, pblk), lambda i: (0, i)),
        compiler_params=pltpu.CompilerParams(dimension_semantics=("parallel",)),
    )(zt, an_bias.reshape(c, 1), an_logs.reshape(c, 1), inv_w)


# --------------------------------------------------------------------------- #
# Kernel B: conv-as-GEMM + bias (+ optional mid-layer ActNorm affine, optional ReLU)
# --------------------------------------------------------------------------- #
def _conv_gemm_kernel(x_ref, w_ref, b_ref, ab_ref, al_ref, o_ref, *, relu, actnorm):
    acc = jnp.dot(w_ref[...], x_ref[...], preferred_element_type=jnp.float32)
    acc = acc + b_ref[...]
    if actnorm:                                               # (h + b)*exp(logs)
        acc = (acc + ab_ref[...]) * jnp.exp(al_ref[...])
    if relu:
        acc = jnp.maximum(acc, 0.0)
    o_ref[...] = acc.astype(o_ref.dtype)


def conv_gemm(patches_t, weight2d, bias, an_bias=None, an_logs=None, *,
              relu=False, actnorm=False):
    """patches_t: (K, P); weight2d: (Cout, K) -> (Cout, P), P lane-dense."""
    k, p = patches_t.shape
    c_out = weight2d.shape[0]
    dt = patches_t.dtype
    if an_bias is None:
        an_bias = jnp.zeros((c_out,), dt)
    if an_logs is None:
        an_logs = jnp.zeros((c_out,), dt)
    pblk = _pick_lane_block(p)
    kern = functools.partial(_conv_gemm_kernel, relu=relu, actnorm=actnorm)
    return pl.pallas_call(
        kern,
        out_shape=jax.ShapeDtypeStruct((c_out, p), dt),
        grid=(p // pblk,),
        in_specs=[
            pl.BlockSpec((k, pblk), lambda i: (0, i)),
            pl.BlockSpec((c_out, k), lambda i: (0, 0)),
            pl.BlockSpec((c_out, 1), lambda i: (0, 0)),
            pl.BlockSpec((c_out, 1), lambda i: (0, 0)),
            pl.BlockSpec((c_out, 1), lambda i: (0, 0)),
        ],
        out_specs=pl.BlockSpec((c_out, pblk), lambda i: (0, i)),
        compiler_params=pltpu.CompilerParams(dimension_semantics=("parallel",)),
    )(patches_t, weight2d, bias.reshape(c_out, 1),
      an_bias.reshape(c_out, 1), an_logs.reshape(c_out, 1))


def subnet_hidden_patches(x_nchw, p):
    """First two layers of create_sequential (Conv3x3+ReLU, Conv1x1+ActNorm+ReLU);
    returns im2col patches (hid*9, N*H*W) for the final Conv2dZeros (fused in Kernel C)."""
    n, _, h, w = x_nchw.shape
    hid = p["w0"].shape[0]
    a = conv_gemm(_im2col_3x3(x_nchw), p["w0"].reshape(hid, -1), p["b0"],
                  relu=True, actnorm=False)                                    # (hid, P)
    a = conv_gemm(a, p["w1"], p["b1"], an_bias=p["an_b1"], an_logs=p["an_logs1"],
                  relu=True, actnorm=True)                                     # (hid, P)
    a_nchw = a.reshape(hid, n, h, w).transpose(1, 0, 2, 3)
    return _im2col_3x3(a_nchw)                                                 # (hid*9, P)


# --------------------------------------------------------------------------- #
# Kernel C: fused Conv2dZeros GEMM + sigmoid gate + coupling affine + per-batch logdet
# --------------------------------------------------------------------------- #
def _zeroconv_coupling_kernel(z_ref, x_ref, ws_ref, wr_ref, bs_ref, br_ref,
                              ls_ref, lr_ref, o_ref, ld_ref):
    x = x_ref[...]                                                 # (K, HWB)
    shift = (jnp.dot(ws_ref[...], x, preferred_element_type=jnp.float32)
             + bs_ref[...]) * jnp.exp(3.0 * ls_ref[...])
    raw = (jnp.dot(wr_ref[...], x, preferred_element_type=jnp.float32)
           + br_ref[...]) * jnp.exp(3.0 * lr_ref[...])
    scale = 1.0 / (1.0 + jnp.exp(-(raw + 2.0))) + AFFINE_EPS
    o_ref[...] = ((z_ref[...] + shift) * scale).astype(o_ref.dtype)

    @pl.when(pl.program_id(1) == 0)
    def _():
        ld_ref[...] = jnp.zeros_like(ld_ref)

    ld_ref[...] += jnp.sum(jnp.log(scale))


def zeroconv_coupling(z_cp, patches_t, p, n, h, w):
    """z_cp: (Cz, N*H*W); patches_t: (K, N*H*W) (same pixel order (n,h,w)).
    Applies z = (z + shift)*scale with (shift, scale) from the final Conv2dZeros.
    Returns (z_out (Cz, N*H*W), per-batch logdet delta (N,))."""
    cz, ptot = z_cp.shape
    k = patches_t.shape[0]
    hw = h * w
    hwb = _pick_block(hw, 1024)
    nblk = hw // hwb

    w2 = p["w2"].reshape(p["w2"].shape[0], -1)                     # (2*Cz, K)
    ws, wr = w2[:cz], w2[cz:]
    bs, br = p["b2"][:cz], p["b2"][cz:]
    ls, lr = p["logs2"][:cz], p["logs2"][cz:]

    pix_map = lambda b, i: (0, b * nblk + i)
    const_map = lambda b, i: (0, 0)

    z_out, ld = pl.pallas_call(
        _zeroconv_coupling_kernel,
        out_shape=(jax.ShapeDtypeStruct((cz, ptot), z_cp.dtype),
                   jax.ShapeDtypeStruct((n, 8, 128), jnp.float32)),
        grid=(n, nblk),
        in_specs=[
            pl.BlockSpec((cz, hwb), pix_map),
            pl.BlockSpec((k, hwb), pix_map),
            pl.BlockSpec((cz, k), const_map),
            pl.BlockSpec((cz, k), const_map),
            pl.BlockSpec((cz, 1), const_map),
            pl.BlockSpec((cz, 1), const_map),
            pl.BlockSpec((cz, 1), const_map),
            pl.BlockSpec((cz, 1), const_map),
        ],
        out_specs=(pl.BlockSpec((cz, hwb), pix_map),
                   pl.BlockSpec((1, 8, 128), lambda b, i: (b, 0, 0))),
        compiler_params=pltpu.CompilerParams(
            dimension_semantics=("parallel", "arbitrary")),
    )(z_cp, patches_t, ws, wr, bs.reshape(cz, 1), br.reshape(cz, 1),
      ls.reshape(cz, 1), lr.reshape(cz, 1))
    return z_out, ld[:, 0, 0]


# --------------------------------------------------------------------------- #
# FlowStep forward
# --------------------------------------------------------------------------- #
def flow_step_forward(x, logdet=None, reverse=False, conditional_features=None, *,
                      params, position=0):
    if reverse:
        # TODO(synk): reverse_flow (decode) path not implemented.
        raise NotImplementedError("reverse flow not implemented")
    n, c, h, w = x.shape
    pixels = h * w
    if logdet is None:
        logdet = jnp.zeros((n,), jnp.float32)

    # ActNorm2d + InvertibleConv1x1 (fused kernel); scalar logdet terms in wrapper.
    z_cp = actnorm_invconv(x, params["an_bias"], params["an_logs"], params["inv_w"])
    logdet = logdet + jnp.sum(params["an_logs"]) * pixels
    logdet = logdet + jnp.linalg.slogdet(params["inv_w"])[1].astype(jnp.float32) * pixels

    # ConditionalCouplingLayer.encode — first coupling (conditional on features).
    ft = conditional_features[position]                                   # (N, Crrdb, H, W)
    pat_ft = subnet_hidden_patches(ft, params["features_net"])            # (hid*9, P)
    z_cp, dld = zeroconv_coupling(z_cp, pat_ft, params["features_net"], n, h, w)
    logdet = logdet + dld

    # Second coupling (z2 conditioned on [z1, ft]).
    c1 = c // 2
    z1_cp, z2_cp = z_cp[:c1], z_cp[c1:]
    z1_nchw = z1_cp.reshape(c1, n, h, w).transpose(1, 0, 2, 3)
    aff_in = jnp.concatenate([z1_nchw, ft], axis=1)                       # (N, c1+Crrdb, H, W)
    pat_af = subnet_hidden_patches(aff_in, params["affine_net"])          # (hid*9, P)
    z2_cp, dld2 = zeroconv_coupling(z2_cp, pat_af, params["affine_net"], n, h, w)
    logdet = logdet + dld2

    z = jnp.concatenate([z1_cp, z2_cp], axis=0).reshape(c, n, h, w).transpose(1, 0, 2, 3)
    return z, logdet


# --------------------------------------------------------------------------- #
# parameters (random; ActNorm data-dependent init / zero-init not replicated)
# --------------------------------------------------------------------------- #
def init_flow_step_params(key, in_channels, conditional_channels=64, hidden_channels=64):
    c = in_channels
    c_co = c - c // 2
    keys = iter(jax.random.split(key, 24))

    def nrm(shape, s):
        return s * jax.random.normal(next(keys), shape, jnp.float32)

    def subnet(c_in, c_out):
        return {
            "w0": nrm((hidden_channels, c_in, 3, 3), 0.05), "b0": nrm((hidden_channels,), 0.05),
            "w1": nrm((hidden_channels, hidden_channels), 0.05), "b1": nrm((hidden_channels,), 0.05),
            "an_b1": nrm((hidden_channels,), 0.1), "an_logs1": nrm((hidden_channels,), 0.1),
            "w2": nrm((c_out, hidden_channels, 3, 3), 0.02), "b2": nrm((c_out,), 0.02),
            "logs2": nrm((c_out,), 0.05),
        }

    inv_w = jnp.linalg.qr(jax.random.uniform(next(keys), (c, c)))[0].astype(jnp.float32)
    return {
        "an_bias": nrm((c,), 0.1), "an_logs": nrm((c,), 0.1), "inv_w": inv_w,
        "features_net": subnet(conditional_channels, 2 * c),
        "affine_net": subnet(c // 2 + conditional_channels, 2 * c_co),
    }


# --------------------------------------------------------------------------- #
# pure-JAX reference (for correctness check)
# --------------------------------------------------------------------------- #
def _conv_ref(x, w4, b, pad):
    y = jax.lax.conv_general_dilated(x, w4, (1, 1), ((pad, pad), (pad, pad)),
                                     dimension_numbers=("NCHW", "OIHW", "NCHW"),
                                     precision=_HI)
    return y + b.reshape(1, -1, 1, 1)


def _subnet_ref(x, p):
    a = jnp.maximum(_conv_ref(x, p["w0"], p["b0"], 1), 0.0)
    a = _conv_ref(a, p["w1"].reshape(*p["w1"].shape, 1, 1), p["b1"], 0)
    a = (a + p["an_b1"].reshape(1, -1, 1, 1)) * jnp.exp(p["an_logs1"].reshape(1, -1, 1, 1))
    a = jnp.maximum(a, 0.0)
    return _conv_ref(a, p["w2"], p["b2"], 1) * jnp.exp(3.0 * p["logs2"].reshape(1, -1, 1, 1))


def flow_step_reference(x, logdet, ft, params):
    n, c, h, w = x.shape
    pix = h * w
    z = (x + params["an_bias"].reshape(1, c, 1, 1)) * jnp.exp(params["an_logs"].reshape(1, c, 1, 1))
    logdet = logdet + jnp.sum(params["an_logs"]) * pix
    z = jnp.einsum("oi,nihw->nohw", params["inv_w"], z, precision=_HI)
    logdet = logdet + jnp.linalg.slogdet(params["inv_w"])[1] * pix
    shift, raw = jnp.split(_subnet_ref(ft, params["features_net"]), 2, axis=1)
    scale = 1.0 / (1.0 + jnp.exp(-(raw + 2.0))) + AFFINE_EPS
    z = (z + shift) * scale
    logdet = logdet + jnp.sum(jnp.log(scale), axis=(1, 2, 3))
    c1 = c // 2
    z1, z2 = z[:, :c1], z[:, c1:]
    shift2, raw2 = jnp.split(_subnet_ref(jnp.concatenate([z1, ft], axis=1),
                                         params["affine_net"]), 2, axis=1)
    scale2 = 1.0 / (1.0 + jnp.exp(-(raw2 + 2.0))) + AFFINE_EPS
    z2 = (z2 + shift2) * scale2
    logdet = logdet + jnp.sum(jnp.log(scale2), axis=(1, 2, 3))
    return jnp.concatenate([z1, z2], axis=1), logdet


# --------------------------------------------------------------------------- #
if __name__ == "__main__":
    key = jax.random.PRNGKey(0)
    N, C, H, W = 2, 8, 16, 16
    C_RRDB, HIDDEN = 64, 64
    k_x, k_ft, k_p = jax.random.split(key, 3)

    x = jax.random.normal(k_x, (N, C, H, W), jnp.float32)
    ft = jax.random.normal(k_ft, (N, C_RRDB, H, W), jnp.float32)
    logdet0 = jnp.zeros((N,), jnp.float32)
    params = init_flow_step_params(k_p, C, C_RRDB, HIDDEN)

    @jax.jit
    def run(x_, ld_, ft_):
        return flow_step_forward(x_, logdet=ld_, reverse=False,
                                 conditional_features=[ft_], params=params, position=0)

    z, ld = run(x, logdet0, ft)
    z = jax.block_until_ready(z)
    ld = jax.block_until_ready(ld)

    z_ref, ld_ref = flow_step_reference(x, logdet0, ft, params)

    assert z.shape == (N, C, H, W) and ld.shape == (N,)
    assert bool(jnp.all(jnp.isfinite(z))) and bool(jnp.all(jnp.isfinite(ld)))
    assert bool(jnp.allclose(z, z_ref, rtol=5e-3, atol=5e-3)), "flow output mismatch"
    assert bool(jnp.allclose(ld, ld_ref, rtol=5e-3, atol=0.5)), "logdet mismatch"

    print("KERNEL_OK")
</pallas_src>

<mosaic_0001>
module attributes {stable_mosaic.version = 11 : i64} {
  func.func @_actnorm_invconv_kernel(%arg0: i32, %arg1: memref<8x256xf32, #tpu.memory_space<vmem>>, %arg2: memref<8x1xf32, #tpu.memory_space<vmem>>, %arg3: memref<8x1xf32, #tpu.memory_space<vmem>>, %arg4: memref<8x8xf32, #tpu.memory_space<vmem>>, %arg5: memref<8x256xf32, #tpu.memory_space<vmem>>) attributes {dimension_semantics = [#tpu.dimension_semantics<parallel>], iteration_bounds = array<i64: 2>, scalar_prefetch = 0 : i64, scratch_operands = 0 : i64, tpu.core_type = #tpu.core_type<tc>, window_params = [{transform_indices = @transform_0, window_bounds = array<i64: 8, 256>}, {pipeline_mode = #tpu.pipeline_mode<synchronous>, transform_indices = @transform_1, window_bounds = array<i64: 8, 1>}, {pipeline_mode = #tpu.pipeline_mode<synchronous>, transform_indices = @transform_2, window_bounds = array<i64: 8, 1>}, {pipeline_mode = #tpu.pipeline_mode<synchronous>, transform_indices = @transform_3, window_bounds = array<i64: 8, 8>}, {transform_indices = @transform_4, window_bounds = array<i64: 8, 256>}]} {
    %c0 = arith.constant 0 : index
    %c0_0 = arith.constant 0 : index
    %0 = vector.load %arg1[%c0, %c0_0] : memref<8x256xf32, #tpu.memory_space<vmem>>, vector<8x256xf32>
    %c0_1 = arith.constant 0 : index
    %c0_2 = arith.constant 0 : index
    %1 = vector.load %arg2[%c0_1, %c0_2] : memref<8x1xf32, #tpu.memory_space<vmem>>, vector<8x1xf32>
    %2 = vector.broadcast %1 : vector<8x1xf32> to vector<8x256xf32>
    %3 = arith.addf %0, %2 : vector<8x256xf32>
    %c0_3 = arith.constant 0 : index
    %c0_4 = arith.constant 0 : index
    %4 = vector.load %arg3[%c0_3, %c0_4] : memref<8x1xf32, #tpu.memory_space<vmem>>, vector<8x1xf32>
    %5 = math.exp %4 : vector<8x1xf32>
    %6 = vector.broadcast %5 : vector<8x1xf32> to vector<8x256xf32>
    %7 = arith.mulf %3, %6 : vector<8x256xf32>
    %c0_5 = arith.constant 0 : index
    %c0_6 = arith.constant 0 : index
    %8 = vector.load %arg4[%c0_5, %c0_6] : memref<8x8xf32, #tpu.memory_space<vmem>>, vector<8x8xf32>
    %cst = arith.constant dense<0.000000e+00> : vector<8x256xf32>
    %9 = tpu.matmul %8, %7, %cst {dimension_numbers = #tpu.dot_dimension_numbers<[1], [0], [0], [1], [0, 0, 1, 1], [], []>} : vector<8x8xf32>, vector<8x256xf32>, vector<8x256xf32> -> vector<8x256xf32>
    %c0_7 = arith.constant 0 : index
    %c0_8 = arith.constant 0 : index
    %10 = vector.load %arg5[%c0_7, %c0_8] : memref<8x256xf32, #tpu.memory_space<vmem>>, vector<8x256xf32>
    tpu.vector_store %arg5[%c0_7, %c0_8], %9 {strides = array<i32>} : memref<8x256xf32, #tpu.memory_space<vmem>>, vector<8x256xf32>,
    return
  }
  func.func @transform_0(%arg0: i32) -> (i32, i32) {
    %c0_i32 = arith.constant 0 : i32
    %c0_i32_0 = arith.constant 0 : i32
    return %c0_i32, %arg0 : i32, i32
  }
  func.func @transform_1(%arg0: i32) -> (i32, i32) {
    %c0_i32 = arith.constant 0 : i32
    %c0_i32_0 = arith.constant 0 : i32
    %c0_i32_1 = arith.constant 0 : i32
    return %c0_i32, %c0_i32_0 : i32, i32
  }
  func.func @transform_2(%arg0: i32) -> (i32, i32) {
    %c0_i32 = arith.constant 0 : i32
    %c0_i32_0 = arith.constant 0 : i32
    %c0_i32_1 = arith.constant 0 : i32
    return %c0_i32, %c0_i32_0 : i32, i32
  }
  func.func @transform_3(%arg0: i32) -> (i32, i32) {
    %c0_i32 = arith.constant 0 : i32
    %c0_i32_0 = arith.constant 0 : i32
    %c0_i32_1 = arith.constant 0 : i32
    return %c0_i32, %c0_i32_0 : i32, i32
  }
  func.func @transform_4(%arg0: i32) -> (i32, i32) {
    %c0_i32 = arith.constant 0 : i32
    %c0_i32_0 = arith.constant 0 : i32
    return %c0_i32, %arg0 : i32, i32
  }
}

module attributes {stable_mosaic.version = 11 : i64} {
  func.func @_conv_gemm_kernel(%arg0: i32, %arg1: memref<64x256xf32, #tpu.memory_space<vmem>>, %arg2: memref<64x64xf32, #tpu.memory_space<vmem>>, %arg3: memref<64x1xf32, #tpu.memory_space<vmem>>, %arg4: memref<64x1xf32, #tpu.memory_space<vmem>>, %arg5: memref<64x1xf32, #tpu.memory_space<vmem>>, %arg6: memref<64x256xf32, #tpu.memory_space<vmem>>) attributes {dimension_semantics = [#tpu.dimension_semantics<parallel>], iteration_bounds = array<i64: 2>, scalar_prefetch = 0 : i64, scratch_operands = 0 : i64, tpu.core_type = #tpu.core_type<tc>, window_params = [{transform_indices = @transform_0, window_bounds = array<i64: 64, 256>}, {pipeline_mode = #tpu.pipeline_mode<synchronous>, transform_indices = @transform_1, window_bounds = array<i64: 64, 64>}, {pipeline_mode = #tpu.pipeline_mode<synchronous>, transform_indices = @transform_2, window_bounds = array<i64: 64, 1>}, {pipeline_mode = #tpu.pipeline_mode<synchronous>, transform_indices = @transform_3, window_bounds = array<i64: 64, 1>}, {pipeline_mode = #tpu.pipeline_mode<synchronous>, transform_indices = @transform_4, window_bounds = array<i64: 64, 1>}, {transform_indices = @transform_5, window_bounds = array<i64: 64, 256>}]} {
    %c0 = arith.constant 0 : index
    %c0_0 = arith.constant 0 : index
    %0 = vector.load %arg2[%c0, %c0_0] : memref<64x64xf32, #tpu.memory_space<vmem>>, vector<64x64xf32>
    %c0_1 = arith.constant 0 : index
    %c0_2 = arith.constant 0 : index
    %1 = vector.load %arg1[%c0_1, %c0_2] : memref<64x256xf32, #tpu.memory_space<vmem>>, vector<64x256xf32>
    %cst = arith.constant dense<0.000000e+00> : vector<64x256xf32>
    %2 = tpu.matmul %0, %1, %cst {dimension_numbers = #tpu.dot_dimension_numbers<[1], [0], [0], [1], [0, 0, 1, 1], [], []>} : vector<64x64xf32>, vector<64x256xf32>, vector<64x256xf32> -> vector<64x256xf32>
    %c0_3 = arith.constant 0 : index
    %c0_4 = arith.constant 0 : index
    %3 = vector.load %arg3[%c0_3, %c0_4] : memref<64x1xf32, #tpu.memory_space<vmem>>, vector<64x1xf32>
    %4 = vector.broadcast %3 : vector<64x1xf32> to vector<64x256xf32>
    %5 = arith.addf %2, %4 : vector<64x256xf32>
    %c0_5 = arith.constant 0 : index
    %c0_6 = arith.constant 0 : index
    %6 = vector.load %arg4[%c0_5, %c0_6] : memref<64x1xf32, #tpu.memory_space<vmem>>, vector<64x1xf32>
    %7 = vector.broadcast %6 : vector<64x1xf32> to vector<64x256xf32>
    %8 = arith.addf %5, %7 : vector<64x256xf32>
    %c0_7 = arith.constant 0 : index
    %c0_8 = arith.constant 0 : index
    %9 = vector.load %arg5[%c0_7, %c0_8] : memref<64x1xf32, #tpu.memory_space<vmem>>, vector<64x1xf32>
    %10 = math.exp %9 : vector<64x1xf32>
    %11 = vector.broadcast %10 : vector<64x1xf32> to vector<64x256xf32>
    %12 = arith.mulf %8, %11 : vector<64x256xf32>
    %cst_9 = arith.constant 0.000000e+00 : f32
    %13 = vector.broadcast %cst_9 : f32 to vector<64x256xf32>
    %14 = arith.maximumf %12, %13 : vector<64x256xf32>
    %c0_10 = arith.constant 0 : index
    %c0_11 = arith.constant 0 : index
    %15 = vector.load %arg6[%c0_10, %c0_11] : memref<64x256xf32, #tpu.memory_space<vmem>>, vector<64x256xf32>
    tpu.vector_store %arg6[%c0_10, %c0_11], %14 {strides = array<i32>} : memref<64x256xf32, #tpu.memory_space<vmem>>, vector<64x256xf32>,
    return
  }
  func.func @transform_0(%arg0: i32) -> (i32, i32) {
    %c0_i32 = arith.constant 0 : i32
    %c0_i32_0 = arith.constant 0 : i32
    return %c0_i32, %arg0 : i32, i32
  }
  func.func @transform_1(%arg0: i32) -> (i32, i32) {
    %c0_i32 = arith.constant 0 : i32
    %c0_i32_0 = arith.constant 0 : i32
    %c0_i32_1 = arith.constant 0 : i32
    return %c0_i32, %c0_i32_0 : i32, i32
  }
  func.func @transform_2(%arg0: i32) -> (i32, i32) {
    %c0_i32 = arith.constant 0 : i32
    %c0_i32_0 = arith.constant 0 : i32
    %c0_i32_1 = arith.constant 0 : i32
    return %c0_i32, %c0_i32_0 : i32, i32
  }
  func.func @transform_3(%arg0: i32) -> (i32, i32) {
    %c0_i32 = arith.constant 0 : i32
    %c0_i32_0 = arith.constant 0 : i32
    %c0_i32_1 = arith.constant 0 : i32
    return %c0_i32, %c0_i32_0 : i32, i32
  }
  func.func @transform_4(%arg0: i32) -> (i32, i32) {
    %c0_i32 = arith.constant 0 : i32
    %c0_i32_0 = arith.constant 0 : i32
    %c0_i32_1 = arith.constant 0 : i32
    return %c0_i32, %c0_i32_0 : i32, i32
  }
  func.func @transform_5(%arg0: i32) -> (i32, i32) {
    %c0_i32 = arith.constant 0 : i32
    %c0_i32_0 = arith.constant 0 : i32
    return %c0_i32, %arg0 : i32, i32
  }
}

module attributes {stable_mosaic.version = 11 : i64} {
  func.func @_conv_gemm_kernel(%arg0: i32, %arg1: memref<576x256xf32, #tpu.memory_space<vmem>>, %arg2: memref<64x576xf32, #tpu.memory_space<vmem>>, %arg3: memref<64x1xf32, #tpu.memory_space<vmem>>, %arg4: memref<64x1xf32, #tpu.memory_space<vmem>>, %arg5: memref<64x1xf32, #tpu.memory_space<vmem>>, %arg6: memref<64x256xf32, #tpu.memory_space<vmem>>) attributes {dimension_semantics = [#tpu.dimension_semantics<parallel>], iteration_bounds = array<i64: 2>, scalar_prefetch = 0 : i64, scratch_operands = 0 : i64, tpu.core_type = #tpu.core_type<tc>, window_params = [{transform_indices = @transform_0, window_bounds = array<i64: 576, 256>}, {pipeline_mode = #tpu.pipeline_mode<synchronous>, transform_indices = @transform_1, window_bounds = array<i64: 64, 576>}, {pipeline_mode = #tpu.pipeline_mode<synchronous>, transform_indices = @transform_2, window_bounds = array<i64: 64, 1>}, {pipeline_mode = #tpu.pipeline_mode<synchronous>, transform_indices = @transform_3, window_bounds = array<i64: 64, 1>}, {pipeline_mode = #tpu.pipeline_mode<synchronous>, transform_indices = @transform_4, window_bounds = array<i64: 64, 1>}, {transform_indices = @transform_5, window_bounds = array<i64: 64, 256>}]} {
    %c0 = arith.constant 0 : index
    %c0_0 = arith.constant 0 : index
    %0 = vector.load %arg2[%c0, %c0_0] : memref<64x576xf32, #tpu.memory_space<vmem>>, vector<64x576xf32>
    %c0_1 = arith.constant 0 : index
    %c0_2 = arith.constant 0 : index
    %1 = vector.load %arg1[%c0_1, %c0_2] : memref<576x256xf32, #tpu.memory_space<vmem>>, vector<576x256xf32>
    %cst = arith.constant dense<0.000000e+00> : vector<64x256xf32>
    %2 = tpu.matmul %0, %1, %cst {dimension_numbers = #tpu.dot_dimension_numbers<[1], [0], [0], [1], [0, 0, 1, 1], [], []>} : vector<64x576xf32>, vector<576x256xf32>, vector<64x256xf32> -> vector<64x256xf32>
    %c0_3 = arith.constant 0 : index
    %c0_4 = arith.constant 0 : index
    %3 = vector.load %arg3[%c0_3, %c0_4] : memref<64x1xf32, #tpu.memory_space<vmem>>, vector<64x1xf32>
    %4 = vector.broadcast %3 : vector<64x1xf32> to vector<64x256xf32>
    %5 = arith.addf %2, %4 : vector<64x256xf32>
    %cst_5 = arith.constant 0.000000e+00 : f32
    %6 = vector.broadcast %cst_5 : f32 to vector<64x256xf32>
    %7 = arith.maximumf %5, %6 : vector<64x256xf32>
    %c0_6 = arith.constant 0 : index
    %c0_7 = arith.constant 0 : index
    %8 = vector.load %arg6[%c0_6, %c0_7] : memref<64x256xf32, #tpu.memory_space<vmem>>, vector<64x256xf32>
    tpu.vector_store %arg6[%c0_6, %c0_7], %7 {strides = array<i32>} : memref<64x256xf32, #tpu.memory_space<vmem>>, vector<64x256xf32>,
    return
  }
  func.func @transform_0(%arg0: i32) -> (i32, i32) {
    %c0_i32 = arith.constant 0 : i32
    %c0_i32_0 = arith.constant 0 : i32
    return %c0_i32, %arg0 : i32, i32
  }
  func.func @transform_1(%arg0: i32) -> (i32, i32) {
    %c0_i32 = arith.constant 0 : i32
    %c0_i32_0 = arith.constant 0 : i32
    %c0_i32_1 = arith.constant 0 : i32
    return %c0_i32, %c0_i32_0 : i32, i32
  }
  func.func @transform_2(%arg0: i32) -> (i32, i32) {
    %c0_i32 = arith.constant 0 : i32
    %c0_i32_0 = arith.constant 0 : i32
    %c0_i32_1 = arith.constant 0 : i32
    return %c0_i32, %c0_i32_0 : i32, i32
  }
  func.func @transform_3(%arg0: i32) -> (i32, i32) {
    %c0_i32 = arith.constant 0 : i32
    %c0_i32_0 = arith.constant 0 : i32
    %c0_i32_1 = arith.constant 0 : i32
    return %c0_i32, %c0_i32_0 : i32, i32
  }
  func.func @transform_4(%arg0: i32) -> (i32, i32) {
    %c0_i32 = arith.constant 0 : i32
    %c0_i32_0 = arith.constant 0 : i32
    %c0_i32_1 = arith.constant 0 : i32
    return %c0_i32, %c0_i32_0 : i32, i32
  }
  func.func @transform_5(%arg0: i32) -> (i32, i32) {
    %c0_i32 = arith.constant 0 : i32
    %c0_i32_0 = arith.constant 0 : i32
    return %c0_i32, %arg0 : i32, i32
  }
}

module attributes {stable_mosaic.version = 11 : i64} {
  func.func @_zeroconv_coupling_kernel(%arg0: i32, %arg1: i32, %arg2: memref<8x256xf32, #tpu.memory_space<vmem>>, %arg3: memref<576x256xf32, #tpu.memory_space<vmem>>, %arg4: memref<8x576xf32, #tpu.memory_space<vmem>>, %arg5: memref<8x576xf32, #tpu.memory_space<vmem>>, %arg6: memref<8x1xf32, #tpu.memory_space<vmem>>, %arg7: memref<8x1xf32, #tpu.memory_space<vmem>>, %arg8: memref<8x1xf32, #tpu.memory_space<vmem>>, %arg9: memref<8x1xf32, #tpu.memory_space<vmem>>, %arg10: memref<8x256xf32, #tpu.memory_space<vmem>>, %arg11: memref<1x8x128xf32, #tpu.memory_space<vmem>>) attributes {dimension_semantics = [#tpu.dimension_semantics<parallel>, #tpu.dimension_semantics<arbitrary>], iteration_bounds = array<i64: 2, 1>, scalar_prefetch = 0 : i64, scratch_operands = 0 : i64, tpu.core_type = #tpu.core_type<tc>, window_params = [{transform_indices = @transform_0, window_bounds = array<i64: 8, 256>}, {transform_indices = @transform_1, window_bounds = array<i64: 576, 256>}, {pipeline_mode = #tpu.pipeline_mode<synchronous>, transform_indices = @transform_2, window_bounds = array<i64: 8, 576>}, {pipeline_mode = #tpu.pipeline_mode<synchronous>, transform_indices = @transform_3, window_bounds = array<i64: 8, 576>}, {pipeline_mode = #tpu.pipeline_mode<synchronous>, transform_indices = @transform_4, window_bounds = array<i64: 8, 1>}, {pipeline_mode = #tpu.pipeline_mode<synchronous>, transform_indices = @transform_5, window_bounds = array<i64: 8, 1>}, {pipeline_mode = #tpu.pipeline_mode<synchronous>, transform_indices = @transform_6, window_bounds = array<i64: 8, 1>}, {pipeline_mode = #tpu.pipeline_mode<synchronous>, transform_indices = @transform_7, window_bounds = array<i64: 8, 1>}, {transform_indices = @transform_8, window_bounds = array<i64: 8, 256>}, {transform_indices = @transform_9, window_bounds = array<i64: 1, 8, 128>}]} {
    %c0 = arith.constant 0 : index
    %c0_0 = arith.constant 0 : index
    %0 = vector.load %arg3[%c0, %c0_0] : memref<576x256xf32, #tpu.memory_space<vmem>>, vector<576x256xf32>
    %c0_1 = arith.constant 0 : index
    %c0_2 = arith.constant 0 : index
    %1 = vector.load %arg4[%c0_1, %c0_2] : memref<8x576xf32, #tpu.memory_space<vmem>>, vector<8x576xf32>
    %cst = arith.constant dense<0.000000e+00> : vector<8x256xf32>
    %2 = tpu.matmul %1, %0, %cst {dimension_numbers = #tpu.dot_dimension_numbers<[1], [0], [0], [1], [0, 0, 1, 1], [], []>} : vector<8x576xf32>, vector<576x256xf32>, vector<8x256xf32> -> vector<8x256xf32>
    %c0_3 = arith.constant 0 : index
    %c0_4 = arith.constant 0 : index
    %3 = vector.load %arg6[%c0_3, %c0_4] : memref<8x1xf32, #tpu.memory_space<vmem>>, vector<8x1xf32>
    %4 = vector.broadcast %3 : vector<8x1xf32> to vector<8x256xf32>
    %5 = arith.addf %2, %4 : vector<8x256xf32>
    %c0_5 = arith.constant 0 : index
    %c0_6 = arith.constant 0 : index
    %6 = vector.load %arg8[%c0_5, %c0_6] : memref<8x1xf32, #tpu.memory_space<vmem>>, vector<8x1xf32>
    %cst_7 = arith.constant 3.000000e+00 : f32
    %7 = vector.broadcast %cst_7 : f32 to vector<8x1xf32>
    %8 = arith.mulf %7, %6 : vector<8x1xf32>
    %9 = math.exp %8 : vector<8x1xf32>
    %10 = vector.broadcast %9 : vector<8x1xf32> to vector<8x256xf32>
    %11 = arith.mulf %5, %10 : vector<8x256xf32>
    %c0_8 = arith.constant 0 : index
    %c0_9 = arith.constant 0 : index
    %12 = vector.load %arg5[%c0_8, %c0_9] : memref<8x576xf32, #tpu.memory_space<vmem>>, vector<8x576xf32>
    %cst_10 = arith.constant dense<0.000000e+00> : vector<8x256xf32>
    %13 = tpu.matmul %12, %0, %cst_10 {dimension_numbers = #tpu.dot_dimension_numbers<[1], [0], [0], [1], [0, 0, 1, 1], [], []>} : vector<8x576xf32>, vector<576x256xf32>, vector<8x256xf32> -> vector<8x256xf32>
    %c0_11 = arith.constant 0 : index
    %c0_12 = arith.constant 0 : index
    %14 = vector.load %arg7[%c0_11, %c0_12] : memref<8x1xf32, #tpu.memory_space<vmem>>, vector<8x1xf32>
    %15 = vector.broadcast %14 : vector<8x1xf32> to vector<8x256xf32>
    %16 = arith.addf %13, %15 : vector<8x256xf32>
    %c0_13 = arith.constant 0 : index
    %c0_14 = arith.constant 0 : index
    %17 = vector.load %arg9[%c0_13, %c0_14] : memref<8x1xf32, #tpu.memory_space<vmem>>, vector<8x1xf32>
    %cst_15 = arith.constant 3.000000e+00 : f32
    %18 = vector.broadcast %cst_15 : f32 to vector<8x1xf32>
    %19 = arith.mulf %18, %17 : vector<8x1xf32>
    %20 = math.exp %19 : vector<8x1xf32>
    %21 = vector.broadcast %20 : vector<8x1xf32> to vector<8x256xf32>
    %22 = arith.mulf %16, %21 : vector<8x256xf32>
    %cst_16 = arith.constant 2.000000e+00 : f32
    %23 = vector.broadcast %cst_16 : f32 to vector<8x256xf32>
    %24 = arith.addf %22, %23 : vector<8x256xf32>
    %cst_17 = arith.constant 0.000000e+00 : f32
    %25 = vector.broadcast %cst_17 : f32 to vector<8x256xf32>
    %26 = arith.subf %25, %24 : vector<8x256xf32>
    %27 = math.exp %26 : vector<8x256xf32>
    %cst_18 = arith.constant 1.000000e+00 : f32
    %28 = vector.broadcast %cst_18 : f32 to vector<8x256xf32>
    %29 = arith.addf %28, %27 : vector<8x256xf32>
    %cst_19 = arith.constant 1.000000e+00 : f32
    %30 = vector.broadcast %cst_19 : f32 to vector<8x256xf32>
    %31 = arith.divf %30, %29 : vector<8x256xf32>
    %cst_20 = arith.constant 9.99999974E-5 : f32
    %32 = vector.broadcast %cst_20 : f32 to vector<8x256xf32>
    %33 = arith.addf %31, %32 : vector<8x256xf32>
    %c0_21 = arith.constant 0 : index
    %c0_22 = arith.constant 0 : index
    %34 = vector.load %arg2[%c0_21, %c0_22] : memref<8x256xf32, #tpu.memory_space<vmem>>, vector<8x256xf32>
    %35 = arith.addf %34, %11 : vector<8x256xf32>
    %36 = arith.mulf %35, %33 : vector<8x256xf32>
    %c0_23 = arith.constant 0 : index
    %c0_24 = arith.constant 0 : index
    %37 = vector.load %arg10[%c0_23, %c0_24] : memref<8x256xf32, #tpu.memory_space<vmem>>, vector<8x256xf32>
    tpu.vector_store %arg10[%c0_23, %c0_24], %36 {strides = array<i32>} : memref<8x256xf32, #tpu.memory_space<vmem>>, vector<8x256xf32>,
    %c0_i32 = arith.constant 0 : i32
    %38 = arith.cmpi eq, %arg1, %c0_i32 : i32
    %39 = arith.extui %38 : i1 to i32
    %c0_i32_25 = arith.constant 0 : i32
    %40 = arith.cmpi ne, %39, %c0_i32_25 : i32
    scf.if %40 {
      %cst_33 = arith.constant 0.000000e+00 : f32
      %50 = vector.broadcast %cst_33 : f32 to vector<1x8x128xf32>
      %c0_34 = arith.constant 0 : index
      %c0_35 = arith.constant 0 : index
      %c0_36 = arith.constant 0 : index
      %51 = vector.load %arg11[%c0_34, %c0_35, %c0_36] : memref<1x8x128xf32, #tpu.memory_space<vmem>>, vector<1x8x128xf32>
      tpu.vector_store %arg11[%c0_34, %c0_35, %c0_36], %50 {strides = array<i32>} : memref<1x8x128xf32, #tpu.memory_space<vmem>>, vector<1x8x128xf32>,
    } else {
    }
    %c0_26 = arith.constant 0 : index
    %c0_27 = arith.constant 0 : index
    %c0_28 = arith.constant 0 : index
    %41 = vector.load %arg11[%c0_26, %c0_27, %c0_28] : memref<1x8x128xf32, #tpu.memory_space<vmem>>, vector<1x8x128xf32>
    %42 = math.log %33 : vector<8x256xf32>
    %43 = vector.shape_cast %42 : vector<8x256xf32> to vector<1x8x256xf32>
    %cst_29 = arith.constant dense<0.000000e+00> : vector<1xf32>
    %44 = vector.multi_reduction <add>, %43, %cst_29 [1, 2] : vector<1x8x256xf32> to vector<1xf32>
    %45 = vector.shape_cast %44 : vector<1xf32> to vector<1x1x1xf32>
    %46 = vector.extract %45[0, 0, 0] : f32 from vector<1x1x1xf32>
    %47 = vector.broadcast %46 : f32 to vector<1x8x128xf32>
    %48 = arith.addf %41, %47 : vector<1x8x128xf32>
    %c0_30 = arith.constant 0 : index
    %c0_31 = arith.constant 0 : index
    %c0_32 = arith.constant 0 : index
    %49 = vector.load %arg11[%c0_30, %c0_31, %c0_32] : memref<1x8x128xf32, #tpu.memory_space<vmem>>, vector<1x8x128xf32>
    tpu.vector_store %arg11[%c0_30, %c0_31, %c0_32], %48 {strides = array<i32>} : memref<1x8x128xf32, #tpu.memory_space<vmem>>, vector<1x8x128xf32>,
    return
  }
  func.func @transform_0(%arg0: i32, %arg1: i32) -> (i32, i32) {
    %c1_i32 = arith.constant 1 : i32
    %0 = arith.muli %arg0, %c1_i32 : i32
    %1 = arith.addi %0, %arg1 : i32
    %c0_i32 = arith.constant 0 : i32
    %c0_i32_0 = arith.constant 0 : i32
    return %c0_i32, %1 : i32, i32
  }
  func.func @transform_1(%arg0: i32, %arg1: i32) -> (i32, i32) {
    %c1_i32 = arith.constant 1 : i32
    %0 = arith.muli %arg0, %c1_i32 : i32
    %1 = arith.addi %0, %arg1 : i32
    %c0_i32 = arith.constant 0 : i32
    %c0_i32_0 = arith.constant 0 : i32
    return %c0_i32, %1 : i32, i32
  }
  func.func @transform_2(%arg0: i32, %arg1: i32) -> (i32, i32) {
    %c0_i32 = arith.constant 0 : i32
    %c0_i32_0 = arith.constant 0 : i32
    %c0_i32_1 = arith.constant 0 : i32
    return %c0_i32, %c0_i32_0 : i32, i32
  }
  func.func @transform_3(%arg0: i32, %arg1: i32) -> (i32, i32) {
    %c0_i32 = arith.constant 0 : i32
    %c0_i32_0 = arith.constant 0 : i32
    %c0_i32_1 = arith.constant 0 : i32
    return %c0_i32, %c0_i32_0 : i32, i32
  }
  func.func @transform_4(%arg0: i32, %arg1: i32) -> (i32, i32) {
    %c0_i32 = arith.constant 0 : i32
    %c0_i32_0 = arith.constant 0 : i32
    %c0_i32_1 = arith.constant 0 : i32
    return %c0_i32, %c0_i32_0 : i32, i32
  }
  func.func @transform_5(%arg0: i32, %arg1: i32) -> (i32, i32) {
    %c0_i32 = arith.constant 0 : i32
    %c0_i32_0 = arith.constant 0 : i32
    %c0_i32_1 = arith.constant 0 : i32
    return %c0_i32, %c0_i32_0 : i32, i32
  }
  func.func @transform_6(%arg0: i32, %arg1: i32) -> (i32, i32) {
    %c0_i32 = arith.constant 0 : i32
    %c0_i32_0 = arith.constant 0 : i32
    %c0_i32_1 = arith.constant 0 : i32
    return %c0_i32, %c0_i32_0 : i32, i32
  }
  func.func @transform_7(%arg0: i32, %arg1: i32) -> (i32, i32) {
    %c0_i32 = arith.constant 0 : i32
    %c0_i32_0 = arith.constant 0 : i32
    %c0_i32_1 = arith.constant 0 : i32
    return %c0_i32, %c0_i32_0 : i32, i32
  }
  func.func @transform_8(%arg0: i32, %arg1: i32) -> (i32, i32) {
    %c1_i32 = arith.constant 1 : i32
    %0 = arith.muli %arg0, %c1_i32 : i32
    %1 = arith.addi %0, %arg1 : i32
    %c0_i32 = arith.constant 0 : i32
    %c0_i32_0 = arith.constant 0 : i32
    return %c0_i32, %1 : i32, i32
  }
  func.func @transform_9(%arg0: i32, %arg1: i32) -> (i32, i32, i32) {
    %c0_i32 = arith.constant 0 : i32
    %c0_i32_0 = arith.constant 0 : i32
    %c0_i32_1 = arith.constant 0 : i32
    return %arg0, %c0_i32, %c0_i32_0 : i32, i32, i32
  }
}

module attributes {stable_mosaic.version = 11 : i64} {
  func.func @_conv_gemm_kernel(%arg0: i32, %arg1: memref<612x256xf32, #tpu.memory_space<vmem>>, %arg2: memref<64x612xf32, #tpu.memory_space<vmem>>, %arg3: memref<64x1xf32, #tpu.memory_space<vmem>>, %arg4: memref<64x1xf32, #tpu.memory_space<vmem>>, %arg5: memref<64x1xf32, #tpu.memory_space<vmem>>, %arg6: memref<64x256xf32, #tpu.memory_space<vmem>>) attributes {dimension_semantics = [#tpu.dimension_semantics<parallel>], iteration_bounds = array<i64: 2>, scalar_prefetch = 0 : i64, scratch_operands = 0 : i64, tpu.core_type = #tpu.core_type<tc>, window_params = [{transform_indices = @transform_0, window_bounds = array<i64: 612, 256>}, {pipeline_mode = #tpu.pipeline_mode<synchronous>, transform_indices = @transform_1, window_bounds = array<i64: 64, 612>}, {pipeline_mode = #tpu.pipeline_mode<synchronous>, transform_indices = @transform_2, window_bounds = array<i64: 64, 1>}, {pipeline_mode = #tpu.pipeline_mode<synchronous>, transform_indices = @transform_3, window_bounds = array<i64: 64, 1>}, {pipeline_mode = #tpu.pipeline_mode<synchronous>, transform_indices = @transform_4, window_bounds = array<i64: 64, 1>}, {transform_indices = @transform_5, window_bounds = array<i64: 64, 256>}]} {
    %c0 = arith.constant 0 : index
    %c0_0 = arith.constant 0 : index
    %0 = vector.load %arg2[%c0, %c0_0] : memref<64x612xf32, #tpu.memory_space<vmem>>, vector<64x612xf32>
    %c0_1 = arith.constant 0 : index
    %c0_2 = arith.constant 0 : index
    %1 = vector.load %arg1[%c0_1, %c0_2] : memref<612x256xf32, #tpu.memory_space<vmem>>, vector<612x256xf32>
    %cst = arith.constant dense<0.000000e+00> : vector<64x256xf32>
    %2 = tpu.matmul %0, %1, %cst {dimension_numbers = #tpu.dot_dimension_numbers<[1], [0], [0], [1], [0, 0, 1, 1], [], []>} : vector<64x612xf32>, vector<612x256xf32>, vector<64x256xf32> -> vector<64x256xf32>
    %c0_3 = arith.constant 0 : index
    %c0_4 = arith.constant 0 : index
    %3 = vector.load %arg3[%c0_3, %c0_4] : memref<64x1xf32, #tpu.memory_space<vmem>>, vector<64x1xf32>
    %4 = vector.broadcast %3 : vector<64x1xf32> to vector<64x256xf32>
    %5 = arith.addf %2, %4 : vector<64x256xf32>
    %cst_5 = arith.constant 0.000000e+00 : f32
    %6 = vector.broadcast %cst_5 : f32 to vector<64x256xf32>
    %7 = arith.maximumf %5, %6 : vector<64x256xf32>
    %c0_6 = arith.constant 0 : index
    %c0_7 = arith.constant 0 : index
    %8 = vector.load %arg6[%c0_6, %c0_7] : memref<64x256xf32, #tpu.memory_space<vmem>>, vector<64x256xf32>
    tpu.vector_store %arg6[%c0_6, %c0_7], %7 {strides = array<i32>} : memref<64x256xf32, #tpu.memory_space<vmem>>, vector<64x256xf32>,
    return
  }
  func.func @transform_0(%arg0: i32) -> (i32, i32) {
    %c0_i32 = arith.constant 0 : i32
    %c0_i32_0 = arith.constant 0 : i32
    return %c0_i32, %arg0 : i32, i32
  }
  func.func @transform_1(%arg0: i32) -> (i32, i32) {
    %c0_i32 = arith.constant 0 : i32
    %c0_i32_0 = arith.constant 0 : i32
    %c0_i32_1 = arith.constant 0 : i32
    return %c0_i32, %c0_i32_0 : i32, i32
  }
  func.func @transform_2(%arg0: i32) -> (i32, i32) {
    %c0_i32 = arith.constant 0 : i32
    %c0_i32_0 = arith.constant 0 : i32
    %c0_i32_1 = arith.constant 0 : i32
    return %c0_i32, %c0_i32_0 : i32, i32
  }
  func.func @transform_3(%arg0: i32) -> (i32, i32) {
    %c0_i32 = arith.constant 0 : i32
    %c0_i32_0 = arith.constant 0 : i32
    %c0_i32_1 = arith.constant 0 : i32
    return %c0_i32, %c0_i32_0 : i32, i32
  }
  func.func @transform_4(%arg0: i32) -> (i32, i32) {
    %c0_i32 = arith.constant 0 : i32
    %c0_i32_0 = arith.constant 0 : i32
    %c0_i32_1 = arith.constant 0 : i32
    return %c0_i32, %c0_i32_0 : i32, i32
  }
  func.func @transform_5(%arg0: i32) -> (i32, i32) {
    %c0_i32 = arith.constant 0 : i32
    %c0_i32_0 = arith.constant 0 : i32
    return %c0_i32, %arg0 : i32, i32
  }
}

module attributes {stable_mosaic.version = 11 : i64} {
  func.func @_zeroconv_coupling_kernel(%arg0: i32, %arg1: i32, %arg2: memref<4x256xf32, #tpu.memory_space<vmem>>, %arg3: memref<576x256xf32, #tpu.memory_space<vmem>>, %arg4: memref<4x576xf32, #tpu.memory_space<vmem>>, %arg5: memref<4x576xf32, #tpu.memory_space<vmem>>, %arg6: memref<4x1xf32, #tpu.memory_space<vmem>>, %arg7: memref<4x1xf32, #tpu.memory_space<vmem>>, %arg8: memref<4x1xf32, #tpu.memory_space<vmem>>, %arg9: memref<4x1xf32, #tpu.memory_space<vmem>>, %arg10: memref<4x256xf32, #tpu.memory_space<vmem>>, %arg11: memref<1x8x128xf32, #tpu.memory_space<vmem>>) attributes {dimension_semantics = [#tpu.dimension_semantics<parallel>, #tpu.dimension_semantics<arbitrary>], iteration_bounds = array<i64: 2, 1>, scalar_prefetch = 0 : i64, scratch_operands = 0 : i64, tpu.core_type = #tpu.core_type<tc>, window_params = [{transform_indices = @transform_0, window_bounds = array<i64: 4, 256>}, {transform_indices = @transform_1, window_bounds = array<i64: 576, 256>}, {pipeline_mode = #tpu.pipeline_mode<synchronous>, transform_indices = @transform_2, window_bounds = array<i64: 4, 576>}, {pipeline_mode = #tpu.pipeline_mode<synchronous>, transform_indices = @transform_3, window_bounds = array<i64: 4, 576>}, {pipeline_mode = #tpu.pipeline_mode<synchronous>, transform_indices = @transform_4, window_bounds = array<i64: 4, 1>}, {pipeline_mode = #tpu.pipeline_mode<synchronous>, transform_indices = @transform_5, window_bounds = array<i64: 4, 1>}, {pipeline_mode = #tpu.pipeline_mode<synchronous>, transform_indices = @transform_6, window_bounds = array<i64: 4, 1>}, {pipeline_mode = #tpu.pipeline_mode<synchronous>, transform_indices = @transform_7, window_bounds = array<i64: 4, 1>}, {transform_indices = @transform_8, window_bounds = array<i64: 4, 256>}, {transform_indices = @transform_9, window_bounds = array<i64: 1, 8, 128>}]} {
    %c0 = arith.constant 0 : index
    %c0_0 = arith.constant 0 : index
    %0 = vector.load %arg3[%c0, %c0_0] : memref<576x256xf32, #tpu.memory_space<vmem>>, vector<576x256xf32>
    %c0_1 = arith.constant 0 : index
    %c0_2 = arith.constant 0 : index
    %1 = vector.load %arg4[%c0_1, %c0_2] : memref<4x576xf32, #tpu.memory_space<vmem>>, vector<4x576xf32>
    %cst = arith.constant dense<0.000000e+00> : vector<4x256xf32>
    %2 = tpu.matmul %1, %0, %cst {dimension_numbers = #tpu.dot_dimension_numbers<[1], [0], [0], [1], [0, 0, 1, 1], [], []>} : vector<4x576xf32>, vector<576x256xf32>, vector<4x256xf32> -> vector<4x256xf32>
    %c0_3 = arith.constant 0 : index
    %c0_4 = arith.constant 0 : index
    %3 = vector.load %arg6[%c0_3, %c0_4] : memref<4x1xf32, #tpu.memory_space<vmem>>, vector<4x1xf32>
    %4 = vector.broadcast %3 : vector<4x1xf32> to vector<4x256xf32>
    %5 = arith.addf %2, %4 : vector<4x256xf32>
    %c0_5 = arith.constant 0 : index
    %c0_6 = arith.constant 0 : index
    %6 = vector.load %arg8[%c0_5, %c0_6] : memref<4x1xf32, #tpu.memory_space<vmem>>, vector<4x1xf32>
    %cst_7 = arith.constant 3.000000e+00 : f32
    %7 = vector.broadcast %cst_7 : f32 to vector<4x1xf32>
    %8 = arith.mulf %7, %6 : vector<4x1xf32>
    %9 = math.exp %8 : vector<4x1xf32>
    %10 = vector.broadcast %9 : vector<4x1xf32> to vector<4x256xf32>
    %11 = arith.mulf %5, %10 : vector<4x256xf32>
    %c0_8 = arith.constant 0 : index
    %c0_9 = arith.constant 0 : index
    %12 = vector.load %arg5[%c0_8, %c0_9] : memref<4x576xf32, #tpu.memory_space<vmem>>, vector<4x576xf32>
    %cst_10 = arith.constant dense<0.000000e+00> : vector<4x256xf32>
    %13 = tpu.matmul %12, %0, %cst_10 {dimension_numbers = #tpu.dot_dimension_numbers<[1], [0], [0], [1], [0, 0, 1, 1], [], []>} : vector<4x576xf32>, vector<576x256xf32>, vector<4x256xf32> -> vector<4x256xf32>
    %c0_11 = arith.constant 0 : index
    %c0_12 = arith.constant 0 : index
    %14 = vector.load %arg7[%c0_11, %c0_12] : memref<4x1xf32, #tpu.memory_space<vmem>>, vector<4x1xf32>
    %15 = vector.broadcast %14 : vector<4x1xf32> to vector<4x256xf32>
    %16 = arith.addf %13, %15 : vector<4x256xf32>
    %c0_13 = arith.constant 0 : index
    %c0_14 = arith.constant 0 : index
    %17 = vector.load %arg9[%c0_13, %c0_14] : memref<4x1xf32, #tpu.memory_space<vmem>>, vector<4x1xf32>
    %cst_15 = arith.constant 3.000000e+00 : f32
    %18 = vector.broadcast %cst_15 : f32 to vector<4x1xf32>
    %19 = arith.mulf %18, %17 : vector<4x1xf32>
    %20 = math.exp %19 : vector<4x1xf32>
    %21 = vector.broadcast %20 : vector<4x1xf32> to vector<4x256xf32>
    %22 = arith.mulf %16, %21 : vector<4x256xf32>
    %cst_16 = arith.constant 2.000000e+00 : f32
    %23 = vector.broadcast %cst_16 : f32 to vector<4x256xf32>
    %24 = arith.addf %22, %23 : vector<4x256xf32>
    %cst_17 = arith.constant 0.000000e+00 : f32
    %25 = vector.broadcast %cst_17 : f32 to vector<4x256xf32>
    %26 = arith.subf %25, %24 : vector<4x256xf32>
    %27 = math.exp %26 : vector<4x256xf32>
    %cst_18 = arith.constant 1.000000e+00 : f32
    %28 = vector.broadcast %cst_18 : f32 to vector<4x256xf32>
    %29 = arith.addf %28, %27 : vector<4x256xf32>
    %cst_19 = arith.constant 1.000000e+00 : f32
    %30 = vector.broadcast %cst_19 : f32 to vector<4x256xf32>
    %31 = arith.divf %30, %29 : vector<4x256xf32>
    %cst_20 = arith.constant 9.99999974E-5 : f32
    %32 = vector.broadcast %cst_20 : f32 to vector<4x256xf32>
    %33 = arith.addf %31, %32 : vector<4x256xf32>
    %c0_21 = arith.constant 0 : index
    %c0_22 = arith.constant 0 : index
    %34 = vector.load %arg2[%c0_21, %c0_22] : memref<4x256xf32, #tpu.memory_space<vmem>>, vector<4x256xf32>
    %35 = arith.addf %34, %11 : vector<4x256xf32>
    %36 = arith.mulf %35, %33 : vector<4x256xf32>
    %c0_23 = arith.constant 0 : index
    %c0_24 = arith.constant 0 : index
    %37 = vector.load %arg10[%c0_23, %c0_24] : memref<4x256xf32, #tpu.memory_space<vmem>>, vector<4x256xf32>
    tpu.vector_store %arg10[%c0_23, %c0_24], %36 {strides = array<i32>} : memref<4x256xf32, #tpu.memory_space<vmem>>, vector<4x256xf32>,
    %c0_i32 = arith.constant 0 : i32
    %38 = arith.cmpi eq, %arg1, %c0_i32 : i32
    %39 = arith.extui %38 : i1 to i32
    %c0_i32_25 = arith.constant 0 : i32
    %40 = arith.cmpi ne, %39, %c0_i32_25 : i32
    scf.if %40 {
      %cst_33 = arith.constant 0.000000e+00 : f32
      %50 = vector.broadcast %cst_33 : f32 to vector<1x8x128xf32>
      %c0_34 = arith.constant 0 : index
      %c0_35 = arith.constant 0 : index
      %c0_36 = arith.constant 0 : index
      %51 = vector.load %arg11[%c0_34, %c0_35, %c0_36] : memref<1x8x128xf32, #tpu.memory_space<vmem>>, vector<1x8x128xf32>
      tpu.vector_store %arg11[%c0_34, %c0_35, %c0_36], %50 {strides = array<i32>} : memref<1x8x128xf32, #tpu.memory_space<vmem>>, vector<1x8x128xf32>,
    } else {
    }
    %c0_26 = arith.constant 0 : index
    %c0_27 = arith.constant 0 : index
    %c0_28 = arith.constant 0 : index
    %41 = vector.load %arg11[%c0_26, %c0_27, %c0_28] : memref<1x8x128xf32, #tpu.memory_space<vmem>>, vector<1x8x128xf32>
    %42 = math.log %33 : vector<4x256xf32>
    %43 = vector.shape_cast %42 : vector<4x256xf32> to vector<1x4x256xf32>
    %cst_29 = arith.constant dense<0.000000e+00> : vector<1xf32>
    %44 = vector.multi_reduction <add>, %43, %cst_29 [1, 2] : vector<1x4x256xf32> to vector<1xf32>
    %45 = vector.shape_cast %44 : vector<1xf32> to vector<1x1x1xf32>
    %46 = vector.extract %45[0, 0, 0] : f32 from vector<1x1x1xf32>
    %47 = vector.broadcast %46 : f32 to vector<1x8x128xf32>
    %48 = arith.addf %41, %47 : vector<1x8x128xf32>
    %c0_30 = arith.constant 0 : index
    %c0_31 = arith.constant 0 : index
    %c0_32 = arith.constant 0 : index
    %49 = vector.load %arg11[%c0_30, %c0_31, %c0_32] : memref<1x8x128xf32, #tpu.memory_space<vmem>>, vector<1x8x128xf32>
    tpu.vector_store %arg11[%c0_30, %c0_31, %c0_32], %48 {strides = array<i32>} : memref<1x8x128xf32, #tpu.memory_space<vmem>>, vector<1x8x128xf32>,
    return
  }
  func.func @transform_0(%arg0: i32, %arg1: i32) -> (i32, i32) {
    %c1_i32 = arith.constant 1 : i32
    %0 = arith.muli %arg0, %c1_i32 : i32
    %1 = arith.addi %0, %arg1 : i32
    %c0_i32 = arith.constant 0 : i32
    %c0_i32_0 = arith.constant 0 : i32
    return %c0_i32, %1 : i32, i32
  }
  func.func @transform_1(%arg0: i32, %arg1: i32) -> (i32, i32) {
    %c1_i32 = arith.constant 1 : i32
    %0 = arith.muli %arg0, %c1_i32 : i32
    %1 = arith.addi %0, %arg1 : i32
    %c0_i32 = arith.constant 0 : i32
    %c0_i32_0 = arith.constant 0 : i32
    return %c0_i32, %1 : i32, i32
  }
  func.func @transform_2(%arg0: i32, %arg1: i32) -> (i32, i32) {
    %c0_i32 = arith.constant 0 : i32
    %c0_i32_0 = arith.constant 0 : i32
    %c0_i32_1 = arith.constant 0 : i32
    return %c0_i32, %c0_i32_0 : i32, i32
  }
  func.func @transform_3(%arg0: i32, %arg1: i32) -> (i32, i32) {
    %c0_i32 = arith.constant 0 : i32
    %c0_i32_0 = arith.constant 0 : i32
    %c0_i32_1 = arith.constant 0 : i32
    return %c0_i32, %c0_i32_0 : i32, i32
  }
  func.func @transform_4(%arg0: i32, %arg1: i32) -> (i32, i32) {
    %c0_i32 = arith.constant 0 : i32
    %c0_i32_0 = arith.constant 0 : i32
    %c0_i32_1 = arith.constant 0 : i32
    return %c0_i32, %c0_i32_0 : i32, i32
  }
  func.func @transform_5(%arg0: i32, %arg1: i32) -> (i32, i32) {
    %c0_i32 = arith.constant 0 : i32
    %c0_i32_0 = arith.constant 0 : i32
    %c0_i32_1 = arith.constant 0 : i32
    return %c0_i32, %c0_i32_0 : i32, i32
  }
  func.func @transform_6(%arg0: i32, %arg1: i32) -> (i32, i32) {
    %c0_i32 = arith.constant 0 : i32
    %c0_i32_0 = arith.constant 0 : i32
    %c0_i32_1 = arith.constant 0 : i32
    return %c0_i32, %c0_i32_0 : i32, i32
  }
  func.func @transform_7(%arg0: i32, %arg1: i32) -> (i32, i32) {
    %c0_i32 = arith.constant 0 : i32
    %c0_i32_0 = arith.constant 0 : i32
    %c0_i32_1 = arith.constant 0 : i32
    return %c0_i32, %c0_i32_0 : i32, i32
  }
  func.func @transform_8(%arg0: i32, %arg1: i32) -> (i32, i32) {
    %c1_i32 = arith.constant 1 : i32
    %0 = arith.muli %arg0, %c1_i32 : i32
    %1 = arith.addi %0, %arg1 : i32
    %c0_i32 = arith.constant 0 : i32
    %c0_i32_0 = arith.constant 0 : i32
    return %c0_i32, %1 : i32, i32
  }
  func.func @transform_9(%arg0: i32, %arg1: i32) -> (i32, i32, i32) {
    %c0_i32 = arith.constant 0 : i32
    %c0_i32_0 = arith.constant 0 : i32
    %c0_i32_1 = arith.constant 0 : i32
    return %arg0, %c0_i32, %c0_i32_0 : i32, i32, i32
  }
}

</mosaic_0001>

<bundles_post_ra>
// kernel: run.7
= control target key start
LH: loop header
LB: loop body
LE: loop exit
PB: predicated region body
PF: predicated region fallthrough
CT: control target
= control target key end

     0   :  { %9 = vsyncpa [#allocation3], 0  ;;  %s737_s0 = inlined_call_operand.vmem [shape: f32[8,512], index: 0, kind: input, shape index: {}]   ;;  %s738_s1 = inlined_call_operand.hbm [shape: f32[8,1], index: 1, kind: input, shape index: {}]   ;;  %s739_s2 = inlined_call_operand.hbm [shape: f32[8,1], index: 2, kind: input, shape index: {}]   ;;  %s740_s3 = inlined_call_operand.hbm [shape: f32[8,8], index: 3, kind: input, shape index: {}]   ;;  %s741_s4 = inlined_call_operand.vmem [shape: f32[8,512], index: 4, kind: output, shape index: {}]  }
   0x1   :  { %10 = vsyncpa [#allocation5], 0  ;;  %s616_s15 = smov 0  }
   0x2 LB: > { %s424_s16 = sadd.s32 4294967295, %s584_s15   ;;  %p426_p0 = scmp.ge.s32.totalorder %s584_s15, 1  ;;  %s584_s15 = sphi %s616_s15, %s16_s15  }
   0x3   : > { %p136_p1 = scmp.lt.s32.totalorder %s584_s15, 3  ;;  %p626_p2 = scmp.eq.s32.totalorder %s424_s16, 0 }
   0x4   : > { %s586_s19 = smov [#allocation4]   ;;  %s587_s21 = smov [#allocation2]  }
   0x5   : > { %s745_s17 = scalar_select %p626_p2, 1, 0 }
   0x6   : > { %p630_p3 = pnand %p426_p0, %p136_p1  ;;  %s160_s20 = sshll.u32 %s586_s19, 4  ;;  %s161_s20 = int_to_ptr.vmem [resolvable:$true] %s160_s20 }
   0x7   : > { %s149_s22 = sshll.u32 %s587_s21, 4  ;;  %s588_s23 = smov [#allocation6]   ;;  %s642_s22 = int_to_ptr.vmem [resolvable:$true] %s149_s22 }
   0x8   : > { %s746_s18 = scalar_select %p630_p3, 1, 0 }
   0x9   : > { %p454_p4 = pneg %p630_p3  ;;  %s171_s24 = sshll.u32 %s588_s23, 4  ;;  %s644_s24 = int_to_ptr.vmem [resolvable:$true] %s171_s24 }
   0xa   : > { %s486_s28 = scalar_lea.hbm %s739_s2, 128 }
   0xb   : > { %p638_p5 = pnand %p626_p2, %p454_p4  ;;  %p487_p6 = scmp.ne.s32.totalorder %s739_s2, %s486_s28 }
   0xc   : > { %p493_p10 = scmp.lt.u32.totalorder %s486_s28, %s739_s2 }
   0xd   : > { %p654_p7 = pneg %p638_p5 }
   0xf   : > { %p489_p8 = pnand %p654_p7, %p487_p6 }
  0x11   : > { %p490_p9 = pneg %p489_p8 }
  0x13   : > { %p495_p11 = pnand %p493_p10, %p490_p9 }
  0x15   : > { %498 = shalt.err (!%p495_p11)
}
  0x16   : > { %s499_s8 = scalar_lea.vmem %s161_s20, 128  ;;  %p507_p1 = scmp.lt.s32.totalorder %s161_s20, %s161_s20 }
  0x17   : > { %p500_p12 = scmp.ne.s32.totalorder %s161_s20, %s499_s8  ;;  %p508_p4 = scmp.lt.s32.totalorder %s499_s8, %s499_s8 }
  0x19   : > { %p502_p13 = pnand %p500_p12, %p654_p7  ;;  %p509_p2 = por %p508_p4, %p507_p1 }
  0x1b   : > { %p503_p0 = pneg %p502_p13 }
  0x1d   : > { %p510_p3 = pnand %p509_p2, %p503_p0 }
  0x1f   : > { %513 = shalt.err (!%p510_p3)
}
  0x20   : > { %460 = dma.hbm_to_vmem [thread:$0]  (!%p638_p5), %s739_s2, 128, %s161_s20, [#allocation5]  }
  0x21   : > { %s514_s13 = scalar_lea.hbm %s738_s1, 128 }
  0x22   : > { %p515_p6 = scmp.ne.s32.totalorder %s738_s1, %s514_s13  ;;  %p521_p2 = scmp.lt.u32.totalorder %s514_s13, %s738_s1 }
  0x24   : > { %p517_p8 = pnand %p515_p6, %p654_p7 }
  0x26   : > { %p518_p9 = pneg %p517_p8 }
  0x28   : > { %p523_p3 = pnand %p521_p2, %p518_p9 }
  0x2a   : > { %526 = shalt.err (!%p523_p3)
}
  0x2b   : > { %s527_s20 = scalar_lea.vmem %s642_s22, 128  ;;  %p535_p13 = scmp.lt.s32.totalorder %s642_s22, %s642_s22 }
  0x2c   : > { %p528_p10 = scmp.ne.s32.totalorder %s642_s22, %s527_s20  ;;  %p536_p0 = scmp.lt.s32.totalorder %s527_s20, %s527_s20 }
  0x2e   : > { %p530_p11 = pnand %p528_p10, %p654_p7  ;;  %p537_p1 = por %p536_p0, %p535_p13 }
  0x30   : > { %p531_p12 = pneg %p530_p11 }
  0x32   : > { %p538_p4 = pnand %p537_p1, %p531_p12 }
  0x34   : > { %541 = shalt.err (!%p538_p4)
}
  0x35   : > { %457 = dma.hbm_to_vmem [thread:$0]  (!%p638_p5), %s738_s1, 128, %s642_s22, [#allocation3]  }
  0x36   : > { %s542_s30 = scalar_lea.hbm %s740_s3, 128 }
  0x37   : > { %p543_p6 = scmp.ne.s32.totalorder %s740_s3, %s542_s30  ;;  %p549_p2 = scmp.lt.u32.totalorder %s542_s30, %s740_s3 }
  0x39   : > { %p545_p8 = pnand %p543_p6, %p654_p7 }
  0x3b   : > { %p546_p9 = pneg %p545_p8 }
  0x3d   : > { %p551_p3 = pnand %p549_p2, %p546_p9 }
  0x3f   : > { %554 = shalt.err (!%p551_p3)
}
  0x40   : > { %s555_s22 = scalar_lea.vmem %s644_s24, 128  ;;  %p563_p13 = scmp.lt.s32.totalorder %s644_s24, %s644_s24 }
  0x41   : > { %p556_p10 = scmp.ne.s32.totalorder %s644_s24, %s555_s22  ;;  %p564_p0 = scmp.lt.s32.totalorder %s555_s22, %s555_s22 }
  0x43   : > { %p558_p11 = pnand %p556_p10, %p654_p7  ;;  %p565_p1 = por %p564_p0, %p563_p13 }
  0x45   : > { %p559_p12 = pneg %p558_p11 }
  0x47   : > { %p566_p4 = pnand %p565_p1, %p559_p12 }
  0x49   : > { %569 = shalt.err (!%p566_p4)
}
  0x4a   : > { %463 = dma.hbm_to_vmem [thread:$0]  (!%p638_p5), %s740_s3, 128, %s644_s24, [#allocation5]  }
  0x4b   : > { %p749_p6 = scmp.ne.s32.totalorder %s746_s18, 0 }
  0x4c   : > { %p750_p8 = scmp.ne.s32.totalorder (!%p749_p6), %s745_s17, 0 }
  0x4d   : > { %193 = sbr.rel (%p749_p6) target bundleno = 447 (0x1bf), region = 36 }
  0x54   : > { %575 = dma.done.wait (%p750_p8), [#allocation3], 128  }
  0x55   : > { %577 = vsyncadd (%p750_p8), [#allocation3], 4294967168 }
  0x56   : > { %579 = dma.done.wait (%p750_p8), [#allocation5], 256  }
  0x57   : > { %581 = vsyncadd (%p750_p8), [#allocation5], 4294967040  ;;  %v589_v0 = vmov 0   ;;  %v241_v1 = vld [vmem:[#allocation2] sm:$0xff]  ;;  %v249_v2 = vld [vmem:[#allocation4] sm:$0xff]  ;;  %v590_v5 = vmov 0.0  }
  0x58   : > { %483 = vset.pattern.permute.xlu0 %v589_v0  ;;  %v250_v3 = vmul.f32 1.442695, %v249_v2  ;;  %328 = vmatprep.mubr.f32.mxu0 %v590_v5  ;;  %s435_s18 = sshll.u32 %s424_s16, 1  ;;  %v259_v14 = vld [vmem:[#allocation6] sm:$0xff]  ;;  %vm260_vm0 = vcmask 64512  }
  0x59   : > { %244 = vperm.xlu0 %483, %v241_v1   ;;  %p228_p5 = scmp.lt.s32.totalorder %s435_s18, 3 }
  0x5a   : > { %484 = vpow2.f32 %v250_v3 }
  0x5b   : > { %s752_s18 = smov (!%p228_p5, %s435_s18), 3 }
  0x5c   : > { %s436_s24 = sshll.u32 %s752_s18, 3 }
  0x5d   : > { %s231_s5 = scalar_lea.vmem %s737_s0, %s436_s24  ;;  %s237_s13 = scalar_lea.vmem %s741_s4, %s436_s24 }
  0x5e   : > { %v239_v7 = vld [vmem:[%s231_s5] sm:$0xff]  ;;  %v240_v8 = vld [vmem:[%s231_s5 + $0x8] sm:$0xff] }
  0x64   : > { %v485_v4 = vpop.eup %484 }
  0x65   : > { %254 = vperm.xlu0 %483, %v485_v4  }
  0xd8   : > { %v245_v6 = vpop.permute.xlu0 %244 }
  0xd9   : > { %v247_v9 = vadd.f32 %v245_v6, %v239_v7  ;;  %v248_v10 = vadd.f32 %v245_v6, %v240_v8 }
  0xe4   : > { %v255_v11 = vpop.permute.xlu0 %254 }
  0xe5   : > { %v257_v12 = vmul.f32 %v255_v11, %v247_v9  ;;  %v258_v13 = vmul.f32 %v255_v11, %v248_v10 }
  0xe7   : > { %264 = vmatprep.subr.mxu0 %v258_v13 }
  0xe8   : > { %265 = vmatpush1.msra.mxu0 %v257_v12 }
  0xe9   : > { %439 = vmatmul.mubr.msk.f32.vlgmr.msra.gmra.mrb[0].mxu0 %vm260_vm0, %v259_v14 }
 0x1bc   : > { %v330_v15 = vpop.f32.mrb[0].mxu0 }
 0x1bd   : > { %335 = vst [vmem:[%s237_s13] sm:$0xff] %v330_v15  ;;  %v332_v16 = vpop.f32.mrb[1].mxu0 }
 0x1be   : > { %336 = vst [vmem:[%s237_s13 + $0x8] sm:$0xff] %v332_v16 }
 0x1bf PF: > { %s16_s15 = sadd.s32 1, %s584_s15  }
 0x1c0   : > { %p13_p7 = scmp.ge.s32.totalorder %s16_s15, 4  }
 0x1c2   :  { %15 = sbr.rel (!%p13_p7) target bundleno = 2 (0x2), region = 79 }
 0x1c9   :  { %359 = vsyncpa [#allocation3], 1 }
 0x1ca   :  { %361 = vsyncpa [#allocation3 + $0x1], 1 }
 0x1cb   :  { %362 = vsyncpa [#allocation5], 1 }

// kernel: run.9
= control target key start
LH: loop header
LB: loop body
LE: loop exit
PB: predicated region body
PF: predicated region fallthrough
CT: control target
= control target key end

     0   :  { %s919_s18 = smov 0   ;;  %s921_s19 = smov 0   ;;  %s1205_s0 = inlined_call_operand.vmem [shape: f32[64,512], index: 0, kind: input, shape index: {}]   ;;  %s1206_s1 = inlined_call_operand.vmem [shape: f32[64,64], index: 1, kind: input, shape index: {}]   ;;  %s1207_s2 = inlined_call_operand.vmem [shape: f32[64,1], index: 2, kind: input, shape index: {}]   ;;  %s1208_s3 = inlined_call_operand.vmem [shape: f32[64,1], index: 3, kind: input, shape index: {}]   ;;  %s1209_s4 = inlined_call_operand.vmem [shape: f32[64,1], index: 4, kind: input, shape index: {}]   ;;  %s1210_s5 = inlined_call_operand.vmem [shape: f32[64,512], index: 5, kind: output, shape index: {}]  }
   0x1   :  { %s923_s20 = smov 0  }
   0x2 LB: > { %s770_s21 = sadd.s32 4294967295, %s885_s20   ;;  %s936_s22 = sadd.s32 1, %s885_s20   ;;  %s885_s20 = sphi %s923_s20, %s1214_s20   ;;  %s881_s19 = sphi %s921_s19, %s1213_s19   ;;  %s877_s18 = sphi %s919_s18, %s1212_s18  }
   0x3   : > { %s19_s23 = ssub.s32 %s885_s20, %s936_s22  ;;  %s22_s24 = sadd.s32 1, %s881_s19 }
   0x4   : > { %p20_p0 = scmp.eq.s32.totalorder %s19_s23, 0  ;;  %p29_p1 = scmp.ne.s32.totalorder %s881_s19, %s877_s18 }
   0x5   : > { %p30_p2 = scmp.eq.s32.totalorder %s885_s20, 0  ;;  %p143_p3 = scmp.eq.s32.totalorder %s770_s21, 1 }
   0x6   : > { %s947_s25 = scalar_select %p20_p0, %s881_s19, %s22_s24  }
   0x7   : > { %p31_p4 = por %p30_p2, %p29_p1  ;;  %p949_p5 = por %p143_p3, %p29_p1 }
   0x8   : > { %p773_p6 = scmp.ge.s32.totalorder %s885_s20, 2 }
   0xa   : > { %177 = sbr.rel (%p773_p6) target bundleno = 29 (0x1d), region = 32 }
  0x11   : > { %180 = sbr.rel (!%p31_p4) target bundleno = 29 (0x1d), region = 36  ;;  %s182_s27 = sand.u32 (%p31_p4), 1, %s881_s19  }
  0x12   : > { %s793_s28 = sshll.u32 (%p31_p4), %s885_s20, 4  ;;  %s774_s29 = sshll.u32 (%p31_p4), %s182_s27, 7 }
  0x13   : > { %s959_s7 = scalar_lea.vmem (%p31_p4), %s1205_s0, %s793_s28  ;;  %s184_s8 = scalar_lea.vmem (%p31_p4), [#allocation2], %s774_s29 }
  0x14   : > { %v200_v0 = vld [vmem:[%s959_s7] sm:$0xff] (%p31_p4)  ;;  %v202_v1 = vld [vmem:[%s959_s7 + $0x8] sm:$0xff] (%p31_p4) }
  0x15   : > { %v204_v2 = vld [vmem:[%s959_s7 + $0x20] sm:$0xff] (%p31_p4)  ;;  %201 = vst [vmem:[%s184_s8] sm:$0xff] (%p31_p4), %v200_v0  ;;  %203 = vst [vmem:[%s184_s8 + $0x8] sm:$0xff] (%p31_p4), %v202_v1  ;;  %v206_v3 = vld [vmem:[%s959_s7 + $0x28] sm:$0xff] (%p31_p4) }
  0x16   : > { %205 = vst [vmem:[%s184_s8 + $0x10] sm:$0xff] (%p31_p4), %v204_v2  ;;  %v208_v4 = vld [vmem:[%s959_s7 + $0x40] sm:$0xff] (%p31_p4)  ;;  %v210_v5 = vld [vmem:[%s959_s7 + $0x48] sm:$0xff] (%p31_p4)  ;;  %207 = vst [vmem:[%s184_s8 + $0x18] sm:$0xff] (%p31_p4), %v206_v3 }
  0x17   : > { %209 = vst [vmem:[%s184_s8 + $0x20] sm:$0xff] (%p31_p4), %v208_v4  ;;  %211 = vst [vmem:[%s184_s8 + $0x28] sm:$0xff] (%p31_p4), %v210_v5  ;;  %v212_v6 = vld [vmem:[%s959_s7 + $0x60] sm:$0xff] (%p31_p4)  ;;  %v214_v7 = vld [vmem:[%s959_s7 + $0x68] sm:$0xff] (%p31_p4) }
  0x18   : > { %v216_v8 = vld [vmem:[%s959_s7 + $0x80] sm:$0xff]  ;;  %213 = vst [vmem:[%s184_s8 + $0x30] sm:$0xff] %v212_v6  ;;  %215 = vst [vmem:[%s184_s8 + $0x38] sm:$0xff] %v214_v7  ;;  %v218_v9 = vld [vmem:[%s959_s7 + $0x88] sm:$0xff] }
  0x19   : > { %217 = vst [vmem:[%s184_s8 + $0x40] sm:$0xff] %v216_v8  ;;  %v220_v10 = vld [vmem:[%s959_s7 + $0xa0] sm:$0xff]  ;;  %v222_v11 = vld [vmem:[%s959_s7 + $0xa8] sm:$0xff]  ;;  %219 = vst [vmem:[%s184_s8 + $0x48] sm:$0xff] %v218_v9 }
  0x1a   : > { %221 = vst [vmem:[%s184_s8 + $0x50] sm:$0xff] %v220_v10  ;;  %223 = vst [vmem:[%s184_s8 + $0x58] sm:$0xff] %v222_v11  ;;  %v224_v12 = vld [vmem:[%s959_s7 + $0xc0] sm:$0xff]  ;;  %v226_v13 = vld [vmem:[%s959_s7 + $0xc8] sm:$0xff] }
  0x1b   : > { %v228_v14 = vld [vmem:[%s959_s7 + $0xe0] sm:$0xff]  ;;  %225 = vst [vmem:[%s184_s8 + $0x60] sm:$0xff] %v224_v12  ;;  %227 = vst [vmem:[%s184_s8 + $0x68] sm:$0xff] %v226_v13  ;;  %v230_v15 = vld [vmem:[%s959_s7 + $0xe8] sm:$0xff] }
  0x1c   : > { %229 = vst [vmem:[%s184_s8 + $0x70] sm:$0xff] %v228_v14  ;;  %231 = vst [vmem:[%s184_s8 + $0x78] sm:$0xff] %v230_v15 }
  0x1d PF: > { %p777_p7 = scmp.ge.s32.totalorder %s885_s20, 1  ;;  %p236_p8 = scmp.lt.s32.totalorder %s885_s20, 3 }
  0x1f   : > { %p237_p9 = pnand %p777_p7, %p236_p8 }
  0x20   : > { %s243_s9 = sand.u32 (!%p237_p9), 1, %s877_s18   ;;  %v887_v16 = vmov (!%p237_p9), 0.0   ;;  %v888_v17 = vmov (!%p237_p9), 0   ;;  %v297_v18 = vld [vmem:[%s1207_s2 + $0x10] sm:$0xff] (!%p237_p9)  ;;  %v295_v36 = vld [vmem:[%s1207_s2] sm:$0xff] (!%p237_p9)  ;;  %v298_v37 = vld [vmem:[%s1207_s2 + $0x18] sm:$0xff] (!%p237_p9) }
  0x21   : > { %240 = sbr.rel (%p237_p9) target bundleno = 298 (0x12a), region = 59  ;;  %s980_s10 = sshll.u32 (!%p237_p9), %s243_s9, 7  ;;  %432 = vmatprep.mubr.f32.mxu0 (!%p237_p9), %v887_v16  ;;  %456 = vmatprep.mubr.f32.mxu1 (!%p237_p9), %v887_v16  ;;  %v296_v40 = vld [vmem:[%s1207_s2 + $0x8] sm:$0xff] (!%p237_p9)  ;;  %v299_v46 = vld [vmem:[%s1207_s2 + $0x20] sm:$0xff] (!%p237_p9)  ;;  %v302_v47 = vld [vmem:[%s1207_s2 + $0x38] sm:$0xff] (!%p237_p9)  ;;  %vm343_vm0 = vcmask (!%p237_p9), 523264  }
  0x22   : > { %846 = vset.pattern.permute.xlu1 (!%p237_p9), %v888_v17  ;;  %845 = vset.pattern.permute.xlu0 (!%p237_p9), %v888_v17  ;;  %s988_s13 = scalar_lea.vmem (!%p237_p9), [#allocation2], %s980_s10  ;;  %v300_v41 = vld [vmem:[%s1207_s2 + $0x28] sm:$0xff] (!%p237_p9)  ;;  %v301_v50 = vld [vmem:[%s1207_s2 + $0x30] sm:$0xff] (!%p237_p9)  ;;  %v271_v52 = vld [vmem:[%s1206_s1] sm:$0xff] (!%p237_p9)  ;;  %s1134_s28 = scalar_lea.vmem (!%p237_p9), [#allocation3], %s980_s10 }
  0x23   : > { %v280_v19 = vld [vmem:[%s988_s13 + $0x8] sm:$0xff] (!%p237_p9)  ;;  %v282_v20 = vld [vmem:[%s988_s13 + $0x18] sm:$0xff] (!%p237_p9)  ;;  %v279_v21 = vld [vmem:[%s988_s13] sm:$0xff] (!%p237_p9)  ;;  %315 = vperm.xlu1 (!%p237_p9), %846, %v297_v18   ;;  %305 = vperm.xlu0 (!%p237_p9), %845, %v295_v36  }
  0x24   : > { %v795_v22 = vpack.c.bf16 (!%p237_p9), %v282_v20, %v280_v19  ;;  %v281_v23 = vld [vmem:[%s988_s13 + $0x10] sm:$0xff] (!%p237_p9)  ;;  %v284_v24 = vld [vmem:[%s988_s13 + $0x28] sm:$0xff] (!%p237_p9)  ;;  %v286_v25 = vld [vmem:[%s988_s13 + $0x38] sm:$0xff] (!%p237_p9) }
  0x25   : > { %v797_v26 = vpack.c.bf16 (!%p237_p9), %v281_v23, %v279_v21  ;;  %v799_v27 = vpack.c.bf16 (!%p237_p9), %v286_v25, %v284_v24  ;;  %v283_v28 = vld [vmem:[%s988_s13 + $0x20] sm:$0xff] (!%p237_p9)  ;;  %v285_v29 = vld [vmem:[%s988_s13 + $0x30] sm:$0xff] (!%p237_p9)  ;;  %v288_v30 = vld [vmem:[%s988_s13 + $0x48] sm:$0xff] (!%p237_p9) }
  0x26   : > { %796 = vmatprep.subr.bf16.mxu0 (!%p237_p9), %v795_v22  ;;  %811 = vmatprep.subr.bf16.mxu1 (!%p237_p9), %v795_v22  ;;  %v290_v31 = vld [vmem:[%s988_s13 + $0x58] sm:$0xff] (!%p237_p9)  ;;  %v801_v32 = vpack.c.bf16 (!%p237_p9), %v285_v29, %v283_v28  ;;  %v287_v33 = vld [vmem:[%s988_s13 + $0x40] sm:$0xff] (!%p237_p9)  ;;  %v289_v35 = vld [vmem:[%s988_s13 + $0x50] sm:$0xff] (!%p237_p9) }
  0x27   : > { %798 = vmatpush1.bf16.msra.mxu0 (!%p237_p9), %v797_v26  ;;  %815 = vmatpush1.bf16.msra.mxu1 (!%p237_p9), %v797_v26  ;;  %v803_v34 = vpack.c.bf16 (!%p237_p9), %v290_v31, %v288_v30  ;;  %v292_v38 = vld [vmem:[%s988_s13 + $0x68] sm:$0xff] (!%p237_p9)  ;;  %v294_v39 = vld [vmem:[%s988_s13 + $0x78] sm:$0xff] (!%p237_p9)  ;;  %v805_v42 = vpack.c.bf16 (!%p237_p9), %v289_v35, %v287_v33  ;;  %v291_v44 = vld [vmem:[%s988_s13 + $0x60] sm:$0xff] (!%p237_p9) }
  0x28   : > { %800 = vmatprep.subr.bf16.mxu0 %v799_v27  ;;  %812 = vmatprep.subr.bf16.mxu1 %v799_v27  ;;  %v807_v43 = vpack.c.bf16 %v294_v39, %v292_v38  ;;  %v293_v45 = vld [vmem:[%s988_s13 + $0x70] sm:$0xff]  ;;  %v546_v49 = vld [vmem:[%s1209_s4 + $0x8] sm:$0xff]  ;;  %v275_v53 = vld [vmem:[%s1206_s1 + $0x20] sm:$0xff]  ;;  %s794_s10 = sshll.u32 (%p949_p5), %s770_s21, 4 }
  0x29   : > { %320 = vperm.xlu1 %846, %v298_v37   ;;  %310 = vperm.xlu0 %845, %v296_v40   ;;  %v809_v48 = vpack.c.bf16 %v293_v45, %v291_v44  ;;  %v482_v51 = vld [vmem:[%s1208_s3 + $0x8] sm:$0xff]  ;;  %v555_v54 = vmul.f32 1.442695, %v546_v49  ;;  %v545_v55 = vld [vmem:[%s1209_s4] sm:$0xff]  ;;  %v548_v56 = vld [vmem:[%s1209_s4 + $0x18] sm:$0xff]  ;;  %s666_s26 = scalar_lea.vmem (%p949_p5), %s1210_s5, %s794_s10 }
  0x2a   : > { %v481_v57 = vld [vmem:[%s1208_s3] sm:$0xff]  ;;  %v484_v58 = vld [vmem:[%s1208_s3 + $0x18] sm:$0xff]  ;;  %v272_v59 = vld [vmem:[%s1206_s1 + $0x8] sm:$0xff]  ;;  %v553_v61 = vmul.f32 1.442695, %v545_v55 }
  0x2b   : > { %802 = vmatpush1.bf16.msra.mxu0 %v801_v32  ;;  %816 = vmatpush1.bf16.msra.mxu1 %v801_v32  ;;  %v276_v60 = vld [vmem:[%s1206_s1 + $0x28] sm:$0xff]  ;;  %847 = vpow2.f32 %v555_v54  ;;  %v559_v62 = vmul.f32 1.442695, %v548_v56  ;;  %v547_v63 = vld [vmem:[%s1209_s4 + $0x10] sm:$0xff]  ;;  %v549_v7 = vld [vmem:[%s1209_s4 + $0x20] sm:$0xff] }
  0x2c   : > { %804 = vmatprep.subr.bf16.mxu0 %v803_v34  ;;  %813 = vmatprep.subr.bf16.mxu1 %v803_v34  ;;  %v550_v0 = vld [vmem:[%s1209_s4 + $0x28] sm:$0xff]  ;;  %v483_v1 = vld [vmem:[%s1208_s3 + $0x10] sm:$0xff]  ;;  %849 = vpow2.f32 %v553_v61  ;;  %v557_v5 = vmul.f32 1.442695, %v547_v63  ;;  %v552_v8 = vld [vmem:[%s1209_s4 + $0x38] sm:$0xff] }
  0x2d   : > { %330 = vperm.xlu1 %846, %v300_v41   ;;  %325 = vperm.xlu0 %845, %v299_v46   ;;  %v486_v2 = vld [vmem:[%s1208_s3 + $0x28] sm:$0xff]  ;;  %v273_v3 = vld [vmem:[%s1206_s1 + $0x10] sm:$0xff]  ;;  %851 = vpow2.f32 %v559_v62  ;;  %v563_v6 = vmul.f32 1.442695, %v550_v0  ;;  %v485_v9 = vld [vmem:[%s1208_s3 + $0x20] sm:$0xff] }
  0x2e   : > { %v277_v4 = vld [vmem:[%s1206_s1 + $0x30] sm:$0xff]  ;;  %v488_v10 = vld [vmem:[%s1208_s3 + $0x38] sm:$0xff]  ;;  %853 = vpow2.f32 %v557_v5  ;;  %v561_v13 = vmul.f32 1.442695, %v549_v7  ;;  %v567_v14 = vmul.f32 1.442695, %v552_v8 }
  0x2f   : > { %806 = vmatpush1.bf16.msra.mxu0 %v805_v42  ;;  %817 = vmatpush1.bf16.msra.mxu1 %v805_v42  ;;  %v274_v11 = vld [vmem:[%s1206_s1 + $0x18] sm:$0xff]  ;;  %855 = vpow2.f32 %v563_v6  ;;  %v551_v15 = vld [vmem:[%s1209_s4 + $0x30] sm:$0xff] }
  0x30   : > { %808 = vmatprep.subr.bf16.mxu0 %v807_v43  ;;  %814 = vmatprep.subr.bf16.mxu1 %v807_v43  ;;  %v278_v12 = vld [vmem:[%s1206_s1 + $0x38] sm:$0xff]  ;;  %857 = vpow2.f32 %v561_v13  ;;  %v565_v18 = vmul.f32 1.442695, %v551_v15 }
  0x31   : > { %340 = vperm.xlu1 %846, %v302_v47   ;;  %335 = vperm.xlu0 %845, %v301_v50   ;;  %859 = vpow2.f32 %v567_v14 }
  0x32   : > { %861 = vpow2.f32 %v565_v18 }
  0x33   : > { %810 = vmatpush1.bf16.msra.mxu0 %v809_v48  ;;  %818 = vmatpush1.bf16.msra.mxu1 %v809_v48 }
  0x35   : > { %496 = vperm.xlu1 %846, %v482_v51   ;;  %491 = vperm.xlu0 %845, %v481_v57   ;;  %v848_v17 = vpop.eup %847 }
  0x36   : > { %780 = vmatmul.mubr.msk.f32.vlgmr.msra.gmra.mrb[0].mxu0 %vm343_vm0, %v271_v52  ;;  %784 = vmatmul.mubr.msk.f32.vlgmr.msra.gmra.mrb[0].mxu1 %vm343_vm0, %v275_v53  ;;  %v850_v19 = vpop.eup %849 }
  0x37   : > { %438 = vmatprep.mubr.f32.mxu0 %v887_v16  ;;  %462 = vmatprep.mubr.f32.mxu1 %v887_v16  ;;  %v852_v20 = vpop.eup %851 }
  0x38   : > { %v854_v21 = vpop.eup %853 }
  0x39   : > { %506 = vperm.xlu1 %846, %v484_v58   ;;  %501 = vperm.xlu0 %845, %v483_v1   ;;  %v856_v22 = vpop.eup %855 }
  0x3a   : > { %781 = vmatmul.mubr.msk.f32.gmra.mrb[2].mxu0 %vm343_vm0, %v272_v59  ;;  %785 = vmatmul.mubr.msk.f32.gmra.mrb[2].mxu1 %vm343_vm0, %v276_v60  ;;  %v858_v23 = vpop.eup %857 }
  0x3b   : > { %444 = vmatprep.mubr.f32.mxu0 %v887_v16  ;;  %468 = vmatprep.mubr.f32.mxu1 %v887_v16  ;;  %v860_v24 = vpop.eup %859 }
  0x3c   : > { %v862_v25 = vpop.eup %861 }
  0x3d   : > { %516 = vperm.xlu1 %846, %v486_v2   ;;  %511 = vperm.xlu0 %845, %v485_v9  }
  0x3e   : > { %782 = vmatmul.mubr.msk.f32.gmra.mrb[4].mxu0 %vm343_vm0, %v273_v3  ;;  %786 = vmatmul.mubr.msk.f32.gmra.mrb[4].mxu1 %vm343_vm0, %v277_v4 }
  0x3f   : > { %450 = vmatprep.mubr.f32.mxu0 %v887_v16  ;;  %474 = vmatprep.mubr.f32.mxu1 %v887_v16  ;;  %v487_v16 = vld [vmem:[%s1208_s3 + $0x30] sm:$0xff] }
  0x41   : > { %526 = vperm.xlu1 %846, %v488_v10   ;;  %521 = vperm.xlu0 %845, %v487_v16  }
  0x42   : > { %783 = vmatmul.mubr.msk.f32.gmra.mrb[6].mxu0 %vm343_vm0, %v274_v11  ;;  %787 = vmatmul.mubr.msk.f32.gmra.mrb[6].mxu1 %vm343_vm0, %v278_v12 }
  0x45   : > { %576 = vperm.xlu1 %846, %v848_v17   ;;  %571 = vperm.xlu0 %845, %v850_v19  }
  0x49   : > { %586 = vperm.xlu1 %846, %v852_v20   ;;  %581 = vperm.xlu0 %845, %v854_v21  }
  0x4d   : > { %596 = vperm.xlu1 %846, %v856_v22   ;;  %591 = vperm.xlu0 %845, %v858_v23  }
  0x51   : > { %606 = vperm.xlu1 %846, %v860_v24   ;;  %601 = vperm.xlu0 %845, %v862_v25  }
  0xa2   : > { %v306_v26 = vpop.permute.xlu0 %305  ;;  %v1113_v27 = vpop.permute.xlu1 %315 }
  0xa8   : > { %v311_v28 = vpop.permute.xlu0 %310  ;;  %v1115_v29 = vpop.permute.xlu1 %320 }
  0xac   : > { %v326_v30 = vpop.permute.xlu0 %325  ;;  %v331_v31 = vpop.permute.xlu1 %330 }
  0xb0   : > { %v1117_v32 = vpop.permute.xlu0 %335  ;;  %v1119_v33 = vpop.permute.xlu1 %340 }
  0xb4   : > { %v492_v34 = vpop.permute.xlu0 %491  ;;  %v497_v35 = vpop.permute.xlu1 %496 }
  0xb8   : > { %v1121_v36 = vpop.permute.xlu0 %501  ;;  %v1123_v37 = vpop.permute.xlu1 %506 }
  0xbc   : > { %v512_v38 = vpop.permute.xlu0 %511  ;;  %v517_v39 = vpop.permute.xlu1 %516 }
  0xc0   : > { %v1125_v40 = vpop.permute.xlu0 %521  ;;  %v1127_v41 = vpop.permute.xlu1 %526 }
  0xc4   : > { %v572_v42 = vpop.permute.xlu0 %571  ;;  %v577_v43 = vpop.permute.xlu1 %576 }
  0xc8   : > { %v1129_v44 = vpop.permute.xlu0 %581  ;;  %v1131_v45 = vpop.permute.xlu1 %586 }
  0xcc   : > { %v592_v54 = vpop.permute.xlu0 %591  ;;  %v597_v7 = vpop.permute.xlu1 %596 }
 0x109   : > { %v434_v46 = vpop.f32.mrb[0].mxu0  ;;  %v458_v47 = vpop.f32.mrb[0].mxu1 }
 0x10a   : > { %v435_v48 = vadd.f32 %v434_v46, %v306_v26  ;;  %v459_v49 = vadd.f32 %v458_v47, %v326_v30  ;;  %v436_v50 = vpop.f32.mrb[1].mxu0  ;;  %v460_v51 = vpop.f32.mrb[1].mxu1 }
 0x10b   : > { %v437_v52 = vadd.f32 %v436_v50, %v306_v26  ;;  %v461_v53 = vadd.f32 %v460_v51, %v326_v30  ;;  %v602_v30 = vpop.permute.xlu0 %601 }
 0x10c   : > { %v529_v55 = vadd.f32 %v492_v34, %v435_v48  ;;  %v537_v56 = vadd.f32 %v512_v38, %v459_v49 }
 0x10d   : > { %v530_v57 = vadd.f32 %v492_v34, %v437_v52  ;;  %v538_v58 = vadd.f32 %v512_v38, %v461_v53  ;;  %v440_v59 = vpop.f32.mrb[2].mxu0  ;;  %v464_v60 = vpop.f32.mrb[2].mxu1 }
 0x10e   : > { %v609_v61 = vmul.f32 %v572_v42, %v529_v55  ;;  %v617_v62 = vmul.f32 %v592_v54, %v537_v56  ;;  %v441_v63 = vadd.f32 %v440_v59, %v311_v28  ;;  %v465_v0 = vadd.f32 %v464_v60, %v331_v31  ;;  %v442_v1 = vpop.f32.mrb[3].mxu0  ;;  %v466_v2 = vpop.f32.mrb[3].mxu1 }
 0x10f   : > { %v610_v3 = vmul.f32 %v572_v42, %v530_v57  ;;  %v618_v4 = vmul.f32 %v592_v54, %v538_v58  ;;  %v443_v5 = vadd.f32 %v442_v1, %v311_v28  ;;  %v467_v6 = vadd.f32 %v466_v2, %v331_v31  ;;  %v607_v59 = vpop.permute.xlu1 %606 }
 0x110   : > { %v625_v8 = vmax.f32 %v609_v61, 0.0  ;;  %v633_v9 = vmax.f32 %v617_v62, 0.0  ;;  %v531_v10 = vadd.f32 %v497_v35, %v441_v63  ;;  %v539_v11 = vadd.f32 %v517_v39, %v465_v0 }
 0x111   : > { %v626_v12 = vmax.f32 %v610_v3, 0.0  ;;  %v634_v13 = vmax.f32 %v618_v4, 0.0  ;;  %v532_v14 = vadd.f32 %v497_v35, %v443_v5  ;;  %v540_v15 = vadd.f32 %v517_v39, %v467_v6  ;;  %v446_v17 = vpop.f32.mrb[4].mxu0  ;;  %v470_v16 = vpop.f32.mrb[4].mxu1 }
 0x112   : > { %641 = vst [vmem:[%s1134_s28] sm:$0xff] %v625_v8  ;;  %649 = vst [vmem:[%s1134_s28 + $0x40] sm:$0xff] %v633_v9  ;;  %v611_v18 = vmul.f32 %v577_v43, %v531_v10  ;;  %v619_v19 = vmul.f32 %v597_v7, %v539_v11  ;;  %v447_v20 = vadd.f32 %v446_v17, %v1113_v27  ;;  %v448_v22 = vpop.f32.mrb[5].mxu0  ;;  %v472_v23 = vpop.f32.mrb[5].mxu1 }
 0x113   : > { %v471_v21 = vadd.f32 %v470_v16, %v1117_v32  ;;  %642 = vst [vmem:[%s1134_s28 + $0x8] sm:$0xff] %v626_v12  ;;  %650 = vst [vmem:[%s1134_s28 + $0x48] sm:$0xff] %v634_v13  ;;  %v612_v24 = vmul.f32 %v577_v43, %v532_v14  ;;  %v620_v25 = vmul.f32 %v597_v7, %v540_v15 }
 0x114   : > { %v449_v26 = vadd.f32 %v448_v22, %v1113_v27  ;;  %v473_v28 = vadd.f32 %v472_v23, %v1117_v32  ;;  %v627_v31 = vmax.f32 %v611_v18, 0.0  ;;  %v635_v34 = vmax.f32 %v619_v19, 0.0 }
 0x115   : > { %v533_v35 = vadd.f32 %v1121_v36, %v447_v20  ;;  %v541_v38 = vadd.f32 %v1125_v40, %v471_v21  ;;  %v628_v39 = vmax.f32 %v612_v24, 0.0  ;;  %v636_v42 = vmax.f32 %v620_v25, 0.0  ;;  %v452_v47 = vpop.f32.mrb[6].mxu0  ;;  %v476_v48 = vpop.f32.mrb[6].mxu1 }
 0x116   : > { %v534_v46 = vadd.f32 %v1121_v36, %v449_v26  ;;  %v542_v43 = vadd.f32 %v1125_v40, %v473_v28  ;;  %643 = vst [vmem:[%s1134_s28 + $0x10] sm:$0xff] %v627_v31  ;;  %651 = vst [vmem:[%s1134_s28 + $0x50] sm:$0xff] %v635_v34  ;;  %v453_v49 = vadd.f32 %v452_v47, %v1115_v29  ;;  %v454_v51 = vpop.f32.mrb[7].mxu0  ;;  %v478_v52 = vpop.f32.mrb[7].mxu1 }
 0x117   : > { %v613_v27 = vmul.f32 %v1129_v44, %v533_v35  ;;  %v621_v32 = vmul.f32 %v602_v30, %v541_v38  ;;  %v477_v50 = vadd.f32 %v476_v48, %v1119_v33  ;;  %644 = vst [vmem:[%s1134_s28 + $0x18] sm:$0xff] %v628_v39  ;;  %652 = vst [vmem:[%s1134_s28 + $0x58] sm:$0xff] %v636_v42 }
 0x118   : > { %v614_v36 = vmul.f32 %v1129_v44, %v534_v46  ;;  %v622_v40 = vmul.f32 %v602_v30, %v542_v43  ;;  %v455_v53 = vadd.f32 %v454_v51, %v1115_v29  ;;  %v479_v54 = vadd.f32 %v478_v52, %v1119_v33 }
 0x119   : > { %v629_v55 = vmax.f32 %v613_v27, 0.0  ;;  %v637_v56 = vmax.f32 %v621_v32, 0.0  ;;  %v535_v57 = vadd.f32 %v1123_v37, %v453_v49  ;;  %v543_v58 = vadd.f32 %v1127_v41, %v477_v50  ;;  %v695_v10 = vld [vmem:[%s1134_s28 + $0x40] sm:$0xff] (%p949_p5) }
 0x11a   : > { %v630_v60 = vmax.f32 %v614_v36, 0.0  ;;  %v638_v61 = vmax.f32 %v622_v40, 0.0  ;;  %v536_v44 = vadd.f32 %v1123_v37, %v455_v53  ;;  %v544_v62 = vadd.f32 %v1127_v41, %v479_v54  ;;  %663 = sbr.rel (!%p949_p5) target bundleno = 298 (0x12a), region = 67  ;;  %v679_v37 = vld [vmem:[%s1134_s28] sm:$0xff] (%p949_p5)  ;;  %v681_v41 = vld [vmem:[%s1134_s28 + $0x8] sm:$0xff] (%p949_p5)  ;;  %696 = vst [vmem:[%s666_s26 + $0x80] sm:$0xff] (%p949_p5), %v695_v10 }
 0x11b   : > { %645 = vst [vmem:[%s1134_s28 + $0x20] sm:$0xff] %v629_v55  ;;  %653 = vst [vmem:[%s1134_s28 + $0x60] sm:$0xff] %v637_v56  ;;  %v615_v29 = vmul.f32 %v1131_v45, %v535_v57  ;;  %v623_v33 = vmul.f32 %v607_v59, %v543_v58  ;;  %v697_v11 = vld [vmem:[%s1134_s28 + $0x48] sm:$0xff] (%p949_p5) }
 0x11c   : > { %646 = vst [vmem:[%s1134_s28 + $0x28] sm:$0xff] %v630_v60  ;;  %654 = vst [vmem:[%s1134_s28 + $0x68] sm:$0xff] %v638_v61  ;;  %v616_v63 = vmul.f32 %v1131_v45, %v536_v44  ;;  %v624_v0 = vmul.f32 %v607_v59, %v544_v62 }
 0x11d   : > { %v631_v1 = vmax.f32 %v615_v29, 0.0  ;;  %v639_v2 = vmax.f32 %v623_v33, 0.0  ;;  %v683_v45 = vld [vmem:[%s1134_s28 + $0x10] sm:$0xff] (%p949_p5)  ;;  %680 = vst [vmem:[%s666_s26] sm:$0xff] (%p949_p5), %v679_v37  ;;  %682 = vst [vmem:[%s666_s26 + $0x8] sm:$0xff] (%p949_p5), %v681_v41 }
 0x11e   : > { %v632_v3 = vmax.f32 %v616_v63, 0.0  ;;  %v640_v4 = vmax.f32 %v624_v0, 0.0  ;;  %v685_v5 = vld [vmem:[%s1134_s28 + $0x18] sm:$0xff] (%p949_p5)  ;;  %684 = vst [vmem:[%s666_s26 + $0x20] sm:$0xff] (%p949_p5), %v683_v45  ;;  %v699_v12 = vld [vmem:[%s1134_s28 + $0x50] sm:$0xff] (%p949_p5)  ;;  %698 = vst [vmem:[%s666_s26 + $0x88] sm:$0xff] (%p949_p5), %v697_v11 }
 0x11f   : > { %647 = vst [vmem:[%s1134_s28 + $0x30] sm:$0xff] %v631_v1  ;;  %655 = vst [vmem:[%s1134_s28 + $0x70] sm:$0xff] %v639_v2  ;;  %v701_v13 = vld [vmem:[%s1134_s28 + $0x58] sm:$0xff] (%p949_p5) }
 0x120   : > { %648 = vst [vmem:[%s1134_s28 + $0x38] sm:$0xff] %v632_v3  ;;  %656 = vst [vmem:[%s1134_s28 + $0x78] sm:$0xff] %v640_v4 }
 0x121   : > { %686 = vst [vmem:[%s666_s26 + $0x28] sm:$0xff] %v685_v5  ;;  %700 = vst [vmem:[%s666_s26 + $0xa0] sm:$0xff] %v699_v12 }
 0x122   : > { %v687_v6 = vld [vmem:[%s1134_s28 + $0x20] sm:$0xff]  ;;  %702 = vst [vmem:[%s666_s26 + $0xa8] sm:$0xff] %v701_v13 }
 0x123   : > { %v689_v7 = vld [vmem:[%s1134_s28 + $0x28] sm:$0xff]  ;;  %688 = vst [vmem:[%s666_s26 + $0x40] sm:$0xff] %v687_v6  ;;  %v703_v14 = vld [vmem:[%s1134_s28 + $0x60] sm:$0xff] }
 0x124   : > { %690 = vst [vmem:[%s666_s26 + $0x48] sm:$0xff] %v689_v7  ;;  %v705_v15 = vld [vmem:[%s1134_s28 + $0x68] sm:$0xff]  ;;  %704 = vst [vmem:[%s666_s26 + $0xc0] sm:$0xff] %v703_v14 }
 0x125   : > { %706 = vst [vmem:[%s666_s26 + $0xc8] sm:$0xff] %v705_v15 }
 0x126   : > { %v691_v8 = vld [vmem:[%s1134_s28 + $0x30] sm:$0xff] }
 0x127   : > { %v693_v9 = vld [vmem:[%s1134_s28 + $0x38] sm:$0xff]  ;;  %692 = vst [vmem:[%s666_s26 + $0x60] sm:$0xff] %v691_v8  ;;  %v707_v17 = vld [vmem:[%s1134_s28 + $0x70] sm:$0xff] }
 0x128   : > { %694 = vst [vmem:[%s666_s26 + $0x68] sm:$0xff] %v693_v9  ;;  %708 = vst [vmem:[%s666_s26 + $0xe0] sm:$0xff] %v707_v17  ;;  %v709_v16 = vld [vmem:[%s1134_s28 + $0x78] sm:$0xff] }
 0x129   : > { %710 = vst [vmem:[%s666_s26 + $0xe8] sm:$0xff] %v709_v16 }
 0x12a PF: > { %p12_p10 = scmp.ge.s32.totalorder %s936_s22, 4   ;;  %s1212_s18 = smov %s881_s19 }
 0x12b   : > { %s1213_s19 = smov %s947_s25  ;;  %s1214_s20 = smov %s936_s22 }
 0x12c   :  { %14 = sbr.rel (!%p12_p10) target bundleno = 2 (0x2), region = 121 }

// kernel: run.8
= control target key start
LH: loop header
LB: loop body
LE: loop exit
PB: predicated region body
PF: predicated region fallthrough
CT: control target
= control target key end

     0   :  { %s1577_s18 = smov 0   ;;  %s1579_s19 = smov 0   ;;  %s2280_s0 = inlined_call_operand.vmem [shape: f32[576,512], index: 0, kind: input, shape index: {}]   ;;  %s2281_s1 = inlined_call_operand.vmem [shape: f32[64,576], index: 1, kind: input, shape index: {}]   ;;  %s2282_s2 = inlined_call_operand.vmem [shape: f32[64,1], index: 2, kind: input, shape index: {}]   ;;  %s2283_s3 = inlined_call_operand.vmem [shape: f32[64,1], index: 3, kind: input, shape index: {}, may-alias: {3,4}]   ;;  %s2284_s4 = inlined_call_operand.vmem [shape: f32[64,1], index: 4, kind: input, shape index: {}, may-alias: {3,4}]   ;;  %s2285_s5 = inlined_call_operand.vmem [shape: f32[64,512], index: 5, kind: output, shape index: {}]  }
   0x1   :  { %s1581_s20 = smov 0  }
   0x2 LB: > { %s1268_s3 = sadd.s32 4294967295, %s1543_s20   ;;  %s1594_s4 = sadd.s32 1, %s1543_s20   ;;  %s1543_s20 = sphi %s1581_s20, %s2289_s20   ;;  %s1539_s19 = sphi %s1579_s19, %s2288_s19   ;;  %s1535_s18 = sphi %s1577_s18, %s2287_s18  }
   0x3   : > { %s19_s21 = ssub.s32 %s1543_s20, %s1594_s4  ;;  %s22_s22 = sadd.s32 1, %s1539_s19 }
   0x4   : > { %p20_p0 = scmp.eq.s32.totalorder %s19_s21, 0  ;;  %p29_p1 = scmp.ne.s32.totalorder %s1539_s19, %s1535_s18 }
   0x5   : > { %p30_p2 = scmp.eq.s32.totalorder %s1543_s20, 0  ;;  %p143_p3 = scmp.eq.s32.totalorder %s1268_s3, 1 }
   0x6   : > { %s1605_s23 = scalar_select %p20_p0, %s1539_s19, %s22_s22  }
   0x7   : > { %p31_p4 = por %p30_p2, %p29_p1  ;;  %p1607_p5 = por %p143_p3, %p29_p1 }
   0x8   : > { %p1271_p6 = scmp.ge.s32.totalorder %s1543_s20, 2 }
   0xa   : > { %177 = sbr.rel (%p1271_p6) target bundleno = 93 (0x5d), region = 32 }
  0x11   : > { %180 = sbr.rel (!%p31_p4) target bundleno = 93 (0x5d), region = 36  ;;  %s182_s25 = sand.u32 (%p31_p4), 1, %s1539_s19  }
  0x12   : > { %s1289_s26 = sshll.u32 (%p31_p4), %s1543_s20, 4  ;;  %s1491_s27 = smul.u32 (%p31_p4), 1152, %s182_s25 }
  0x13   : > { %s1617_s30 = scalar_lea.vmem (%p31_p4), %s2280_s0, %s1289_s26 }
  0x14   : > { %v200_v0 = vld [vmem:[%s1617_s30] sm:$0xff] (%p31_p4)  ;;  %v202_v1 = vld [vmem:[%s1617_s30 + $0x8] sm:$0xff] (%p31_p4)  ;;  %s1625_s6 = scalar_lea.vmem (%p31_p4), [#allocation2], %s1491_s27 }
  0x15   : > { %v204_v2 = vld [vmem:[%s1617_s30 + $0x20] sm:$0xff] (%p31_p4)  ;;  %v206_v3 = vld [vmem:[%s1617_s30 + $0x28] sm:$0xff] (%p31_p4)  ;;  %201 = vst [vmem:[%s1625_s6] sm:$0xff] (%p31_p4), %v200_v0  ;;  %203 = vst [vmem:[%s1625_s6 + $0x8] sm:$0xff] (%p31_p4), %v202_v1 }
  0x16   : > { %v208_v4 = vld [vmem:[%s1617_s30 + $0x40] sm:$0xff] (%p31_p4)  ;;  %v210_v5 = vld [vmem:[%s1617_s30 + $0x48] sm:$0xff] (%p31_p4)  ;;  %205 = vst [vmem:[%s1625_s6 + $0x10] sm:$0xff] (%p31_p4), %v204_v2  ;;  %207 = vst [vmem:[%s1625_s6 + $0x18] sm:$0xff] (%p31_p4), %v206_v3 }
  0x17   : > { %209 = vst [vmem:[%s1625_s6 + $0x20] sm:$0xff] (%p31_p4), %v208_v4  ;;  %211 = vst [vmem:[%s1625_s6 + $0x28] sm:$0xff] (%p31_p4), %v210_v5  ;;  %v212_v6 = vld [vmem:[%s1617_s30 + $0x60] sm:$0xff] (%p31_p4)  ;;  %v214_v7 = vld [vmem:[%s1617_s30 + $0x68] sm:$0xff] (%p31_p4) }
  0x18   : > { %v216_v8 = vld [vmem:[%s1617_s30 + $0x80] sm:$0xff]  ;;  %213 = vst [vmem:[%s1625_s6 + $0x30] sm:$0xff] %v212_v6  ;;  %215 = vst [vmem:[%s1625_s6 + $0x38] sm:$0xff] %v214_v7  ;;  %v218_v9 = vld [vmem:[%s1617_s30 + $0x88] sm:$0xff] }
  0x19   : > { %217 = vst [vmem:[%s1625_s6 + $0x40] sm:$0xff] %v216_v8  ;;  %v220_v10 = vld [vmem:[%s1617_s30 + $0xa0] sm:$0xff]  ;;  %v222_v11 = vld [vmem:[%s1617_s30 + $0xa8] sm:$0xff]  ;;  %219 = vst [vmem:[%s1625_s6 + $0x48] sm:$0xff] %v218_v9 }
  0x1a   : > { %221 = vst [vmem:[%s1625_s6 + $0x50] sm:$0xff] %v220_v10  ;;  %223 = vst [vmem:[%s1625_s6 + $0x58] sm:$0xff] %v222_v11  ;;  %v224_v12 = vld [vmem:[%s1617_s30 + $0xc0] sm:$0xff]  ;;  %v226_v13 = vld [vmem:[%s1617_s30 + $0xc8] sm:$0xff] }
  0x1b   : > { %v228_v14 = vld [vmem:[%s1617_s30 + $0xe0] sm:$0xff]  ;;  %225 = vst [vmem:[%s1625_s6 + $0x60] sm:$0xff] %v224_v12  ;;  %227 = vst [vmem:[%s1625_s6 + $0x68] sm:$0xff] %v226_v13  ;;  %v230_v15 = vld [vmem:[%s1617_s30 + $0xe8] sm:$0xff] }
  0x1c   : > { %229 = vst [vmem:[%s1625_s6 + $0x70] sm:$0xff] %v228_v14  ;;  %v232_v16 = vld [vmem:[%s1617_s30 + $0x100] sm:$0xff]  ;;  %v234_v17 = vld [vmem:[%s1617_s30 + $0x108] sm:$0xff]  ;;  %231 = vst [vmem:[%s1625_s6 + $0x78] sm:$0xff] %v230_v15 }
  0x1d   : > { %233 = vst [vmem:[%s1625_s6 + $0x80] sm:$0xff] %v232_v16  ;;  %235 = vst [vmem:[%s1625_s6 + $0x88] sm:$0xff] %v234_v17  ;;  %v236_v18 = vld [vmem:[%s1617_s30 + $0x120] sm:$0xff]  ;;  %v238_v19 = vld [vmem:[%s1617_s30 + $0x128] sm:$0xff] }
  0x1e   : > { %v240_v20 = vld [vmem:[%s1617_s30 + $0x140] sm:$0xff]  ;;  %237 = vst [vmem:[%s1625_s6 + $0x90] sm:$0xff] %v236_v18  ;;  %239 = vst [vmem:[%s1625_s6 + $0x98] sm:$0xff] %v238_v19  ;;  %v242_v21 = vld [vmem:[%s1617_s30 + $0x148] sm:$0xff] }
  0x1f   : > { %241 = vst [vmem:[%s1625_s6 + $0xa0] sm:$0xff] %v240_v20  ;;  %v244_v22 = vld [vmem:[%s1617_s30 + $0x160] sm:$0xff]  ;;  %v246_v23 = vld [vmem:[%s1617_s30 + $0x168] sm:$0xff]  ;;  %243 = vst [vmem:[%s1625_s6 + $0xa8] sm:$0xff] %v242_v21 }
  0x20   : > { %245 = vst [vmem:[%s1625_s6 + $0xb0] sm:$0xff] %v244_v22  ;;  %247 = vst [vmem:[%s1625_s6 + $0xb8] sm:$0xff] %v246_v23  ;;  %v248_v24 = vld [vmem:[%s1617_s30 + $0x180] sm:$0xff]  ;;  %v250_v25 = vld [vmem:[%s1617_s30 + $0x188] sm:$0xff] }
  0x21   : > { %v252_v26 = vld [vmem:[%s1617_s30 + $0x1a0] sm:$0xff]  ;;  %249 = vst [vmem:[%s1625_s6 + $0xc0] sm:$0xff] %v248_v24  ;;  %251 = vst [vmem:[%s1625_s6 + $0xc8] sm:$0xff] %v250_v25  ;;  %v254_v27 = vld [vmem:[%s1617_s30 + $0x1a8] sm:$0xff] }
  0x22   : > { %253 = vst [vmem:[%s1625_s6 + $0xd0] sm:$0xff] %v252_v26  ;;  %v256_v28 = vld [vmem:[%s1617_s30 + $0x1c0] sm:$0xff]  ;;  %v258_v29 = vld [vmem:[%s1617_s30 + $0x1c8] sm:$0xff]  ;;  %255 = vst [vmem:[%s1625_s6 + $0xd8] sm:$0xff] %v254_v27 }
  0x23   : > { %257 = vst [vmem:[%s1625_s6 + $0xe0] sm:$0xff] %v256_v28  ;;  %259 = vst [vmem:[%s1625_s6 + $0xe8] sm:$0xff] %v258_v29  ;;  %v260_v30 = vld [vmem:[%s1617_s30 + $0x1e0] sm:$0xff]  ;;  %v262_v31 = vld [vmem:[%s1617_s30 + $0x1e8] sm:$0xff] }
  0x24   : > { %v264_v32 = vld [vmem:[%s1617_s30 + $0x200] sm:$0xff]  ;;  %261 = vst [vmem:[%s1625_s6 + $0xf0] sm:$0xff] %v260_v30  ;;  %263 = vst [vmem:[%s1625_s6 + $0xf8] sm:$0xff] %v262_v31  ;;  %v266_v33 = vld [vmem:[%s1617_s30 + $0x208] sm:$0xff] }
  0x25   : > { %265 = vst [vmem:[%s1625_s6 + $0x100] sm:$0xff] %v264_v32  ;;  %v268_v34 = vld [vmem:[%s1617_s30 + $0x220] sm:$0xff]  ;;  %v270_v35 = vld [vmem:[%s1617_s30 + $0x228] sm:$0xff]  ;;  %267 = vst [vmem:[%s1625_s6 + $0x108] sm:$0xff] %v266_v33 }
  0x26   : > { %269 = vst [vmem:[%s1625_s6 + $0x110] sm:$0xff] %v268_v34  ;;  %271 = vst [vmem:[%s1625_s6 + $0x118] sm:$0xff] %v270_v35  ;;  %v272_v36 = vld [vmem:[%s1617_s30 + $0x240] sm:$0xff]  ;;  %v274_v37 = vld [vmem:[%s1617_s30 + $0x248] sm:$0xff] }
  0x27   : > { %v276_v38 = vld [vmem:[%s1617_s30 + $0x260] sm:$0xff]  ;;  %273 = vst [vmem:[%s1625_s6 + $0x120] sm:$0xff] %v272_v36  ;;  %275 = vst [vmem:[%s1625_s6 + $0x128] sm:$0xff] %v274_v37  ;;  %v278_v39 = vld [vmem:[%s1617_s30 + $0x268] sm:$0xff] }
  0x28   : > { %277 = vst [vmem:[%s1625_s6 + $0x130] sm:$0xff] %v276_v38  ;;  %v280_v40 = vld [vmem:[%s1617_s30 + $0x280] sm:$0xff]  ;;  %v282_v41 = vld [vmem:[%s1617_s30 + $0x288] sm:$0xff]  ;;  %279 = vst [vmem:[%s1625_s6 + $0x138] sm:$0xff] %v278_v39 }
  0x29   : > { %281 = vst [vmem:[%s1625_s6 + $0x140] sm:$0xff] %v280_v40  ;;  %283 = vst [vmem:[%s1625_s6 + $0x148] sm:$0xff] %v282_v41  ;;  %v284_v42 = vld [vmem:[%s1617_s30 + $0x2a0] sm:$0xff]  ;;  %v286_v43 = vld [vmem:[%s1617_s30 + $0x2a8] sm:$0xff] }
  0x2a   : > { %v288_v44 = vld [vmem:[%s1617_s30 + $0x2c0] sm:$0xff]  ;;  %285 = vst [vmem:[%s1625_s6 + $0x150] sm:$0xff] %v284_v42  ;;  %287 = vst [vmem:[%s1625_s6 + $0x158] sm:$0xff] %v286_v43  ;;  %v290_v45 = vld [vmem:[%s1617_s30 + $0x2c8] sm:$0xff] }
  0x2b   : > { %289 = vst [vmem:[%s1625_s6 + $0x160] sm:$0xff] %v288_v44  ;;  %v292_v46 = vld [vmem:[%s1617_s30 + $0x2e0] sm:$0xff]  ;;  %v294_v47 = vld [vmem:[%s1617_s30 + $0x2e8] sm:$0xff]  ;;  %291 = vst [vmem:[%s1625_s6 + $0x168] sm:$0xff] %v290_v45 }
  0x2c   : > { %293 = vst [vmem:[%s1625_s6 + $0x170] sm:$0xff] %v292_v46  ;;  %295 = vst [vmem:[%s1625_s6 + $0x178] sm:$0xff] %v294_v47  ;;  %v296_v48 = vld [vmem:[%s1617_s30 + $0x300] sm:$0xff]  ;;  %v298_v49 = vld [vmem:[%s1617_s30 + $0x308] sm:$0xff] }
  0x2d   : > { %v300_v50 = vld [vmem:[%s1617_s30 + $0x320] sm:$0xff]  ;;  %297 = vst [vmem:[%s1625_s6 + $0x180] sm:$0xff] %v296_v48  ;;  %299 = vst [vmem:[%s1625_s6 + $0x188] sm:$0xff] %v298_v49  ;;  %v302_v51 = vld [vmem:[%s1617_s30 + $0x328] sm:$0xff] }
  0x2e   : > { %301 = vst [vmem:[%s1625_s6 + $0x190] sm:$0xff] %v300_v50  ;;  %v304_v52 = vld [vmem:[%s1617_s30 + $0x340] sm:$0xff]  ;;  %v306_v53 = vld [vmem:[%s1617_s30 + $0x348] sm:$0xff]  ;;  %303 = vst [vmem:[%s1625_s6 + $0x198] sm:$0xff] %v302_v51 }
  0x2f   : > { %305 = vst [vmem:[%s1625_s6 + $0x1a0] sm:$0xff] %v304_v52  ;;  %307 = vst [vmem:[%s1625_s6 + $0x1a8] sm:$0xff] %v306_v53  ;;  %v308_v54 = vld [vmem:[%s1617_s30 + $0x360] sm:$0xff]  ;;  %v310_v55 = vld [vmem:[%s1617_s30 + $0x368] sm:$0xff] }
  0x30   : > { %v312_v56 = vld [vmem:[%s1617_s30 + $0x380] sm:$0xff]  ;;  %309 = vst [vmem:[%s1625_s6 + $0x1b0] sm:$0xff] %v308_v54  ;;  %311 = vst [vmem:[%s1625_s6 + $0x1b8] sm:$0xff] %v310_v55  ;;  %v314_v57 = vld [vmem:[%s1617_s30 + $0x388] sm:$0xff] }
  0x31   : > { %313 = vst [vmem:[%s1625_s6 + $0x1c0] sm:$0xff] %v312_v56  ;;  %v316_v58 = vld [vmem:[%s1617_s30 + $0x3a0] sm:$0xff]  ;;  %v318_v59 = vld [vmem:[%s1617_s30 + $0x3a8] sm:$0xff]  ;;  %315 = vst [vmem:[%s1625_s6 + $0x1c8] sm:$0xff] %v314_v57 }
  0x32   : > { %317 = vst [vmem:[%s1625_s6 + $0x1d0] sm:$0xff] %v316_v58  ;;  %319 = vst [vmem:[%s1625_s6 + $0x1d8] sm:$0xff] %v318_v59  ;;  %v320_v60 = vld [vmem:[%s1617_s30 + $0x3c0] sm:$0xff]  ;;  %v322_v61 = vld [vmem:[%s1617_s30 + $0x3c8] sm:$0xff] }
  0x33   : > { %v324_v62 = vld [vmem:[%s1617_s30 + $0x3e0] sm:$0xff]  ;;  %321 = vst [vmem:[%s1625_s6 + $0x1e0] sm:$0xff] %v320_v60  ;;  %323 = vst [vmem:[%s1625_s6 + $0x1e8] sm:$0xff] %v322_v61  ;;  %v326_v63 = vld [vmem:[%s1617_s30 + $0x3e8] sm:$0xff] }
  0x34   : > { %325 = vst [vmem:[%s1625_s6 + $0x1f0] sm:$0xff] %v324_v62  ;;  %v328_v0 = vld [vmem:[%s1617_s30 + $0x400] sm:$0xff]  ;;  %v330_v1 = vld [vmem:[%s1617_s30 + $0x408] sm:$0xff]  ;;  %327 = vst [vmem:[%s1625_s6 + $0x1f8] sm:$0xff] %v326_v63 }
  0x35   : > { %329 = vst [vmem:[%s1625_s6 + $0x200] sm:$0xff] %v328_v0  ;;  %331 = vst [vmem:[%s1625_s6 + $0x208] sm:$0xff] %v330_v1  ;;  %v332_v2 = vld [vmem:[%s1617_s30 + $0x420] sm:$0xff]  ;;  %v334_v3 = vld [vmem:[%s1617_s30 + $0x428] sm:$0xff] }
  0x36   : > { %v336_v4 = vld [vmem:[%s1617_s30 + $0x440] sm:$0xff]  ;;  %333 = vst [vmem:[%s1625_s6 + $0x210] sm:$0xff] %v332_v2  ;;  %335 = vst [vmem:[%s1625_s6 + $0x218] sm:$0xff] %v334_v3  ;;  %v338_v5 = vld [vmem:[%s1617_s30 + $0x448] sm:$0xff] }
  0x37   : > { %337 = vst [vmem:[%s1625_s6 + $0x220] sm:$0xff] %v336_v4  ;;  %v340_v6 = vld [vmem:[%s1617_s30 + $0x460] sm:$0xff]  ;;  %v342_v7 = vld [vmem:[%s1617_s30 + $0x468] sm:$0xff]  ;;  %339 = vst [vmem:[%s1625_s6 + $0x228] sm:$0xff] %v338_v5 }
  0x38   : > { %341 = vst [vmem:[%s1625_s6 + $0x230] sm:$0xff] %v340_v6  ;;  %343 = vst [vmem:[%s1625_s6 + $0x238] sm:$0xff] %v342_v7  ;;  %v344_v8 = vld [vmem:[%s1617_s30 + $0x480] sm:$0xff]  ;;  %v346_v9 = vld [vmem:[%s1617_s30 + $0x488] sm:$0xff] }
  0x39   : > { %v348_v10 = vld [vmem:[%s1617_s30 + $0x4a0] sm:$0xff]  ;;  %345 = vst [vmem:[%s1625_s6 + $0x240] sm:$0xff] %v344_v8  ;;  %347 = vst [vmem:[%s1625_s6 + $0x248] sm:$0xff] %v346_v9  ;;  %v350_v11 = vld [vmem:[%s1617_s30 + $0x4a8] sm:$0xff] }
  0x3a   : > { %349 = vst [vmem:[%s1625_s6 + $0x250] sm:$0xff] %v348_v10  ;;  %v352_v12 = vld [vmem:[%s1617_s30 + $0x4c0] sm:$0xff]  ;;  %v354_v13 = vld [vmem:[%s1617_s30 + $0x4c8] sm:$0xff]  ;;  %351 = vst [vmem:[%s1625_s6 + $0x258] sm:$0xff] %v350_v11 }
  0x3b   : > { %353 = vst [vmem:[%s1625_s6 + $0x260] sm:$0xff] %v352_v12  ;;  %355 = vst [vmem:[%s1625_s6 + $0x268] sm:$0xff] %v354_v13  ;;  %v356_v14 = vld [vmem:[%s1617_s30 + $0x4e0] sm:$0xff]  ;;  %v358_v15 = vld [vmem:[%s1617_s30 + $0x4e8] sm:$0xff] }
  0x3c   : > { %v360_v16 = vld [vmem:[%s1617_s30 + $0x500] sm:$0xff]  ;;  %357 = vst [vmem:[%s1625_s6 + $0x270] sm:$0xff] %v356_v14  ;;  %359 = vst [vmem:[%s1625_s6 + $0x278] sm:$0xff] %v358_v15  ;;  %v362_v17 = vld [vmem:[%s1617_s30 + $0x508] sm:$0xff] }
  0x3d   : > { %361 = vst [vmem:[%s1625_s6 + $0x280] sm:$0xff] %v360_v16  ;;  %v364_v18 = vld [vmem:[%s1617_s30 + $0x520] sm:$0xff]  ;;  %v366_v19 = vld [vmem:[%s1617_s30 + $0x528] sm:$0xff]  ;;  %363 = vst [vmem:[%s1625_s6 + $0x288] sm:$0xff] %v362_v17 }
  0x3e   : > { %365 = vst [vmem:[%s1625_s6 + $0x290] sm:$0xff] %v364_v18  ;;  %367 = vst [vmem:[%s1625_s6 + $0x298] sm:$0xff] %v366_v19  ;;  %v368_v20 = vld [vmem:[%s1617_s30 + $0x540] sm:$0xff]  ;;  %v370_v21 = vld [vmem:[%s1617_s30 + $0x548] sm:$0xff] }
  0x3f   : > { %v372_v22 = vld [vmem:[%s1617_s30 + $0x560] sm:$0xff]  ;;  %369 = vst [vmem:[%s1625_s6 + $0x2a0] sm:$0xff] %v368_v20  ;;  %371 = vst [vmem:[%s1625_s6 + $0x2a8] sm:$0xff] %v370_v21  ;;  %v374_v23 = vld [vmem:[%s1617_s30 + $0x568] sm:$0xff] }
  0x40   : > { %373 = vst [vmem:[%s1625_s6 + $0x2b0] sm:$0xff] %v372_v22  ;;  %v376_v24 = vld [vmem:[%s1617_s30 + $0x580] sm:$0xff]  ;;  %v378_v25 = vld [vmem:[%s1617_s30 + $0x588] sm:$0xff]  ;;  %375 = vst [vmem:[%s1625_s6 + $0x2b8] sm:$0xff] %v374_v23 }
  0x41   : > { %377 = vst [vmem:[%s1625_s6 + $0x2c0] sm:$0xff] %v376_v24  ;;  %379 = vst [vmem:[%s1625_s6 + $0x2c8] sm:$0xff] %v378_v25  ;;  %v380_v26 = vld [vmem:[%s1617_s30 + $0x5a0] sm:$0xff]  ;;  %v382_v27 = vld [vmem:[%s1617_s30 + $0x5a8] sm:$0xff] }
  0x42   : > { %v384_v28 = vld [vmem:[%s1617_s30 + $0x5c0] sm:$0xff]  ;;  %381 = vst [vmem:[%s1625_s6 + $0x2d0] sm:$0xff] %v380_v26  ;;  %383 = vst [vmem:[%s1625_s6 + $0x2d8] sm:$0xff] %v382_v27  ;;  %v386_v29 = vld [vmem:[%s1617_s30 + $0x5c8] sm:$0xff] }
  0x43   : > { %385 = vst [vmem:[%s1625_s6 + $0x2e0] sm:$0xff] %v384_v28  ;;  %v388_v30 = vld [vmem:[%s1617_s30 + $0x5e0] sm:$0xff]  ;;  %v390_v31 = vld [vmem:[%s1617_s30 + $0x5e8] sm:$0xff]  ;;  %387 = vst [vmem:[%s1625_s6 + $0x2e8] sm:$0xff] %v386_v29 }
  0x44   : > { %389 = vst [vmem:[%s1625_s6 + $0x2f0] sm:$0xff] %v388_v30  ;;  %391 = vst [vmem:[%s1625_s6 + $0x2f8] sm:$0xff] %v390_v31  ;;  %v392_v32 = vld [vmem:[%s1617_s30 + $0x600] sm:$0xff]  ;;  %v394_v33 = vld [vmem:[%s1617_s30 + $0x608] sm:$0xff] }
  0x45   : > { %v396_v34 = vld [vmem:[%s1617_s30 + $0x620] sm:$0xff]  ;;  %393 = vst [vmem:[%s1625_s6 + $0x300] sm:$0xff] %v392_v32  ;;  %395 = vst [vmem:[%s1625_s6 + $0x308] sm:$0xff] %v394_v33  ;;  %v398_v35 = vld [vmem:[%s1617_s30 + $0x628] sm:$0xff] }
  0x46   : > { %397 = vst [vmem:[%s1625_s6 + $0x310] sm:$0xff] %v396_v34  ;;  %v400_v36 = vld [vmem:[%s1617_s30 + $0x640] sm:$0xff]  ;;  %v402_v37 = vld [vmem:[%s1617_s30 + $0x648] sm:$0xff]  ;;  %399 = vst [vmem:[%s1625_s6 + $0x318] sm:$0xff] %v398_v35 }
  0x47   : > { %401 = vst [vmem:[%s1625_s6 + $0x320] sm:$0xff] %v400_v36  ;;  %403 = vst [vmem:[%s1625_s6 + $0x328] sm:$0xff] %v402_v37  ;;  %v404_v38 = vld [vmem:[%s1617_s30 + $0x660] sm:$0xff]  ;;  %v406_v39 = vld [vmem:[%s1617_s30 + $0x668] sm:$0xff] }
  0x48   : > { %v408_v40 = vld [vmem:[%s1617_s30 + $0x680] sm:$0xff]  ;;  %405 = vst [vmem:[%s1625_s6 + $0x330] sm:$0xff] %v404_v38  ;;  %407 = vst [vmem:[%s1625_s6 + $0x338] sm:$0xff] %v406_v39  ;;  %v410_v41 = vld [vmem:[%s1617_s30 + $0x688] sm:$0xff] }
  0x49   : > { %409 = vst [vmem:[%s1625_s6 + $0x340] sm:$0xff] %v408_v40  ;;  %v412_v42 = vld [vmem:[%s1617_s30 + $0x6a0] sm:$0xff]  ;;  %v414_v43 = vld [vmem:[%s1617_s30 + $0x6a8] sm:$0xff]  ;;  %411 = vst [vmem:[%s1625_s6 + $0x348] sm:$0xff] %v410_v41 }
  0x4a   : > { %413 = vst [vmem:[%s1625_s6 + $0x350] sm:$0xff] %v412_v42  ;;  %415 = vst [vmem:[%s1625_s6 + $0x358] sm:$0xff] %v414_v43  ;;  %v416_v44 = vld [vmem:[%s1617_s30 + $0x6c0] sm:$0xff]  ;;  %v418_v45 = vld [vmem:[%s1617_s30 + $0x6c8] sm:$0xff] }
  0x4b   : > { %v420_v46 = vld [vmem:[%s1617_s30 + $0x6e0] sm:$0xff]  ;;  %417 = vst [vmem:[%s1625_s6 + $0x360] sm:$0xff] %v416_v44  ;;  %419 = vst [vmem:[%s1625_s6 + $0x368] sm:$0xff] %v418_v45  ;;  %v422_v47 = vld [vmem:[%s1617_s30 + $0x6e8] sm:$0xff] }
  0x4c   : > { %421 = vst [vmem:[%s1625_s6 + $0x370] sm:$0xff] %v420_v46  ;;  %v424_v48 = vld [vmem:[%s1617_s30 + $0x700] sm:$0xff]  ;;  %v426_v49 = vld [vmem:[%s1617_s30 + $0x708] sm:$0xff]  ;;  %423 = vst [vmem:[%s1625_s6 + $0x378] sm:$0xff] %v422_v47 }
  0x4d   : > { %425 = vst [vmem:[%s1625_s6 + $0x380] sm:$0xff] %v424_v48  ;;  %427 = vst [vmem:[%s1625_s6 + $0x388] sm:$0xff] %v426_v49  ;;  %v428_v50 = vld [vmem:[%s1617_s30 + $0x720] sm:$0xff]  ;;  %v430_v51 = vld [vmem:[%s1617_s30 + $0x728] sm:$0xff] }
  0x4e   : > { %v432_v52 = vld [vmem:[%s1617_s30 + $0x740] sm:$0xff]  ;;  %429 = vst [vmem:[%s1625_s6 + $0x390] sm:$0xff] %v428_v50  ;;  %431 = vst [vmem:[%s1625_s6 + $0x398] sm:$0xff] %v430_v51  ;;  %v434_v53 = vld [vmem:[%s1617_s30 + $0x748] sm:$0xff] }
  0x4f   : > { %433 = vst [vmem:[%s1625_s6 + $0x3a0] sm:$0xff] %v432_v52  ;;  %v436_v54 = vld [vmem:[%s1617_s30 + $0x760] sm:$0xff]  ;;  %v438_v55 = vld [vmem:[%s1617_s30 + $0x768] sm:$0xff]  ;;  %435 = vst [vmem:[%s1625_s6 + $0x3a8] sm:$0xff] %v434_v53 }
  0x50   : > { %437 = vst [vmem:[%s1625_s6 + $0x3b0] sm:$0xff] %v436_v54  ;;  %439 = vst [vmem:[%s1625_s6 + $0x3b8] sm:$0xff] %v438_v55  ;;  %v440_v56 = vld [vmem:[%s1617_s30 + $0x780] sm:$0xff]  ;;  %v442_v57 = vld [vmem:[%s1617_s30 + $0x788] sm:$0xff] }
  0x51   : > { %v444_v58 = vld [vmem:[%s1617_s30 + $0x7a0] sm:$0xff]  ;;  %441 = vst [vmem:[%s1625_s6 + $0x3c0] sm:$0xff] %v440_v56  ;;  %443 = vst [vmem:[%s1625_s6 + $0x3c8] sm:$0xff] %v442_v57  ;;  %v446_v59 = vld [vmem:[%s1617_s30 + $0x7a8] sm:$0xff] }
  0x52   : > { %445 = vst [vmem:[%s1625_s6 + $0x3d0] sm:$0xff] %v444_v58  ;;  %v448_v60 = vld [vmem:[%s1617_s30 + $0x7c0] sm:$0xff]  ;;  %v450_v61 = vld [vmem:[%s1617_s30 + $0x7c8] sm:$0xff]  ;;  %447 = vst [vmem:[%s1625_s6 + $0x3d8] sm:$0xff] %v446_v59 }
  0x53   : > { %449 = vst [vmem:[%s1625_s6 + $0x3e0] sm:$0xff] %v448_v60  ;;  %451 = vst [vmem:[%s1625_s6 + $0x3e8] sm:$0xff] %v450_v61  ;;  %v452_v62 = vld [vmem:[%s1617_s30 + $0x7e0] sm:$0xff]  ;;  %v454_v63 = vld [vmem:[%s1617_s30 + $0x7e8] sm:$0xff] }
  0x54   : > { %v456_v0 = vld [vmem:[%s1617_s30 + $0x800] sm:$0xff]  ;;  %453 = vst [vmem:[%s1625_s6 + $0x3f0] sm:$0xff] %v452_v62  ;;  %455 = vst [vmem:[%s1625_s6 + $0x3f8] sm:$0xff] %v454_v63  ;;  %v458_v1 = vld [vmem:[%s1617_s30 + $0x808] sm:$0xff] }
  0x55   : > { %457 = vst [vmem:[%s1625_s6 + $0x400] sm:$0xff] %v456_v0  ;;  %v460_v2 = vld [vmem:[%s1617_s30 + $0x820] sm:$0xff]  ;;  %v462_v3 = vld [vmem:[%s1617_s30 + $0x828] sm:$0xff]  ;;  %459 = vst [vmem:[%s1625_s6 + $0x408] sm:$0xff] %v458_v1 }
  0x56   : > { %461 = vst [vmem:[%s1625_s6 + $0x410] sm:$0xff] %v460_v2  ;;  %463 = vst [vmem:[%s1625_s6 + $0x418] sm:$0xff] %v462_v3  ;;  %v464_v4 = vld [vmem:[%s1617_s30 + $0x840] sm:$0xff]  ;;  %v466_v5 = vld [vmem:[%s1617_s30 + $0x848] sm:$0xff] }
  0x57   : > { %v468_v6 = vld [vmem:[%s1617_s30 + $0x860] sm:$0xff]  ;;  %465 = vst [vmem:[%s1625_s6 + $0x420] sm:$0xff] %v464_v4  ;;  %467 = vst [vmem:[%s1625_s6 + $0x428] sm:$0xff] %v466_v5  ;;  %v470_v7 = vld [vmem:[%s1617_s30 + $0x868] sm:$0xff] }
  0x58   : > { %469 = vst [vmem:[%s1625_s6 + $0x430] sm:$0xff] %v468_v6  ;;  %v472_v8 = vld [vmem:[%s1617_s30 + $0x880] sm:$0xff]  ;;  %v474_v9 = vld [vmem:[%s1617_s30 + $0x888] sm:$0xff]  ;;  %471 = vst [vmem:[%s1625_s6 + $0x438] sm:$0xff] %v470_v7 }
  0x59   : > { %473 = vst [vmem:[%s1625_s6 + $0x440] sm:$0xff] %v472_v8  ;;  %475 = vst [vmem:[%s1625_s6 + $0x448] sm:$0xff] %v474_v9  ;;  %v476_v10 = vld [vmem:[%s1617_s30 + $0x8a0] sm:$0xff]  ;;  %v478_v11 = vld [vmem:[%s1617_s30 + $0x8a8] sm:$0xff] }
  0x5a   : > { %v480_v12 = vld [vmem:[%s1617_s30 + $0x8c0] sm:$0xff]  ;;  %477 = vst [vmem:[%s1625_s6 + $0x450] sm:$0xff] %v476_v10  ;;  %479 = vst [vmem:[%s1625_s6 + $0x458] sm:$0xff] %v478_v11  ;;  %v482_v13 = vld [vmem:[%s1617_s30 + $0x8c8] sm:$0xff] }
  0x5b   : > { %481 = vst [vmem:[%s1625_s6 + $0x460] sm:$0xff] %v480_v12  ;;  %v484_v14 = vld [vmem:[%s1617_s30 + $0x8e0] sm:$0xff]  ;;  %v486_v15 = vld [vmem:[%s1617_s30 + $0x8e8] sm:$0xff]  ;;  %483 = vst [vmem:[%s1625_s6 + $0x468] sm:$0xff] %v482_v13 }
  0x5c   : > { %485 = vst [vmem:[%s1625_s6 + $0x470] sm:$0xff] %v484_v14  ;;  %487 = vst [vmem:[%s1625_s6 + $0x478] sm:$0xff] %v486_v15 }
  0x5d PF: > { %p1274_p7 = scmp.ge.s32.totalorder %s1543_s20, 1  ;;  %p492_p8 = scmp.lt.s32.totalorder %s1543_s20, 3 }
  0x5f   : > { %p493_p9 = pnand %p1274_p7, %p492_p8 }
  0x60   : > { %s499_s7 = sand.u32 (!%p493_p9), 1, %s1535_s18   ;;  %v528_v16 = vld [vmem:[%s2281_s1 + $0x8] sm:$0xff] (!%p493_p9)  ;;  %v530_v17 = vld [vmem:[%s2281_s1 + $0x18] sm:$0xff] (!%p493_p9)  ;;  %v1545_v18 = vmov (!%p493_p9), 0   ;;  %vm759_vm0 = vcmask (!%p493_p9), 523264  }
  0x61   : > { %496 = sbr.rel (%p493_p9) target bundleno = 439 (0x1b7), region = 59  ;;  %848 = vmatprep.mubr.f32.mxu1 (!%p493_p9), %v528_v16  ;;  %961 = vmatprep.mubr.f32.mxu0 (!%p493_p9), %v530_v17 }
  0x62   : > { %s1492_s12 = smul.u32 (!%p493_p9), 1152, %s499_s7  ;;  %1519 = vset.pattern.permute.xlu0 (!%p493_p9), %v1545_v18  ;;  %1520 = vset.pattern.permute.xlu1 (!%p493_p9), %v1545_v18 }
  0x64   : > { %s1920_s13 = scalar_lea.vmem (!%p493_p9), [#allocation2], %s1492_s12  ;;  %s1275_s12 = sshll.u32 (!%p493_p9), %s499_s7, 7 }
  0x65   : > { %v568_v19 = vld [vmem:[%s1920_s13 + $0x8] sm:$0xff] (!%p493_p9)  ;;  %v570_v20 = vld [vmem:[%s1920_s13 + $0x18] sm:$0xff] (!%p493_p9)  ;;  %v567_v24 = vld [vmem:[%s1920_s13] sm:$0xff] (!%p493_p9)  ;;  %s2224_s18 = scalar_lea.vmem (!%p493_p9), [#allocation3], %s1275_s12 }
  0x66   : > { %v632_v21 = vld [vmem:[%s1920_s13 + $0x208] sm:$0xff] (!%p493_p9)  ;;  %v1291_v22 = vpack.c.bf16 (!%p493_p9), %v570_v20, %v568_v19  ;;  %v634_v23 = vld [vmem:[%s1920_s13 + $0x218] sm:$0xff] (!%p493_p9)  ;;  %v569_v25 = vld [vmem:[%s1920_s13 + $0x10] sm:$0xff] (!%p493_p9) }
  0x67   : > { %v1355_v26 = vpack.c.bf16 (!%p493_p9), %v634_v23, %v632_v21  ;;  %v1293_v27 = vpack.c.bf16 (!%p493_p9), %v569_v25, %v567_v24  ;;  %v631_v28 = vld [vmem:[%s1920_s13 + $0x200] sm:$0xff] (!%p493_p9)  ;;  %v633_v29 = vld [vmem:[%s1920_s13 + $0x210] sm:$0xff] (!%p493_p9)  ;;  %v572_v30 = vld [vmem:[%s1920_s13 + $0x28] sm:$0xff] (!%p493_p9) }
  0x68   : > { %1292 = vmatprep.subr.bf16.mxu1 %v1291_v22  ;;  %v1357_v31 = vpack.c.bf16 %v633_v29, %v631_v28  ;;  %v574_v32 = vld [vmem:[%s1920_s13 + $0x38] sm:$0xff]  ;;  %v636_v33 = vld [vmem:[%s1920_s13 + $0x228] sm:$0xff]  ;;  %v571_v37 = vld [vmem:[%s1920_s13 + $0x20] sm:$0xff]  ;;  %s1290_s7 = sshll.u32 (%p1607_p5), %s1268_s3, 4 }
  0x69   : > { %v638_v34 = vld [vmem:[%s1920_s13 + $0x238] sm:$0xff]  ;;  %1356 = vmatprep.subr.bf16.mxu0 %v1355_v26  ;;  %1294 = vmatpush1.bf16.msra.mxu1 %v1293_v27  ;;  %v1295_v35 = vpack.c.bf16 %v574_v32, %v572_v30  ;;  %v573_v38 = vld [vmem:[%s1920_s13 + $0x30] sm:$0xff]  ;;  %v635_v39 = vld [vmem:[%s1920_s13 + $0x220] sm:$0xff]  ;;  %s1164_s24 = scalar_lea.vmem (%p1607_p5), %s2285_s5, %s1290_s7 }
  0x6a   : > { %v1359_v36 = vpack.c.bf16 %v638_v34, %v636_v33  ;;  %1358 = vmatpush1.bf16.msra.mxu0 %v1357_v31  ;;  %v1297_v40 = vpack.c.bf16 %v573_v38, %v571_v37  ;;  %v637_v41 = vld [vmem:[%s1920_s13 + $0x230] sm:$0xff]  ;;  %v576_v42 = vld [vmem:[%s1920_s13 + $0x48] sm:$0xff]  ;;  %v578_v43 = vld [vmem:[%s1920_s13 + $0x58] sm:$0xff] }
  0x6b   : > { %1296 = vmatprep.subr.bf16.mxu1 %v1295_v35  ;;  %v1361_v44 = vpack.c.bf16 %v637_v41, %v635_v39  ;;  %v1299_v45 = vpack.c.bf16 %v578_v43, %v576_v42  ;;  %v640_v46 = vld [vmem:[%s1920_s13 + $0x248] sm:$0xff]  ;;  %v642_v47 = vld [vmem:[%s1920_s13 + $0x258] sm:$0xff]  ;;  %v575_v48 = vld [vmem:[%s1920_s13 + $0x40] sm:$0xff] }
  0x6c   : > { %1360 = vmatprep.subr.bf16.mxu0 %v1359_v36  ;;  %v1363_v49 = vpack.c.bf16 %v642_v47, %v640_v46  ;;  %v577_v50 = vld [vmem:[%s1920_s13 + $0x50] sm:$0xff]  ;;  %v639_v51 = vld [vmem:[%s1920_s13 + $0x240] sm:$0xff]  ;;  %v580_v54 = vld [vmem:[%s1920_s13 + $0x68] sm:$0xff] }
  0x6d   : > { %v641_v52 = vld [vmem:[%s1920_s13 + $0x250] sm:$0xff]  ;;  %1298 = vmatpush1.bf16.msra.mxu1 %v1297_v40  ;;  %v1301_v53 = vpack.c.bf16 %v577_v50, %v575_v48  ;;  %v582_v55 = vld [vmem:[%s1920_s13 + $0x78] sm:$0xff]  ;;  %v644_v56 = vld [vmem:[%s1920_s13 + $0x268] sm:$0xff] }
  0x6e   : > { %1362 = vmatpush1.bf16.msra.mxu0 %v1361_v44  ;;  %1300 = vmatprep.subr.bf16.mxu1 %v1299_v45  ;;  %v1365_v57 = vpack.c.bf16 %v641_v52, %v639_v51  ;;  %v1303_v58 = vpack.c.bf16 %v582_v55, %v580_v54  ;;  %v646_v59 = vld [vmem:[%s1920_s13 + $0x278] sm:$0xff]  ;;  %v579_v60 = vld [vmem:[%s1920_s13 + $0x60] sm:$0xff]  ;;  %v581_v61 = vld [vmem:[%s1920_s13 + $0x70] sm:$0xff] }
  0x6f   : > { %1364 = vmatprep.subr.bf16.mxu0 %v1363_v49  ;;  %v1367_v62 = vpack.c.bf16 %v646_v59, %v644_v56  ;;  %v643_v63 = vld [vmem:[%s1920_s13 + $0x260] sm:$0xff]  ;;  %v645_v0 = vld [vmem:[%s1920_s13 + $0x270] sm:$0xff]  ;;  %v584_v1 = vld [vmem:[%s1920_s13 + $0x88] sm:$0xff]  ;;  %v1305_v5 = vpack.c.bf16 %v581_v61, %v579_v60 }
  0x70   : > { %v586_v2 = vld [vmem:[%s1920_s13 + $0x98] sm:$0xff]  ;;  %v648_v3 = vld [vmem:[%s1920_s13 + $0x288] sm:$0xff]  ;;  %v1369_v6 = vpack.c.bf16 %v645_v0, %v643_v63  ;;  %v583_v8 = vld [vmem:[%s1920_s13 + $0x80] sm:$0xff] }
  0x71   : > { %v650_v4 = vld [vmem:[%s1920_s13 + $0x298] sm:$0xff]  ;;  %1302 = vmatpush1.bf16.msra.mxu1 %v1301_v53  ;;  %v1307_v7 = vpack.c.bf16 %v586_v2, %v584_v1  ;;  %v585_v9 = vld [vmem:[%s1920_s13 + $0x90] sm:$0xff]  ;;  %v647_v10 = vld [vmem:[%s1920_s13 + $0x280] sm:$0xff] }
  0x72   : > { %1366 = vmatpush1.bf16.msra.mxu0 %v1365_v57  ;;  %1304 = vmatprep.subr.bf16.mxu1 %v1303_v58  ;;  %v1371_v11 = vpack.c.bf16 %v650_v4, %v648_v3  ;;  %v649_v12 = vld [vmem:[%s1920_s13 + $0x290] sm:$0xff]  ;;  %v588_v13 = vld [vmem:[%s1920_s13 + $0xa8] sm:$0xff]  ;;  %v590_v14 = vld [vmem:[%s1920_s13 + $0xb8] sm:$0xff]  ;;  %v1309_v17 = vpack.c.bf16 %v585_v9, %v583_v8 }
  0x73   : > { %1368 = vmatprep.subr.bf16.mxu0 %v1367_v62  ;;  %v652_v15 = vld [vmem:[%s1920_s13 + $0x2a8] sm:$0xff]  ;;  %v654_v16 = vld [vmem:[%s1920_s13 + $0x2b8] sm:$0xff]  ;;  %v1373_v18 = vpack.c.bf16 %v649_v12, %v647_v10  ;;  %v1311_v19 = vpack.c.bf16 %v590_v14, %v588_v13  ;;  %v587_v20 = vld [vmem:[%s1920_s13 + $0xa0] sm:$0xff] }
  0x74   : > { %v589_v21 = vld [vmem:[%s1920_s13 + $0xb0] sm:$0xff]  ;;  %v651_v22 = vld [vmem:[%s1920_s13 + $0x2a0] sm:$0xff]  ;;  %v1375_v23 = vpack.c.bf16 %v654_v16, %v652_v15  ;;  %v592_v25 = vld [vmem:[%s1920_s13 + $0xc8] sm:$0xff] }
  0x75   : > { %1306 = vmatpush1.bf16.msra.mxu1 %v1305_v5  ;;  %v653_v24 = vld [vmem:[%s1920_s13 + $0x2b0] sm:$0xff]  ;;  %v594_v26 = vld [vmem:[%s1920_s13 + $0xd8] sm:$0xff]  ;;  %v656_v27 = vld [vmem:[%s1920_s13 + $0x2c8] sm:$0xff]  ;;  %v1313_v29 = vpack.c.bf16 %v589_v21, %v587_v20 }
  0x76   : > { %1370 = vmatpush1.bf16.msra.mxu0 %v1369_v6  ;;  %1308 = vmatprep.subr.bf16.mxu1 %v1307_v7  ;;  %v658_v28 = vld [vmem:[%s1920_s13 + $0x2d8] sm:$0xff]  ;;  %v1377_v30 = vpack.c.bf16 %v653_v24, %v651_v22  ;;  %v1315_v31 = vpack.c.bf16 %v594_v26, %v592_v25  ;;  %v591_v32 = vld [vmem:[%s1920_s13 + $0xc0] sm:$0xff]  ;;  %v593_v33 = vld [vmem:[%s1920_s13 + $0xd0] sm:$0xff] }
  0x77   : > { %1372 = vmatprep.subr.bf16.mxu0 %v1371_v11  ;;  %v655_v34 = vld [vmem:[%s1920_s13 + $0x2c0] sm:$0xff]  ;;  %v1379_v35 = vpack.c.bf16 %v658_v28, %v656_v27  ;;  %v657_v36 = vld [vmem:[%s1920_s13 + $0x2d0] sm:$0xff]  ;;  %v596_v37 = vld [vmem:[%s1920_s13 + $0xe8] sm:$0xff]  ;;  %v1317_v41 = vpack.c.bf16 %v593_v33, %v591_v32 }
  0x78   : > { %v598_v38 = vld [vmem:[%s1920_s13 + $0xf8] sm:$0xff]  ;;  %v660_v39 = vld [vmem:[%s1920_s13 + $0x2e8] sm:$0xff]  ;;  %v1381_v42 = vpack.c.bf16 %v657_v36, %v655_v34  ;;  %v595_v44 = vld [vmem:[%s1920_s13 + $0xe0] sm:$0xff] }
  0x79   : > { %1310 = vmatpush1.bf16.msra.mxu1 %v1309_v17  ;;  %v662_v40 = vld [vmem:[%s1920_s13 + $0x2f8] sm:$0xff]  ;;  %v1319_v43 = vpack.c.bf16 %v598_v38, %v596_v37  ;;  %v597_v45 = vld [vmem:[%s1920_s13 + $0xf0] sm:$0xff]  ;;  %v659_v46 = vld [vmem:[%s1920_s13 + $0x2e0] sm:$0xff] }
  0x7a   : > { %1374 = vmatpush1.bf16.msra.mxu0 %v1373_v18  ;;  %1312 = vmatprep.subr.bf16.mxu1 %v1311_v19  ;;  %v1383_v47 = vpack.c.bf16 %v662_v40, %v660_v39  ;;  %v661_v48 = vld [vmem:[%s1920_s13 + $0x2f0] sm:$0xff]  ;;  %v600_v49 = vld [vmem:[%s1920_s13 + $0x108] sm:$0xff]  ;;  %v602_v50 = vld [vmem:[%s1920_s13 + $0x118] sm:$0xff]  ;;  %v1321_v53 = vpack.c.bf16 %v597_v45, %v595_v44 }
  0x7b   : > { %1376 = vmatprep.subr.bf16.mxu0 %v1375_v23  ;;  %v664_v51 = vld [vmem:[%s1920_s13 + $0x308] sm:$0xff]  ;;  %v666_v52 = vld [vmem:[%s1920_s13 + $0x318] sm:$0xff]  ;;  %v1385_v54 = vpack.c.bf16 %v661_v48, %v659_v46  ;;  %v1323_v55 = vpack.c.bf16 %v602_v50, %v600_v49  ;;  %v599_v56 = vld [vmem:[%s1920_s13 + $0x100] sm:$0xff] }
  0x7c   : > { %v601_v57 = vld [vmem:[%s1920_s13 + $0x110] sm:$0xff]  ;;  %v663_v58 = vld [vmem:[%s1920_s13 + $0x300] sm:$0xff]  ;;  %v1387_v59 = vpack.c.bf16 %v666_v52, %v664_v51  ;;  %v604_v61 = vld [vmem:[%s1920_s13 + $0x128] sm:$0xff] }
  0x7d   : > { %1314 = vmatpush1.bf16.msra.mxu1 %v1313_v29  ;;  %v665_v60 = vld [vmem:[%s1920_s13 + $0x310] sm:$0xff]  ;;  %v606_v62 = vld [vmem:[%s1920_s13 + $0x138] sm:$0xff]  ;;  %v668_v63 = vld [vmem:[%s1920_s13 + $0x328] sm:$0xff]  ;;  %v1325_v1 = vpack.c.bf16 %v601_v57, %v599_v56 }
  0x7e   : > { %1378 = vmatpush1.bf16.msra.mxu0 %v1377_v30  ;;  %1316 = vmatprep.subr.bf16.mxu1 %v1315_v31  ;;  %v670_v0 = vld [vmem:[%s1920_s13 + $0x338] sm:$0xff]  ;;  %v1389_v2 = vpack.c.bf16 %v665_v60, %v663_v58  ;;  %v1327_v3 = vpack.c.bf16 %v606_v62, %v604_v61  ;;  %v603_v4 = vld [vmem:[%s1920_s13 + $0x120] sm:$0xff]  ;;  %v605_v5 = vld [vmem:[%s1920_s13 + $0x130] sm:$0xff] }
  0x7f   : > { %1380 = vmatprep.subr.bf16.mxu0 %v1379_v35  ;;  %v667_v6 = vld [vmem:[%s1920_s13 + $0x320] sm:$0xff]  ;;  %v1391_v7 = vpack.c.bf16 %v670_v0, %v668_v63  ;;  %v669_v8 = vld [vmem:[%s1920_s13 + $0x330] sm:$0xff]  ;;  %v608_v9 = vld [vmem:[%s1920_s13 + $0x148] sm:$0xff]  ;;  %v1329_v13 = vpack.c.bf16 %v605_v5, %v603_v4 }
  0x80   : > { %v610_v10 = vld [vmem:[%s1920_s13 + $0x158] sm:$0xff]  ;;  %v672_v11 = vld [vmem:[%s1920_s13 + $0x348] sm:$0xff]  ;;  %v1393_v14 = vpack.c.bf16 %v669_v8, %v667_v6  ;;  %v607_v16 = vld [vmem:[%s1920_s13 + $0x140] sm:$0xff] }
  0x81   : > { %1318 = vmatpush1.bf16.msra.mxu1 %v1317_v41  ;;  %v674_v12 = vld [vmem:[%s1920_s13 + $0x358] sm:$0xff]  ;;  %v1331_v15 = vpack.c.bf16 %v610_v10, %v608_v9  ;;  %v609_v17 = vld [vmem:[%s1920_s13 + $0x150] sm:$0xff]  ;;  %v671_v18 = vld [vmem:[%s1920_s13 + $0x340] sm:$0xff] }
  0x82   : > { %1382 = vmatpush1.bf16.msra.mxu0 %v1381_v42  ;;  %1320 = vmatprep.subr.bf16.mxu1 %v1319_v43  ;;  %v1395_v19 = vpack.c.bf16 %v674_v12, %v672_v11  ;;  %v673_v20 = vld [vmem:[%s1920_s13 + $0x350] sm:$0xff]  ;;  %v612_v21 = vld [vmem:[%s1920_s13 + $0x168] sm:$0xff]  ;;  %v614_v22 = vld [vmem:[%s1920_s13 + $0x178] sm:$0xff]  ;;  %v1333_v25 = vpack.c.bf16 %v609_v17, %v607_v16 }
  0x83   : > { %1384 = vmatprep.subr.bf16.mxu0 %v1383_v47  ;;  %v676_v23 = vld [vmem:[%s1920_s13 + $0x368] sm:$0xff]  ;;  %v678_v24 = vld [vmem:[%s1920_s13 + $0x378] sm:$0xff]  ;;  %v1397_v26 = vpack.c.bf16 %v673_v20, %v671_v18  ;;  %v1335_v27 = vpack.c.bf16 %v614_v22, %v612_v21  ;;  %v611_v28 = vld [vmem:[%s1920_s13 + $0x160] sm:$0xff] }
  0x84   : > { %v613_v29 = vld [vmem:[%s1920_s13 + $0x170] sm:$0xff]  ;;  %v675_v30 = vld [vmem:[%s1920_s13 + $0x360] sm:$0xff]  ;;  %v1399_v31 = vpack.c.bf16 %v678_v24, %v676_v23  ;;  %v616_v33 = vld [vmem:[%s1920_s13 + $0x188] sm:$0xff] }
  0x85   : > { %1322 = vmatpush1.bf16.msra.mxu1 %v1321_v53  ;;  %v677_v32 = vld [vmem:[%s1920_s13 + $0x370] sm:$0xff]  ;;  %v618_v34 = vld [vmem:[%s1920_s13 + $0x198] sm:$0xff]  ;;  %v680_v35 = vld [vmem:[%s1920_s13 + $0x388] sm:$0xff]  ;;  %v1337_v37 = vpack.c.bf16 %v613_v29, %v611_v28 }
  0x86   : > { %1386 = vmatpush1.bf16.msra.mxu0 %v1385_v54  ;;  %1324 = vmatprep.subr.bf16.mxu1 %v1323_v55  ;;  %v682_v36 = vld [vmem:[%s1920_s13 + $0x398] sm:$0xff]  ;;  %v1401_v38 = vpack.c.bf16 %v677_v32, %v675_v30  ;;  %v1339_v39 = vpack.c.bf16 %v618_v34, %v616_v33  ;;  %v615_v40 = vld [vmem:[%s1920_s13 + $0x180] sm:$0xff]  ;;  %v617_v41 = vld [vmem:[%s1920_s13 + $0x190] sm:$0xff] }
  0x87   : > { %1388 = vmatprep.subr.bf16.mxu0 %v1387_v59  ;;  %v679_v42 = vld [vmem:[%s1920_s13 + $0x380] sm:$0xff]  ;;  %v1403_v43 = vpack.c.bf16 %v682_v36, %v680_v35  ;;  %v681_v44 = vld [vmem:[%s1920_s13 + $0x390] sm:$0xff]  ;;  %v620_v45 = vld [vmem:[%s1920_s13 + $0x1a8] sm:$0xff]  ;;  %v1341_v49 = vpack.c.bf16 %v617_v41, %v615_v40 }
  0x88   : > { %v622_v46 = vld [vmem:[%s1920_s13 + $0x1b8] sm:$0xff]  ;;  %v684_v47 = vld [vmem:[%s1920_s13 + $0x3a8] sm:$0xff]  ;;  %v1405_v50 = vpack.c.bf16 %v681_v44, %v679_v42  ;;  %v619_v52 = vld [vmem:[%s1920_s13 + $0x1a0] sm:$0xff] }
  0x89   : > { %1326 = vmatpush1.bf16.msra.mxu1 %v1325_v1  ;;  %v686_v48 = vld [vmem:[%s1920_s13 + $0x3b8] sm:$0xff]  ;;  %v1343_v51 = vpack.c.bf16 %v622_v46, %v620_v45  ;;  %v621_v53 = vld [vmem:[%s1920_s13 + $0x1b0] sm:$0xff]  ;;  %v683_v54 = vld [vmem:[%s1920_s13 + $0x3a0] sm:$0xff] }
  0x8a   : > { %1390 = vmatpush1.bf16.msra.mxu0 %v1389_v2  ;;  %1328 = vmatprep.subr.bf16.mxu1 %v1327_v3  ;;  %v1407_v55 = vpack.c.bf16 %v686_v48, %v684_v47  ;;  %v685_v56 = vld [vmem:[%s1920_s13 + $0x3b0] sm:$0xff]  ;;  %v624_v57 = vld [vmem:[%s1920_s13 + $0x1c8] sm:$0xff]  ;;  %v626_v58 = vld [vmem:[%s1920_s13 + $0x1d8] sm:$0xff]  ;;  %v1345_v61 = vpack.c.bf16 %v621_v53, %v619_v52 }
  0x8b   : > { %1392 = vmatprep.subr.bf16.mxu0 %v1391_v7  ;;  %v688_v59 = vld [vmem:[%s1920_s13 + $0x3c8] sm:$0xff]  ;;  %v690_v60 = vld [vmem:[%s1920_s13 + $0x3d8] sm:$0xff]  ;;  %v1409_v62 = vpack.c.bf16 %v685_v56, %v683_v54  ;;  %v1347_v63 = vpack.c.bf16 %v626_v58, %v624_v57  ;;  %v623_v0 = vld [vmem:[%s1920_s13 + $0x1c0] sm:$0xff] }
  0x8c   : > { %v625_v1 = vld [vmem:[%s1920_s13 + $0x1d0] sm:$0xff]  ;;  %v687_v2 = vld [vmem:[%s1920_s13 + $0x3c0] sm:$0xff]  ;;  %v1411_v3 = vpack.c.bf16 %v690_v60, %v688_v59  ;;  %v628_v5 = vld [vmem:[%s1920_s13 + $0x1e8] sm:$0xff] }
  0x8d   : > { %1330 = vmatpush1.bf16.msra.mxu1 %v1329_v13  ;;  %v689_v4 = vld [vmem:[%s1920_s13 + $0x3d0] sm:$0xff]  ;;  %v630_v6 = vld [vmem:[%s1920_s13 + $0x1f8] sm:$0xff]  ;;  %v692_v7 = vld [vmem:[%s1920_s13 + $0x3e8] sm:$0xff]  ;;  %v1349_v9 = vpack.c.bf16 %v625_v1, %v623_v0 }
  0x8e   : > { %1394 = vmatpush1.bf16.msra.mxu0 %v1393_v14  ;;  %1332 = vmatprep.subr.bf16.mxu1 %v1331_v15  ;;  %v694_v8 = vld [vmem:[%s1920_s13 + $0x3f8] sm:$0xff]  ;;  %v627_v10 = vld [vmem:[%s1920_s13 + $0x1e0] sm:$0xff]  ;;  %v629_v11 = vld [vmem:[%s1920_s13 + $0x1f0] sm:$0xff]  ;;  %v1413_v12 = vpack.c.bf16 %v689_v4, %v687_v2  ;;  %v1351_v13 = vpack.c.bf16 %v630_v6, %v628_v5 }
  0x8f   : > { %1396 = vmatprep.subr.bf16.mxu0 %v1395_v19  ;;  %v691_v14 = vld [vmem:[%s1920_s13 + $0x3e0] sm:$0xff]  ;;  %v717_v16 = vld [vmem:[%s2282_s2 + $0x30] sm:$0xff]  ;;  %v1415_v17 = vpack.c.bf16 %v694_v8, %v692_v7  ;;  %v696_v19 = vld [vmem:[%s1920_s13 + $0x408] sm:$0xff]  ;;  %v1353_v22 = vpack.c.bf16 %v629_v11, %v627_v10 }
  0x90   : > { %v715_v15 = vld [vmem:[%s2282_s2 + $0x20] sm:$0xff]  ;;  %v693_v18 = vld [vmem:[%s1920_s13 + $0x3f0] sm:$0xff]  ;;  %v698_v20 = vld [vmem:[%s1920_s13 + $0x418] sm:$0xff]  ;;  %751 = vperm.xlu1 %1520, %v717_v16  }
  0x91   : > { %1334 = vmatpush1.bf16.msra.mxu1 %v1333_v25  ;;  %741 = vperm.xlu0 %1519, %v715_v15   ;;  %v716_v21 = vld [vmem:[%s2282_s2 + $0x28] sm:$0xff]  ;;  %v718_v23 = vld [vmem:[%s2282_s2 + $0x38] sm:$0xff]  ;;  %v1417_v24 = vpack.c.bf16 %v693_v18, %v691_v14  ;;  %v1419_v25 = vpack.c.bf16 %v698_v20, %v696_v19  ;;  %v711_v30 = vld [vmem:[%s2282_s2] sm:$0xff] }
  0x92   : > { %1398 = vmatpush1.bf16.msra.mxu0 %v1397_v26  ;;  %1336 = vmatprep.subr.bf16.mxu1 %v1335_v27  ;;  %v695_v26 = vld [vmem:[%s1920_s13 + $0x400] sm:$0xff]  ;;  %v697_v27 = vld [vmem:[%s1920_s13 + $0x410] sm:$0xff]  ;;  %v700_v28 = vld [vmem:[%s1920_s13 + $0x428] sm:$0xff] }
  0x93   : > { %1400 = vmatprep.subr.bf16.mxu0 %v1399_v31  ;;  %v702_v29 = vld [vmem:[%s1920_s13 + $0x438] sm:$0xff]  ;;  %v527_v31 = vld [vmem:[%s2281_s1] sm:$0xff]  ;;  %v1421_v32 = vpack.c.bf16 %v697_v27, %v695_v26  ;;  %v712_v33 = vld [vmem:[%s2282_s2 + $0x8] sm:$0xff] }
  0x94   : > { %756 = vperm.xlu1 %1520, %v718_v23   ;;  %v529_v34 = vld [vmem:[%s2281_s1 + $0x10] sm:$0xff]  ;;  %v1423_v36 = vpack.c.bf16 %v702_v29, %v700_v28  ;;  %v704_v40 = vld [vmem:[%s1920_s13 + $0x448] sm:$0xff]  ;;  %v706_v41 = vld [vmem:[%s1920_s13 + $0x458] sm:$0xff] }
  0x95   : > { %1338 = vmatpush1.bf16.msra.mxu1 %v1337_v37  ;;  %746 = vperm.xlu0 %1519, %v716_v21   ;;  %v533_v35 = vld [vmem:[%s2281_s1 + $0x30] sm:$0xff]  ;;  %v699_v37 = vld [vmem:[%s1920_s13 + $0x420] sm:$0xff]  ;;  %v532_v42 = vld [vmem:[%s2281_s1 + $0x28] sm:$0xff]  ;;  %v1427_v47 = vpack.c.bf16 %v706_v41, %v704_v40 }
  0x96   : > { %1402 = vmatpush1.bf16.msra.mxu0 %v1401_v38  ;;  %1340 = vmatprep.subr.bf16.mxu1 %v1339_v39  ;;  %v701_v38 = vld [vmem:[%s1920_s13 + $0x430] sm:$0xff]  ;;  %v535_v39 = vld [vmem:[%s2281_s1 + $0x40] sm:$0xff]  ;;  %v538_v44 = vld [vmem:[%s2281_s1 + $0x58] sm:$0xff] }
  0x97   : > { %1404 = vmatprep.subr.bf16.mxu0 %v1403_v43  ;;  %v534_v43 = vld [vmem:[%s2281_s1 + $0x38] sm:$0xff]  ;;  %v1425_v45 = vpack.c.bf16 %v701_v38, %v699_v37  ;;  %v540_v46 = vld [vmem:[%s2281_s1 + $0x68] sm:$0xff]  ;;  %v703_v48 = vld [vmem:[%s1920_s13 + $0x440] sm:$0xff] }
  0x98   : > { %726 = vperm.xlu1 %1520, %v712_v33   ;;  %v537_v52 = vld [vmem:[%s2281_s1 + $0x50] sm:$0xff]  ;;  %v539_v53 = vld [vmem:[%s2281_s1 + $0x60] sm:$0xff]  ;;  %v542_v60 = vld [vmem:[%s2281_s1 + $0x78] sm:$0xff] }
  0x99   : > { %1342 = vmatpush1.bf16.msra.mxu1 %v1341_v49  ;;  %721 = vperm.xlu0 %1519, %v711_v30   ;;  %v705_v49 = vld [vmem:[%s1920_s13 + $0x450] sm:$0xff]  ;;  %v543_v54 = vld [vmem:[%s2281_s1 + $0x80] sm:$0xff]  ;;  %v550_v0 = vld [vmem:[%s2281_s1 + $0xb8] sm:$0xff] }
  0x9a   : > { %1406 = vmatpush1.bf16.msra.mxu0 %v1405_v50  ;;  %1344 = vmatprep.subr.bf16.mxu1 %v1343_v51  ;;  %v708_v50 = vld [vmem:[%s1920_s13 + $0x468] sm:$0xff]  ;;  %v710_v51 = vld [vmem:[%s1920_s13 + $0x478] sm:$0xff]  ;;  %v545_v56 = vld [vmem:[%s2281_s1 + $0x90] sm:$0xff] }
  0x9b   : > { %1408 = vmatprep.subr.bf16.mxu0 %v1407_v55  ;;  %v1429_v55 = vpack.c.bf16 %v705_v49, %v703_v48  ;;  %v1431_v57 = vpack.c.bf16 %v710_v51, %v708_v50  ;;  %v707_v58 = vld [vmem:[%s1920_s13 + $0x460] sm:$0xff]  ;;  %v709_v59 = vld [vmem:[%s1920_s13 + $0x470] sm:$0xff]  ;;  %v552_v7 = vld [vmem:[%s2281_s1 + $0xc8] sm:$0xff] }
  0x9c   : > { %v713_v1 = vld [vmem:[%s2282_s2 + $0x10] sm:$0xff]  ;;  %v547_v2 = vld [vmem:[%s2281_s1 + $0xa0] sm:$0xff]  ;;  %v554_v8 = vld [vmem:[%s2281_s1 + $0xd8] sm:$0xff] }
  0x9d   : > { %1346 = vmatpush1.bf16.msra.mxu1 %v1345_v61  ;;  %v544_v61 = vld [vmem:[%s2281_s1 + $0x88] sm:$0xff]  ;;  %v549_v4 = vld [vmem:[%s2281_s1 + $0xb0] sm:$0xff]  ;;  %v555_v6 = vld [vmem:[%s2281_s1 + $0xe0] sm:$0xff]  ;;  %731 = vperm.xlu0 %1519, %v713_v1  }
  0x9e   : > { %1410 = vmatpush1.bf16.msra.mxu0 %v1409_v62  ;;  %1348 = vmatprep.subr.bf16.mxu1 %v1347_v63  ;;  %v548_v62 = vld [vmem:[%s2281_s1 + $0xa8] sm:$0xff]  ;;  %v1433_v63 = vpack.c.bf16 %v709_v59, %v707_v58  ;;  %v553_v5 = vld [vmem:[%s2281_s1 + $0xd0] sm:$0xff]  ;;  %v562_v15 = vld [vmem:[%s2281_s1 + $0x118] sm:$0xff] }
  0x9f   : > { %1412 = vmatprep.subr.bf16.mxu0 %v1411_v3  ;;  %v714_v3 = vld [vmem:[%s2282_s2 + $0x18] sm:$0xff]  ;;  %v560_v10 = vld [vmem:[%s2281_s1 + $0x108] sm:$0xff]  ;;  %v557_v11 = vld [vmem:[%s2281_s1 + $0xf0] sm:$0xff] }
  0xa0   : > { %736 = vperm.xlu1 %1520, %v714_v3   ;;  %v565_v14 = vld [vmem:[%s2281_s1 + $0x130] sm:$0xff]  ;;  %v564_v16 = vld [vmem:[%s2281_s1 + $0x128] sm:$0xff]  ;;  %v551_v18 = vld [vmem:[%s2281_s1 + $0xc0] sm:$0xff] }
  0xa1   : > { %1350 = vmatpush1.bf16.msra.mxu1 %v1349_v9  ;;  %v558_v9 = vld [vmem:[%s2281_s1 + $0xf8] sm:$0xff]  ;;  %v531_v19 = vld [vmem:[%s2281_s1 + $0x20] sm:$0xff]  ;;  %v556_v20 = vld [vmem:[%s2281_s1 + $0xe8] sm:$0xff] }
  0xa2   : > { %1414 = vmatpush1.bf16.msra.mxu0 %v1413_v12  ;;  %1352 = vmatprep.subr.bf16.mxu1 %v1351_v13  ;;  %v559_v12 = vld [vmem:[%s2281_s1 + $0x100] sm:$0xff]  ;;  %v536_v21 = vld [vmem:[%s2281_s1 + $0x48] sm:$0xff]  ;;  %v541_v23 = vld [vmem:[%s2281_s1 + $0x70] sm:$0xff] }
  0xa3   : > { %1416 = vmatprep.subr.bf16.mxu0 %v1415_v17  ;;  %v563_v13 = vld [vmem:[%s2281_s1 + $0x120] sm:$0xff]  ;;  %v1546_v17 = vmov 0.0  }
  0xa5   : > { %1354 = vmatpush1.bf16.msra.mxu1 %v1353_v22  ;;  %v561_v22 = vld [vmem:[%s2281_s1 + $0x110] sm:$0xff] }
  0xa6   : > { %1418 = vmatpush1.bf16.msra.mxu0 %v1417_v24  ;;  %1435 = vmatprep.subr.bf16.mxu1 %v1419_v25  ;;  %v566_v24 = vld [vmem:[%s2281_s1 + $0x138] sm:$0xff] }
  0xa7   : > { %1420 = vmatprep.subr.bf16.mxu0 %v1419_v25  ;;  %v546_v25 = vld [vmem:[%s2281_s1 + $0x98] sm:$0xff] }
  0xa8   : > { %849 = vmatmul.mubr.f32.vlgmr.msra.gmra.mrb[0].mxu1 %v527_v31 }
  0xa9   : > { %962 = vmatmul.mubr.f32.vlgmr.msra.gmra.mrb[0].mxu0 %v529_v34  ;;  %1439 = vmatpush1.bf16.msra.mxu1 %v1421_v32 }
  0xaa   : > { %1422 = vmatpush1.bf16.msra.mxu0 %v1421_v32  ;;  %854 = vmatprep.mubr.f32.mxu1 %v533_v35 }
  0xab   : > { %967 = vmatprep.mubr.f32.mxu0 %v535_v39  ;;  %1424 = vmatprep.subr.bf16.mxu0 %v1423_v36 }
  0xac   : > { %855 = vmatmul.mubr.f32.gmra.mrb[2].mxu1 %v532_v42  ;;  %1436 = vmatprep.subr.bf16.mxu1 %v1423_v36 }
  0xad   : > { %968 = vmatmul.mubr.f32.gmra.mrb[2].mxu0 %v534_v43  ;;  %860 = vmatprep.mubr.f32.mxu1 %v538_v44 }
  0xae   : > { %973 = vmatprep.mubr.f32.mxu0 %v540_v46  ;;  %1426 = vmatpush1.bf16.msra.mxu0 %v1425_v45 }
  0xaf   : > { %1440 = vmatpush1.bf16.msra.mxu1 %v1425_v45  ;;  %1428 = vmatprep.subr.bf16.mxu0 %v1427_v47 }
  0xb0   : > { %861 = vmatmul.mubr.f32.gmra.mrb[4].mxu1 %v537_v52  ;;  %1437 = vmatprep.subr.bf16.mxu1 %v1427_v47 }
  0xb1   : > { %974 = vmatmul.mubr.f32.gmra.mrb[4].mxu0 %v539_v53  ;;  %866 = vmatprep.mubr.f32.mxu1 %v543_v54 }
  0xb2   : > { %979 = vmatprep.mubr.f32.mxu0 %v545_v56  ;;  %1430 = vmatpush1.bf16.msra.mxu0 %v1429_v55 }
  0xb3   : > { %1441 = vmatpush1.bf16.msra.mxu1 %v1429_v55  ;;  %1432 = vmatprep.subr.bf16.mxu0 %v1431_v57 }
  0xb4   : > { %867 = vmatmul.mubr.f32.gmra.mrb[6].mxu1 %v542_v60  ;;  %1438 = vmatprep.subr.bf16.mxu1 %v1431_v57 }
  0xb5   : > { %980 = vmatmul.mubr.f32.gmra.mrb[6].mxu0 %v544_v61  ;;  %872 = vmatprep.mubr.f32.mxu1 %v548_v62 }
  0xb6   : > { %985 = vmatprep.mubr.f32.mxu0 %v550_v0  ;;  %1434 = vmatpush1.bf16.msra.mxu0 %v1433_v63 }
  0xb7   : > { %1442 = vmatpush1.bf16.msra.mxu1 %v1433_v63 }
  0xb8   : > { %873 = vmatmul.mubr.f32.gmra.mrb[8].mxu1 %v547_v2 }
  0xb9   : > { %986 = vmatmul.mubr.f32.gmra.mrb[8].mxu0 %v549_v4  ;;  %878 = vmatprep.mubr.f32.mxu1 %v553_v5 }
  0xba   : > { %991 = vmatprep.mubr.f32.mxu0 %v555_v6 }
  0xbc   : > { %879 = vmatmul.mubr.f32.gmra.mrb[10].mxu1 %v552_v7 }
  0xbd   : > { %992 = vmatmul.mubr.f32.gmra.mrb[10].mxu0 %v554_v8  ;;  %884 = vmatprep.mubr.f32.mxu1 %v558_v9 }
  0xbe   : > { %997 = vmatprep.mubr.f32.mxu0 %v560_v10 }
  0xc0   : > { %885 = vmatmul.mubr.f32.gmra.mrb[12].mxu1 %v557_v11 }
  0xc1   : > { %998 = vmatmul.mubr.f32.gmra.mrb[12].mxu0 %v559_v12  ;;  %890 = vmatprep.mubr.f32.mxu1 %v563_v13 }
  0xc2   : > { %1003 = vmatprep.mubr.f32.mxu0 %v565_v14 }
  0xc4   : > { %891 = vmatmul.mubr.f32.gmra.mrb[14].mxu1 %v562_v15 }
  0xc5   : > { %1004 = vmatmul.mubr.f32.gmra.mrb[14].mxu0 %v564_v16  ;;  %1098 = vmatprep.mubr.f32.mxu1 %v1546_v17 }
  0xc6   : > { %1074 = vmatprep.mubr.f32.mxu0 %v1546_v17 }
  0xc8   : > { %1280 = vmatmul.mubr.msk.f32.vlgmr.msra.gmra.mrb[16].mxu1 %vm759_vm0, %v551_v18 }
  0xc9   : > { %1276 = vmatmul.mubr.msk.f32.vlgmr.msra.gmra.mrb[0].mxu0 %vm759_vm0, %v531_v19  ;;  %1104 = vmatprep.mubr.f32.mxu1 %v1546_v17 }
  0xca   : > { %1080 = vmatprep.mubr.f32.mxu0 %v1546_v17 }
  0xcc   : > { %1281 = vmatmul.mubr.msk.f32.gmra.mrb[18].mxu1 %vm759_vm0, %v556_v20 }
  0xcd   : > { %1277 = vmatmul.mubr.msk.f32.gmra.mrb[2].mxu0 %vm759_vm0, %v536_v21  ;;  %1110 = vmatprep.mubr.f32.mxu1 %v1546_v17 }
  0xce   : > { %1086 = vmatprep.mubr.f32.mxu0 %v1546_v17 }
  0xd0   : > { %1282 = vmatmul.mubr.msk.f32.gmra.mrb[20].mxu1 %vm759_vm0, %v561_v22 }
  0xd1   : > { %1278 = vmatmul.mubr.msk.f32.gmra.mrb[4].mxu0 %vm759_vm0, %v541_v23  ;;  %1116 = vmatprep.mubr.f32.mxu1 %v1546_v17 }
  0xd2   : > { %1092 = vmatprep.mubr.f32.mxu0 %v1546_v17 }
  0xd4   : > { %1283 = vmatmul.mubr.msk.f32.gmra.mrb[22].mxu1 %vm759_vm0, %v566_v24 }
  0xd5   : > { %1279 = vmatmul.mubr.msk.f32.gmra.mrb[6].mxu0 %vm759_vm0, %v546_v25 }
 0x10f   : > { %v752_v41 = vpop.permute.xlu1 %751 }
 0x110   : > { %v742_v34 = vpop.permute.xlu0 %741 }
 0x113   : > { %v757_v57 = vpop.permute.xlu1 %756 }
 0x114   : > { %v747_v43 = vpop.permute.xlu0 %746 }
 0x117   : > { %v727_v7 = vpop.permute.xlu1 %726 }
 0x118   : > { %v722_v61 = vpop.permute.xlu0 %721 }
 0x11c   : > { %v732_v20 = vpop.permute.xlu0 %731 }
 0x17b   : > { %v850_v26 = vpop.f32.mrb[0].mxu1 }
 0x17c   : > { %v852_v27 = vpop.f32.mrb[1].mxu1  ;;  %v851_v6 = vadd.f32 %v850_v26, %v722_v61 }
 0x17d   : > { %v853_v10 = vadd.f32 %v852_v27, %v722_v61 }
 0x17f   : > { %v856_v28 = vpop.f32.mrb[2].mxu1 }
 0x180   : > { %v858_v29 = vpop.f32.mrb[3].mxu1  ;;  %v857_v19 = vadd.f32 %v856_v28, %v727_v7 }
 0x181   : > { %v859_v24 = vadd.f32 %v858_v29, %v727_v7 }
 0x183   : > { %v2212_v30 = vpop.f32.mrb[4].mxu1 }
 0x184   : > { %v2214_v31 = vpop.f32.mrb[5].mxu1 }
 0x187   : > { %v2216_v32 = vpop.f32.mrb[6].mxu1 }
 0x188   : > { %v2218_v33 = vpop.f32.mrb[7].mxu1 }
 0x18b   : > { %v874_v35 = vpop.f32.mrb[8].mxu1 }
 0x18c   : > { %v875_v36 = vadd.f32 %v874_v35, %v742_v34  ;;  %v987_v37 = vpop.f32.mrb[8].mxu0  ;;  %v876_v38 = vpop.f32.mrb[9].mxu1 }
 0x18d   : > { %v877_v39 = vadd.f32 %v876_v38, %v742_v34  ;;  %v989_v40 = vpop.f32.mrb[9].mxu0  ;;  %v863_v38 = vadd.f32 %v2212_v30, %v732_v20 }
 0x18e   : > { %v988_v42 = vadd.f32 %v987_v37, %v875_v36 }
 0x18f   : > { %v990_v44 = vadd.f32 %v989_v40, %v877_v39  ;;  %v880_v45 = vpop.f32.mrb[10].mxu1  ;;  %v737_v39 = vpop.permute.xlu1 %736 }
 0x190   : > { %v881_v46 = vadd.f32 %v880_v45, %v747_v43  ;;  %v993_v47 = vpop.f32.mrb[10].mxu0  ;;  %v882_v48 = vpop.f32.mrb[11].mxu1 }
 0x191   : > { %v883_v49 = vadd.f32 %v882_v48, %v747_v43  ;;  %v995_v50 = vpop.f32.mrb[11].mxu0  ;;  %v865_v43 = vadd.f32 %v2214_v31, %v732_v20 }
 0x192   : > { %v994_v51 = vadd.f32 %v993_v47, %v881_v46 }
 0x193   : > { %v996_v52 = vadd.f32 %v995_v50, %v883_v49  ;;  %v886_v53 = vpop.f32.mrb[12].mxu1 }
 0x194   : > { %v887_v54 = vadd.f32 %v886_v53, %v752_v41  ;;  %v999_v55 = vpop.f32.mrb[12].mxu0  ;;  %v888_v56 = vpop.f32.mrb[13].mxu1 }
 0x195   : > { %v889_v58 = vadd.f32 %v888_v56, %v752_v41  ;;  %v1001_v59 = vpop.f32.mrb[13].mxu0 }
 0x196   : > { %v1000_v60 = vadd.f32 %v999_v55, %v887_v54  ;;  %v871_v55 = vadd.f32 %v2218_v33, %v737_v39 }
 0x197   : > { %v1002_v62 = vadd.f32 %v1001_v59, %v889_v58  ;;  %v892_v63 = vpop.f32.mrb[14].mxu1 }
 0x198   : > { %v893_v0 = vadd.f32 %v892_v63, %v757_v57  ;;  %v1005_v1 = vpop.f32.mrb[14].mxu0  ;;  %v894_v2 = vpop.f32.mrb[15].mxu1 }
 0x199   : > { %v895_v3 = vadd.f32 %v894_v2, %v757_v57  ;;  %v1007_v4 = vpop.f32.mrb[15].mxu0 }
 0x19a   : > { %v1006_v5 = vadd.f32 %v1005_v1, %v893_v0 }
 0x19b   : > { %v2222_v8 = vadd.f32 %v1007_v4, %v895_v3  ;;  %v1100_v9 = vpop.f32.mrb[16].mxu1 }
 0x19c   : > { %v1076_v11 = vpop.f32.mrb[0].mxu0  ;;  %v1101_v12 = vadd.f32 %v1100_v9, %v988_v42  ;;  %v1102_v13 = vpop.f32.mrb[17].mxu1 }
 0x19d   : > { %v1444_v14 = vadd.f32 %v1076_v11, %v851_v6  ;;  %v1078_v15 = vpop.f32.mrb[1].mxu0  ;;  %v1103_v16 = vadd.f32 %v1102_v13, %v990_v44 }
 0x19e   : > { %v1131_v17 = vmax.f32 %v1101_v12, 0.0  ;;  %v1446_v18 = vadd.f32 %v1078_v15, %v853_v10 }
 0x19f   : > { %v1123_v21 = vmax.f32 %v1444_v14, 0.0  ;;  %v1132_v22 = vmax.f32 %v1103_v16, 0.0  ;;  %v1106_v23 = vpop.f32.mrb[18].mxu1 }
 0x1a0   : > { %1147 = vst [vmem:[%s2224_s18 + $0x40] sm:$0xff] %v1131_v17  ;;  %v1124_v25 = vmax.f32 %v1446_v18, 0.0  ;;  %v1082_v26 = vpop.f32.mrb[2].mxu0  ;;  %v1107_v27 = vadd.f32 %v1106_v23, %v994_v51  ;;  %v1108_v34 = vpop.f32.mrb[19].mxu1 }
 0x1a1   : > { %1139 = vst [vmem:[%s2224_s18] sm:$0xff] %v1123_v21  ;;  %1148 = vst [vmem:[%s2224_s18 + $0x48] sm:$0xff] %v1132_v22  ;;  %v1448_v28 = vadd.f32 %v1082_v26, %v857_v19  ;;  %v1084_v35 = vpop.f32.mrb[3].mxu0  ;;  %v1109_v36 = vadd.f32 %v1108_v34, %v996_v52  ;;  %v869_v52 = vadd.f32 %v2216_v32, %v737_v39 }
 0x1a2   : > { %1140 = vst [vmem:[%s2224_s18 + $0x8] sm:$0xff] %v1124_v25  ;;  %v1133_v29 = vmax.f32 %v1107_v27, 0.0  ;;  %v1450_v37 = vadd.f32 %v1084_v35, %v859_v24 }
 0x1a3   : > { %v1125_v40 = vmax.f32 %v1448_v28, 0.0  ;;  %v1134_v41 = vmax.f32 %v1109_v36, 0.0  ;;  %v1112_v42 = vpop.f32.mrb[20].mxu1 }
 0x1a4   : > { %1149 = vst [vmem:[%s2224_s18 + $0x50] sm:$0xff] %v1133_v29  ;;  %v1126_v44 = vmax.f32 %v1450_v37, 0.0  ;;  %v1088_v45 = vpop.f32.mrb[4].mxu0  ;;  %v1113_v46 = vadd.f32 %v1112_v42, %v1000_v60  ;;  %v1114_v47 = vpop.f32.mrb[21].mxu1 }
 0x1a5   : > { %1141 = vst [vmem:[%s2224_s18 + $0x10] sm:$0xff] %v1125_v40  ;;  %1150 = vst [vmem:[%s2224_s18 + $0x58] sm:$0xff] %v1134_v41  ;;  %v1452_v48 = vadd.f32 %v1088_v45, %v863_v38  ;;  %v1090_v49 = vpop.f32.mrb[5].mxu0  ;;  %v1115_v30 = vadd.f32 %v1114_v47, %v1002_v62 }
 0x1a6   : > { %1142 = vst [vmem:[%s2224_s18 + $0x18] sm:$0xff] %v1126_v44  ;;  %v1135_v50 = vmax.f32 %v1113_v46, 0.0  ;;  %v1454_v51 = vadd.f32 %v1090_v49, %v865_v43 }
 0x1a7   : > { %v1127_v31 = vmax.f32 %v1452_v48, 0.0  ;;  %v1136_v53 = vmax.f32 %v1115_v30, 0.0  ;;  %v1118_v54 = vpop.f32.mrb[22].mxu1  ;;  %v1193_v10 = vld [vmem:[%s2224_s18 + $0x40] sm:$0xff] (%p1607_p5) }
 0x1a8   : > { %1151 = vst [vmem:[%s2224_s18 + $0x60] sm:$0xff] %v1135_v50  ;;  %v1128_v56 = vmax.f32 %v1454_v51, 0.0  ;;  %v1094_v57 = vpop.f32.mrb[6].mxu0  ;;  %v1119_v58 = vadd.f32 %v1118_v54, %v1006_v5  ;;  %v1120_v59 = vpop.f32.mrb[23].mxu1  ;;  %1161 = sbr.rel (!%p1607_p5) target bundleno = 439 (0x1b7), region = 67  ;;  %v1177_v2 = vld [vmem:[%s2224_s18] sm:$0xff] (%p1607_p5) }
 0x1a9   : > { %1143 = vst [vmem:[%s2224_s18 + $0x20] sm:$0xff] %v1127_v31  ;;  %1152 = vst [vmem:[%s2224_s18 + $0x68] sm:$0xff] %v1136_v53  ;;  %v1456_v60 = vadd.f32 %v1094_v57, %v869_v52  ;;  %v1096_v61 = vpop.f32.mrb[7].mxu0  ;;  %v1121_v32 = vadd.f32 %v1120_v59, %v2222_v8  ;;  %v1179_v3 = vld [vmem:[%s2224_s18 + $0x8] sm:$0xff] (%p1607_p5) }
 0x1aa   : > { %1144 = vst [vmem:[%s2224_s18 + $0x28] sm:$0xff] %v1128_v56  ;;  %v1137_v62 = vmax.f32 %v1119_v58, 0.0  ;;  %v1458_v63 = vadd.f32 %v1096_v61, %v871_v55  ;;  %1178 = vst [vmem:[%s1164_s24] sm:$0xff] (%p1607_p5), %v1177_v2  ;;  %v1195_v11 = vld [vmem:[%s2224_s18 + $0x48] sm:$0xff] (%p1607_p5) }
 0x1ab   : > { %v1129_v0 = vmax.f32 %v1456_v60, 0.0  ;;  %v1138_v33 = vmax.f32 %v1121_v32, 0.0  ;;  %1180 = vst [vmem:[%s1164_s24 + $0x8] sm:$0xff] (%p1607_p5), %v1179_v3  ;;  %1194 = vst [vmem:[%s1164_s24 + $0x80] sm:$0xff] (%p1607_p5), %v1193_v10  ;;  %v1197_v12 = vld [vmem:[%s2224_s18 + $0x50] sm:$0xff] (%p1607_p5) }
 0x1ac   : > { %1153 = vst [vmem:[%s2224_s18 + $0x70] sm:$0xff] %v1137_v62  ;;  %v1130_v1 = vmax.f32 %v1458_v63, 0.0  ;;  %v1181_v4 = vld [vmem:[%s2224_s18 + $0x10] sm:$0xff] (%p1607_p5)  ;;  %v1199_v13 = vld [vmem:[%s2224_s18 + $0x58] sm:$0xff] (%p1607_p5)  ;;  %1196 = vst [vmem:[%s1164_s24 + $0x88] sm:$0xff] (%p1607_p5), %v1195_v11 }
 0x1ad   : > { %1145 = vst [vmem:[%s2224_s18 + $0x30] sm:$0xff] %v1129_v0  ;;  %1154 = vst [vmem:[%s2224_s18 + $0x78] sm:$0xff] %v1138_v33  ;;  %v1183_v5 = vld [vmem:[%s2224_s18 + $0x18] sm:$0xff] (%p1607_p5) }
 0x1ae   : > { %1146 = vst [vmem:[%s2224_s18 + $0x38] sm:$0xff] %v1130_v1  ;;  %1182 = vst [vmem:[%s1164_s24 + $0x20] sm:$0xff] (%p1607_p5), %v1181_v4 }
 0x1af   : > { %1184 = vst [vmem:[%s1164_s24 + $0x28] sm:$0xff] %v1183_v5  ;;  %1198 = vst [vmem:[%s1164_s24 + $0xa0] sm:$0xff] %v1197_v12  ;;  %v1201_v14 = vld [vmem:[%s2224_s18 + $0x60] sm:$0xff] }
 0x1b0   : > { %v1185_v6 = vld [vmem:[%s2224_s18 + $0x20] sm:$0xff]  ;;  %1200 = vst [vmem:[%s1164_s24 + $0xa8] sm:$0xff] %v1199_v13  ;;  %v1203_v15 = vld [vmem:[%s2224_s18 + $0x68] sm:$0xff]  ;;  %1202 = vst [vmem:[%s1164_s24 + $0xc0] sm:$0xff] %v1201_v14 }
 0x1b1   : > { %v1187_v7 = vld [vmem:[%s2224_s18 + $0x28] sm:$0xff]  ;;  %1186 = vst [vmem:[%s1164_s24 + $0x40] sm:$0xff] %v1185_v6  ;;  %1204 = vst [vmem:[%s1164_s24 + $0xc8] sm:$0xff] %v1203_v15 }
 0x1b2   : > { %1188 = vst [vmem:[%s1164_s24 + $0x48] sm:$0xff] %v1187_v7 }
 0x1b3   : > { %v1205_v16 = vld [vmem:[%s2224_s18 + $0x70] sm:$0xff] }
 0x1b4   : > { %v1189_v8 = vld [vmem:[%s2224_s18 + $0x30] sm:$0xff]  ;;  %1206 = vst [vmem:[%s1164_s24 + $0xe0] sm:$0xff] %v1205_v16  ;;  %v1207_v17 = vld [vmem:[%s2224_s18 + $0x78] sm:$0xff] }
 0x1b5   : > { %v1191_v9 = vld [vmem:[%s2224_s18 + $0x38] sm:$0xff]  ;;  %1190 = vst [vmem:[%s1164_s24 + $0x60] sm:$0xff] %v1189_v8  ;;  %1208 = vst [vmem:[%s1164_s24 + $0xe8] sm:$0xff] %v1207_v17 }
 0x1b6   : > { %1192 = vst [vmem:[%s1164_s24 + $0x68] sm:$0xff] %v1191_v9 }
 0x1b7 PF: > { %p12_p10 = scmp.ge.s32.totalorder %s1594_s4, 4   ;;  %s2287_s18 = smov %s1539_s19 }
 0x1b8   : > { %s2288_s19 = smov %s1605_s23  ;;  %s2289_s20 = smov %s1594_s4 }
 0x1b9   :  { %14 = sbr.rel (!%p12_p10) target bundleno = 2 (0x2), region = 121 }

// kernel: run.10
= control target key start
LH: loop header
LB: loop body
LE: loop exit
PB: predicated region body
PF: predicated region fallthrough
CT: control target
= control target key end

     0   :  { %s1961_s30 = smov 0   ;;  %s1963_s10 = smov 0   ;;  %s2514_s0 = inlined_call_operand.vmem [shape: f32[8,512], index: 0, kind: input, shape index: {}]   ;;  %s2515_s1 = inlined_call_operand.vmem [shape: f32[576,512], index: 1, kind: input, shape index: {}]   ;;  %s2516_s2 = inlined_call_operand.vmem [shape: f32[8,576], index: 2, kind: input, shape index: {}]   ;;  %s2517_s3 = inlined_call_operand.vmem [shape: f32[8,576], index: 3, kind: input, shape index: {}]   ;;  %s2518_s4 = inlined_call_operand.vmem [shape: f32[8,1], index: 4, kind: input, shape index: {}]   ;;  %s2519_s5 = inlined_call_operand.vmem [shape: f32[8,1], index: 5, kind: input, shape index: {}]   ;;  %s2520_s6 = inlined_call_operand.vmem [shape: f32[8,1], index: 6, kind: input, shape index: {}]   ;;  %s2521_s7 = inlined_call_operand.vmem [shape: f32[8,1], index: 7, kind: input, shape index: {}]   ;;  %s2522_s8 = inlined_call_operand.vmem [shape: f32[8,512], index: 8, kind: output, shape index: {0}]   ;;  %s2523_s9 = inlined_call_operand.vmem [shape: f32[2,8,128], index: 9, kind: output, shape index: {1}]  }
   0x1   :  { %s1965_s11 = smov 0   ;;  %s1967_s12 = smov 0  }
   0x2   :  { %s1969_s13 = smov 0  }
   0x3 LB: > { %s32_s14 = sadd.s32 1, %s1903_s12  ;;  %p76_p1 = scmp.ne.s32.totalorder %s1895_s10, %s1891_s30  ;;  %s1907_s13 = sphi %s1969_s13, %s20_s13   ;;  %s1903_s12 = sphi %s1967_s12, %s2527_s12   ;;  %s1899_s11 = sphi %s1965_s11, %s2526_s11   ;;  %s1895_s10 = sphi %s1963_s10, %s2525_s10   ;;  %s1891_s30 = sphi %s1961_s30, %s2524_s30  }
   0x4   : > { %p34_p0 = scmp.ge.s32.totalorder %s32_s14, 2  ;;  %p77_p2 = scmp.eq.s32.totalorder %s1907_s13, 0 }
   0x5   : > { %s69_s16 = sadd.s32 1, %s1895_s10  ;;  %p1491_p5 = scmp.ge.s32.totalorder %s1907_s13, 2 }
   0x6   : > { %s2529_s14 = smov (%p34_p0, %s32_s14), 0  ;;  %p78_p3 = por %p77_p2, %p76_p1 }
   0x7   : > { %s66_s15 = ssub.s32 %s1903_s12, %s2529_s14  ;;  %300 = sbr.rel (%p1491_p5) target bundleno = 90 (0x5a), region = 40 }
   0x8   : > { %p67_p4 = scmp.eq.s32.totalorder %s66_s15, 0 }
   0xa   : > { %s1996_s17 = scalar_select %p67_p4, %s1895_s10, %s69_s16  }
   0xe   : > { %314 = sbr.rel (!%p78_p3) target bundleno = 90 (0x5a), region = 48  ;;  %s316_s18 = sand.u32 (%p78_p3), 1, %s1895_s10  }
   0xf   : > { %s1504_s19 = sshll.u32 (%p78_p3), %s1903_s12, 4  ;;  %s1805_s20 = smul.u32 (%p78_p3), 1152, %s316_s18 }
  0x10   : > { %s2004_s23 = scalar_lea.vmem (%p78_p3), %s2515_s1, %s1504_s19 }
  0x11   : > { %v335_v0 = vld [vmem:[%s2004_s23] sm:$0xff] (%p78_p3)  ;;  %v337_v1 = vld [vmem:[%s2004_s23 + $0x8] sm:$0xff] (%p78_p3)  ;;  %s2012_s24 = scalar_lea.vmem (%p78_p3), [#allocation2], %s1805_s20 }
  0x12   : > { %v339_v2 = vld [vmem:[%s2004_s23 + $0x20] sm:$0xff] (%p78_p3)  ;;  %v341_v3 = vld [vmem:[%s2004_s23 + $0x28] sm:$0xff] (%p78_p3)  ;;  %336 = vst [vmem:[%s2012_s24] sm:$0xff] (%p78_p3), %v335_v0  ;;  %338 = vst [vmem:[%s2012_s24 + $0x8] sm:$0xff] (%p78_p3), %v337_v1 }
  0x13   : > { %v343_v4 = vld [vmem:[%s2004_s23 + $0x40] sm:$0xff] (%p78_p3)  ;;  %v345_v5 = vld [vmem:[%s2004_s23 + $0x48] sm:$0xff] (%p78_p3)  ;;  %340 = vst [vmem:[%s2012_s24 + $0x10] sm:$0xff] (%p78_p3), %v339_v2  ;;  %342 = vst [vmem:[%s2012_s24 + $0x18] sm:$0xff] (%p78_p3), %v341_v3 }
  0x14   : > { %344 = vst [vmem:[%s2012_s24 + $0x20] sm:$0xff] (%p78_p3), %v343_v4  ;;  %346 = vst [vmem:[%s2012_s24 + $0x28] sm:$0xff] (%p78_p3), %v345_v5  ;;  %v347_v6 = vld [vmem:[%s2004_s23 + $0x60] sm:$0xff] (%p78_p3)  ;;  %v349_v7 = vld [vmem:[%s2004_s23 + $0x68] sm:$0xff] (%p78_p3) }
  0x15   : > { %v351_v8 = vld [vmem:[%s2004_s23 + $0x80] sm:$0xff]  ;;  %348 = vst [vmem:[%s2012_s24 + $0x30] sm:$0xff] %v347_v6  ;;  %350 = vst [vmem:[%s2012_s24 + $0x38] sm:$0xff] %v349_v7  ;;  %v353_v9 = vld [vmem:[%s2004_s23 + $0x88] sm:$0xff] }
  0x16   : > { %352 = vst [vmem:[%s2012_s24 + $0x40] sm:$0xff] %v351_v8  ;;  %v355_v10 = vld [vmem:[%s2004_s23 + $0xa0] sm:$0xff]  ;;  %v357_v11 = vld [vmem:[%s2004_s23 + $0xa8] sm:$0xff]  ;;  %354 = vst [vmem:[%s2012_s24 + $0x48] sm:$0xff] %v353_v9 }
  0x17   : > { %356 = vst [vmem:[%s2012_s24 + $0x50] sm:$0xff] %v355_v10  ;;  %358 = vst [vmem:[%s2012_s24 + $0x58] sm:$0xff] %v357_v11  ;;  %v359_v12 = vld [vmem:[%s2004_s23 + $0xc0] sm:$0xff]  ;;  %v361_v13 = vld [vmem:[%s2004_s23 + $0xc8] sm:$0xff] }
  0x18   : > { %v363_v14 = vld [vmem:[%s2004_s23 + $0xe0] sm:$0xff]  ;;  %360 = vst [vmem:[%s2012_s24 + $0x60] sm:$0xff] %v359_v12  ;;  %362 = vst [vmem:[%s2012_s24 + $0x68] sm:$0xff] %v361_v13  ;;  %v365_v15 = vld [vmem:[%s2004_s23 + $0xe8] sm:$0xff] }
  0x19   : > { %364 = vst [vmem:[%s2012_s24 + $0x70] sm:$0xff] %v363_v14  ;;  %v367_v16 = vld [vmem:[%s2004_s23 + $0x100] sm:$0xff]  ;;  %v369_v17 = vld [vmem:[%s2004_s23 + $0x108] sm:$0xff]  ;;  %366 = vst [vmem:[%s2012_s24 + $0x78] sm:$0xff] %v365_v15 }
  0x1a   : > { %368 = vst [vmem:[%s2012_s24 + $0x80] sm:$0xff] %v367_v16  ;;  %370 = vst [vmem:[%s2012_s24 + $0x88] sm:$0xff] %v369_v17  ;;  %v371_v18 = vld [vmem:[%s2004_s23 + $0x120] sm:$0xff]  ;;  %v373_v19 = vld [vmem:[%s2004_s23 + $0x128] sm:$0xff] }
  0x1b   : > { %v375_v20 = vld [vmem:[%s2004_s23 + $0x140] sm:$0xff]  ;;  %372 = vst [vmem:[%s2012_s24 + $0x90] sm:$0xff] %v371_v18  ;;  %374 = vst [vmem:[%s2012_s24 + $0x98] sm:$0xff] %v373_v19  ;;  %v377_v21 = vld [vmem:[%s2004_s23 + $0x148] sm:$0xff] }
  0x1c   : > { %376 = vst [vmem:[%s2012_s24 + $0xa0] sm:$0xff] %v375_v20  ;;  %v379_v22 = vld [vmem:[%s2004_s23 + $0x160] sm:$0xff]  ;;  %v381_v23 = vld [vmem:[%s2004_s23 + $0x168] sm:$0xff]  ;;  %378 = vst [vmem:[%s2012_s24 + $0xa8] sm:$0xff] %v377_v21 }
  0x1d   : > { %380 = vst [vmem:[%s2012_s24 + $0xb0] sm:$0xff] %v379_v22  ;;  %382 = vst [vmem:[%s2012_s24 + $0xb8] sm:$0xff] %v381_v23  ;;  %v383_v24 = vld [vmem:[%s2004_s23 + $0x180] sm:$0xff]  ;;  %v385_v25 = vld [vmem:[%s2004_s23 + $0x188] sm:$0xff] }
  0x1e   : > { %v387_v26 = vld [vmem:[%s2004_s23 + $0x1a0] sm:$0xff]  ;;  %384 = vst [vmem:[%s2012_s24 + $0xc0] sm:$0xff] %v383_v24  ;;  %386 = vst [vmem:[%s2012_s24 + $0xc8] sm:$0xff] %v385_v25  ;;  %v389_v27 = vld [vmem:[%s2004_s23 + $0x1a8] sm:$0xff] }
  0x1f   : > { %388 = vst [vmem:[%s2012_s24 + $0xd0] sm:$0xff] %v387_v26  ;;  %v391_v28 = vld [vmem:[%s2004_s23 + $0x1c0] sm:$0xff]  ;;  %v393_v29 = vld [vmem:[%s2004_s23 + $0x1c8] sm:$0xff]  ;;  %390 = vst [vmem:[%s2012_s24 + $0xd8] sm:$0xff] %v389_v27 }
  0x20   : > { %392 = vst [vmem:[%s2012_s24 + $0xe0] sm:$0xff] %v391_v28  ;;  %394 = vst [vmem:[%s2012_s24 + $0xe8] sm:$0xff] %v393_v29  ;;  %v395_v30 = vld [vmem:[%s2004_s23 + $0x1e0] sm:$0xff]  ;;  %v397_v31 = vld [vmem:[%s2004_s23 + $0x1e8] sm:$0xff] }
  0x21   : > { %v399_v32 = vld [vmem:[%s2004_s23 + $0x200] sm:$0xff]  ;;  %396 = vst [vmem:[%s2012_s24 + $0xf0] sm:$0xff] %v395_v30  ;;  %398 = vst [vmem:[%s2012_s24 + $0xf8] sm:$0xff] %v397_v31  ;;  %v401_v33 = vld [vmem:[%s2004_s23 + $0x208] sm:$0xff] }
  0x22   : > { %400 = vst [vmem:[%s2012_s24 + $0x100] sm:$0xff] %v399_v32  ;;  %v403_v34 = vld [vmem:[%s2004_s23 + $0x220] sm:$0xff]  ;;  %v405_v35 = vld [vmem:[%s2004_s23 + $0x228] sm:$0xff]  ;;  %402 = vst [vmem:[%s2012_s24 + $0x108] sm:$0xff] %v401_v33 }
  0x23   : > { %404 = vst [vmem:[%s2012_s24 + $0x110] sm:$0xff] %v403_v34  ;;  %406 = vst [vmem:[%s2012_s24 + $0x118] sm:$0xff] %v405_v35  ;;  %v407_v36 = vld [vmem:[%s2004_s23 + $0x240] sm:$0xff]  ;;  %v409_v37 = vld [vmem:[%s2004_s23 + $0x248] sm:$0xff] }
  0x24   : > { %v411_v38 = vld [vmem:[%s2004_s23 + $0x260] sm:$0xff]  ;;  %408 = vst [vmem:[%s2012_s24 + $0x120] sm:$0xff] %v407_v36  ;;  %410 = vst [vmem:[%s2012_s24 + $0x128] sm:$0xff] %v409_v37  ;;  %v413_v39 = vld [vmem:[%s2004_s23 + $0x268] sm:$0xff] }
  0x25   : > { %412 = vst [vmem:[%s2012_s24 + $0x130] sm:$0xff] %v411_v38  ;;  %v415_v40 = vld [vmem:[%s2004_s23 + $0x280] sm:$0xff]  ;;  %v417_v41 = vld [vmem:[%s2004_s23 + $0x288] sm:$0xff]  ;;  %414 = vst [vmem:[%s2012_s24 + $0x138] sm:$0xff] %v413_v39 }
  0x26   : > { %416 = vst [vmem:[%s2012_s24 + $0x140] sm:$0xff] %v415_v40  ;;  %418 = vst [vmem:[%s2012_s24 + $0x148] sm:$0xff] %v417_v41  ;;  %v419_v42 = vld [vmem:[%s2004_s23 + $0x2a0] sm:$0xff]  ;;  %v421_v43 = vld [vmem:[%s2004_s23 + $0x2a8] sm:$0xff] }
  0x27   : > { %v423_v44 = vld [vmem:[%s2004_s23 + $0x2c0] sm:$0xff]  ;;  %420 = vst [vmem:[%s2012_s24 + $0x150] sm:$0xff] %v419_v42  ;;  %422 = vst [vmem:[%s2012_s24 + $0x158] sm:$0xff] %v421_v43  ;;  %v425_v45 = vld [vmem:[%s2004_s23 + $0x2c8] sm:$0xff] }
  0x28   : > { %424 = vst [vmem:[%s2012_s24 + $0x160] sm:$0xff] %v423_v44  ;;  %v427_v46 = vld [vmem:[%s2004_s23 + $0x2e0] sm:$0xff]  ;;  %v429_v47 = vld [vmem:[%s2004_s23 + $0x2e8] sm:$0xff]  ;;  %426 = vst [vmem:[%s2012_s24 + $0x168] sm:$0xff] %v425_v45 }
  0x29   : > { %428 = vst [vmem:[%s2012_s24 + $0x170] sm:$0xff] %v427_v46  ;;  %430 = vst [vmem:[%s2012_s24 + $0x178] sm:$0xff] %v429_v47  ;;  %v431_v48 = vld [vmem:[%s2004_s23 + $0x300] sm:$0xff]  ;;  %v433_v49 = vld [vmem:[%s2004_s23 + $0x308] sm:$0xff] }
  0x2a   : > { %v435_v50 = vld [vmem:[%s2004_s23 + $0x320] sm:$0xff]  ;;  %432 = vst [vmem:[%s2012_s24 + $0x180] sm:$0xff] %v431_v48  ;;  %434 = vst [vmem:[%s2012_s24 + $0x188] sm:$0xff] %v433_v49  ;;  %v437_v51 = vld [vmem:[%s2004_s23 + $0x328] sm:$0xff] }
  0x2b   : > { %436 = vst [vmem:[%s2012_s24 + $0x190] sm:$0xff] %v435_v50  ;;  %v439_v52 = vld [vmem:[%s2004_s23 + $0x340] sm:$0xff]  ;;  %v441_v53 = vld [vmem:[%s2004_s23 + $0x348] sm:$0xff]  ;;  %438 = vst [vmem:[%s2012_s24 + $0x198] sm:$0xff] %v437_v51 }
  0x2c   : > { %440 = vst [vmem:[%s2012_s24 + $0x1a0] sm:$0xff] %v439_v52  ;;  %442 = vst [vmem:[%s2012_s24 + $0x1a8] sm:$0xff] %v441_v53  ;;  %v443_v54 = vld [vmem:[%s2004_s23 + $0x360] sm:$0xff]  ;;  %v445_v55 = vld [vmem:[%s2004_s23 + $0x368] sm:$0xff] }
  0x2d   : > { %v447_v56 = vld [vmem:[%s2004_s23 + $0x380] sm:$0xff]  ;;  %444 = vst [vmem:[%s2012_s24 + $0x1b0] sm:$0xff] %v443_v54  ;;  %446 = vst [vmem:[%s2012_s24 + $0x1b8] sm:$0xff] %v445_v55  ;;  %v449_v57 = vld [vmem:[%s2004_s23 + $0x388] sm:$0xff] }
  0x2e   : > { %448 = vst [vmem:[%s2012_s24 + $0x1c0] sm:$0xff] %v447_v56  ;;  %v451_v58 = vld [vmem:[%s2004_s23 + $0x3a0] sm:$0xff]  ;;  %v453_v59 = vld [vmem:[%s2004_s23 + $0x3a8] sm:$0xff]  ;;  %450 = vst [vmem:[%s2012_s24 + $0x1c8] sm:$0xff] %v449_v57 }
  0x2f   : > { %452 = vst [vmem:[%s2012_s24 + $0x1d0] sm:$0xff] %v451_v58  ;;  %454 = vst [vmem:[%s2012_s24 + $0x1d8] sm:$0xff] %v453_v59  ;;  %v455_v60 = vld [vmem:[%s2004_s23 + $0x3c0] sm:$0xff]  ;;  %v457_v61 = vld [vmem:[%s2004_s23 + $0x3c8] sm:$0xff] }
  0x30   : > { %v459_v62 = vld [vmem:[%s2004_s23 + $0x3e0] sm:$0xff]  ;;  %456 = vst [vmem:[%s2012_s24 + $0x1e0] sm:$0xff] %v455_v60  ;;  %458 = vst [vmem:[%s2012_s24 + $0x1e8] sm:$0xff] %v457_v61  ;;  %v461_v63 = vld [vmem:[%s2004_s23 + $0x3e8] sm:$0xff] }
  0x31   : > { %460 = vst [vmem:[%s2012_s24 + $0x1f0] sm:$0xff] %v459_v62  ;;  %v463_v0 = vld [vmem:[%s2004_s23 + $0x400] sm:$0xff]  ;;  %v465_v1 = vld [vmem:[%s2004_s23 + $0x408] sm:$0xff]  ;;  %462 = vst [vmem:[%s2012_s24 + $0x1f8] sm:$0xff] %v461_v63 }
  0x32   : > { %464 = vst [vmem:[%s2012_s24 + $0x200] sm:$0xff] %v463_v0  ;;  %466 = vst [vmem:[%s2012_s24 + $0x208] sm:$0xff] %v465_v1  ;;  %v467_v2 = vld [vmem:[%s2004_s23 + $0x420] sm:$0xff]  ;;  %v469_v3 = vld [vmem:[%s2004_s23 + $0x428] sm:$0xff] }
  0x33   : > { %v471_v4 = vld [vmem:[%s2004_s23 + $0x440] sm:$0xff]  ;;  %468 = vst [vmem:[%s2012_s24 + $0x210] sm:$0xff] %v467_v2  ;;  %470 = vst [vmem:[%s2012_s24 + $0x218] sm:$0xff] %v469_v3  ;;  %v473_v5 = vld [vmem:[%s2004_s23 + $0x448] sm:$0xff] }
  0x34   : > { %472 = vst [vmem:[%s2012_s24 + $0x220] sm:$0xff] %v471_v4  ;;  %v475_v6 = vld [vmem:[%s2004_s23 + $0x460] sm:$0xff]  ;;  %v477_v7 = vld [vmem:[%s2004_s23 + $0x468] sm:$0xff]  ;;  %474 = vst [vmem:[%s2012_s24 + $0x228] sm:$0xff] %v473_v5 }
  0x35   : > { %476 = vst [vmem:[%s2012_s24 + $0x230] sm:$0xff] %v475_v6  ;;  %478 = vst [vmem:[%s2012_s24 + $0x238] sm:$0xff] %v477_v7  ;;  %v479_v8 = vld [vmem:[%s2004_s23 + $0x480] sm:$0xff]  ;;  %v481_v9 = vld [vmem:[%s2004_s23 + $0x488] sm:$0xff] }
  0x36   : > { %v483_v10 = vld [vmem:[%s2004_s23 + $0x4a0] sm:$0xff]  ;;  %480 = vst [vmem:[%s2012_s24 + $0x240] sm:$0xff] %v479_v8  ;;  %482 = vst [vmem:[%s2012_s24 + $0x248] sm:$0xff] %v481_v9  ;;  %v485_v11 = vld [vmem:[%s2004_s23 + $0x4a8] sm:$0xff] }
  0x37   : > { %484 = vst [vmem:[%s2012_s24 + $0x250] sm:$0xff] %v483_v10  ;;  %v487_v12 = vld [vmem:[%s2004_s23 + $0x4c0] sm:$0xff]  ;;  %v489_v13 = vld [vmem:[%s2004_s23 + $0x4c8] sm:$0xff]  ;;  %486 = vst [vmem:[%s2012_s24 + $0x258] sm:$0xff] %v485_v11 }
  0x38   : > { %488 = vst [vmem:[%s2012_s24 + $0x260] sm:$0xff] %v487_v12  ;;  %490 = vst [vmem:[%s2012_s24 + $0x268] sm:$0xff] %v489_v13  ;;  %v491_v14 = vld [vmem:[%s2004_s23 + $0x4e0] sm:$0xff]  ;;  %v493_v15 = vld [vmem:[%s2004_s23 + $0x4e8] sm:$0xff] }
  0x39   : > { %v495_v16 = vld [vmem:[%s2004_s23 + $0x500] sm:$0xff]  ;;  %492 = vst [vmem:[%s2012_s24 + $0x270] sm:$0xff] %v491_v14  ;;  %494 = vst [vmem:[%s2012_s24 + $0x278] sm:$0xff] %v493_v15  ;;  %v497_v17 = vld [vmem:[%s2004_s23 + $0x508] sm:$0xff] }
  0x3a   : > { %496 = vst [vmem:[%s2012_s24 + $0x280] sm:$0xff] %v495_v16  ;;  %v499_v18 = vld [vmem:[%s2004_s23 + $0x520] sm:$0xff]  ;;  %v501_v19 = vld [vmem:[%s2004_s23 + $0x528] sm:$0xff]  ;;  %498 = vst [vmem:[%s2012_s24 + $0x288] sm:$0xff] %v497_v17 }
  0x3b   : > { %500 = vst [vmem:[%s2012_s24 + $0x290] sm:$0xff] %v499_v18  ;;  %502 = vst [vmem:[%s2012_s24 + $0x298] sm:$0xff] %v501_v19  ;;  %v503_v20 = vld [vmem:[%s2004_s23 + $0x540] sm:$0xff]  ;;  %v505_v21 = vld [vmem:[%s2004_s23 + $0x548] sm:$0xff] }
  0x3c   : > { %v507_v22 = vld [vmem:[%s2004_s23 + $0x560] sm:$0xff]  ;;  %504 = vst [vmem:[%s2012_s24 + $0x2a0] sm:$0xff] %v503_v20  ;;  %506 = vst [vmem:[%s2012_s24 + $0x2a8] sm:$0xff] %v505_v21  ;;  %v509_v23 = vld [vmem:[%s2004_s23 + $0x568] sm:$0xff] }
  0x3d   : > { %508 = vst [vmem:[%s2012_s24 + $0x2b0] sm:$0xff] %v507_v22  ;;  %v511_v24 = vld [vmem:[%s2004_s23 + $0x580] sm:$0xff]  ;;  %v513_v25 = vld [vmem:[%s2004_s23 + $0x588] sm:$0xff]  ;;  %510 = vst [vmem:[%s2012_s24 + $0x2b8] sm:$0xff] %v509_v23 }
  0x3e   : > { %512 = vst [vmem:[%s2012_s24 + $0x2c0] sm:$0xff] %v511_v24  ;;  %514 = vst [vmem:[%s2012_s24 + $0x2c8] sm:$0xff] %v513_v25  ;;  %v515_v26 = vld [vmem:[%s2004_s23 + $0x5a0] sm:$0xff]  ;;  %v517_v27 = vld [vmem:[%s2004_s23 + $0x5a8] sm:$0xff] }
  0x3f   : > { %v519_v28 = vld [vmem:[%s2004_s23 + $0x5c0] sm:$0xff]  ;;  %516 = vst [vmem:[%s2012_s24 + $0x2d0] sm:$0xff] %v515_v26  ;;  %518 = vst [vmem:[%s2012_s24 + $0x2d8] sm:$0xff] %v517_v27  ;;  %v521_v29 = vld [vmem:[%s2004_s23 + $0x5c8] sm:$0xff] }
  0x40   : > { %520 = vst [vmem:[%s2012_s24 + $0x2e0] sm:$0xff] %v519_v28  ;;  %v523_v30 = vld [vmem:[%s2004_s23 + $0x5e0] sm:$0xff]  ;;  %v525_v31 = vld [vmem:[%s2004_s23 + $0x5e8] sm:$0xff]  ;;  %522 = vst [vmem:[%s2012_s24 + $0x2e8] sm:$0xff] %v521_v29 }
  0x41   : > { %524 = vst [vmem:[%s2012_s24 + $0x2f0] sm:$0xff] %v523_v30  ;;  %526 = vst [vmem:[%s2012_s24 + $0x2f8] sm:$0xff] %v525_v31  ;;  %v527_v32 = vld [vmem:[%s2004_s23 + $0x600] sm:$0xff]  ;;  %v529_v33 = vld [vmem:[%s2004_s23 + $0x608] sm:$0xff] }
  0x42   : > { %v531_v34 = vld [vmem:[%s2004_s23 + $0x620] sm:$0xff]  ;;  %528 = vst [vmem:[%s2012_s24 + $0x300] sm:$0xff] %v527_v32  ;;  %530 = vst [vmem:[%s2012_s24 + $0x308] sm:$0xff] %v529_v33  ;;  %v533_v35 = vld [vmem:[%s2004_s23 + $0x628] sm:$0xff] }
  0x43   : > { %532 = vst [vmem:[%s2012_s24 + $0x310] sm:$0xff] %v531_v34  ;;  %v535_v36 = vld [vmem:[%s2004_s23 + $0x640] sm:$0xff]  ;;  %v537_v37 = vld [vmem:[%s2004_s23 + $0x648] sm:$0xff]  ;;  %534 = vst [vmem:[%s2012_s24 + $0x318] sm:$0xff] %v533_v35 }
  0x44   : > { %536 = vst [vmem:[%s2012_s24 + $0x320] sm:$0xff] %v535_v36  ;;  %538 = vst [vmem:[%s2012_s24 + $0x328] sm:$0xff] %v537_v37  ;;  %v539_v38 = vld [vmem:[%s2004_s23 + $0x660] sm:$0xff]  ;;  %v541_v39 = vld [vmem:[%s2004_s23 + $0x668] sm:$0xff] }
  0x45   : > { %v543_v40 = vld [vmem:[%s2004_s23 + $0x680] sm:$0xff]  ;;  %540 = vst [vmem:[%s2012_s24 + $0x330] sm:$0xff] %v539_v38  ;;  %542 = vst [vmem:[%s2012_s24 + $0x338] sm:$0xff] %v541_v39  ;;  %v545_v41 = vld [vmem:[%s2004_s23 + $0x688] sm:$0xff] }
  0x46   : > { %544 = vst [vmem:[%s2012_s24 + $0x340] sm:$0xff] %v543_v40  ;;  %v547_v42 = vld [vmem:[%s2004_s23 + $0x6a0] sm:$0xff]  ;;  %v549_v43 = vld [vmem:[%s2004_s23 + $0x6a8] sm:$0xff]  ;;  %546 = vst [vmem:[%s2012_s24 + $0x348] sm:$0xff] %v545_v41 }
  0x47   : > { %548 = vst [vmem:[%s2012_s24 + $0x350] sm:$0xff] %v547_v42  ;;  %550 = vst [vmem:[%s2012_s24 + $0x358] sm:$0xff] %v549_v43  ;;  %v551_v44 = vld [vmem:[%s2004_s23 + $0x6c0] sm:$0xff]  ;;  %v553_v45 = vld [vmem:[%s2004_s23 + $0x6c8] sm:$0xff] }
  0x48   : > { %v555_v46 = vld [vmem:[%s2004_s23 + $0x6e0] sm:$0xff]  ;;  %552 = vst [vmem:[%s2012_s24 + $0x360] sm:$0xff] %v551_v44  ;;  %554 = vst [vmem:[%s2012_s24 + $0x368] sm:$0xff] %v553_v45  ;;  %v557_v47 = vld [vmem:[%s2004_s23 + $0x6e8] sm:$0xff] }
  0x49   : > { %556 = vst [vmem:[%s2012_s24 + $0x370] sm:$0xff] %v555_v46  ;;  %v559_v48 = vld [vmem:[%s2004_s23 + $0x700] sm:$0xff]  ;;  %v561_v49 = vld [vmem:[%s2004_s23 + $0x708] sm:$0xff]  ;;  %558 = vst [vmem:[%s2012_s24 + $0x378] sm:$0xff] %v557_v47 }
  0x4a   : > { %560 = vst [vmem:[%s2012_s24 + $0x380] sm:$0xff] %v559_v48  ;;  %562 = vst [vmem:[%s2012_s24 + $0x388] sm:$0xff] %v561_v49  ;;  %v563_v50 = vld [vmem:[%s2004_s23 + $0x720] sm:$0xff]  ;;  %v565_v51 = vld [vmem:[%s2004_s23 + $0x728] sm:$0xff] }
  0x4b   : > { %v567_v52 = vld [vmem:[%s2004_s23 + $0x740] sm:$0xff]  ;;  %564 = vst [vmem:[%s2012_s24 + $0x390] sm:$0xff] %v563_v50  ;;  %566 = vst [vmem:[%s2012_s24 + $0x398] sm:$0xff] %v565_v51  ;;  %v569_v53 = vld [vmem:[%s2004_s23 + $0x748] sm:$0xff] }
  0x4c   : > { %568 = vst [vmem:[%s2012_s24 + $0x3a0] sm:$0xff] %v567_v52  ;;  %v571_v54 = vld [vmem:[%s2004_s23 + $0x760] sm:$0xff]  ;;  %v573_v55 = vld [vmem:[%s2004_s23 + $0x768] sm:$0xff]  ;;  %570 = vst [vmem:[%s2012_s24 + $0x3a8] sm:$0xff] %v569_v53 }
  0x4d   : > { %572 = vst [vmem:[%s2012_s24 + $0x3b0] sm:$0xff] %v571_v54  ;;  %574 = vst [vmem:[%s2012_s24 + $0x3b8] sm:$0xff] %v573_v55  ;;  %v575_v56 = vld [vmem:[%s2004_s23 + $0x780] sm:$0xff]  ;;  %v577_v57 = vld [vmem:[%s2004_s23 + $0x788] sm:$0xff] }
  0x4e   : > { %v579_v58 = vld [vmem:[%s2004_s23 + $0x7a0] sm:$0xff]  ;;  %576 = vst [vmem:[%s2012_s24 + $0x3c0] sm:$0xff] %v575_v56  ;;  %578 = vst [vmem:[%s2012_s24 + $0x3c8] sm:$0xff] %v577_v57  ;;  %v581_v59 = vld [vmem:[%s2004_s23 + $0x7a8] sm:$0xff] }
  0x4f   : > { %580 = vst [vmem:[%s2012_s24 + $0x3d0] sm:$0xff] %v579_v58  ;;  %v583_v60 = vld [vmem:[%s2004_s23 + $0x7c0] sm:$0xff]  ;;  %v585_v61 = vld [vmem:[%s2004_s23 + $0x7c8] sm:$0xff]  ;;  %582 = vst [vmem:[%s2012_s24 + $0x3d8] sm:$0xff] %v581_v59 }
  0x50   : > { %584 = vst [vmem:[%s2012_s24 + $0x3e0] sm:$0xff] %v583_v60  ;;  %586 = vst [vmem:[%s2012_s24 + $0x3e8] sm:$0xff] %v585_v61  ;;  %v587_v62 = vld [vmem:[%s2004_s23 + $0x7e0] sm:$0xff]  ;;  %v589_v63 = vld [vmem:[%s2004_s23 + $0x7e8] sm:$0xff] }
  0x51   : > { %v591_v0 = vld [vmem:[%s2004_s23 + $0x800] sm:$0xff]  ;;  %588 = vst [vmem:[%s2012_s24 + $0x3f0] sm:$0xff] %v587_v62  ;;  %590 = vst [vmem:[%s2012_s24 + $0x3f8] sm:$0xff] %v589_v63  ;;  %v593_v1 = vld [vmem:[%s2004_s23 + $0x808] sm:$0xff] }
  0x52   : > { %592 = vst [vmem:[%s2012_s24 + $0x400] sm:$0xff] %v591_v0  ;;  %v595_v2 = vld [vmem:[%s2004_s23 + $0x820] sm:$0xff]  ;;  %v597_v3 = vld [vmem:[%s2004_s23 + $0x828] sm:$0xff]  ;;  %594 = vst [vmem:[%s2012_s24 + $0x408] sm:$0xff] %v593_v1 }
  0x53   : > { %596 = vst [vmem:[%s2012_s24 + $0x410] sm:$0xff] %v595_v2  ;;  %598 = vst [vmem:[%s2012_s24 + $0x418] sm:$0xff] %v597_v3  ;;  %v599_v4 = vld [vmem:[%s2004_s23 + $0x840] sm:$0xff]  ;;  %v601_v5 = vld [vmem:[%s2004_s23 + $0x848] sm:$0xff] }
  0x54   : > { %v603_v6 = vld [vmem:[%s2004_s23 + $0x860] sm:$0xff]  ;;  %600 = vst [vmem:[%s2012_s24 + $0x420] sm:$0xff] %v599_v4  ;;  %602 = vst [vmem:[%s2012_s24 + $0x428] sm:$0xff] %v601_v5  ;;  %v605_v7 = vld [vmem:[%s2004_s23 + $0x868] sm:$0xff] }
  0x55   : > { %604 = vst [vmem:[%s2012_s24 + $0x430] sm:$0xff] %v603_v6  ;;  %v607_v8 = vld [vmem:[%s2004_s23 + $0x880] sm:$0xff]  ;;  %v609_v9 = vld [vmem:[%s2004_s23 + $0x888] sm:$0xff]  ;;  %606 = vst [vmem:[%s2012_s24 + $0x438] sm:$0xff] %v605_v7 }
  0x56   : > { %608 = vst [vmem:[%s2012_s24 + $0x440] sm:$0xff] %v607_v8  ;;  %610 = vst [vmem:[%s2012_s24 + $0x448] sm:$0xff] %v609_v9  ;;  %v611_v10 = vld [vmem:[%s2004_s23 + $0x8a0] sm:$0xff]  ;;  %v613_v11 = vld [vmem:[%s2004_s23 + $0x8a8] sm:$0xff] }
  0x57   : > { %v615_v12 = vld [vmem:[%s2004_s23 + $0x8c0] sm:$0xff]  ;;  %612 = vst [vmem:[%s2012_s24 + $0x450] sm:$0xff] %v611_v10  ;;  %614 = vst [vmem:[%s2012_s24 + $0x458] sm:$0xff] %v613_v11  ;;  %v617_v13 = vld [vmem:[%s2004_s23 + $0x8c8] sm:$0xff] }
  0x58   : > { %616 = vst [vmem:[%s2012_s24 + $0x460] sm:$0xff] %v615_v12  ;;  %v619_v14 = vld [vmem:[%s2004_s23 + $0x8e0] sm:$0xff]  ;;  %v621_v15 = vld [vmem:[%s2004_s23 + $0x8e8] sm:$0xff]  ;;  %618 = vst [vmem:[%s2012_s24 + $0x468] sm:$0xff] %v617_v13 }
  0x59   : > { %620 = vst [vmem:[%s2012_s24 + $0x470] sm:$0xff] %v619_v14  ;;  %622 = vst [vmem:[%s2012_s24 + $0x478] sm:$0xff] %v621_v15 }
  0x5a PF: > { %p1494_p6 = scmp.ge.s32.totalorder %s1907_s13, 1  ;;  %p627_p7 = scmp.lt.s32.totalorder %s1907_s13, 3 }
  0x5c   : > { %p628_p8 = pnand %p1494_p6, %p627_p7 }
  0x5d   : > { %s634_s25 = sand.u32 (!%p628_p8), 1, %s1891_s30   ;;  %v1086_v16 = vld [vmem:[%s2517_s3 + $0x8] sm:$0xff] (!%p628_p8)  ;;  %v1909_v60 = vmov (!%p628_p8), 0   ;;  %vm857_vm0 = vcmask (!%p628_p8), 523264   ;;  %s1495_s26 = sshll.u32 (!%p628_p8), %s1899_s11, 1 }
  0x5e   : > { %631 = sbr.rel (%p628_p8) target bundleno = 715 (0x2cb), region = 71  ;;  %1163 = vmatprep.mubr.f32.mxu1 (!%p628_p8), %v1086_v16  ;;  %1851 = vset.pattern.permute.xlu0 (!%p628_p8), %v1909_v60  ;;  %p682_p9 = scmp.lt.s32.totalorder (!%p628_p8), %s1495_s26, 3 }
  0x5f   : > { %s1806_s28 = smul.u32 (!%p628_p8), 1152, %s634_s25  ;;  %1852 = vset.pattern.permute.xlu1 (!%p628_p8), %v1909_v60  ;;  %p698_p10 = scmp.lt.s32.totalorder (!%p628_p8), %s1899_s11, 1 }
  0x61   : > { %s2302_s29 = scalar_lea.vmem (!%p628_p8), [#allocation2], %s1806_s28 }
  0x62   : > { %v703_v17 = vld [vmem:[%s2302_s29 + $0x8] sm:$0xff] (!%p628_p8)  ;;  %v705_v18 = vld [vmem:[%s2302_s29 + $0x18] sm:$0xff] (!%p628_p8)  ;;  %v702_v19 = vld [vmem:[%s2302_s29] sm:$0xff] (!%p628_p8) }
  0x63   : > { %v1505_v20 = vpack.c.bf16 (!%p628_p8), %v705_v18, %v703_v17  ;;  %v704_v21 = vld [vmem:[%s2302_s29 + $0x10] sm:$0xff] (!%p628_p8)  ;;  %v707_v22 = vld [vmem:[%s2302_s29 + $0x28] sm:$0xff] (!%p628_p8)  ;;  %v709_v23 = vld [vmem:[%s2302_s29 + $0x38] sm:$0xff] (!%p628_p8) }
  0x64   : > { %v1507_v24 = vpack.c.bf16 (!%p628_p8), %v704_v21, %v702_v19  ;;  %v1509_v25 = vpack.c.bf16 (!%p628_p8), %v709_v23, %v707_v22  ;;  %v706_v26 = vld [vmem:[%s2302_s29 + $0x20] sm:$0xff] (!%p628_p8)  ;;  %v708_v27 = vld [vmem:[%s2302_s29 + $0x30] sm:$0xff] (!%p628_p8)  ;;  %v711_v28 = vld [vmem:[%s2302_s29 + $0x48] sm:$0xff] (!%p628_p8) }
  0x65   : > { %1650 = vmatprep.subr.bf16.mxu1 %v1505_v20  ;;  %v713_v29 = vld [vmem:[%s2302_s29 + $0x58] sm:$0xff]  ;;  %1506 = vmatprep.subr.bf16.mxu0 %v1505_v20  ;;  %v1511_v30 = vpack.c.bf16 %v708_v27, %v706_v26  ;;  %v710_v32 = vld [vmem:[%s2302_s29 + $0x40] sm:$0xff]  ;;  %v712_v33 = vld [vmem:[%s2302_s29 + $0x50] sm:$0xff]  ;;  %s2531_s26 = smov (!%p682_p9, %s1495_s26), 3  ;;  %s2533_s11 = smov (!%p698_p10, %s1899_s11), 1 }
  0x66   : > { %1652 = vmatpush1.bf16.msra.mxu1 %v1507_v24  ;;  %1508 = vmatpush1.bf16.msra.mxu0 %v1507_v24  ;;  %v1513_v31 = vpack.c.bf16 %v713_v29, %v711_v28  ;;  %v715_v34 = vld [vmem:[%s2302_s29 + $0x68] sm:$0xff]  ;;  %v717_v35 = vld [vmem:[%s2302_s29 + $0x78] sm:$0xff]  ;;  %v1515_v36 = vpack.c.bf16 %v712_v33, %v710_v32  ;;  %v714_v38 = vld [vmem:[%s2302_s29 + $0x60] sm:$0xff]  ;;  %s1496_s27 = sshll.u32 %s2531_s26, 3  ;;  %s1499_s20 = sshll.u32 %s2533_s11, 3 }
  0x67   : > { %1654 = vmatprep.subr.bf16.mxu1 %v1509_v25  ;;  %1510 = vmatprep.subr.bf16.mxu0 %v1509_v25  ;;  %v1517_v37 = vpack.c.bf16 %v717_v35, %v715_v34  ;;  %v716_v39 = vld [vmem:[%s2302_s29 + $0x70] sm:$0xff]  ;;  %v719_v40 = vld [vmem:[%s2302_s29 + $0x88] sm:$0xff]  ;;  %v721_v41 = vld [vmem:[%s2302_s29 + $0x98] sm:$0xff]  ;;  %s685_s15 = scalar_lea.vmem %s2514_s0, %s1496_s27  ;;  %s695_s19 = scalar_lea.vmem %s2522_s8, %s1496_s27 }
  0x68   : > { %v1519_v42 = vpack.c.bf16 %v716_v39, %v714_v38  ;;  %v1521_v43 = vpack.c.bf16 %v721_v41, %v719_v40  ;;  %v718_v44 = vld [vmem:[%s2302_s29 + $0x80] sm:$0xff]  ;;  %v720_v45 = vld [vmem:[%s2302_s29 + $0x90] sm:$0xff]  ;;  %v723_v46 = vld [vmem:[%s2302_s29 + $0xa8] sm:$0xff]  ;;  %s701_s24 = scalar_lea.vmem %s2523_s9, %s1499_s20 }
  0x69   : > { %v725_v47 = vld [vmem:[%s2302_s29 + $0xb8] sm:$0xff]  ;;  %v1523_v48 = vpack.c.bf16 %v720_v45, %v718_v44  ;;  %v722_v50 = vld [vmem:[%s2302_s29 + $0xa0] sm:$0xff]  ;;  %v724_v51 = vld [vmem:[%s2302_s29 + $0xb0] sm:$0xff] }
  0x6a   : > { %1656 = vmatpush1.bf16.msra.mxu1 %v1511_v30  ;;  %1512 = vmatpush1.bf16.msra.mxu0 %v1511_v30  ;;  %v1525_v49 = vpack.c.bf16 %v725_v47, %v723_v46  ;;  %v727_v52 = vld [vmem:[%s2302_s29 + $0xc8] sm:$0xff]  ;;  %v729_v53 = vld [vmem:[%s2302_s29 + $0xd8] sm:$0xff]  ;;  %v1527_v54 = vpack.c.bf16 %v724_v51, %v722_v50  ;;  %v726_v56 = vld [vmem:[%s2302_s29 + $0xc0] sm:$0xff] }
  0x6b   : > { %1658 = vmatprep.subr.bf16.mxu1 %v1513_v31  ;;  %1514 = vmatprep.subr.bf16.mxu0 %v1513_v31  ;;  %v1529_v55 = vpack.c.bf16 %v729_v53, %v727_v52  ;;  %v728_v57 = vld [vmem:[%s2302_s29 + $0xd0] sm:$0xff]  ;;  %v731_v58 = vld [vmem:[%s2302_s29 + $0xe8] sm:$0xff]  ;;  %v733_v59 = vld [vmem:[%s2302_s29 + $0xf8] sm:$0xff] }
  0x6c   : > { %v1531_v61 = vpack.c.bf16 %v728_v57, %v726_v56  ;;  %v1533_v62 = vpack.c.bf16 %v733_v59, %v731_v58  ;;  %v730_v63 = vld [vmem:[%s2302_s29 + $0xe0] sm:$0xff]  ;;  %v732_v0 = vld [vmem:[%s2302_s29 + $0xf0] sm:$0xff]  ;;  %v735_v1 = vld [vmem:[%s2302_s29 + $0x108] sm:$0xff] }
  0x6d   : > { %v737_v2 = vld [vmem:[%s2302_s29 + $0x118] sm:$0xff]  ;;  %v1535_v3 = vpack.c.bf16 %v732_v0, %v730_v63  ;;  %v734_v5 = vld [vmem:[%s2302_s29 + $0x100] sm:$0xff]  ;;  %v736_v6 = vld [vmem:[%s2302_s29 + $0x110] sm:$0xff] }
  0x6e   : > { %1660 = vmatpush1.bf16.msra.mxu1 %v1515_v36  ;;  %1516 = vmatpush1.bf16.msra.mxu0 %v1515_v36  ;;  %v1537_v4 = vpack.c.bf16 %v737_v2, %v735_v1  ;;  %v739_v7 = vld [vmem:[%s2302_s29 + $0x128] sm:$0xff]  ;;  %v741_v8 = vld [vmem:[%s2302_s29 + $0x138] sm:$0xff]  ;;  %v1539_v9 = vpack.c.bf16 %v736_v6, %v734_v5  ;;  %v738_v11 = vld [vmem:[%s2302_s29 + $0x120] sm:$0xff] }
  0x6f   : > { %1662 = vmatprep.subr.bf16.mxu1 %v1517_v37  ;;  %1518 = vmatprep.subr.bf16.mxu0 %v1517_v37  ;;  %v1541_v10 = vpack.c.bf16 %v741_v8, %v739_v7  ;;  %v740_v12 = vld [vmem:[%s2302_s29 + $0x130] sm:$0xff]  ;;  %v743_v13 = vld [vmem:[%s2302_s29 + $0x148] sm:$0xff]  ;;  %v745_v14 = vld [vmem:[%s2302_s29 + $0x158] sm:$0xff] }
  0x70   : > { %v1543_v15 = vpack.c.bf16 %v740_v12, %v738_v11  ;;  %v1545_v16 = vpack.c.bf16 %v745_v14, %v743_v13  ;;  %v742_v17 = vld [vmem:[%s2302_s29 + $0x140] sm:$0xff]  ;;  %v744_v18 = vld [vmem:[%s2302_s29 + $0x150] sm:$0xff]  ;;  %v747_v19 = vld [vmem:[%s2302_s29 + $0x168] sm:$0xff] }
  0x71   : > { %v749_v20 = vld [vmem:[%s2302_s29 + $0x178] sm:$0xff]  ;;  %v1547_v21 = vpack.c.bf16 %v744_v18, %v742_v17  ;;  %v746_v23 = vld [vmem:[%s2302_s29 + $0x160] sm:$0xff]  ;;  %v748_v24 = vld [vmem:[%s2302_s29 + $0x170] sm:$0xff] }
  0x72   : > { %1664 = vmatpush1.bf16.msra.mxu1 %v1519_v42  ;;  %1520 = vmatpush1.bf16.msra.mxu0 %v1519_v42  ;;  %v1549_v22 = vpack.c.bf16 %v749_v20, %v747_v19  ;;  %v751_v25 = vld [vmem:[%s2302_s29 + $0x188] sm:$0xff]  ;;  %v753_v26 = vld [vmem:[%s2302_s29 + $0x198] sm:$0xff]  ;;  %v1551_v27 = vpack.c.bf16 %v748_v24, %v746_v23  ;;  %v750_v29 = vld [vmem:[%s2302_s29 + $0x180] sm:$0xff] }
  0x73   : > { %1666 = vmatprep.subr.bf16.mxu1 %v1521_v43  ;;  %1522 = vmatprep.subr.bf16.mxu0 %v1521_v43  ;;  %v1553_v28 = vpack.c.bf16 %v753_v26, %v751_v25  ;;  %v752_v30 = vld [vmem:[%s2302_s29 + $0x190] sm:$0xff]  ;;  %v755_v31 = vld [vmem:[%s2302_s29 + $0x1a8] sm:$0xff]  ;;  %v757_v32 = vld [vmem:[%s2302_s29 + $0x1b8] sm:$0xff] }
  0x74   : > { %v1555_v33 = vpack.c.bf16 %v752_v30, %v750_v29  ;;  %v754_v34 = vld [vmem:[%s2302_s29 + $0x1a0] sm:$0xff]  ;;  %v756_v35 = vld [vmem:[%s2302_s29 + $0x1b0] sm:$0xff]  ;;  %v1557_v36 = vpack.c.bf16 %v757_v32, %v755_v31  ;;  %v759_v40 = vld [vmem:[%s2302_s29 + $0x1c8] sm:$0xff] }
  0x75   : > { %v1090_v37 = vld [vmem:[%s2519_s5] sm:$0xff]  ;;  %v761_v41 = vld [vmem:[%s2302_s29 + $0x1d8] sm:$0xff]  ;;  %v847_v44 = vld [vmem:[%s2516_s2 + $0x8] sm:$0xff]  ;;  %v1559_v45 = vpack.c.bf16 %v756_v35, %v754_v34 }
  0x76   : > { %1668 = vmatpush1.bf16.msra.mxu1 %v1523_v48  ;;  %1524 = vmatpush1.bf16.msra.mxu0 %v1523_v48  ;;  %v1312_v38 = vld [vmem:[%s2521_s7] sm:$0xff]  ;;  %v1561_v48 = vpack.c.bf16 %v761_v41, %v759_v40  ;;  %v760_v50 = vld [vmem:[%s2302_s29 + $0x1d0] sm:$0xff]  ;;  %v763_v51 = vld [vmem:[%s2302_s29 + $0x1e8] sm:$0xff] }
  0x77   : > { %1670 = vmatprep.subr.bf16.mxu1 %v1525_v49  ;;  %1526 = vmatprep.subr.bf16.mxu0 %v1525_v49  ;;  %v1074_v39 = vld [vmem:[%s2520_s6] sm:$0xff]  ;;  %v1313_v42 = vmul.f32 3.0, %v1312_v38  ;;  %v765_v52 = vld [vmem:[%s2302_s29 + $0x1f8] sm:$0xff]  ;;  %v764_v56 = vld [vmem:[%s2302_s29 + $0x1f0] sm:$0xff] }
  0x78   : > { %1093 = vperm.xlu0 %1851, %v1090_v37   ;;  %v1075_v43 = vmul.f32 3.0, %v1074_v39  ;;  %925 = vmatprep.mubr.f32.mxu0 %v847_v44  ;;  %v758_v49 = vld [vmem:[%s2302_s29 + $0x1c0] sm:$0xff]  ;;  %v767_v57 = vld [vmem:[%s2302_s29 + $0x208] sm:$0xff]  ;;  %v769_v58 = vld [vmem:[%s2302_s29 + $0x218] sm:$0xff] }
  0x79   : > { %v1314_v46 = vmul.f32 1.442695, %v1313_v42  ;;  %v1563_v53 = vpack.c.bf16 %v760_v50, %v758_v49  ;;  %v1569_v60 = vpack.c.bf16 %v769_v58, %v767_v57  ;;  %v771_v63 = vld [vmem:[%s2302_s29 + $0x228] sm:$0xff]  ;;  %v773_v0 = vld [vmem:[%s2302_s29 + $0x238] sm:$0xff]  ;;  %v1085_v2 = vld [vmem:[%s2517_s3] sm:$0xff] }
  0x7a   : > { %1672 = vmatpush1.bf16.msra.mxu1 %v1527_v54  ;;  %1528 = vmatpush1.bf16.msra.mxu0 %v1527_v54  ;;  %v1076_v47 = vmul.f32 1.442695, %v1075_v43  ;;  %v1565_v54 = vpack.c.bf16 %v765_v52, %v763_v51  ;;  %v1573_v5 = vpack.c.bf16 %v773_v0, %v771_v63  ;;  %v770_v6 = vld [vmem:[%s2302_s29 + $0x220] sm:$0xff]  ;;  %v772_v7 = vld [vmem:[%s2302_s29 + $0x230] sm:$0xff]  ;;  %v1088_v8 = vld [vmem:[%s2517_s3 + $0x18] sm:$0xff] }
  0x7b   : > { %1674 = vmatprep.subr.bf16.mxu1 %v1529_v55  ;;  %1530 = vmatprep.subr.bf16.mxu0 %v1529_v55  ;;  %1853 = vpow2.f32 %v1314_v46  ;;  %v762_v55 = vld [vmem:[%s2302_s29 + $0x1e0] sm:$0xff]  ;;  %v777_v11 = vld [vmem:[%s2302_s29 + $0x258] sm:$0xff]  ;;  %v1575_v13 = vpack.c.bf16 %v772_v7, %v770_v6  ;;  %v779_v17 = vld [vmem:[%s2302_s29 + $0x268] sm:$0xff] }
  0x7c   : > { %1855 = vpow2.f32 %v1076_v47  ;;  %v1567_v59 = vpack.c.bf16 %v764_v56, %v762_v55  ;;  %v849_v12 = vld [vmem:[%s2516_s2 + $0x18] sm:$0xff]  ;;  %v783_v23 = vld [vmem:[%s2302_s29 + $0x288] sm:$0xff]  ;;  %v788_v34 = vld [vmem:[%s2302_s29 + $0x2b0] sm:$0xff] }
  0x7d   : > { %v781_v18 = vld [vmem:[%s2302_s29 + $0x278] sm:$0xff]  ;;  %v787_v29 = vld [vmem:[%s2302_s29 + $0x2a8] sm:$0xff]  ;;  %v790_v39 = vld [vmem:[%s2302_s29 + $0x2c0] sm:$0xff] }
  0x7e   : > { %1676 = vmatpush1.bf16.msra.mxu1 %v1531_v61  ;;  %1532 = vmatpush1.bf16.msra.mxu0 %v1531_v61  ;;  %v766_v61 = vld [vmem:[%s2302_s29 + $0x200] sm:$0xff]  ;;  %v1581_v20 = vpack.c.bf16 %v781_v18, %v779_v17  ;;  %v785_v24 = vld [vmem:[%s2302_s29 + $0x298] sm:$0xff]  ;;  %v791_v35 = vld [vmem:[%s2302_s29 + $0x2c8] sm:$0xff] }
  0x7f   : > { %1678 = vmatprep.subr.bf16.mxu1 %v1533_v62  ;;  %1534 = vmatprep.subr.bf16.mxu0 %v1533_v62  ;;  %v768_v62 = vld [vmem:[%s2302_s29 + $0x210] sm:$0xff]  ;;  %v1585_v26 = vpack.c.bf16 %v785_v24, %v783_v23  ;;  %v789_v30 = vld [vmem:[%s2302_s29 + $0x2b8] sm:$0xff]  ;;  %v795_v41 = vld [vmem:[%s2302_s29 + $0x2e8] sm:$0xff] }
  0x80   : > { %v1589_v32 = vpack.c.bf16 %v789_v30, %v787_v29  ;;  %v792_v40 = vld [vmem:[%s2302_s29 + $0x2d0] sm:$0xff]  ;;  %v797_v42 = vld [vmem:[%s2302_s29 + $0x2f8] sm:$0xff]  ;;  %v799_v47 = vld [vmem:[%s2302_s29 + $0x308] sm:$0xff] }
  0x81   : > { %v1595_v43 = vpack.c.bf16 %v792_v40, %v790_v39  ;;  %v1597_v44 = vpack.c.bf16 %v797_v42, %v795_v41  ;;  %v796_v46 = vld [vmem:[%s2302_s29 + $0x2f0] sm:$0xff]  ;;  %v798_v51 = vld [vmem:[%s2302_s29 + $0x300] sm:$0xff]  ;;  %v815_v7 = vld [vmem:[%s2302_s29 + $0x388] sm:$0xff] }
  0x82   : > { %1680 = vmatpush1.bf16.msra.mxu1 %v1535_v3  ;;  %1536 = vmatpush1.bf16.msra.mxu0 %v1535_v3  ;;  %v1571_v3 = vpack.c.bf16 %v768_v62, %v766_v61  ;;  %v800_v52 = vld [vmem:[%s2302_s29 + $0x310] sm:$0xff]  ;;  %v802_v57 = vld [vmem:[%s2302_s29 + $0x320] sm:$0xff] }
  0x83   : > { %1682 = vmatprep.subr.bf16.mxu1 %v1537_v4  ;;  %1538 = vmatprep.subr.bf16.mxu0 %v1537_v4  ;;  %v846_v4 = vld [vmem:[%s2516_s2] sm:$0xff]  ;;  %v1603_v55 = vpack.c.bf16 %v800_v52, %v798_v51  ;;  %v804_v58 = vld [vmem:[%s2302_s29 + $0x330] sm:$0xff]  ;;  %v843_v52 = vld [vmem:[%s2302_s29 + $0x468] sm:$0xff] }
  0x84   : > { %v1607_v61 = vpack.c.bf16 %v804_v58, %v802_v57  ;;  %v806_v63 = vld [vmem:[%s2302_s29 + $0x340] sm:$0xff]  ;;  %v808_v0 = vld [vmem:[%s2302_s29 + $0x350] sm:$0xff] }
  0x85   : > { %v1854_v1 = vpop.eup %1853  ;;  %v812_v6 = vld [vmem:[%s2302_s29 + $0x370] sm:$0xff]  ;;  %v818_v17 = vld [vmem:[%s2302_s29 + $0x3a0] sm:$0xff] }
  0x86   : > { %1684 = vmatpush1.bf16.msra.mxu1 %v1539_v9  ;;  %1540 = vmatpush1.bf16.msra.mxu0 %v1539_v9  ;;  %v1856_v9 = vpop.eup %1855  ;;  %v820_v18 = vld [vmem:[%s2302_s29 + $0x3b0] sm:$0xff]  ;;  %v822_v23 = vld [vmem:[%s2302_s29 + $0x3c0] sm:$0xff] }
  0x87   : > { %1686 = vmatprep.subr.bf16.mxu1 %v1541_v10  ;;  %1542 = vmatprep.subr.bf16.mxu0 %v1541_v10  ;;  %v775_v10 = vld [vmem:[%s2302_s29 + $0x248] sm:$0xff]  ;;  %v824_v24 = vld [vmem:[%s2302_s29 + $0x3d0] sm:$0xff]  ;;  %v826_v29 = vld [vmem:[%s2302_s29 + $0x3e0] sm:$0xff] }
  0x88   : > { %1318 = vperm.xlu0 %1851, %v1854_v1   ;;  %v1577_v14 = vpack.c.bf16 %v777_v11, %v775_v10  ;;  %v811_v1 = vld [vmem:[%s2302_s29 + $0x368] sm:$0xff]  ;;  %v814_v11 = vld [vmem:[%s2302_s29 + $0x380] sm:$0xff]  ;;  %v828_v30 = vld [vmem:[%s2302_s29 + $0x3f0] sm:$0xff] }
  0x89   : > { %v1087_v39 = vld [vmem:[%s2517_s3 + $0x10] sm:$0xff]  ;;  %v834_v42 = vld [vmem:[%s2302_s29 + $0x420] sm:$0xff] }
  0x8a   : > { %1688 = vmatpush1.bf16.msra.mxu1 %v1543_v15  ;;  %1544 = vmatpush1.bf16.msra.mxu0 %v1543_v15  ;;  %v774_v15 = vld [vmem:[%s2302_s29 + $0x240] sm:$0xff]  ;;  %v840_v51 = vld [vmem:[%s2302_s29 + $0x450] sm:$0xff] }
  0x8b   : > { %1690 = vmatprep.subr.bf16.mxu1 %v1545_v16  ;;  %1546 = vmatprep.subr.bf16.mxu0 %v1545_v16  ;;  %v776_v16 = vld [vmem:[%s2302_s29 + $0x250] sm:$0xff] }
  0x8c   : > { %1080 = vperm.xlu0 %1851, %v1856_v9   ;;  %v1579_v19 = vpack.c.bf16 %v776_v16, %v774_v15  ;;  %v844_v57 = vld [vmem:[%s2302_s29 + $0x470] sm:$0xff] }
  0x8e   : > { %1692 = vmatpush1.bf16.msra.mxu1 %v1547_v21  ;;  %1548 = vmatpush1.bf16.msra.mxu0 %v1547_v21  ;;  %v778_v21 = vld [vmem:[%s2302_s29 + $0x260] sm:$0xff] }
  0x8f   : > { %1694 = vmatprep.subr.bf16.mxu1 %v1549_v22  ;;  %1550 = vmatprep.subr.bf16.mxu0 %v1549_v22  ;;  %v780_v22 = vld [vmem:[%s2302_s29 + $0x270] sm:$0xff] }
  0x90   : > { %v1583_v25 = vpack.c.bf16 %v780_v22, %v778_v21  ;;  %v1623_v21 = vpack.c.bf16 %v820_v18, %v818_v17 }
  0x92   : > { %1696 = vmatpush1.bf16.msra.mxu1 %v1551_v27  ;;  %1552 = vmatpush1.bf16.msra.mxu0 %v1551_v27  ;;  %v782_v27 = vld [vmem:[%s2302_s29 + $0x280] sm:$0xff] }
  0x93   : > { %1698 = vmatprep.subr.bf16.mxu1 %v1553_v28  ;;  %1554 = vmatprep.subr.bf16.mxu0 %v1553_v28  ;;  %v784_v28 = vld [vmem:[%s2302_s29 + $0x290] sm:$0xff] }
  0x94   : > { %v1587_v31 = vpack.c.bf16 %v784_v28, %v782_v27  ;;  %v1627_v27 = vpack.c.bf16 %v824_v24, %v822_v23 }
  0x96   : > { %1700 = vmatpush1.bf16.msra.mxu1 %v1555_v33  ;;  %1556 = vmatpush1.bf16.msra.mxu0 %v1555_v33  ;;  %v786_v33 = vld [vmem:[%s2302_s29 + $0x2a0] sm:$0xff] }
  0x97   : > { %1702 = vmatprep.subr.bf16.mxu1 %v1557_v36  ;;  %1558 = vmatprep.subr.bf16.mxu0 %v1557_v36  ;;  %v793_v36 = vld [vmem:[%s2302_s29 + $0x2d8] sm:$0xff]  ;;  %v1591_v37 = vpack.c.bf16 %v788_v34, %v786_v33  ;;  %v1631_v33 = vpack.c.bf16 %v828_v30, %v826_v29 }
  0x98   : > { %v1593_v38 = vpack.c.bf16 %v793_v36, %v791_v35  ;;  %v830_v35 = vld [vmem:[%s2302_s29 + $0x400] sm:$0xff]  ;;  %v832_v36 = vld [vmem:[%s2302_s29 + $0x410] sm:$0xff] }
  0x99   : > { %v1635_v40 = vpack.c.bf16 %v832_v36, %v830_v35  ;;  %v1339_v35 = vld [vmem:[%s685_s15] sm:$0xff]  ;;  %v1340_v36 = vld [vmem:[%s685_s15 + $0x8] sm:$0xff] }
  0x9a   : > { %1704 = vmatpush1.bf16.msra.mxu1 %v1559_v45  ;;  %1560 = vmatpush1.bf16.msra.mxu0 %v1559_v45  ;;  %v794_v45 = vld [vmem:[%s2302_s29 + $0x2e0] sm:$0xff] }
  0x9b   : > { %1706 = vmatprep.subr.bf16.mxu1 %v1561_v48  ;;  %1562 = vmatprep.subr.bf16.mxu0 %v1561_v48  ;;  %v801_v48 = vld [vmem:[%s2302_s29 + $0x318] sm:$0xff]  ;;  %v1599_v49 = vpack.c.bf16 %v796_v46, %v794_v45  ;;  %v848_v46 = vld [vmem:[%s2516_s2 + $0x10] sm:$0xff] }
  0x9c   : > { %v1601_v50 = vpack.c.bf16 %v801_v48, %v799_v47  ;;  %v841_v45 = vld [vmem:[%s2302_s29 + $0x458] sm:$0xff]  ;;  %v1910_v48 = vmov 0.0  }
  0x9e   : > { %1708 = vmatpush1.bf16.msra.mxu1 %v1563_v53  ;;  %1564 = vmatpush1.bf16.msra.mxu0 %v1563_v53  ;;  %v803_v53 = vld [vmem:[%s2302_s29 + $0x328] sm:$0xff] }
  0x9f   : > { %1710 = vmatprep.subr.bf16.mxu1 %v1565_v54  ;;  %1566 = vmatprep.subr.bf16.mxu0 %v1565_v54  ;;  %v805_v54 = vld [vmem:[%s2302_s29 + $0x338] sm:$0xff] }
  0xa0   : > { %v1605_v56 = vpack.c.bf16 %v805_v54, %v803_v53  ;;  %v845_v53 = vld [vmem:[%s2302_s29 + $0x478] sm:$0xff] }
  0xa2   : > { %1712 = vmatpush1.bf16.msra.mxu1 %v1567_v59  ;;  %1568 = vmatpush1.bf16.msra.mxu0 %v1567_v59  ;;  %v807_v59 = vld [vmem:[%s2302_s29 + $0x348] sm:$0xff] }
  0xa3   : > { %1714 = vmatprep.subr.bf16.mxu1 %v1569_v60  ;;  %1570 = vmatprep.subr.bf16.mxu0 %v1569_v60  ;;  %v809_v60 = vld [vmem:[%s2302_s29 + $0x358] sm:$0xff] }
  0xa4   : > { %v1609_v62 = vpack.c.bf16 %v809_v60, %v807_v59  ;;  %v1089_v59 = vld [vmem:[%s2517_s3 + $0x20] sm:$0xff] }
  0xa5   : > { %1164 = vmatmul.mubr.f32.vlgmr.msra.gmra.mrb[0].mxu1 %v1085_v2  ;;  %926 = vmatmul.mubr.f32.vlgmr.msra.gmra.mrb[0].mxu0 %v846_v4  ;;  %v813_v2 = vld [vmem:[%s2302_s29 + $0x378] sm:$0xff]  ;;  %v850_v60 = vld [vmem:[%s2516_s2 + $0x20] sm:$0xff] }
  0xa6   : > { %1716 = vmatpush1.bf16.msra.mxu1 %v1571_v3  ;;  %1234 = vmatprep.mubr.f32.mxu1 %v1088_v8  ;;  %v1613_v4 = vpack.c.bf16 %v813_v2, %v811_v1  ;;  %v817_v8 = vld [vmem:[%s2302_s29 + $0x398] sm:$0xff] }
  0xa7   : > { %1718 = vmatprep.subr.bf16.mxu1 %v1573_v5  ;;  %1572 = vmatpush1.bf16.msra.mxu0 %v1571_v3  ;;  %v1611_v3 = vpack.c.bf16 %v808_v0, %v806_v63  ;;  %v1617_v10 = vpack.c.bf16 %v817_v8, %v815_v7 }
  0xa8   : > { %996 = vmatprep.mubr.f32.mxu0 %v849_v12  ;;  %1574 = vmatprep.subr.bf16.mxu0 %v1573_v5  ;;  %v810_v5 = vld [vmem:[%s2302_s29 + $0x360] sm:$0xff]  ;;  %v816_v12 = vld [vmem:[%s2302_s29 + $0x390] sm:$0xff] }
  0xa9   : > { %v1615_v9 = vpack.c.bf16 %v812_v6, %v810_v5  ;;  %v1619_v15 = vpack.c.bf16 %v816_v12, %v814_v11 }
  0xaa   : > { %1720 = vmatpush1.bf16.msra.mxu1 %v1575_v13 }
  0xab   : > { %1722 = vmatprep.subr.bf16.mxu1 %v1577_v14  ;;  %1576 = vmatpush1.bf16.msra.mxu0 %v1575_v13  ;;  %v819_v13 = vld [vmem:[%s2302_s29 + $0x3a8] sm:$0xff] }
  0xac   : > { %1578 = vmatprep.subr.bf16.mxu0 %v1577_v14  ;;  %v821_v14 = vld [vmem:[%s2302_s29 + $0x3b8] sm:$0xff] }
  0xad   : > { %v1621_v16 = vpack.c.bf16 %v821_v14, %v819_v13 }
  0xae   : > { %1724 = vmatpush1.bf16.msra.mxu1 %v1579_v19 }
  0xaf   : > { %1726 = vmatprep.subr.bf16.mxu1 %v1581_v20  ;;  %1580 = vmatpush1.bf16.msra.mxu0 %v1579_v19  ;;  %v823_v19 = vld [vmem:[%s2302_s29 + $0x3c8] sm:$0xff] }
  0xb0   : > { %1582 = vmatprep.subr.bf16.mxu0 %v1581_v20  ;;  %v825_v20 = vld [vmem:[%s2302_s29 + $0x3d8] sm:$0xff] }
  0xb1   : > { %v1625_v22 = vpack.c.bf16 %v825_v20, %v823_v19 }
  0xb2   : > { %1728 = vmatpush1.bf16.msra.mxu1 %v1583_v25 }
  0xb3   : > { %1730 = vmatprep.subr.bf16.mxu1 %v1585_v26  ;;  %1584 = vmatpush1.bf16.msra.mxu0 %v1583_v25  ;;  %v827_v25 = vld [vmem:[%s2302_s29 + $0x3e8] sm:$0xff] }
  0xb4   : > { %1586 = vmatprep.subr.bf16.mxu0 %v1585_v26  ;;  %v829_v26 = vld [vmem:[%s2302_s29 + $0x3f8] sm:$0xff] }
  0xb5   : > { %v1629_v28 = vpack.c.bf16 %v829_v26, %v827_v25  ;;  %v851_v26 = vld [vmem:[%s2518_s4] sm:$0xff] }
  0xb6   : > { %1732 = vmatpush1.bf16.msra.mxu1 %v1587_v31 }
  0xb7   : > { %1734 = vmatprep.subr.bf16.mxu1 %v1589_v32  ;;  %1588 = vmatpush1.bf16.msra.mxu0 %v1587_v31  ;;  %v831_v31 = vld [vmem:[%s2302_s29 + $0x408] sm:$0xff] }
  0xb8   : > { %1590 = vmatprep.subr.bf16.mxu0 %v1589_v32  ;;  %v833_v32 = vld [vmem:[%s2302_s29 + $0x418] sm:$0xff] }
  0xb9   : > { %v1633_v34 = vpack.c.bf16 %v833_v32, %v831_v31 }
  0xba   : > { %1736 = vmatpush1.bf16.msra.mxu1 %v1591_v37 }
  0xbb   : > { %1738 = vmatprep.subr.bf16.mxu1 %v1593_v38  ;;  %1592 = vmatpush1.bf16.msra.mxu0 %v1591_v37  ;;  %v835_v37 = vld [vmem:[%s2302_s29 + $0x428] sm:$0xff] }
  0xbc   : > { %1594 = vmatprep.subr.bf16.mxu0 %v1593_v38  ;;  %v837_v38 = vld [vmem:[%s2302_s29 + $0x438] sm:$0xff] }
  0xbd   : > { %v1637_v41 = vpack.c.bf16 %v837_v38, %v835_v37 }
  0xbe   : > { %1740 = vmatpush1.bf16.msra.mxu1 %v1595_v43 }
  0xbf   : > { %1742 = vmatprep.subr.bf16.mxu1 %v1597_v44  ;;  %1596 = vmatpush1.bf16.msra.mxu0 %v1595_v43  ;;  %v836_v43 = vld [vmem:[%s2302_s29 + $0x430] sm:$0xff] }
  0xc0   : > { %1598 = vmatprep.subr.bf16.mxu0 %v1597_v44  ;;  %v839_v44 = vld [vmem:[%s2302_s29 + $0x448] sm:$0xff]  ;;  %v1639_v47 = vpack.c.bf16 %v836_v43, %v834_v42 }
  0xc2   : > { %1744 = vmatpush1.bf16.msra.mxu1 %v1599_v49 }
  0xc3   : > { %1746 = vmatprep.subr.bf16.mxu1 %v1601_v50  ;;  %1600 = vmatpush1.bf16.msra.mxu0 %v1599_v49  ;;  %v1641_v49 = vpack.c.bf16 %v841_v45, %v839_v44 }
  0xc4   : > { %1602 = vmatprep.subr.bf16.mxu0 %v1601_v50  ;;  %v838_v50 = vld [vmem:[%s2302_s29 + $0x440] sm:$0xff] }
  0xc5   : > { %v1643_v54 = vpack.c.bf16 %v840_v51, %v838_v50 }
  0xc6   : > { %1748 = vmatpush1.bf16.msra.mxu1 %v1603_v55 }
  0xc7   : > { %1750 = vmatprep.subr.bf16.mxu1 %v1605_v56  ;;  %1604 = vmatpush1.bf16.msra.mxu0 %v1603_v55  ;;  %v1645_v55 = vpack.c.bf16 %v845_v53, %v843_v52 }
  0xc8   : > { %1606 = vmatprep.subr.bf16.mxu0 %v1605_v56  ;;  %v842_v56 = vld [vmem:[%s2302_s29 + $0x460] sm:$0xff] }
  0xc9   : > { %v1647_v58 = vpack.c.bf16 %v844_v57, %v842_v56 }
  0xca   : > { %1752 = vmatpush1.bf16.msra.mxu1 %v1607_v61 }
  0xcb   : > { %1754 = vmatprep.subr.bf16.mxu1 %v1609_v62  ;;  %1608 = vmatpush1.bf16.msra.mxu0 %v1607_v61 }
  0xcc   : > { %1610 = vmatprep.subr.bf16.mxu0 %v1609_v62 }
  0xce   : > { %1756 = vmatpush1.bf16.msra.mxu1 %v1611_v3 }
  0xcf   : > { %1758 = vmatprep.subr.bf16.mxu1 %v1613_v4  ;;  %1612 = vmatpush1.bf16.msra.mxu0 %v1611_v3 }
  0xd0   : > { %1614 = vmatprep.subr.bf16.mxu0 %v1613_v4 }
  0xd2   : > { %1760 = vmatpush1.bf16.msra.mxu1 %v1615_v9 }
  0xd3   : > { %1762 = vmatprep.subr.bf16.mxu1 %v1617_v10  ;;  %1616 = vmatpush1.bf16.msra.mxu0 %v1615_v9 }
  0xd4   : > { %1618 = vmatprep.subr.bf16.mxu0 %v1617_v10 }
  0xd6   : > { %1764 = vmatpush1.bf16.msra.mxu1 %v1619_v15 }
  0xd7   : > { %1766 = vmatprep.subr.bf16.mxu1 %v1621_v16  ;;  %1620 = vmatpush1.bf16.msra.mxu0 %v1619_v15 }
  0xd8   : > { %1622 = vmatprep.subr.bf16.mxu0 %v1621_v16 }
  0xda   : > { %1768 = vmatpush1.bf16.msra.mxu1 %v1623_v21 }
  0xdb   : > { %1770 = vmatprep.subr.bf16.mxu1 %v1625_v22  ;;  %1624 = vmatpush1.bf16.msra.mxu0 %v1623_v21 }
  0xdc   : > { %1626 = vmatprep.subr.bf16.mxu0 %v1625_v22 }
  0xde   : > { %1772 = vmatpush1.bf16.msra.mxu1 %v1627_v27 }
  0xdf   : > { %1774 = vmatprep.subr.bf16.mxu1 %v1629_v28  ;;  %1628 = vmatpush1.bf16.msra.mxu0 %v1627_v27 }
  0xe0   : > { %1630 = vmatprep.subr.bf16.mxu0 %v1629_v28 }
  0xe2   : > { %1776 = vmatpush1.bf16.msra.mxu1 %v1631_v33 }
  0xe3   : > { %1778 = vmatprep.subr.bf16.mxu1 %v1633_v34  ;;  %1632 = vmatpush1.bf16.msra.mxu0 %v1631_v33 }
  0xe4   : > { %1634 = vmatprep.subr.bf16.mxu0 %v1633_v34 }
  0xe5   : > { %1235 = vmatmul.mubr.f32.vlgmr.msra.gmra.mrb[0].mxu1 %v1087_v39 }
  0xe6   : > { %1780 = vmatpush1.bf16.msra.mxu1 %v1635_v40  ;;  %1305 = vmatprep.mubr.f32.mxu1 %v1910_v48 }
  0xe7   : > { %1782 = vmatprep.subr.bf16.mxu1 %v1637_v41  ;;  %997 = vmatmul.mubr.f32.vlgmr.msra.gmra.mrb[0].mxu0 %v848_v46 }
  0xe8   : > { %1636 = vmatpush1.bf16.msra.mxu0 %v1635_v40  ;;  %1067 = vmatprep.mubr.f32.mxu0 %v1910_v48 }
  0xe9   : > { %1638 = vmatprep.subr.bf16.mxu0 %v1637_v41 }
  0xea   : > { %1784 = vmatpush1.bf16.msra.mxu1 %v1639_v47 }
  0xeb   : > { %1786 = vmatprep.subr.bf16.mxu1 %v1641_v49 }
  0xec   : > { %1640 = vmatpush1.bf16.msra.mxu0 %v1639_v47 }
  0xed   : > { %1642 = vmatprep.subr.bf16.mxu0 %v1641_v49 }
  0xee   : > { %1788 = vmatpush1.bf16.msra.mxu1 %v1643_v54 }
  0xef   : > { %1790 = vmatprep.subr.bf16.mxu1 %v1645_v55 }
  0xf0   : > { %1644 = vmatpush1.bf16.msra.mxu0 %v1643_v54 }
  0xf1   : > { %1646 = vmatprep.subr.bf16.mxu0 %v1645_v55 }
  0xf2   : > { %1792 = vmatpush1.bf16.msra.mxu1 %v1647_v58 }
  0xf4   : > { %1648 = vmatpush1.bf16.msra.mxu0 %v1647_v58 }
  0xf5   : > { %1501 = vmatmul.mubr.msk.f32.vlgmr.msra.gmra.mrb[0].mxu1 %vm857_vm0, %v1089_v59 }
  0xf7   : > { %1500 = vmatmul.mubr.msk.f32.vlgmr.msra.gmra.mrb[0].mxu0 %vm857_vm0, %v850_v60  ;;  %v1094_v61 = vpop.permute.xlu0 %1093 }
 0x107   : > { %v1319_v1 = vpop.permute.xlu0 %1318 }
 0x10b   : > { %v1081_v34 = vpop.permute.xlu0 %1080 }
 0x1c8   : > { %v1307_v62 = vpop.f32.mrb[0].mxu1 }
 0x1c9   : > { %v1795_v63 = vadd.f32 %v1307_v62, %v1094_v61  ;;  %v1309_v0 = vpop.f32.mrb[1].mxu1 }
 0x1ca   : > { %v1796_v2 = vadd.f32 %v1309_v0, %v1094_v61  ;;  %v1069_v3 = vpop.f32.mrb[0].mxu0 }
 0x1cb   : > { %v1321_v4 = vmul.f32 %v1795_v63, %v1319_v1  ;;  %v1071_v5 = vpop.f32.mrb[1].mxu0 }
 0x1cc   : > { %v1322_v6 = vmul.f32 %v1796_v2, %v1319_v1 }
 0x1cd   : > { %v1323_v7 = vadd.f32 2.0, %v1321_v4 }
 0x1ce   : > { %v1324_v8 = vadd.f32 2.0, %v1322_v6 }
 0x1cf   : > { %v1325_v9 = vsub.f32 0.0, %v1323_v7 }
 0x1d0   : > { %v1326_v10 = vsub.f32 0.0, %v1324_v8 }
 0x1d1   : > { %v1327_v11 = vmul.f32 1.442695, %v1325_v9 }
 0x1d2   : > { %v1329_v12 = vmul.f32 1.442695, %v1326_v10 }
 0x1d3   : > { %1857 = vpow2.f32 %v1327_v11 }
 0x1d4   : > { %1859 = vpow2.f32 %v1329_v12 }
 0x1dd   : > { %v1858_v13 = vpop.eup %1857 }
 0x1de   : > { %v1860_v14 = vpop.eup %1859  ;;  %v1331_v15 = vadd.f32 1.0, %v1858_v13 }
 0x1df   : > { %v1332_v16 = vadd.f32 1.0, %v1860_v14 }
 0x1e0   : > { %1861 = vrcp.f32 %v1331_v15 }
 0x1e1   : > { %1863 = vrcp.f32 %v1332_v16 }
 0x1ea   : > { %v1862_v17 = vpop.eup %1861 }
 0x1eb   : > { %v1864_v18 = vpop.eup %1863  ;;  %v1337_v19 = vadd.f32 0.0001, %v1862_v17 }
 0x1ec   : > { %v1338_v20 = vadd.f32 0.0001, %v1864_v18 }
 0x1ed   : > { %1865 = vlog2.f32 %v1337_v19 }
 0x1ee   : > { %1867 = vlog2.f32 %v1338_v20 }
 0x1f7   : > { %v1866_v21 = vpop.eup %1865 }
 0x1f8   : > { %v1868_v22 = vpop.eup %1867  ;;  %v1354_v23 = vmul.f32 0.6931472, %v1866_v21 }
 0x1f9   : > { %v1356_v24 = vmul.f32 0.6931472, %v1868_v22 }
 0x1fb   : > { %v1357_v25 = vadd.f32 %v1356_v24, %v1354_v23 }
 0x1fd   : > { %1358 = vadd.xlane.f32.xlu1 %v1357_v25 }
 0x20e   : > { %854 = vperm.xlu1 %1852, %v851_v26  }
 0x28a   : > { %v1359_v27 = vpop.xlane.xlu1 %1358 }
 0x28b   : > { %v1360_v28 = vrot.slane %v1359_v27, 4 }
 0x28d   : > { %v1361_v29 = vadd.f32 %v1360_v28, %v1359_v27 }
 0x28e   : > { %v855_v30 = vpop.permute.xlu1 %854 }
 0x28f   : > { %v1362_v31 = vrot.slane %v1361_v29, 2  ;;  %v1793_v32 = vadd.f32 %v1069_v3, %v855_v30  ;;  %v1794_v33 = vadd.f32 %v1071_v5, %v855_v30 }
 0x291   : > { %v1083_v37 = vmul.f32 %v1793_v32, %v1081_v34  ;;  %v1084_v38 = vmul.f32 %v1794_v33, %v1081_v34  ;;  %v1363_v39 = vadd.f32 %v1362_v31, %v1361_v29 }
 0x293   : > { %v1341_v40 = vadd.f32 %v1339_v35, %v1083_v37  ;;  %v1342_v41 = vadd.f32 %v1340_v36, %v1084_v38  ;;  %v1364_v42 = vrot.slane %v1363_v39, 1 }
 0x295   : > { %v1343_v43 = vmul.f32 %v1341_v40, %v1337_v19  ;;  %v1344_v44 = vmul.f32 %v1342_v41, %v1338_v20  ;;  %v1365_v45 = vadd.f32 %v1364_v42, %v1363_v39 }
 0x297   : > { %1345 = vst [vmem:[%s695_s19] sm:$0xff] %v1343_v43  ;;  %1807 = vpush %v1365_v45 }
 0x298   : > { %1346 = vst [vmem:[%s695_s19 + $0x8] sm:$0xff] %v1344_v44 }
 0x2c8   : > { %s1808_s21 = spop %1807 }
 0x2c9   : > { %v1367_v46 = vstv %s1808_s21 }
 0x2ca   : > { %1369 = vst [vmem:[%s701_s24] sm:$0xff] %v1367_v46 }
 0x2cb PF: > { %s20_s13 = sadd.s32 1, %s1907_s13   ;;  %s2524_s30 = smov %s1895_s10 }
 0x2cc   : > { %p17_p11 = scmp.ge.s32.totalorder %s20_s13, 4   ;;  %s2525_s10 = smov %s1996_s17 }
 0x2cd   : > { %s2526_s11 = smov %s1903_s12  ;;  %s2527_s12 = smov %s2529_s14 }
 0x2ce   :  { %19 = sbr.rel (!%p17_p11) target bundleno = 3 (0x3), region = 129 }

// kernel: run.11
= control target key start
LH: loop header
LB: loop body
LE: loop exit
PB: predicated region body
PF: predicated region fallthrough
CT: control target
= control target key end

     0   :  { %s1630_s18 = smov 0   ;;  %s1632_s19 = smov 0   ;;  %s2367_s0 = inlined_call_operand.vmem [shape: f32[612,512], index: 0, kind: input, shape index: {}]   ;;  %s2368_s1 = inlined_call_operand.vmem [shape: f32[64,612], index: 1, kind: input, shape index: {}]   ;;  %s2369_s2 = inlined_call_operand.vmem [shape: f32[64,1], index: 2, kind: input, shape index: {}]   ;;  %s2370_s3 = inlined_call_operand.vmem [shape: f32[64,1], index: 3, kind: input, shape index: {}, may-alias: {3,4}]   ;;  %s2371_s4 = inlined_call_operand.vmem [shape: f32[64,1], index: 4, kind: input, shape index: {}, may-alias: {3,4}]   ;;  %s2372_s5 = inlined_call_operand.vmem [shape: f32[64,512], index: 5, kind: output, shape index: {}]  }
   0x1   :  { %s1634_s20 = smov 0  }
   0x2 LB: > { %s1305_s3 = sadd.s32 4294967295, %s1596_s20   ;;  %s1647_s4 = sadd.s32 1, %s1596_s20   ;;  %s1596_s20 = sphi %s1634_s20, %s2376_s20   ;;  %s1592_s19 = sphi %s1632_s19, %s2375_s19   ;;  %s1588_s18 = sphi %s1630_s18, %s2374_s18  }
   0x3   : > { %s19_s21 = ssub.s32 %s1596_s20, %s1647_s4  ;;  %s22_s22 = sadd.s32 1, %s1592_s19 }
   0x4   : > { %p20_p0 = scmp.eq.s32.totalorder %s19_s21, 0  ;;  %p29_p1 = scmp.ne.s32.totalorder %s1592_s19, %s1588_s18 }
   0x5   : > { %p30_p2 = scmp.eq.s32.totalorder %s1596_s20, 0  ;;  %p143_p3 = scmp.eq.s32.totalorder %s1305_s3, 1 }
   0x6   : > { %s1658_s23 = scalar_select %p20_p0, %s1592_s19, %s22_s22  }
   0x7   : > { %p31_p4 = por %p30_p2, %p29_p1  ;;  %p1660_p5 = por %p143_p3, %p29_p1 }
   0x8   : > { %p1308_p6 = scmp.ge.s32.totalorder %s1596_s20, 2 }
   0xa   : > { %177 = sbr.rel (%p1308_p6) target bundleno = 98 (0x62), region = 32 }
  0x11   : > { %180 = sbr.rel (!%p31_p4) target bundleno = 98 (0x62), region = 36  ;;  %s182_s25 = sand.u32 (%p31_p4), 1, %s1592_s19  }
  0x12   : > { %s1328_s26 = sshll.u32 (%p31_p4), %s1596_s20, 4  ;;  %s1544_s27 = smul.u32 (%p31_p4), 1232, %s182_s25 }
  0x13   : > { %s1670_s30 = scalar_lea.vmem (%p31_p4), %s2367_s0, %s1328_s26 }
  0x14   : > { %v200_v0 = vld [vmem:[%s1670_s30] sm:$0xff] (%p31_p4)  ;;  %v202_v1 = vld [vmem:[%s1670_s30 + $0x8] sm:$0xff] (%p31_p4)  ;;  %s1678_s6 = scalar_lea.vmem (%p31_p4), [#allocation2], %s1544_s27 }
  0x15   : > { %v204_v2 = vld [vmem:[%s1670_s30 + $0x20] sm:$0xff] (%p31_p4)  ;;  %v206_v3 = vld [vmem:[%s1670_s30 + $0x28] sm:$0xff] (%p31_p4)  ;;  %201 = vst [vmem:[%s1678_s6] sm:$0xff] (%p31_p4), %v200_v0  ;;  %203 = vst [vmem:[%s1678_s6 + $0x8] sm:$0xff] (%p31_p4), %v202_v1 }
  0x16   : > { %v208_v4 = vld [vmem:[%s1670_s30 + $0x40] sm:$0xff] (%p31_p4)  ;;  %v210_v5 = vld [vmem:[%s1670_s30 + $0x48] sm:$0xff] (%p31_p4)  ;;  %205 = vst [vmem:[%s1678_s6 + $0x10] sm:$0xff] (%p31_p4), %v204_v2  ;;  %207 = vst [vmem:[%s1678_s6 + $0x18] sm:$0xff] (%p31_p4), %v206_v3 }
  0x17   : > { %209 = vst [vmem:[%s1678_s6 + $0x20] sm:$0xff] (%p31_p4), %v208_v4  ;;  %211 = vst [vmem:[%s1678_s6 + $0x28] sm:$0xff] (%p31_p4), %v210_v5  ;;  %v212_v6 = vld [vmem:[%s1670_s30 + $0x60] sm:$0xff] (%p31_p4)  ;;  %v214_v7 = vld [vmem:[%s1670_s30 + $0x68] sm:$0xff] (%p31_p4) }
  0x18   : > { %v216_v8 = vld [vmem:[%s1670_s30 + $0x80] sm:$0xff]  ;;  %213 = vst [vmem:[%s1678_s6 + $0x30] sm:$0xff] %v212_v6  ;;  %215 = vst [vmem:[%s1678_s6 + $0x38] sm:$0xff] %v214_v7  ;;  %v218_v9 = vld [vmem:[%s1670_s30 + $0x88] sm:$0xff] }
  0x19   : > { %217 = vst [vmem:[%s1678_s6 + $0x40] sm:$0xff] %v216_v8  ;;  %v220_v10 = vld [vmem:[%s1670_s30 + $0xa0] sm:$0xff]  ;;  %v222_v11 = vld [vmem:[%s1670_s30 + $0xa8] sm:$0xff]  ;;  %219 = vst [vmem:[%s1678_s6 + $0x48] sm:$0xff] %v218_v9 }
  0x1a   : > { %221 = vst [vmem:[%s1678_s6 + $0x50] sm:$0xff] %v220_v10  ;;  %223 = vst [vmem:[%s1678_s6 + $0x58] sm:$0xff] %v222_v11  ;;  %v224_v12 = vld [vmem:[%s1670_s30 + $0xc0] sm:$0xff]  ;;  %v226_v13 = vld [vmem:[%s1670_s30 + $0xc8] sm:$0xff] }
  0x1b   : > { %v228_v14 = vld [vmem:[%s1670_s30 + $0xe0] sm:$0xff]  ;;  %225 = vst [vmem:[%s1678_s6 + $0x60] sm:$0xff] %v224_v12  ;;  %227 = vst [vmem:[%s1678_s6 + $0x68] sm:$0xff] %v226_v13  ;;  %v230_v15 = vld [vmem:[%s1670_s30 + $0xe8] sm:$0xff] }
  0x1c   : > { %229 = vst [vmem:[%s1678_s6 + $0x70] sm:$0xff] %v228_v14  ;;  %v232_v16 = vld [vmem:[%s1670_s30 + $0x100] sm:$0xff]  ;;  %v234_v17 = vld [vmem:[%s1670_s30 + $0x108] sm:$0xff]  ;;  %231 = vst [vmem:[%s1678_s6 + $0x78] sm:$0xff] %v230_v15 }
  0x1d   : > { %233 = vst [vmem:[%s1678_s6 + $0x80] sm:$0xff] %v232_v16  ;;  %235 = vst [vmem:[%s1678_s6 + $0x88] sm:$0xff] %v234_v17  ;;  %v236_v18 = vld [vmem:[%s1670_s30 + $0x120] sm:$0xff]  ;;  %v238_v19 = vld [vmem:[%s1670_s30 + $0x128] sm:$0xff] }
  0x1e   : > { %v240_v20 = vld [vmem:[%s1670_s30 + $0x140] sm:$0xff]  ;;  %237 = vst [vmem:[%s1678_s6 + $0x90] sm:$0xff] %v236_v18  ;;  %239 = vst [vmem:[%s1678_s6 + $0x98] sm:$0xff] %v238_v19  ;;  %v242_v21 = vld [vmem:[%s1670_s30 + $0x148] sm:$0xff] }
  0x1f   : > { %241 = vst [vmem:[%s1678_s6 + $0xa0] sm:$0xff] %v240_v20  ;;  %v244_v22 = vld [vmem:[%s1670_s30 + $0x160] sm:$0xff]  ;;  %v246_v23 = vld [vmem:[%s1670_s30 + $0x168] sm:$0xff]  ;;  %243 = vst [vmem:[%s1678_s6 + $0xa8] sm:$0xff] %v242_v21 }
  0x20   : > { %245 = vst [vmem:[%s1678_s6 + $0xb0] sm:$0xff] %v244_v22  ;;  %247 = vst [vmem:[%s1678_s6 + $0xb8] sm:$0xff] %v246_v23  ;;  %v248_v24 = vld [vmem:[%s1670_s30 + $0x180] sm:$0xff]  ;;  %v250_v25 = vld [vmem:[%s1670_s30 + $0x188] sm:$0xff] }
  0x21   : > { %v252_v26 = vld [vmem:[%s1670_s30 + $0x1a0] sm:$0xff]  ;;  %249 = vst [vmem:[%s1678_s6 + $0xc0] sm:$0xff] %v248_v24  ;;  %251 = vst [vmem:[%s1678_s6 + $0xc8] sm:$0xff] %v250_v25  ;;  %v254_v27 = vld [vmem:[%s1670_s30 + $0x1a8] sm:$0xff] }
  0x22   : > { %253 = vst [vmem:[%s1678_s6 + $0xd0] sm:$0xff] %v252_v26  ;;  %v256_v28 = vld [vmem:[%s1670_s30 + $0x1c0] sm:$0xff]  ;;  %v258_v29 = vld [vmem:[%s1670_s30 + $0x1c8] sm:$0xff]  ;;  %255 = vst [vmem:[%s1678_s6 + $0xd8] sm:$0xff] %v254_v27 }
  0x23   : > { %257 = vst [vmem:[%s1678_s6 + $0xe0] sm:$0xff] %v256_v28  ;;  %259 = vst [vmem:[%s1678_s6 + $0xe8] sm:$0xff] %v258_v29  ;;  %v260_v30 = vld [vmem:[%s1670_s30 + $0x1e0] sm:$0xff]  ;;  %v262_v31 = vld [vmem:[%s1670_s30 + $0x1e8] sm:$0xff] }
  0x24   : > { %v264_v32 = vld [vmem:[%s1670_s30 + $0x200] sm:$0xff]  ;;  %261 = vst [vmem:[%s1678_s6 + $0xf0] sm:$0xff] %v260_v30  ;;  %263 = vst [vmem:[%s1678_s6 + $0xf8] sm:$0xff] %v262_v31  ;;  %v266_v33 = vld [vmem:[%s1670_s30 + $0x208] sm:$0xff] }
  0x25   : > { %265 = vst [vmem:[%s1678_s6 + $0x100] sm:$0xff] %v264_v32  ;;  %v268_v34 = vld [vmem:[%s1670_s30 + $0x220] sm:$0xff]  ;;  %v270_v35 = vld [vmem:[%s1670_s30 + $0x228] sm:$0xff]  ;;  %267 = vst [vmem:[%s1678_s6 + $0x108] sm:$0xff] %v266_v33 }
  0x26   : > { %269 = vst [vmem:[%s1678_s6 + $0x110] sm:$0xff] %v268_v34  ;;  %271 = vst [vmem:[%s1678_s6 + $0x118] sm:$0xff] %v270_v35  ;;  %v272_v36 = vld [vmem:[%s1670_s30 + $0x240] sm:$0xff]  ;;  %v274_v37 = vld [vmem:[%s1670_s30 + $0x248] sm:$0xff] }
  0x27   : > { %v276_v38 = vld [vmem:[%s1670_s30 + $0x260] sm:$0xff]  ;;  %273 = vst [vmem:[%s1678_s6 + $0x120] sm:$0xff] %v272_v36  ;;  %275 = vst [vmem:[%s1678_s6 + $0x128] sm:$0xff] %v274_v37  ;;  %v278_v39 = vld [vmem:[%s1670_s30 + $0x268] sm:$0xff] }
  0x28   : > { %277 = vst [vmem:[%s1678_s6 + $0x130] sm:$0xff] %v276_v38  ;;  %v280_v40 = vld [vmem:[%s1670_s30 + $0x280] sm:$0xff]  ;;  %v282_v41 = vld [vmem:[%s1670_s30 + $0x288] sm:$0xff]  ;;  %279 = vst [vmem:[%s1678_s6 + $0x138] sm:$0xff] %v278_v39 }
  0x29   : > { %281 = vst [vmem:[%s1678_s6 + $0x140] sm:$0xff] %v280_v40  ;;  %283 = vst [vmem:[%s1678_s6 + $0x148] sm:$0xff] %v282_v41  ;;  %v284_v42 = vld [vmem:[%s1670_s30 + $0x2a0] sm:$0xff]  ;;  %v286_v43 = vld [vmem:[%s1670_s30 + $0x2a8] sm:$0xff] }
  0x2a   : > { %v288_v44 = vld [vmem:[%s1670_s30 + $0x2c0] sm:$0xff]  ;;  %285 = vst [vmem:[%s1678_s6 + $0x150] sm:$0xff] %v284_v42  ;;  %287 = vst [vmem:[%s1678_s6 + $0x158] sm:$0xff] %v286_v43  ;;  %v290_v45 = vld [vmem:[%s1670_s30 + $0x2c8] sm:$0xff] }
  0x2b   : > { %289 = vst [vmem:[%s1678_s6 + $0x160] sm:$0xff] %v288_v44  ;;  %v292_v46 = vld [vmem:[%s1670_s30 + $0x2e0] sm:$0xff]  ;;  %v294_v47 = vld [vmem:[%s1670_s30 + $0x2e8] sm:$0xff]  ;;  %291 = vst [vmem:[%s1678_s6 + $0x168] sm:$0xff] %v290_v45 }
  0x2c   : > { %293 = vst [vmem:[%s1678_s6 + $0x170] sm:$0xff] %v292_v46  ;;  %295 = vst [vmem:[%s1678_s6 + $0x178] sm:$0xff] %v294_v47  ;;  %v296_v48 = vld [vmem:[%s1670_s30 + $0x300] sm:$0xff]  ;;  %v298_v49 = vld [vmem:[%s1670_s30 + $0x308] sm:$0xff] }
  0x2d   : > { %v300_v50 = vld [vmem:[%s1670_s30 + $0x320] sm:$0xff]  ;;  %297 = vst [vmem:[%s1678_s6 + $0x180] sm:$0xff] %v296_v48  ;;  %299 = vst [vmem:[%s1678_s6 + $0x188] sm:$0xff] %v298_v49  ;;  %v302_v51 = vld [vmem:[%s1670_s30 + $0x328] sm:$0xff] }
  0x2e   : > { %301 = vst [vmem:[%s1678_s6 + $0x190] sm:$0xff] %v300_v50  ;;  %v304_v52 = vld [vmem:[%s1670_s30 + $0x340] sm:$0xff]  ;;  %v306_v53 = vld [vmem:[%s1670_s30 + $0x348] sm:$0xff]  ;;  %303 = vst [vmem:[%s1678_s6 + $0x198] sm:$0xff] %v302_v51 }
  0x2f   : > { %305 = vst [vmem:[%s1678_s6 + $0x1a0] sm:$0xff] %v304_v52  ;;  %307 = vst [vmem:[%s1678_s6 + $0x1a8] sm:$0xff] %v306_v53  ;;  %v308_v54 = vld [vmem:[%s1670_s30 + $0x360] sm:$0xff]  ;;  %v310_v55 = vld [vmem:[%s1670_s30 + $0x368] sm:$0xff] }
  0x30   : > { %v312_v56 = vld [vmem:[%s1670_s30 + $0x380] sm:$0xff]  ;;  %309 = vst [vmem:[%s1678_s6 + $0x1b0] sm:$0xff] %v308_v54  ;;  %311 = vst [vmem:[%s1678_s6 + $0x1b8] sm:$0xff] %v310_v55  ;;  %v314_v57 = vld [vmem:[%s1670_s30 + $0x388] sm:$0xff] }
  0x31   : > { %313 = vst [vmem:[%s1678_s6 + $0x1c0] sm:$0xff] %v312_v56  ;;  %v316_v58 = vld [vmem:[%s1670_s30 + $0x3a0] sm:$0xff]  ;;  %v318_v59 = vld [vmem:[%s1670_s30 + $0x3a8] sm:$0xff]  ;;  %315 = vst [vmem:[%s1678_s6 + $0x1c8] sm:$0xff] %v314_v57 }
  0x32   : > { %317 = vst [vmem:[%s1678_s6 + $0x1d0] sm:$0xff] %v316_v58  ;;  %319 = vst [vmem:[%s1678_s6 + $0x1d8] sm:$0xff] %v318_v59  ;;  %v320_v60 = vld [vmem:[%s1670_s30 + $0x3c0] sm:$0xff]  ;;  %v322_v61 = vld [vmem:[%s1670_s30 + $0x3c8] sm:$0xff] }
  0x33   : > { %v324_v62 = vld [vmem:[%s1670_s30 + $0x3e0] sm:$0xff]  ;;  %321 = vst [vmem:[%s1678_s6 + $0x1e0] sm:$0xff] %v320_v60  ;;  %323 = vst [vmem:[%s1678_s6 + $0x1e8] sm:$0xff] %v322_v61  ;;  %v326_v63 = vld [vmem:[%s1670_s30 + $0x3e8] sm:$0xff] }
  0x34   : > { %325 = vst [vmem:[%s1678_s6 + $0x1f0] sm:$0xff] %v324_v62  ;;  %v328_v0 = vld [vmem:[%s1670_s30 + $0x400] sm:$0xff]  ;;  %v330_v1 = vld [vmem:[%s1670_s30 + $0x408] sm:$0xff]  ;;  %327 = vst [vmem:[%s1678_s6 + $0x1f8] sm:$0xff] %v326_v63 }
  0x35   : > { %329 = vst [vmem:[%s1678_s6 + $0x200] sm:$0xff] %v328_v0  ;;  %331 = vst [vmem:[%s1678_s6 + $0x208] sm:$0xff] %v330_v1  ;;  %v332_v2 = vld [vmem:[%s1670_s30 + $0x420] sm:$0xff]  ;;  %v334_v3 = vld [vmem:[%s1670_s30 + $0x428] sm:$0xff] }
  0x36   : > { %v336_v4 = vld [vmem:[%s1670_s30 + $0x440] sm:$0xff]  ;;  %333 = vst [vmem:[%s1678_s6 + $0x210] sm:$0xff] %v332_v2  ;;  %335 = vst [vmem:[%s1678_s6 + $0x218] sm:$0xff] %v334_v3  ;;  %v338_v5 = vld [vmem:[%s1670_s30 + $0x448] sm:$0xff] }
  0x37   : > { %337 = vst [vmem:[%s1678_s6 + $0x220] sm:$0xff] %v336_v4  ;;  %v340_v6 = vld [vmem:[%s1670_s30 + $0x460] sm:$0xff]  ;;  %v342_v7 = vld [vmem:[%s1670_s30 + $0x468] sm:$0xff]  ;;  %339 = vst [vmem:[%s1678_s6 + $0x228] sm:$0xff] %v338_v5 }
  0x38   : > { %341 = vst [vmem:[%s1678_s6 + $0x230] sm:$0xff] %v340_v6  ;;  %343 = vst [vmem:[%s1678_s6 + $0x238] sm:$0xff] %v342_v7  ;;  %v344_v8 = vld [vmem:[%s1670_s30 + $0x480] sm:$0xff]  ;;  %v346_v9 = vld [vmem:[%s1670_s30 + $0x488] sm:$0xff] }
  0x39   : > { %v348_v10 = vld [vmem:[%s1670_s30 + $0x4a0] sm:$0xff]  ;;  %345 = vst [vmem:[%s1678_s6 + $0x240] sm:$0xff] %v344_v8  ;;  %347 = vst [vmem:[%s1678_s6 + $0x248] sm:$0xff] %v346_v9  ;;  %v350_v11 = vld [vmem:[%s1670_s30 + $0x4a8] sm:$0xff] }
  0x3a   : > { %349 = vst [vmem:[%s1678_s6 + $0x250] sm:$0xff] %v348_v10  ;;  %v352_v12 = vld [vmem:[%s1670_s30 + $0x4c0] sm:$0xff]  ;;  %v354_v13 = vld [vmem:[%s1670_s30 + $0x4c8] sm:$0xff]  ;;  %351 = vst [vmem:[%s1678_s6 + $0x258] sm:$0xff] %v350_v11 }
  0x3b   : > { %353 = vst [vmem:[%s1678_s6 + $0x260] sm:$0xff] %v352_v12  ;;  %355 = vst [vmem:[%s1678_s6 + $0x268] sm:$0xff] %v354_v13  ;;  %v356_v14 = vld [vmem:[%s1670_s30 + $0x4e0] sm:$0xff]  ;;  %v358_v15 = vld [vmem:[%s1670_s30 + $0x4e8] sm:$0xff] }
  0x3c   : > { %v360_v16 = vld [vmem:[%s1670_s30 + $0x500] sm:$0xff]  ;;  %357 = vst [vmem:[%s1678_s6 + $0x270] sm:$0xff] %v356_v14  ;;  %359 = vst [vmem:[%s1678_s6 + $0x278] sm:$0xff] %v358_v15  ;;  %v362_v17 = vld [vmem:[%s1670_s30 + $0x508] sm:$0xff] }
  0x3d   : > { %361 = vst [vmem:[%s1678_s6 + $0x280] sm:$0xff] %v360_v16  ;;  %v364_v18 = vld [vmem:[%s1670_s30 + $0x520] sm:$0xff]  ;;  %v366_v19 = vld [vmem:[%s1670_s30 + $0x528] sm:$0xff]  ;;  %363 = vst [vmem:[%s1678_s6 + $0x288] sm:$0xff] %v362_v17 }
  0x3e   : > { %365 = vst [vmem:[%s1678_s6 + $0x290] sm:$0xff] %v364_v18  ;;  %367 = vst [vmem:[%s1678_s6 + $0x298] sm:$0xff] %v366_v19  ;;  %v368_v20 = vld [vmem:[%s1670_s30 + $0x540] sm:$0xff]  ;;  %v370_v21 = vld [vmem:[%s1670_s30 + $0x548] sm:$0xff] }
  0x3f   : > { %v372_v22 = vld [vmem:[%s1670_s30 + $0x560] sm:$0xff]  ;;  %369 = vst [vmem:[%s1678_s6 + $0x2a0] sm:$0xff] %v368_v20  ;;  %371 = vst [vmem:[%s1678_s6 + $0x2a8] sm:$0xff] %v370_v21  ;;  %v374_v23 = vld [vmem:[%s1670_s30 + $0x568] sm:$0xff] }
  0x40   : > { %373 = vst [vmem:[%s1678_s6 + $0x2b0] sm:$0xff] %v372_v22  ;;  %v376_v24 = vld [vmem:[%s1670_s30 + $0x580] sm:$0xff]  ;;  %v378_v25 = vld [vmem:[%s1670_s30 + $0x588] sm:$0xff]  ;;  %375 = vst [vmem:[%s1678_s6 + $0x2b8] sm:$0xff] %v374_v23 }
  0x41   : > { %377 = vst [vmem:[%s1678_s6 + $0x2c0] sm:$0xff] %v376_v24  ;;  %379 = vst [vmem:[%s1678_s6 + $0x2c8] sm:$0xff] %v378_v25  ;;  %v380_v26 = vld [vmem:[%s1670_s30 + $0x5a0] sm:$0xff]  ;;  %v382_v27 = vld [vmem:[%s1670_s30 + $0x5a8] sm:$0xff] }
  0x42   : > { %v384_v28 = vld [vmem:[%s1670_s30 + $0x5c0] sm:$0xff]  ;;  %381 = vst [vmem:[%s1678_s6 + $0x2d0] sm:$0xff] %v380_v26  ;;  %383 = vst [vmem:[%s1678_s6 + $0x2d8] sm:$0xff] %v382_v27  ;;  %v386_v29 = vld [vmem:[%s1670_s30 + $0x5c8] sm:$0xff] }
  0x43   : > { %385 = vst [vmem:[%s1678_s6 + $0x2e0] sm:$0xff] %v384_v28  ;;  %v388_v30 = vld [vmem:[%s1670_s30 + $0x5e0] sm:$0xff]  ;;  %v390_v31 = vld [vmem:[%s1670_s30 + $0x5e8] sm:$0xff]  ;;  %387 = vst [vmem:[%s1678_s6 + $0x2e8] sm:$0xff] %v386_v29 }
  0x44   : > { %389 = vst [vmem:[%s1678_s6 + $0x2f0] sm:$0xff] %v388_v30  ;;  %391 = vst [vmem:[%s1678_s6 + $0x2f8] sm:$0xff] %v390_v31  ;;  %v392_v32 = vld [vmem:[%s1670_s30 + $0x600] sm:$0xff]  ;;  %v394_v33 = vld [vmem:[%s1670_s30 + $0x608] sm:$0xff] }
  0x45   : > { %v396_v34 = vld [vmem:[%s1670_s30 + $0x620] sm:$0xff]  ;;  %393 = vst [vmem:[%s1678_s6 + $0x300] sm:$0xff] %v392_v32  ;;  %395 = vst [vmem:[%s1678_s6 + $0x308] sm:$0xff] %v394_v33  ;;  %v398_v35 = vld [vmem:[%s1670_s30 + $0x628] sm:$0xff] }
  0x46   : > { %397 = vst [vmem:[%s1678_s6 + $0x310] sm:$0xff] %v396_v34  ;;  %v400_v36 = vld [vmem:[%s1670_s30 + $0x640] sm:$0xff]  ;;  %v402_v37 = vld [vmem:[%s1670_s30 + $0x648] sm:$0xff]  ;;  %399 = vst [vmem:[%s1678_s6 + $0x318] sm:$0xff] %v398_v35 }
  0x47   : > { %401 = vst [vmem:[%s1678_s6 + $0x320] sm:$0xff] %v400_v36  ;;  %403 = vst [vmem:[%s1678_s6 + $0x328] sm:$0xff] %v402_v37  ;;  %v404_v38 = vld [vmem:[%s1670_s30 + $0x660] sm:$0xff]  ;;  %v406_v39 = vld [vmem:[%s1670_s30 + $0x668] sm:$0xff] }
  0x48   : > { %v408_v40 = vld [vmem:[%s1670_s30 + $0x680] sm:$0xff]  ;;  %405 = vst [vmem:[%s1678_s6 + $0x330] sm:$0xff] %v404_v38  ;;  %407 = vst [vmem:[%s1678_s6 + $0x338] sm:$0xff] %v406_v39  ;;  %v410_v41 = vld [vmem:[%s1670_s30 + $0x688] sm:$0xff] }
  0x49   : > { %409 = vst [vmem:[%s1678_s6 + $0x340] sm:$0xff] %v408_v40  ;;  %v412_v42 = vld [vmem:[%s1670_s30 + $0x6a0] sm:$0xff]  ;;  %v414_v43 = vld [vmem:[%s1670_s30 + $0x6a8] sm:$0xff]  ;;  %411 = vst [vmem:[%s1678_s6 + $0x348] sm:$0xff] %v410_v41 }
  0x4a   : > { %413 = vst [vmem:[%s1678_s6 + $0x350] sm:$0xff] %v412_v42  ;;  %415 = vst [vmem:[%s1678_s6 + $0x358] sm:$0xff] %v414_v43  ;;  %v416_v44 = vld [vmem:[%s1670_s30 + $0x6c0] sm:$0xff]  ;;  %v418_v45 = vld [vmem:[%s1670_s30 + $0x6c8] sm:$0xff] }
  0x4b   : > { %v420_v46 = vld [vmem:[%s1670_s30 + $0x6e0] sm:$0xff]  ;;  %417 = vst [vmem:[%s1678_s6 + $0x360] sm:$0xff] %v416_v44  ;;  %419 = vst [vmem:[%s1678_s6 + $0x368] sm:$0xff] %v418_v45  ;;  %v422_v47 = vld [vmem:[%s1670_s30 + $0x6e8] sm:$0xff] }
  0x4c   : > { %421 = vst [vmem:[%s1678_s6 + $0x370] sm:$0xff] %v420_v46  ;;  %v424_v48 = vld [vmem:[%s1670_s30 + $0x700] sm:$0xff]  ;;  %v426_v49 = vld [vmem:[%s1670_s30 + $0x708] sm:$0xff]  ;;  %423 = vst [vmem:[%s1678_s6 + $0x378] sm:$0xff] %v422_v47 }
  0x4d   : > { %425 = vst [vmem:[%s1678_s6 + $0x380] sm:$0xff] %v424_v48  ;;  %427 = vst [vmem:[%s1678_s6 + $0x388] sm:$0xff] %v426_v49  ;;  %v428_v50 = vld [vmem:[%s1670_s30 + $0x720] sm:$0xff]  ;;  %v430_v51 = vld [vmem:[%s1670_s30 + $0x728] sm:$0xff] }
  0x4e   : > { %v432_v52 = vld [vmem:[%s1670_s30 + $0x740] sm:$0xff]  ;;  %429 = vst [vmem:[%s1678_s6 + $0x390] sm:$0xff] %v428_v50  ;;  %431 = vst [vmem:[%s1678_s6 + $0x398] sm:$0xff] %v430_v51  ;;  %v434_v53 = vld [vmem:[%s1670_s30 + $0x748] sm:$0xff] }
  0x4f   : > { %433 = vst [vmem:[%s1678_s6 + $0x3a0] sm:$0xff] %v432_v52  ;;  %v436_v54 = vld [vmem:[%s1670_s30 + $0x760] sm:$0xff]  ;;  %v438_v55 = vld [vmem:[%s1670_s30 + $0x768] sm:$0xff]  ;;  %435 = vst [vmem:[%s1678_s6 + $0x3a8] sm:$0xff] %v434_v53 }
  0x50   : > { %437 = vst [vmem:[%s1678_s6 + $0x3b0] sm:$0xff] %v436_v54  ;;  %439 = vst [vmem:[%s1678_s6 + $0x3b8] sm:$0xff] %v438_v55  ;;  %v440_v56 = vld [vmem:[%s1670_s30 + $0x780] sm:$0xff]  ;;  %v442_v57 = vld [vmem:[%s1670_s30 + $0x788] sm:$0xff] }
  0x51   : > { %v444_v58 = vld [vmem:[%s1670_s30 + $0x7a0] sm:$0xff]  ;;  %441 = vst [vmem:[%s1678_s6 + $0x3c0] sm:$0xff] %v440_v56  ;;  %443 = vst [vmem:[%s1678_s6 + $0x3c8] sm:$0xff] %v442_v57  ;;  %v446_v59 = vld [vmem:[%s1670_s30 + $0x7a8] sm:$0xff] }
  0x52   : > { %445 = vst [vmem:[%s1678_s6 + $0x3d0] sm:$0xff] %v444_v58  ;;  %v448_v60 = vld [vmem:[%s1670_s30 + $0x7c0] sm:$0xff]  ;;  %v450_v61 = vld [vmem:[%s1670_s30 + $0x7c8] sm:$0xff]  ;;  %447 = vst [vmem:[%s1678_s6 + $0x3d8] sm:$0xff] %v446_v59 }
  0x53   : > { %449 = vst [vmem:[%s1678_s6 + $0x3e0] sm:$0xff] %v448_v60  ;;  %451 = vst [vmem:[%s1678_s6 + $0x3e8] sm:$0xff] %v450_v61  ;;  %v452_v62 = vld [vmem:[%s1670_s30 + $0x7e0] sm:$0xff]  ;;  %v454_v63 = vld [vmem:[%s1670_s30 + $0x7e8] sm:$0xff] }
  0x54   : > { %v456_v0 = vld [vmem:[%s1670_s30 + $0x800] sm:$0xff]  ;;  %453 = vst [vmem:[%s1678_s6 + $0x3f0] sm:$0xff] %v452_v62  ;;  %455 = vst [vmem:[%s1678_s6 + $0x3f8] sm:$0xff] %v454_v63  ;;  %v458_v1 = vld [vmem:[%s1670_s30 + $0x808] sm:$0xff] }
  0x55   : > { %457 = vst [vmem:[%s1678_s6 + $0x400] sm:$0xff] %v456_v0  ;;  %v460_v2 = vld [vmem:[%s1670_s30 + $0x820] sm:$0xff]  ;;  %v462_v3 = vld [vmem:[%s1670_s30 + $0x828] sm:$0xff]  ;;  %459 = vst [vmem:[%s1678_s6 + $0x408] sm:$0xff] %v458_v1 }
  0x56   : > { %461 = vst [vmem:[%s1678_s6 + $0x410] sm:$0xff] %v460_v2  ;;  %463 = vst [vmem:[%s1678_s6 + $0x418] sm:$0xff] %v462_v3  ;;  %v464_v4 = vld [vmem:[%s1670_s30 + $0x840] sm:$0xff]  ;;  %v466_v5 = vld [vmem:[%s1670_s30 + $0x848] sm:$0xff] }
  0x57   : > { %v468_v6 = vld [vmem:[%s1670_s30 + $0x860] sm:$0xff]  ;;  %465 = vst [vmem:[%s1678_s6 + $0x420] sm:$0xff] %v464_v4  ;;  %467 = vst [vmem:[%s1678_s6 + $0x428] sm:$0xff] %v466_v5  ;;  %v470_v7 = vld [vmem:[%s1670_s30 + $0x868] sm:$0xff] }
  0x58   : > { %469 = vst [vmem:[%s1678_s6 + $0x430] sm:$0xff] %v468_v6  ;;  %v472_v8 = vld [vmem:[%s1670_s30 + $0x880] sm:$0xff]  ;;  %v474_v9 = vld [vmem:[%s1670_s30 + $0x888] sm:$0xff]  ;;  %471 = vst [vmem:[%s1678_s6 + $0x438] sm:$0xff] %v470_v7 }
  0x59   : > { %473 = vst [vmem:[%s1678_s6 + $0x440] sm:$0xff] %v472_v8  ;;  %475 = vst [vmem:[%s1678_s6 + $0x448] sm:$0xff] %v474_v9  ;;  %v476_v10 = vld [vmem:[%s1670_s30 + $0x8a0] sm:$0xff]  ;;  %v478_v11 = vld [vmem:[%s1670_s30 + $0x8a8] sm:$0xff] }
  0x5a   : > { %v480_v12 = vld [vmem:[%s1670_s30 + $0x8c0] sm:$0xff]  ;;  %477 = vst [vmem:[%s1678_s6 + $0x450] sm:$0xff] %v476_v10  ;;  %479 = vst [vmem:[%s1678_s6 + $0x458] sm:$0xff] %v478_v11  ;;  %v482_v13 = vld [vmem:[%s1670_s30 + $0x8c8] sm:$0xff] }
  0x5b   : > { %481 = vst [vmem:[%s1678_s6 + $0x460] sm:$0xff] %v480_v12  ;;  %v484_v14 = vld [vmem:[%s1670_s30 + $0x8e0] sm:$0xff]  ;;  %v486_v15 = vld [vmem:[%s1670_s30 + $0x8e8] sm:$0xff]  ;;  %483 = vst [vmem:[%s1678_s6 + $0x468] sm:$0xff] %v482_v13 }
  0x5c   : > { %485 = vst [vmem:[%s1678_s6 + $0x470] sm:$0xff] %v484_v14  ;;  %487 = vst [vmem:[%s1678_s6 + $0x478] sm:$0xff] %v486_v15  ;;  %v488_v16 = vld [vmem:[%s1670_s30 + $0x900] sm:$0xff]  ;;  %v490_v17 = vld [vmem:[%s1670_s30 + $0x908] sm:$0xff] }
  0x5d   : > { %v492_v18 = vld [vmem:[%s1670_s30 + $0x920] sm:$0xff]  ;;  %489 = vst [vmem:[%s1678_s6 + $0x480] sm:$0xff] %v488_v16  ;;  %491 = vst [vmem:[%s1678_s6 + $0x488] sm:$0xff] %v490_v17  ;;  %v494_v19 = vld [vmem:[%s1670_s30 + $0x928] sm:$0xff] }
  0x5e   : > { %493 = vst [vmem:[%s1678_s6 + $0x490] sm:$0xff] %v492_v18  ;;  %v496_v20 = vld [vmem:[%s1670_s30 + $0x940] sm:$0xff]  ;;  %v498_v21 = vld [vmem:[%s1670_s30 + $0x948] sm:$0xff]  ;;  %495 = vst [vmem:[%s1678_s6 + $0x498] sm:$0xff] %v494_v19 }
  0x5f   : > { %497 = vst [vmem:[%s1678_s6 + $0x4a0] sm:$0xff] %v496_v20  ;;  %499 = vst [vmem:[%s1678_s6 + $0x4a8] sm:$0xff] %v498_v21  ;;  %v500_v22 = vld [vmem:[%s1670_s30 + $0x960] sm:$0xff]  ;;  %v502_v23 = vld [vmem:[%s1670_s30 + $0x968] sm:$0xff] }
  0x60   : > { %v504_v24 = vld [vmem:[%s1670_s30 + $0x980] sm:$0xff]  ;;  %501 = vst [vmem:[%s1678_s6 + $0x4b0] sm:$0xff] %v500_v22  ;;  %503 = vst [vmem:[%s1678_s6 + $0x4b8] sm:$0xff] %v502_v23  ;;  %v506_v25 = vld [vmem:[%s1670_s30 + $0x988] sm:$0xff] }
  0x61   : > { %505 = vst [vmem:[%s1678_s6 + $0x4c0] sm:$0xff] %v504_v24  ;;  %507 = vst [vmem:[%s1678_s6 + $0x4c8] sm:$0xff] %v506_v25 }
  0x62 PF: > { %p1311_p7 = scmp.ge.s32.totalorder %s1596_s20, 1  ;;  %p512_p8 = scmp.lt.s32.totalorder %s1596_s20, 3 }
  0x64   : > { %p513_p9 = pnand %p1311_p7, %p512_p8 }
  0x65   : > { %s519_s7 = sand.u32 (!%p513_p9), 1, %s1588_s18   ;;  %v548_v26 = vld [vmem:[%s2368_s1 + $0x8] sm:$0xff] (!%p513_p9)  ;;  %v550_v27 = vld [vmem:[%s2368_s1 + $0x18] sm:$0xff] (!%p513_p9)  ;;  %v1598_v28 = vmov (!%p513_p9), 0   ;;  %vm814_vm0 = vcmask (!%p513_p9), 1043456   ;;  %vm789_vm1 = vcmask (!%p513_p9), 818176  }
  0x66   : > { %516 = sbr.rel (%p513_p9) target bundleno = 444 (0x1bc), region = 59  ;;  %885 = vmatprep.mubr.f32.mxu1 (!%p513_p9), %v548_v26  ;;  %998 = vmatprep.mubr.f32.mxu0 (!%p513_p9), %v550_v27  ;;  %s1312_s14 = sshll.u32 (!%p513_p9), %s519_s7, 7 }
  0x67   : > { %s1545_s12 = smul.u32 (!%p513_p9), 1232, %s519_s7  ;;  %1572 = vset.pattern.permute.xlu0 (!%p513_p9), %v1598_v28  ;;  %1573 = vset.pattern.permute.xlu1 (!%p513_p9), %v1598_v28  ;;  %s2311_s18 = scalar_lea.vmem (!%p513_p9), [#allocation3], %s1312_s14 }
  0x69   : > { %s1993_s13 = scalar_lea.vmem (!%p513_p9), [#allocation2], %s1545_s12 }
  0x6a   : > { %v588_v29 = vld [vmem:[%s1993_s13 + $0x8] sm:$0xff] (!%p513_p9)  ;;  %v590_v30 = vld [vmem:[%s1993_s13 + $0x18] sm:$0xff] (!%p513_p9)  ;;  %v587_v34 = vld [vmem:[%s1993_s13] sm:$0xff] (!%p513_p9) }
  0x6b   : > { %v652_v31 = vld [vmem:[%s1993_s13 + $0x208] sm:$0xff] (!%p513_p9)  ;;  %v1330_v32 = vpack.c.bf16 (!%p513_p9), %v590_v30, %v588_v29  ;;  %v654_v33 = vld [vmem:[%s1993_s13 + $0x218] sm:$0xff] (!%p513_p9)  ;;  %v589_v35 = vld [vmem:[%s1993_s13 + $0x10] sm:$0xff] (!%p513_p9) }
  0x6c   : > { %v1394_v36 = vpack.c.bf16 (!%p513_p9), %v654_v33, %v652_v31  ;;  %v1332_v37 = vpack.c.bf16 (!%p513_p9), %v589_v35, %v587_v34  ;;  %v651_v38 = vld [vmem:[%s1993_s13 + $0x200] sm:$0xff] (!%p513_p9)  ;;  %v653_v39 = vld [vmem:[%s1993_s13 + $0x210] sm:$0xff] (!%p513_p9)  ;;  %v592_v40 = vld [vmem:[%s1993_s13 + $0x28] sm:$0xff] (!%p513_p9) }
  0x6d   : > { %1331 = vmatprep.subr.bf16.mxu1 %v1330_v32  ;;  %v1396_v41 = vpack.c.bf16 %v653_v39, %v651_v38  ;;  %v594_v42 = vld [vmem:[%s1993_s13 + $0x38] sm:$0xff]  ;;  %v656_v43 = vld [vmem:[%s1993_s13 + $0x228] sm:$0xff]  ;;  %v591_v47 = vld [vmem:[%s1993_s13 + $0x20] sm:$0xff]  ;;  %s1329_s7 = sshll.u32 (%p1660_p5), %s1305_s3, 4 }
  0x6e   : > { %v658_v44 = vld [vmem:[%s1993_s13 + $0x238] sm:$0xff]  ;;  %1395 = vmatprep.subr.bf16.mxu0 %v1394_v36  ;;  %1333 = vmatpush1.bf16.msra.mxu1 %v1332_v37  ;;  %v1334_v45 = vpack.c.bf16 %v594_v42, %v592_v40  ;;  %v593_v48 = vld [vmem:[%s1993_s13 + $0x30] sm:$0xff]  ;;  %v655_v49 = vld [vmem:[%s1993_s13 + $0x220] sm:$0xff]  ;;  %s1201_s24 = scalar_lea.vmem (%p1660_p5), %s2372_s5, %s1329_s7 }
  0x6f   : > { %v1398_v46 = vpack.c.bf16 %v658_v44, %v656_v43  ;;  %1397 = vmatpush1.bf16.msra.mxu0 %v1396_v41  ;;  %v1336_v50 = vpack.c.bf16 %v593_v48, %v591_v47  ;;  %v657_v51 = vld [vmem:[%s1993_s13 + $0x230] sm:$0xff]  ;;  %v596_v52 = vld [vmem:[%s1993_s13 + $0x48] sm:$0xff]  ;;  %v598_v53 = vld [vmem:[%s1993_s13 + $0x58] sm:$0xff] }
  0x70   : > { %1335 = vmatprep.subr.bf16.mxu1 %v1334_v45  ;;  %v1400_v54 = vpack.c.bf16 %v657_v51, %v655_v49  ;;  %v1338_v55 = vpack.c.bf16 %v598_v53, %v596_v52  ;;  %v660_v56 = vld [vmem:[%s1993_s13 + $0x248] sm:$0xff]  ;;  %v662_v57 = vld [vmem:[%s1993_s13 + $0x258] sm:$0xff]  ;;  %v595_v58 = vld [vmem:[%s1993_s13 + $0x40] sm:$0xff] }
  0x71   : > { %1399 = vmatprep.subr.bf16.mxu0 %v1398_v46  ;;  %v1402_v59 = vpack.c.bf16 %v662_v57, %v660_v56  ;;  %v597_v60 = vld [vmem:[%s1993_s13 + $0x50] sm:$0xff]  ;;  %v659_v61 = vld [vmem:[%s1993_s13 + $0x240] sm:$0xff]  ;;  %v600_v0 = vld [vmem:[%s1993_s13 + $0x68] sm:$0xff] }
  0x72   : > { %v661_v62 = vld [vmem:[%s1993_s13 + $0x250] sm:$0xff]  ;;  %1337 = vmatpush1.bf16.msra.mxu1 %v1336_v50  ;;  %v1340_v63 = vpack.c.bf16 %v597_v60, %v595_v58  ;;  %v602_v1 = vld [vmem:[%s1993_s13 + $0x78] sm:$0xff]  ;;  %v664_v2 = vld [vmem:[%s1993_s13 + $0x268] sm:$0xff] }
  0x73   : > { %1401 = vmatpush1.bf16.msra.mxu0 %v1400_v54  ;;  %1339 = vmatprep.subr.bf16.mxu1 %v1338_v55  ;;  %v1404_v3 = vpack.c.bf16 %v661_v62, %v659_v61  ;;  %v1342_v4 = vpack.c.bf16 %v602_v1, %v600_v0  ;;  %v666_v5 = vld [vmem:[%s1993_s13 + $0x278] sm:$0xff]  ;;  %v599_v6 = vld [vmem:[%s1993_s13 + $0x60] sm:$0xff]  ;;  %v601_v7 = vld [vmem:[%s1993_s13 + $0x70] sm:$0xff] }
  0x74   : > { %1403 = vmatprep.subr.bf16.mxu0 %v1402_v59  ;;  %v1406_v8 = vpack.c.bf16 %v666_v5, %v664_v2  ;;  %v663_v9 = vld [vmem:[%s1993_s13 + $0x260] sm:$0xff]  ;;  %v665_v10 = vld [vmem:[%s1993_s13 + $0x270] sm:$0xff]  ;;  %v604_v11 = vld [vmem:[%s1993_s13 + $0x88] sm:$0xff]  ;;  %v1344_v15 = vpack.c.bf16 %v601_v7, %v599_v6 }
  0x75   : > { %v606_v12 = vld [vmem:[%s1993_s13 + $0x98] sm:$0xff]  ;;  %v668_v13 = vld [vmem:[%s1993_s13 + $0x288] sm:$0xff]  ;;  %v1408_v16 = vpack.c.bf16 %v665_v10, %v663_v9  ;;  %v603_v18 = vld [vmem:[%s1993_s13 + $0x80] sm:$0xff] }
  0x76   : > { %v670_v14 = vld [vmem:[%s1993_s13 + $0x298] sm:$0xff]  ;;  %1341 = vmatpush1.bf16.msra.mxu1 %v1340_v63  ;;  %v1346_v17 = vpack.c.bf16 %v606_v12, %v604_v11  ;;  %v605_v19 = vld [vmem:[%s1993_s13 + $0x90] sm:$0xff]  ;;  %v667_v20 = vld [vmem:[%s1993_s13 + $0x280] sm:$0xff] }
  0x77   : > { %1405 = vmatpush1.bf16.msra.mxu0 %v1404_v3  ;;  %1343 = vmatprep.subr.bf16.mxu1 %v1342_v4  ;;  %v1410_v21 = vpack.c.bf16 %v670_v14, %v668_v13  ;;  %v669_v22 = vld [vmem:[%s1993_s13 + $0x290] sm:$0xff]  ;;  %v608_v23 = vld [vmem:[%s1993_s13 + $0xa8] sm:$0xff]  ;;  %v610_v24 = vld [vmem:[%s1993_s13 + $0xb8] sm:$0xff]  ;;  %v1348_v27 = vpack.c.bf16 %v605_v19, %v603_v18 }
  0x78   : > { %1407 = vmatprep.subr.bf16.mxu0 %v1406_v8  ;;  %v672_v25 = vld [vmem:[%s1993_s13 + $0x2a8] sm:$0xff]  ;;  %v674_v26 = vld [vmem:[%s1993_s13 + $0x2b8] sm:$0xff]  ;;  %v1412_v28 = vpack.c.bf16 %v669_v22, %v667_v20  ;;  %v1350_v29 = vpack.c.bf16 %v610_v24, %v608_v23  ;;  %v607_v30 = vld [vmem:[%s1993_s13 + $0xa0] sm:$0xff] }
  0x79   : > { %v609_v31 = vld [vmem:[%s1993_s13 + $0xb0] sm:$0xff]  ;;  %v671_v32 = vld [vmem:[%s1993_s13 + $0x2a0] sm:$0xff]  ;;  %v1414_v33 = vpack.c.bf16 %v674_v26, %v672_v25  ;;  %v612_v35 = vld [vmem:[%s1993_s13 + $0xc8] sm:$0xff] }
  0x7a   : > { %1345 = vmatpush1.bf16.msra.mxu1 %v1344_v15  ;;  %v673_v34 = vld [vmem:[%s1993_s13 + $0x2b0] sm:$0xff]  ;;  %v614_v36 = vld [vmem:[%s1993_s13 + $0xd8] sm:$0xff]  ;;  %v676_v37 = vld [vmem:[%s1993_s13 + $0x2c8] sm:$0xff]  ;;  %v1352_v39 = vpack.c.bf16 %v609_v31, %v607_v30 }
  0x7b   : > { %1409 = vmatpush1.bf16.msra.mxu0 %v1408_v16  ;;  %1347 = vmatprep.subr.bf16.mxu1 %v1346_v17  ;;  %v678_v38 = vld [vmem:[%s1993_s13 + $0x2d8] sm:$0xff]  ;;  %v1416_v40 = vpack.c.bf16 %v673_v34, %v671_v32  ;;  %v1354_v41 = vpack.c.bf16 %v614_v36, %v612_v35  ;;  %v611_v42 = vld [vmem:[%s1993_s13 + $0xc0] sm:$0xff]  ;;  %v613_v43 = vld [vmem:[%s1993_s13 + $0xd0] sm:$0xff] }
  0x7c   : > { %1411 = vmatprep.subr.bf16.mxu0 %v1410_v21  ;;  %v675_v44 = vld [vmem:[%s1993_s13 + $0x2c0] sm:$0xff]  ;;  %v1418_v45 = vpack.c.bf16 %v678_v38, %v676_v37  ;;  %v677_v46 = vld [vmem:[%s1993_s13 + $0x2d0] sm:$0xff]  ;;  %v616_v47 = vld [vmem:[%s1993_s13 + $0xe8] sm:$0xff]  ;;  %v1356_v51 = vpack.c.bf16 %v613_v43, %v611_v42 }
  0x7d   : > { %v618_v48 = vld [vmem:[%s1993_s13 + $0xf8] sm:$0xff]  ;;  %v680_v49 = vld [vmem:[%s1993_s13 + $0x2e8] sm:$0xff]  ;;  %v1420_v52 = vpack.c.bf16 %v677_v46, %v675_v44  ;;  %v615_v54 = vld [vmem:[%s1993_s13 + $0xe0] sm:$0xff] }
  0x7e   : > { %1349 = vmatpush1.bf16.msra.mxu1 %v1348_v27  ;;  %v682_v50 = vld [vmem:[%s1993_s13 + $0x2f8] sm:$0xff]  ;;  %v1358_v53 = vpack.c.bf16 %v618_v48, %v616_v47  ;;  %v617_v55 = vld [vmem:[%s1993_s13 + $0xf0] sm:$0xff]  ;;  %v679_v56 = vld [vmem:[%s1993_s13 + $0x2e0] sm:$0xff] }
  0x7f   : > { %1413 = vmatpush1.bf16.msra.mxu0 %v1412_v28  ;;  %1351 = vmatprep.subr.bf16.mxu1 %v1350_v29  ;;  %v1422_v57 = vpack.c.bf16 %v682_v50, %v680_v49  ;;  %v681_v58 = vld [vmem:[%s1993_s13 + $0x2f0] sm:$0xff]  ;;  %v620_v59 = vld [vmem:[%s1993_s13 + $0x108] sm:$0xff]  ;;  %v622_v60 = vld [vmem:[%s1993_s13 + $0x118] sm:$0xff]  ;;  %v1360_v63 = vpack.c.bf16 %v617_v55, %v615_v54 }
  0x80   : > { %1415 = vmatprep.subr.bf16.mxu0 %v1414_v33  ;;  %v684_v61 = vld [vmem:[%s1993_s13 + $0x308] sm:$0xff]  ;;  %v686_v62 = vld [vmem:[%s1993_s13 + $0x318] sm:$0xff]  ;;  %v1424_v0 = vpack.c.bf16 %v681_v58, %v679_v56  ;;  %v1362_v1 = vpack.c.bf16 %v622_v60, %v620_v59  ;;  %v619_v2 = vld [vmem:[%s1993_s13 + $0x100] sm:$0xff] }
  0x81   : > { %v621_v3 = vld [vmem:[%s1993_s13 + $0x110] sm:$0xff]  ;;  %v683_v4 = vld [vmem:[%s1993_s13 + $0x300] sm:$0xff]  ;;  %v1426_v5 = vpack.c.bf16 %v686_v62, %v684_v61  ;;  %v624_v7 = vld [vmem:[%s1993_s13 + $0x128] sm:$0xff] }
  0x82   : > { %1353 = vmatpush1.bf16.msra.mxu1 %v1352_v39  ;;  %v685_v6 = vld [vmem:[%s1993_s13 + $0x310] sm:$0xff]  ;;  %v626_v8 = vld [vmem:[%s1993_s13 + $0x138] sm:$0xff]  ;;  %v688_v9 = vld [vmem:[%s1993_s13 + $0x328] sm:$0xff]  ;;  %v1364_v11 = vpack.c.bf16 %v621_v3, %v619_v2 }
  0x83   : > { %1417 = vmatpush1.bf16.msra.mxu0 %v1416_v40  ;;  %1355 = vmatprep.subr.bf16.mxu1 %v1354_v41  ;;  %v690_v10 = vld [vmem:[%s1993_s13 + $0x338] sm:$0xff]  ;;  %v1428_v12 = vpack.c.bf16 %v685_v6, %v683_v4  ;;  %v1366_v13 = vpack.c.bf16 %v626_v8, %v624_v7  ;;  %v623_v14 = vld [vmem:[%s1993_s13 + $0x120] sm:$0xff]  ;;  %v625_v15 = vld [vmem:[%s1993_s13 + $0x130] sm:$0xff] }
  0x84   : > { %1419 = vmatprep.subr.bf16.mxu0 %v1418_v45  ;;  %v687_v16 = vld [vmem:[%s1993_s13 + $0x320] sm:$0xff]  ;;  %v1430_v17 = vpack.c.bf16 %v690_v10, %v688_v9  ;;  %v689_v18 = vld [vmem:[%s1993_s13 + $0x330] sm:$0xff]  ;;  %v628_v19 = vld [vmem:[%s1993_s13 + $0x148] sm:$0xff]  ;;  %v1368_v23 = vpack.c.bf16 %v625_v15, %v623_v14 }
  0x85   : > { %v630_v20 = vld [vmem:[%s1993_s13 + $0x158] sm:$0xff]  ;;  %v692_v21 = vld [vmem:[%s1993_s13 + $0x348] sm:$0xff]  ;;  %v1432_v24 = vpack.c.bf16 %v689_v18, %v687_v16  ;;  %v627_v26 = vld [vmem:[%s1993_s13 + $0x140] sm:$0xff] }
  0x86   : > { %1357 = vmatpush1.bf16.msra.mxu1 %v1356_v51  ;;  %v694_v22 = vld [vmem:[%s1993_s13 + $0x358] sm:$0xff]  ;;  %v1370_v25 = vpack.c.bf16 %v630_v20, %v628_v19  ;;  %v629_v27 = vld [vmem:[%s1993_s13 + $0x150] sm:$0xff]  ;;  %v691_v28 = vld [vmem:[%s1993_s13 + $0x340] sm:$0xff] }
  0x87   : > { %1421 = vmatpush1.bf16.msra.mxu0 %v1420_v52  ;;  %1359 = vmatprep.subr.bf16.mxu1 %v1358_v53  ;;  %v1434_v29 = vpack.c.bf16 %v694_v22, %v692_v21  ;;  %v693_v30 = vld [vmem:[%s1993_s13 + $0x350] sm:$0xff]  ;;  %v632_v31 = vld [vmem:[%s1993_s13 + $0x168] sm:$0xff]  ;;  %v634_v32 = vld [vmem:[%s1993_s13 + $0x178] sm:$0xff]  ;;  %v1372_v35 = vpack.c.bf16 %v629_v27, %v627_v26 }
  0x88   : > { %1423 = vmatprep.subr.bf16.mxu0 %v1422_v57  ;;  %v696_v33 = vld [vmem:[%s1993_s13 + $0x368] sm:$0xff]  ;;  %v698_v34 = vld [vmem:[%s1993_s13 + $0x378] sm:$0xff]  ;;  %v1436_v36 = vpack.c.bf16 %v693_v30, %v691_v28  ;;  %v1374_v37 = vpack.c.bf16 %v634_v32, %v632_v31  ;;  %v631_v38 = vld [vmem:[%s1993_s13 + $0x160] sm:$0xff] }
  0x89   : > { %v633_v39 = vld [vmem:[%s1993_s13 + $0x170] sm:$0xff]  ;;  %v695_v40 = vld [vmem:[%s1993_s13 + $0x360] sm:$0xff]  ;;  %v1438_v41 = vpack.c.bf16 %v698_v34, %v696_v33  ;;  %v636_v43 = vld [vmem:[%s1993_s13 + $0x188] sm:$0xff] }
  0x8a   : > { %1361 = vmatpush1.bf16.msra.mxu1 %v1360_v63  ;;  %v697_v42 = vld [vmem:[%s1993_s13 + $0x370] sm:$0xff]  ;;  %v638_v44 = vld [vmem:[%s1993_s13 + $0x198] sm:$0xff]  ;;  %v700_v45 = vld [vmem:[%s1993_s13 + $0x388] sm:$0xff]  ;;  %v1376_v47 = vpack.c.bf16 %v633_v39, %v631_v38 }
  0x8b   : > { %1425 = vmatpush1.bf16.msra.mxu0 %v1424_v0  ;;  %1363 = vmatprep.subr.bf16.mxu1 %v1362_v1  ;;  %v702_v46 = vld [vmem:[%s1993_s13 + $0x398] sm:$0xff]  ;;  %v1440_v48 = vpack.c.bf16 %v697_v42, %v695_v40  ;;  %v1378_v49 = vpack.c.bf16 %v638_v44, %v636_v43  ;;  %v635_v50 = vld [vmem:[%s1993_s13 + $0x180] sm:$0xff]  ;;  %v637_v51 = vld [vmem:[%s1993_s13 + $0x190] sm:$0xff] }
  0x8c   : > { %1427 = vmatprep.subr.bf16.mxu0 %v1426_v5  ;;  %v699_v52 = vld [vmem:[%s1993_s13 + $0x380] sm:$0xff]  ;;  %v1442_v53 = vpack.c.bf16 %v702_v46, %v700_v45  ;;  %v701_v54 = vld [vmem:[%s1993_s13 + $0x390] sm:$0xff]  ;;  %v640_v55 = vld [vmem:[%s1993_s13 + $0x1a8] sm:$0xff]  ;;  %v1380_v59 = vpack.c.bf16 %v637_v51, %v635_v50 }
  0x8d   : > { %v642_v56 = vld [vmem:[%s1993_s13 + $0x1b8] sm:$0xff]  ;;  %v704_v57 = vld [vmem:[%s1993_s13 + $0x3a8] sm:$0xff]  ;;  %v1444_v60 = vpack.c.bf16 %v701_v54, %v699_v52  ;;  %v639_v62 = vld [vmem:[%s1993_s13 + $0x1a0] sm:$0xff] }
  0x8e   : > { %1365 = vmatpush1.bf16.msra.mxu1 %v1364_v11  ;;  %v706_v58 = vld [vmem:[%s1993_s13 + $0x3b8] sm:$0xff]  ;;  %v1382_v61 = vpack.c.bf16 %v642_v56, %v640_v55  ;;  %v641_v63 = vld [vmem:[%s1993_s13 + $0x1b0] sm:$0xff]  ;;  %v703_v0 = vld [vmem:[%s1993_s13 + $0x3a0] sm:$0xff] }
  0x8f   : > { %1429 = vmatpush1.bf16.msra.mxu0 %v1428_v12  ;;  %1367 = vmatprep.subr.bf16.mxu1 %v1366_v13  ;;  %v1446_v1 = vpack.c.bf16 %v706_v58, %v704_v57  ;;  %v705_v2 = vld [vmem:[%s1993_s13 + $0x3b0] sm:$0xff]  ;;  %v644_v3 = vld [vmem:[%s1993_s13 + $0x1c8] sm:$0xff]  ;;  %v646_v4 = vld [vmem:[%s1993_s13 + $0x1d8] sm:$0xff]  ;;  %v1384_v7 = vpack.c.bf16 %v641_v63, %v639_v62 }
  0x90   : > { %1431 = vmatprep.subr.bf16.mxu0 %v1430_v17  ;;  %v708_v5 = vld [vmem:[%s1993_s13 + $0x3c8] sm:$0xff]  ;;  %v710_v6 = vld [vmem:[%s1993_s13 + $0x3d8] sm:$0xff]  ;;  %v1448_v8 = vpack.c.bf16 %v705_v2, %v703_v0  ;;  %v1386_v9 = vpack.c.bf16 %v646_v4, %v644_v3  ;;  %v643_v10 = vld [vmem:[%s1993_s13 + $0x1c0] sm:$0xff] }
  0x91   : > { %v645_v11 = vld [vmem:[%s1993_s13 + $0x1d0] sm:$0xff]  ;;  %v707_v12 = vld [vmem:[%s1993_s13 + $0x3c0] sm:$0xff]  ;;  %v1450_v13 = vpack.c.bf16 %v710_v6, %v708_v5  ;;  %v648_v15 = vld [vmem:[%s1993_s13 + $0x1e8] sm:$0xff] }
  0x92   : > { %1369 = vmatpush1.bf16.msra.mxu1 %v1368_v23  ;;  %v709_v14 = vld [vmem:[%s1993_s13 + $0x3d0] sm:$0xff]  ;;  %v650_v16 = vld [vmem:[%s1993_s13 + $0x1f8] sm:$0xff]  ;;  %v712_v17 = vld [vmem:[%s1993_s13 + $0x3e8] sm:$0xff]  ;;  %v1388_v19 = vpack.c.bf16 %v645_v11, %v643_v10 }
  0x93   : > { %1433 = vmatpush1.bf16.msra.mxu0 %v1432_v24  ;;  %1371 = vmatprep.subr.bf16.mxu1 %v1370_v25  ;;  %v714_v18 = vld [vmem:[%s1993_s13 + $0x3f8] sm:$0xff]  ;;  %v1452_v20 = vpack.c.bf16 %v709_v14, %v707_v12  ;;  %v1390_v21 = vpack.c.bf16 %v650_v16, %v648_v15  ;;  %v647_v22 = vld [vmem:[%s1993_s13 + $0x1e0] sm:$0xff]  ;;  %v649_v23 = vld [vmem:[%s1993_s13 + $0x1f0] sm:$0xff] }
  0x94   : > { %1435 = vmatprep.subr.bf16.mxu0 %v1434_v29  ;;  %v711_v24 = vld [vmem:[%s1993_s13 + $0x3e0] sm:$0xff]  ;;  %v1454_v25 = vpack.c.bf16 %v714_v18, %v712_v17  ;;  %v713_v26 = vld [vmem:[%s1993_s13 + $0x3f0] sm:$0xff]  ;;  %v716_v27 = vld [vmem:[%s1993_s13 + $0x408] sm:$0xff]  ;;  %v1392_v29 = vpack.c.bf16 %v649_v23, %v647_v22 }
  0x95   : > { %v718_v28 = vld [vmem:[%s1993_s13 + $0x418] sm:$0xff]  ;;  %v745_v30 = vld [vmem:[%s2369_s2 + $0x20] sm:$0xff]  ;;  %v1456_v31 = vpack.c.bf16 %v713_v26, %v711_v24  ;;  %v549_v42 = vld [vmem:[%s2368_s1 + $0x10] sm:$0xff] }
  0x96   : > { %1373 = vmatpush1.bf16.msra.mxu1 %v1372_v35  ;;  %v1458_v32 = vpack.c.bf16 %v718_v28, %v716_v27  ;;  %v715_v33 = vld [vmem:[%s1993_s13 + $0x400] sm:$0xff]  ;;  %v717_v34 = vld [vmem:[%s1993_s13 + $0x410] sm:$0xff]  ;;  %771 = vperm.xlu0 %1572, %v745_v30   ;;  %v746_v38 = vld [vmem:[%s2369_s2 + $0x28] sm:$0xff] }
  0x97   : > { %1437 = vmatpush1.bf16.msra.mxu0 %v1436_v36  ;;  %1375 = vmatprep.subr.bf16.mxu1 %v1374_v37  ;;  %v747_v35 = vld [vmem:[%s2369_s2 + $0x30] sm:$0xff]  ;;  %v720_v36 = vld [vmem:[%s1993_s13 + $0x428] sm:$0xff]  ;;  %v722_v37 = vld [vmem:[%s1993_s13 + $0x438] sm:$0xff]  ;;  %v1460_v40 = vpack.c.bf16 %v717_v34, %v715_v33 }
  0x98   : > { %1439 = vmatprep.subr.bf16.mxu0 %v1438_v41  ;;  %781 = vperm.xlu1 %1573, %v747_v35   ;;  %v547_v39 = vld [vmem:[%s2368_s1] sm:$0xff]  ;;  %v748_v41 = vld [vmem:[%s2369_s2 + $0x38] sm:$0xff]  ;;  %v553_v45 = vld [vmem:[%s2368_s1 + $0x30] sm:$0xff]  ;;  %v1462_v46 = vpack.c.bf16 %v722_v37, %v720_v36 }
  0x99   : > { %v719_v43 = vld [vmem:[%s1993_s13 + $0x420] sm:$0xff]  ;;  %v721_v44 = vld [vmem:[%s1993_s13 + $0x430] sm:$0xff]  ;;  %v552_v50 = vld [vmem:[%s2368_s1 + $0x28] sm:$0xff] }
  0x9a   : > { %1377 = vmatpush1.bf16.msra.mxu1 %v1376_v47  ;;  %776 = vperm.xlu0 %1572, %v746_v38   ;;  %v555_v47 = vld [vmem:[%s2368_s1 + $0x40] sm:$0xff]  ;;  %v1464_v51 = vpack.c.bf16 %v721_v44, %v719_v43  ;;  %v554_v52 = vld [vmem:[%s2368_s1 + $0x38] sm:$0xff]  ;;  %v560_v57 = vld [vmem:[%s2368_s1 + $0x68] sm:$0xff] }
  0x9b   : > { %1441 = vmatpush1.bf16.msra.mxu0 %v1440_v48  ;;  %1379 = vmatprep.subr.bf16.mxu1 %v1378_v49  ;;  %v724_v48 = vld [vmem:[%s1993_s13 + $0x448] sm:$0xff]  ;;  %v726_v49 = vld [vmem:[%s1993_s13 + $0x458] sm:$0xff]  ;;  %v723_v55 = vld [vmem:[%s1993_s13 + $0x440] sm:$0xff] }
  0x9c   : > { %1443 = vmatprep.subr.bf16.mxu0 %v1442_v53  ;;  %786 = vperm.xlu1 %1573, %v748_v41   ;;  %v558_v53 = vld [vmem:[%s2368_s1 + $0x58] sm:$0xff]  ;;  %v1466_v54 = vpack.c.bf16 %v726_v49, %v724_v48  ;;  %v725_v56 = vld [vmem:[%s1993_s13 + $0x450] sm:$0xff]  ;;  %v727_v2 = vld [vmem:[%s1993_s13 + $0x460] sm:$0xff] }
  0x9d   : > { %v728_v58 = vld [vmem:[%s1993_s13 + $0x468] sm:$0xff]  ;;  %v563_v62 = vld [vmem:[%s2368_s1 + $0x80] sm:$0xff]  ;;  %v1468_v63 = vpack.c.bf16 %v725_v56, %v723_v55  ;;  %v565_v0 = vld [vmem:[%s2368_s1 + $0x90] sm:$0xff] }
  0x9e   : > { %1381 = vmatpush1.bf16.msra.mxu1 %v1380_v59  ;;  %v730_v59 = vld [vmem:[%s1993_s13 + $0x478] sm:$0xff]  ;;  %v729_v3 = vld [vmem:[%s1993_s13 + $0x470] sm:$0xff]  ;;  %v732_v4 = vld [vmem:[%s1993_s13 + $0x488] sm:$0xff] }
  0x9f   : > { %1445 = vmatpush1.bf16.msra.mxu0 %v1444_v60  ;;  %1383 = vmatprep.subr.bf16.mxu1 %v1382_v61  ;;  %v557_v60 = vld [vmem:[%s2368_s1 + $0x50] sm:$0xff]  ;;  %v559_v61 = vld [vmem:[%s2368_s1 + $0x60] sm:$0xff]  ;;  %v734_v5 = vld [vmem:[%s1993_s13 + $0x498] sm:$0xff] }
  0xa0   : > { %1447 = vmatprep.subr.bf16.mxu0 %v1446_v1  ;;  %v1470_v1 = vpack.c.bf16 %v730_v59, %v728_v58  ;;  %v562_v6 = vld [vmem:[%s2368_s1 + $0x78] sm:$0xff]  ;;  %v1474_v11 = vpack.c.bf16 %v734_v5, %v732_v4  ;;  %v731_v12 = vld [vmem:[%s1993_s13 + $0x480] sm:$0xff]  ;;  %v737_v23 = vld [vmem:[%s1993_s13 + $0x4b0] sm:$0xff] }
  0xa1   : > { %v570_v10 = vld [vmem:[%s2368_s1 + $0xb8] sm:$0xff]  ;;  %v567_v16 = vld [vmem:[%s2368_s1 + $0xa0] sm:$0xff]  ;;  %v569_v17 = vld [vmem:[%s2368_s1 + $0xb0] sm:$0xff] }
  0xa2   : > { %1385 = vmatpush1.bf16.msra.mxu1 %v1384_v7  ;;  %v564_v7 = vld [vmem:[%s2368_s1 + $0x88] sm:$0xff]  ;;  %v573_v18 = vld [vmem:[%s2368_s1 + $0xd0] sm:$0xff]  ;;  %v578_v26 = vld [vmem:[%s2368_s1 + $0xf8] sm:$0xff] }
  0xa3   : > { %1449 = vmatpush1.bf16.msra.mxu0 %v1448_v8  ;;  %1387 = vmatprep.subr.bf16.mxu1 %v1386_v9  ;;  %v568_v8 = vld [vmem:[%s2368_s1 + $0xa8] sm:$0xff]  ;;  %v1472_v9 = vpack.c.bf16 %v729_v3, %v727_v2  ;;  %v735_v22 = vld [vmem:[%s1993_s13 + $0x4a0] sm:$0xff]  ;;  %v582_v36 = vld [vmem:[%s2368_s1 + $0x118] sm:$0xff] }
  0xa4   : > { %1451 = vmatprep.subr.bf16.mxu0 %v1450_v13  ;;  %v733_v13 = vld [vmem:[%s1993_s13 + $0x490] sm:$0xff]  ;;  %v736_v14 = vld [vmem:[%s1993_s13 + $0x4a8] sm:$0xff]  ;;  %v738_v15 = vld [vmem:[%s1993_s13 + $0x4b8] sm:$0xff]  ;;  %v1480_v27 = vpack.c.bf16 %v737_v23, %v735_v22 }
  0xa5   : > { %v572_v24 = vld [vmem:[%s2368_s1 + $0xc8] sm:$0xff]  ;;  %v577_v30 = vld [vmem:[%s2368_s1 + $0xf0] sm:$0xff]  ;;  %v741_v35 = vld [vmem:[%s2369_s2] sm:$0xff] }
  0xa6   : > { %1389 = vmatpush1.bf16.msra.mxu1 %v1388_v19  ;;  %v1476_v19 = vpack.c.bf16 %v733_v13, %v731_v12  ;;  %v580_v28 = vld [vmem:[%s2368_s1 + $0x108] sm:$0xff]  ;;  %v585_v33 = vld [vmem:[%s2368_s1 + $0x130] sm:$0xff]  ;;  %751 = vperm.xlu0 %1572, %v741_v35   ;;  %v571_v41 = vld [vmem:[%s2368_s1 + $0xc0] sm:$0xff] }
  0xa7   : > { %1453 = vmatpush1.bf16.msra.mxu0 %v1452_v20  ;;  %1391 = vmatprep.subr.bf16.mxu1 %v1390_v21  ;;  %v575_v20 = vld [vmem:[%s2368_s1 + $0xe0] sm:$0xff]  ;;  %v1478_v21 = vpack.c.bf16 %v738_v15, %v736_v14  ;;  %v742_v37 = vld [vmem:[%s2369_s2 + $0x8] sm:$0xff]  ;;  %v586_v48 = vld [vmem:[%s2368_s1 + $0x138] sm:$0xff] }
  0xa8   : > { %1455 = vmatprep.subr.bf16.mxu0 %v1454_v25  ;;  %v574_v25 = vld [vmem:[%s2368_s1 + $0xd8] sm:$0xff]  ;;  %v739_v34 = vld [vmem:[%s1993_s13 + $0x4c0] sm:$0xf]  ;;  %v584_v38 = vld [vmem:[%s2368_s1 + $0x128] sm:$0xff]  ;;  %756 = vperm.xlu1 %1573, %v742_v37  }
  0xa9   : > { %v551_v43 = vld [vmem:[%s2368_s1 + $0x20] sm:$0xff]  ;;  %v576_v44 = vld [vmem:[%s2368_s1 + $0xe8] sm:$0xff]  ;;  %v566_v49 = vld [vmem:[%s2368_s1 + $0x98] sm:$0xff] }
  0xaa   : > { %1393 = vmatpush1.bf16.msra.mxu1 %v1392_v29  ;;  %v740_v29 = vld [vmem:[%s1993_s13 + $0x4c8] sm:$0xf] }
  0xab   : > { %1457 = vmatpush1.bf16.msra.mxu0 %v1456_v31  ;;  %1482 = vmatprep.subr.bf16.mxu1 %v1458_v32  ;;  %v579_v31 = vld [vmem:[%s2368_s1 + $0x100] sm:$0xff] }
  0xac   : > { %1459 = vmatprep.subr.bf16.mxu0 %v1458_v32  ;;  %v583_v32 = vld [vmem:[%s2368_s1 + $0x120] sm:$0xff] }
  0xad   : > { %886 = vmatmul.mubr.f32.vlgmr.msra.gmra.mrb[0].mxu1 %v547_v39  ;;  %v743_v39 = vld [vmem:[%s2369_s2 + $0x10] sm:$0xff] }
  0xae   : > { %999 = vmatmul.mubr.f32.vlgmr.msra.gmra.mrb[0].mxu0 %v549_v42  ;;  %1489 = vmatpush1.bf16.msra.mxu1 %v1460_v40  ;;  %v744_v42 = vld [vmem:[%s2369_s2 + $0x18] sm:$0xff] }
  0xaf   : > { %1461 = vmatpush1.bf16.msra.mxu0 %v1460_v40  ;;  %891 = vmatprep.mubr.f32.mxu1 %v553_v45  ;;  %v1599_v40 = vmov 0.0   ;;  %v556_v45 = vld [vmem:[%s2368_s1 + $0x48] sm:$0xff] }
  0xb0   : > { %1004 = vmatprep.mubr.f32.mxu0 %v555_v47  ;;  %1463 = vmatprep.subr.bf16.mxu0 %v1462_v46  ;;  %v561_v47 = vld [vmem:[%s2368_s1 + $0x70] sm:$0xff] }
  0xb1   : > { %892 = vmatmul.mubr.f32.gmra.mrb[2].mxu1 %v552_v50  ;;  %1483 = vmatprep.subr.bf16.mxu1 %v1462_v46  ;;  %v581_v46 = vld [vmem:[%s2368_s1 + $0x110] sm:$0xff] }
  0xb2   : > { %1005 = vmatmul.mubr.f32.gmra.mrb[2].mxu0 %v554_v52  ;;  %1490 = vmatpush1.bf16.msra.mxu1 %v1464_v51 }
  0xb3   : > { %1465 = vmatpush1.bf16.msra.mxu0 %v1464_v51  ;;  %897 = vmatprep.mubr.f32.mxu1 %v558_v53 }
  0xb4   : > { %1010 = vmatprep.mubr.f32.mxu0 %v560_v57  ;;  %1467 = vmatprep.subr.bf16.mxu0 %v1466_v54 }
  0xb5   : > { %898 = vmatmul.mubr.f32.gmra.mrb[4].mxu1 %v557_v60  ;;  %1484 = vmatprep.subr.bf16.mxu1 %v1466_v54 }
  0xb6   : > { %1011 = vmatmul.mubr.f32.gmra.mrb[4].mxu0 %v559_v61  ;;  %903 = vmatprep.mubr.f32.mxu1 %v563_v62 }
  0xb7   : > { %1016 = vmatprep.mubr.f32.mxu0 %v565_v0  ;;  %1469 = vmatpush1.bf16.msra.mxu0 %v1468_v63 }
  0xb8   : > { %1491 = vmatpush1.bf16.msra.mxu1 %v1468_v63  ;;  %1471 = vmatprep.subr.bf16.mxu0 %v1470_v1 }
  0xb9   : > { %904 = vmatmul.mubr.f32.gmra.mrb[6].mxu1 %v562_v6  ;;  %1485 = vmatprep.subr.bf16.mxu1 %v1470_v1 }
  0xba   : > { %1017 = vmatmul.mubr.f32.gmra.mrb[6].mxu0 %v564_v7  ;;  %909 = vmatprep.mubr.f32.mxu1 %v568_v8 }
  0xbb   : > { %1022 = vmatprep.mubr.f32.mxu0 %v570_v10  ;;  %1473 = vmatpush1.bf16.msra.mxu0 %v1472_v9 }
  0xbc   : > { %1492 = vmatpush1.bf16.msra.mxu1 %v1472_v9  ;;  %1475 = vmatprep.subr.bf16.mxu0 %v1474_v11 }
  0xbd   : > { %910 = vmatmul.mubr.f32.gmra.mrb[8].mxu1 %v567_v16  ;;  %1486 = vmatprep.subr.bf16.mxu1 %v1474_v11 }
  0xbe   : > { %1023 = vmatmul.mubr.f32.gmra.mrb[8].mxu0 %v569_v17  ;;  %915 = vmatprep.mubr.f32.mxu1 %v573_v18 }
  0xbf   : > { %1028 = vmatprep.mubr.f32.mxu0 %v575_v20  ;;  %1477 = vmatpush1.bf16.msra.mxu0 %v1476_v19 }
  0xc0   : > { %1493 = vmatpush1.bf16.msra.mxu1 %v1476_v19  ;;  %1479 = vmatprep.subr.bf16.mxu0 %v1478_v21 }
  0xc1   : > { %916 = vmatmul.mubr.f32.gmra.mrb[10].mxu1 %v572_v24  ;;  %1487 = vmatprep.subr.bf16.mxu1 %v1478_v21 }
  0xc2   : > { %1029 = vmatmul.mubr.f32.gmra.mrb[10].mxu0 %v574_v25  ;;  %921 = vmatprep.mubr.f32.mxu1 %v578_v26 }
  0xc3   : > { %1034 = vmatprep.mubr.f32.mxu0 %v580_v28  ;;  %1481 = vmatpush1.bf16.msra.mxu0 %v1480_v27 }
  0xc4   : > { %1494 = vmatpush1.bf16.msra.mxu1 %v1480_v27  ;;  %1313 = vmatprep.subr.msk.mxu0 %vm814_vm0, %v740_v29 }
  0xc5   : > { %922 = vmatmul.mubr.f32.gmra.mrb[12].mxu1 %v577_v30  ;;  %1488 = vmatprep.subr.msk.mxu1 %vm814_vm0, %v740_v29 }
  0xc6   : > { %1035 = vmatmul.mubr.f32.gmra.mrb[12].mxu0 %v579_v31  ;;  %927 = vmatprep.mubr.f32.mxu1 %v583_v32 }
  0xc7   : > { %1040 = vmatprep.mubr.f32.mxu0 %v585_v33  ;;  %1314 = vmatpush1.msk.msra.mxu0 %vm814_vm0, %v739_v34 }
  0xc8   : > { %1495 = vmatpush1.msk.msra.mxu1 %vm814_vm0, %v739_v34  ;;  %761 = vperm.xlu0 %1572, %v743_v39  }
  0xc9   : > { %928 = vmatmul.mubr.f32.gmra.mrb[14].mxu1 %v582_v36  ;;  %766 = vperm.xlu1 %1573, %v744_v42  }
  0xca   : > { %1041 = vmatmul.mubr.f32.gmra.mrb[14].mxu0 %v584_v38  ;;  %1135 = vmatprep.mubr.f32.mxu1 %v1599_v40 }
  0xcb   : > { %1111 = vmatprep.mubr.f32.mxu0 %v1599_v40 }
  0xcd   : > { %1319 = vmatmul.mubr.msk.f32.vlgmr.msra.gmra.mrb[16].mxu1 %vm789_vm1, %v571_v41 }
  0xce   : > { %1315 = vmatmul.mubr.msk.f32.vlgmr.msra.gmra.mrb[0].mxu0 %vm789_vm1, %v551_v43  ;;  %1141 = vmatprep.mubr.f32.mxu1 %v1599_v40 }
  0xcf   : > { %1117 = vmatprep.mubr.f32.mxu0 %v1599_v40 }
  0xd1   : > { %1320 = vmatmul.mubr.msk.f32.gmra.mrb[18].mxu1 %vm789_vm1, %v576_v44 }
  0xd2   : > { %1316 = vmatmul.mubr.msk.f32.gmra.mrb[2].mxu0 %vm789_vm1, %v556_v45  ;;  %1147 = vmatprep.mubr.f32.mxu1 %v1599_v40 }
  0xd3   : > { %1123 = vmatprep.mubr.f32.mxu0 %v1599_v40 }
  0xd5   : > { %1321 = vmatmul.mubr.msk.f32.gmra.mrb[20].mxu1 %vm789_vm1, %v581_v46 }
  0xd6   : > { %1317 = vmatmul.mubr.msk.f32.gmra.mrb[4].mxu0 %vm789_vm1, %v561_v47  ;;  %1153 = vmatprep.mubr.f32.mxu1 %v1599_v40 }
  0xd7   : > { %1129 = vmatprep.mubr.f32.mxu0 %v1599_v40 }
  0xd9   : > { %1322 = vmatmul.mubr.msk.f32.gmra.mrb[22].mxu1 %vm789_vm1, %v586_v48 }
  0xda   : > { %1318 = vmatmul.mubr.msk.f32.gmra.mrb[6].mxu0 %vm789_vm1, %v566_v49 }
 0x115   : > { %v772_v58 = vpop.permute.xlu0 %771 }
 0x117   : > { %v782_v1 = vpop.permute.xlu1 %781 }
 0x119   : > { %v777_v3 = vpop.permute.xlu0 %776 }
 0x11b   : > { %v787_v17 = vpop.permute.xlu1 %786 }
 0x125   : > { %v752_v21 = vpop.permute.xlu0 %751 }
 0x127   : > { %v757_v31 = vpop.permute.xlu1 %756 }
 0x147   : > { %v762_v44 = vpop.permute.xlu0 %761 }
 0x180   : > { %v887_v50 = vpop.f32.mrb[0].mxu1 }
 0x181   : > { %v889_v51 = vpop.f32.mrb[1].mxu1  ;;  %v888_v30 = vadd.f32 %v887_v50, %v752_v21 }
 0x182   : > { %v890_v34 = vadd.f32 %v889_v51, %v752_v21 }
 0x184   : > { %v893_v52 = vpop.f32.mrb[2].mxu1 }
 0x185   : > { %v895_v53 = vpop.f32.mrb[3].mxu1  ;;  %v894_v43 = vadd.f32 %v893_v52, %v757_v31 }
 0x186   : > { %v896_v48 = vadd.f32 %v895_v53, %v757_v31 }
 0x188   : > { %v2299_v54 = vpop.f32.mrb[4].mxu1 }
 0x189   : > { %v2301_v55 = vpop.f32.mrb[5].mxu1 }
 0x18c   : > { %v2303_v56 = vpop.f32.mrb[6].mxu1 }
 0x18d   : > { %v2305_v57 = vpop.f32.mrb[7].mxu1 }
 0x190   : > { %v911_v59 = vpop.f32.mrb[8].mxu1 }
 0x191   : > { %v912_v60 = vadd.f32 %v911_v59, %v772_v58  ;;  %v1024_v61 = vpop.f32.mrb[8].mxu0  ;;  %v913_v62 = vpop.f32.mrb[9].mxu1 }
 0x192   : > { %v914_v63 = vadd.f32 %v913_v62, %v772_v58  ;;  %v1026_v0 = vpop.f32.mrb[9].mxu0  ;;  %v900_v62 = vadd.f32 %v2299_v54, %v762_v44 }
 0x193   : > { %v1025_v2 = vadd.f32 %v1024_v61, %v912_v60 }
 0x194   : > { %v1027_v4 = vadd.f32 %v1026_v0, %v914_v63  ;;  %v917_v5 = vpop.f32.mrb[10].mxu1  ;;  %v767_v63 = vpop.permute.xlu1 %766 }
 0x195   : > { %v918_v6 = vadd.f32 %v917_v5, %v777_v3  ;;  %v1030_v7 = vpop.f32.mrb[10].mxu0  ;;  %v919_v8 = vpop.f32.mrb[11].mxu1 }
 0x196   : > { %v920_v9 = vadd.f32 %v919_v8, %v777_v3  ;;  %v1032_v10 = vpop.f32.mrb[11].mxu0  ;;  %v902_v3 = vadd.f32 %v2301_v55, %v762_v44 }
 0x197   : > { %v1031_v11 = vadd.f32 %v1030_v7, %v918_v6 }
 0x198   : > { %v1033_v12 = vadd.f32 %v1032_v10, %v920_v9  ;;  %v923_v13 = vpop.f32.mrb[12].mxu1 }
 0x199   : > { %v924_v14 = vadd.f32 %v923_v13, %v782_v1  ;;  %v1036_v15 = vpop.f32.mrb[12].mxu0  ;;  %v925_v16 = vpop.f32.mrb[13].mxu1 }
 0x19a   : > { %v926_v18 = vadd.f32 %v925_v16, %v782_v1  ;;  %v1038_v19 = vpop.f32.mrb[13].mxu0 }
 0x19b   : > { %v1037_v20 = vadd.f32 %v1036_v15, %v924_v14  ;;  %v908_v15 = vadd.f32 %v2305_v57, %v767_v63 }
 0x19c   : > { %v1039_v22 = vadd.f32 %v1038_v19, %v926_v18  ;;  %v929_v23 = vpop.f32.mrb[14].mxu1 }
 0x19d   : > { %v930_v24 = vadd.f32 %v929_v23, %v787_v17  ;;  %v1042_v25 = vpop.f32.mrb[14].mxu0  ;;  %v931_v26 = vpop.f32.mrb[15].mxu1 }
 0x19e   : > { %v932_v27 = vadd.f32 %v931_v26, %v787_v17  ;;  %v1044_v28 = vpop.f32.mrb[15].mxu0 }
 0x19f   : > { %v1043_v29 = vadd.f32 %v1042_v25, %v930_v24 }
 0x1a0   : > { %v2309_v32 = vadd.f32 %v1044_v28, %v932_v27  ;;  %v1137_v33 = vpop.f32.mrb[16].mxu1 }
 0x1a1   : > { %v1113_v35 = vpop.f32.mrb[0].mxu0  ;;  %v1138_v36 = vadd.f32 %v1137_v33, %v1025_v2  ;;  %v1139_v37 = vpop.f32.mrb[17].mxu1 }
 0x1a2   : > { %v1497_v38 = vadd.f32 %v1113_v35, %v888_v30  ;;  %v1115_v39 = vpop.f32.mrb[1].mxu0  ;;  %v1140_v40 = vadd.f32 %v1139_v37, %v1027_v4 }
 0x1a3   : > { %v1168_v41 = vmax.f32 %v1138_v36, 0.0  ;;  %v1499_v42 = vadd.f32 %v1115_v39, %v890_v34 }
 0x1a4   : > { %v1160_v45 = vmax.f32 %v1497_v38, 0.0  ;;  %v1169_v46 = vmax.f32 %v1140_v40, 0.0  ;;  %v1143_v47 = vpop.f32.mrb[18].mxu1 }
 0x1a5   : > { %1184 = vst [vmem:[%s2311_s18 + $0x40] sm:$0xff] %v1168_v41  ;;  %v1161_v49 = vmax.f32 %v1499_v42, 0.0  ;;  %v1119_v50 = vpop.f32.mrb[2].mxu0  ;;  %v1144_v51 = vadd.f32 %v1143_v47, %v1031_v11  ;;  %v1145_v58 = vpop.f32.mrb[19].mxu1 }
 0x1a6   : > { %1176 = vst [vmem:[%s2311_s18] sm:$0xff] %v1160_v45  ;;  %1185 = vst [vmem:[%s2311_s18 + $0x48] sm:$0xff] %v1169_v46  ;;  %v1501_v52 = vadd.f32 %v1119_v50, %v894_v43  ;;  %v1121_v59 = vpop.f32.mrb[3].mxu0  ;;  %v1146_v60 = vadd.f32 %v1145_v58, %v1033_v12  ;;  %v906_v12 = vadd.f32 %v2303_v56, %v767_v63 }
 0x1a7   : > { %1177 = vst [vmem:[%s2311_s18 + $0x8] sm:$0xff] %v1161_v49  ;;  %v1170_v53 = vmax.f32 %v1144_v51, 0.0  ;;  %v1503_v61 = vadd.f32 %v1121_v59, %v896_v48 }
 0x1a8   : > { %v1162_v0 = vmax.f32 %v1501_v52, 0.0  ;;  %v1171_v1 = vmax.f32 %v1146_v60, 0.0  ;;  %v1149_v2 = vpop.f32.mrb[20].mxu1 }
 0x1a9   : > { %1186 = vst [vmem:[%s2311_s18 + $0x50] sm:$0xff] %v1170_v53  ;;  %v1163_v4 = vmax.f32 %v1503_v61, 0.0  ;;  %v1125_v5 = vpop.f32.mrb[4].mxu0  ;;  %v1150_v6 = vadd.f32 %v1149_v2, %v1037_v20  ;;  %v1151_v7 = vpop.f32.mrb[21].mxu1 }
 0x1aa   : > { %1178 = vst [vmem:[%s2311_s18 + $0x10] sm:$0xff] %v1162_v0  ;;  %1187 = vst [vmem:[%s2311_s18 + $0x58] sm:$0xff] %v1171_v1  ;;  %v1505_v8 = vadd.f32 %v1125_v5, %v900_v62  ;;  %v1127_v9 = vpop.f32.mrb[5].mxu0  ;;  %v1152_v54 = vadd.f32 %v1151_v7, %v1039_v22 }
 0x1ab   : > { %1179 = vst [vmem:[%s2311_s18 + $0x18] sm:$0xff] %v1163_v4  ;;  %v1172_v10 = vmax.f32 %v1150_v6, 0.0  ;;  %v1507_v11 = vadd.f32 %v1127_v9, %v902_v3 }
 0x1ac   : > { %v1164_v55 = vmax.f32 %v1505_v8, 0.0  ;;  %v1173_v13 = vmax.f32 %v1152_v54, 0.0  ;;  %v1155_v14 = vpop.f32.mrb[22].mxu1  ;;  %v1230_v34 = vld [vmem:[%s2311_s18 + $0x40] sm:$0xff] (%p1660_p5) }
 0x1ad   : > { %1188 = vst [vmem:[%s2311_s18 + $0x60] sm:$0xff] %v1172_v10  ;;  %v1165_v16 = vmax.f32 %v1507_v11, 0.0  ;;  %v1131_v17 = vpop.f32.mrb[6].mxu0  ;;  %v1156_v18 = vadd.f32 %v1155_v14, %v1043_v29  ;;  %v1157_v19 = vpop.f32.mrb[23].mxu1  ;;  %1198 = sbr.rel (!%p1660_p5) target bundleno = 444 (0x1bc), region = 67  ;;  %v1214_v26 = vld [vmem:[%s2311_s18] sm:$0xff] (%p1660_p5) }
 0x1ae   : > { %1180 = vst [vmem:[%s2311_s18 + $0x20] sm:$0xff] %v1164_v55  ;;  %1189 = vst [vmem:[%s2311_s18 + $0x68] sm:$0xff] %v1173_v13  ;;  %v1509_v20 = vadd.f32 %v1131_v17, %v906_v12  ;;  %v1133_v21 = vpop.f32.mrb[7].mxu0  ;;  %v1158_v56 = vadd.f32 %v1157_v19, %v2309_v32  ;;  %v1216_v27 = vld [vmem:[%s2311_s18 + $0x8] sm:$0xff] (%p1660_p5) }
 0x1af   : > { %1181 = vst [vmem:[%s2311_s18 + $0x28] sm:$0xff] %v1165_v16  ;;  %v1174_v22 = vmax.f32 %v1156_v18, 0.0  ;;  %v1511_v23 = vadd.f32 %v1133_v21, %v908_v15  ;;  %1215 = vst [vmem:[%s1201_s24] sm:$0xff] (%p1660_p5), %v1214_v26  ;;  %v1232_v35 = vld [vmem:[%s2311_s18 + $0x48] sm:$0xff] (%p1660_p5) }
 0x1b0   : > { %v1166_v24 = vmax.f32 %v1509_v20, 0.0  ;;  %v1175_v57 = vmax.f32 %v1158_v56, 0.0  ;;  %1217 = vst [vmem:[%s1201_s24 + $0x8] sm:$0xff] (%p1660_p5), %v1216_v27  ;;  %1231 = vst [vmem:[%s1201_s24 + $0x80] sm:$0xff] (%p1660_p5), %v1230_v34  ;;  %v1234_v36 = vld [vmem:[%s2311_s18 + $0x50] sm:$0xff] (%p1660_p5) }
 0x1b1   : > { %1190 = vst [vmem:[%s2311_s18 + $0x70] sm:$0xff] %v1174_v22  ;;  %v1167_v25 = vmax.f32 %v1511_v23, 0.0  ;;  %v1218_v28 = vld [vmem:[%s2311_s18 + $0x10] sm:$0xff] (%p1660_p5)  ;;  %v1236_v37 = vld [vmem:[%s2311_s18 + $0x58] sm:$0xff] (%p1660_p5)  ;;  %1233 = vst [vmem:[%s1201_s24 + $0x88] sm:$0xff] (%p1660_p5), %v1232_v35 }
 0x1b2   : > { %1182 = vst [vmem:[%s2311_s18 + $0x30] sm:$0xff] %v1166_v24  ;;  %1191 = vst [vmem:[%s2311_s18 + $0x78] sm:$0xff] %v1175_v57  ;;  %v1220_v29 = vld [vmem:[%s2311_s18 + $0x18] sm:$0xff] (%p1660_p5) }
 0x1b3   : > { %1183 = vst [vmem:[%s2311_s18 + $0x38] sm:$0xff] %v1167_v25  ;;  %1219 = vst [vmem:[%s1201_s24 + $0x20] sm:$0xff] (%p1660_p5), %v1218_v28 }
 0x1b4   : > { %1221 = vst [vmem:[%s1201_s24 + $0x28] sm:$0xff] %v1220_v29  ;;  %1235 = vst [vmem:[%s1201_s24 + $0xa0] sm:$0xff] %v1234_v36  ;;  %v1238_v38 = vld [vmem:[%s2311_s18 + $0x60] sm:$0xff] }
 0x1b5   : > { %v1222_v30 = vld [vmem:[%s2311_s18 + $0x20] sm:$0xff]  ;;  %1237 = vst [vmem:[%s1201_s24 + $0xa8] sm:$0xff] %v1236_v37  ;;  %v1240_v39 = vld [vmem:[%s2311_s18 + $0x68] sm:$0xff]  ;;  %1239 = vst [vmem:[%s1201_s24 + $0xc0] sm:$0xff] %v1238_v38 }
 0x1b6   : > { %v1224_v31 = vld [vmem:[%s2311_s18 + $0x28] sm:$0xff]  ;;  %1223 = vst [vmem:[%s1201_s24 + $0x40] sm:$0xff] %v1222_v30  ;;  %1241 = vst [vmem:[%s1201_s24 + $0xc8] sm:$0xff] %v1240_v39 }
 0x1b7   : > { %1225 = vst [vmem:[%s1201_s24 + $0x48] sm:$0xff] %v1224_v31 }
 0x1b8   : > { %v1242_v40 = vld [vmem:[%s2311_s18 + $0x70] sm:$0xff] }
 0x1b9   : > { %v1226_v32 = vld [vmem:[%s2311_s18 + $0x30] sm:$0xff]  ;;  %1243 = vst [vmem:[%s1201_s24 + $0xe0] sm:$0xff] %v1242_v40  ;;  %v1244_v41 = vld [vmem:[%s2311_s18 + $0x78] sm:$0xff] }
 0x1ba   : > { %v1228_v33 = vld [vmem:[%s2311_s18 + $0x38] sm:$0xff]  ;;  %1227 = vst [vmem:[%s1201_s24 + $0x60] sm:$0xff] %v1226_v32  ;;  %1245 = vst [vmem:[%s1201_s24 + $0xe8] sm:$0xff] %v1244_v41 }
 0x1bb   : > { %1229 = vst [vmem:[%s1201_s24 + $0x68] sm:$0xff] %v1228_v33 }
 0x1bc PF: > { %p12_p10 = scmp.ge.s32.totalorder %s1647_s4, 4   ;;  %s2374_s18 = smov %s1592_s19 }
 0x1bd   : > { %s2375_s19 = smov %s1658_s23  ;;  %s2376_s20 = smov %s1647_s4 }
 0x1be   :  { %14 = sbr.rel (!%p12_p10) target bundleno = 2 (0x2), region = 121 }

// kernel: run.13
= control target key start
LH: loop header
LB: loop body
LE: loop exit
PB: predicated region body
PF: predicated region fallthrough
CT: control target
= control target key end

     0   :  { %s1980_s30 = smov 0   ;;  %s1982_s10 = smov 0   ;;  %s2536_s0 = inlined_call_operand.vmem [shape: f32[4,512], index: 0, kind: input, shape index: {}]   ;;  %s2537_s1 = inlined_call_operand.vmem [shape: f32[576,512], index: 1, kind: input, shape index: {}]   ;;  %s2538_s2 = inlined_call_operand.vmem [shape: f32[4,576], index: 2, kind: input, shape index: {}]   ;;  %s2539_s3 = inlined_call_operand.vmem [shape: f32[4,576], index: 3, kind: input, shape index: {}]   ;;  %s2540_s4 = inlined_call_operand.vmem [shape: f32[4,1], index: 4, kind: input, shape index: {}]   ;;  %s2541_s5 = inlined_call_operand.vmem [shape: f32[4,1], index: 5, kind: input, shape index: {}]   ;;  %s2542_s6 = inlined_call_operand.vmem [shape: f32[4,1], index: 6, kind: input, shape index: {}]   ;;  %s2543_s7 = inlined_call_operand.vmem [shape: f32[4,1], index: 7, kind: input, shape index: {}]   ;;  %s2544_s8 = inlined_call_operand.vmem [shape: f32[4,512], index: 8, kind: output, shape index: {0}]   ;;  %s2545_s9 = inlined_call_operand.vmem [shape: f32[2,8,128], index: 9, kind: output, shape index: {1}]  }
   0x1   :  { %s1984_s11 = smov 0   ;;  %s1986_s12 = smov 0  }
   0x2   :  { %s1988_s13 = smov 0  }
   0x3 LB: > { %s32_s14 = sadd.s32 1, %s1922_s12  ;;  %p76_p1 = scmp.ne.s32.totalorder %s1914_s10, %s1910_s30  ;;  %s1926_s13 = sphi %s1988_s13, %s20_s13   ;;  %s1922_s12 = sphi %s1986_s12, %s2549_s12   ;;  %s1918_s11 = sphi %s1984_s11, %s2548_s11   ;;  %s1914_s10 = sphi %s1982_s10, %s2547_s10   ;;  %s1910_s30 = sphi %s1980_s30, %s2546_s30  }
   0x4   : > { %p34_p0 = scmp.ge.s32.totalorder %s32_s14, 2  ;;  %p77_p2 = scmp.eq.s32.totalorder %s1926_s13, 0 }
   0x5   : > { %s69_s16 = sadd.s32 1, %s1914_s10  ;;  %p1506_p5 = scmp.ge.s32.totalorder %s1926_s13, 2 }
   0x6   : > { %s2551_s14 = smov (%p34_p0, %s32_s14), 0  ;;  %p78_p3 = por %p77_p2, %p76_p1 }
   0x7   : > { %s66_s15 = ssub.s32 %s1922_s12, %s2551_s14  ;;  %300 = sbr.rel (%p1506_p5) target bundleno = 90 (0x5a), region = 40 }
   0x8   : > { %p67_p4 = scmp.eq.s32.totalorder %s66_s15, 0 }
   0xa   : > { %s2015_s17 = scalar_select %p67_p4, %s1914_s10, %s69_s16  }
   0xe   : > { %314 = sbr.rel (!%p78_p3) target bundleno = 90 (0x5a), region = 48  ;;  %s316_s18 = sand.u32 (%p78_p3), 1, %s1914_s10  }
   0xf   : > { %s1519_s19 = sshll.u32 (%p78_p3), %s1922_s12, 4  ;;  %s1820_s20 = smul.u32 (%p78_p3), 1152, %s316_s18 }
  0x10   : > { %s2023_s23 = scalar_lea.vmem (%p78_p3), %s2537_s1, %s1519_s19 }
  0x11   : > { %v335_v0 = vld [vmem:[%s2023_s23] sm:$0xff] (%p78_p3)  ;;  %v337_v1 = vld [vmem:[%s2023_s23 + $0x8] sm:$0xff] (%p78_p3)  ;;  %s2031_s24 = scalar_lea.vmem (%p78_p3), [#allocation2], %s1820_s20 }
  0x12   : > { %v339_v2 = vld [vmem:[%s2023_s23 + $0x20] sm:$0xff] (%p78_p3)  ;;  %v341_v3 = vld [vmem:[%s2023_s23 + $0x28] sm:$0xff] (%p78_p3)  ;;  %336 = vst [vmem:[%s2031_s24] sm:$0xff] (%p78_p3), %v335_v0  ;;  %338 = vst [vmem:[%s2031_s24 + $0x8] sm:$0xff] (%p78_p3), %v337_v1 }
  0x13   : > { %v343_v4 = vld [vmem:[%s2023_s23 + $0x40] sm:$0xff] (%p78_p3)  ;;  %v345_v5 = vld [vmem:[%s2023_s23 + $0x48] sm:$0xff] (%p78_p3)  ;;  %340 = vst [vmem:[%s2031_s24 + $0x10] sm:$0xff] (%p78_p3), %v339_v2  ;;  %342 = vst [vmem:[%s2031_s24 + $0x18] sm:$0xff] (%p78_p3), %v341_v3 }
  0x14   : > { %344 = vst [vmem:[%s2031_s24 + $0x20] sm:$0xff] (%p78_p3), %v343_v4  ;;  %346 = vst [vmem:[%s2031_s24 + $0x28] sm:$0xff] (%p78_p3), %v345_v5  ;;  %v347_v6 = vld [vmem:[%s2023_s23 + $0x60] sm:$0xff] (%p78_p3)  ;;  %v349_v7 = vld [vmem:[%s2023_s23 + $0x68] sm:$0xff] (%p78_p3) }
  0x15   : > { %v351_v8 = vld [vmem:[%s2023_s23 + $0x80] sm:$0xff]  ;;  %348 = vst [vmem:[%s2031_s24 + $0x30] sm:$0xff] %v347_v6  ;;  %350 = vst [vmem:[%s2031_s24 + $0x38] sm:$0xff] %v349_v7  ;;  %v353_v9 = vld [vmem:[%s2023_s23 + $0x88] sm:$0xff] }
  0x16   : > { %352 = vst [vmem:[%s2031_s24 + $0x40] sm:$0xff] %v351_v8  ;;  %v355_v10 = vld [vmem:[%s2023_s23 + $0xa0] sm:$0xff]  ;;  %v357_v11 = vld [vmem:[%s2023_s23 + $0xa8] sm:$0xff]  ;;  %354 = vst [vmem:[%s2031_s24 + $0x48] sm:$0xff] %v353_v9 }
  0x17   : > { %356 = vst [vmem:[%s2031_s24 + $0x50] sm:$0xff] %v355_v10  ;;  %358 = vst [vmem:[%s2031_s24 + $0x58] sm:$0xff] %v357_v11  ;;  %v359_v12 = vld [vmem:[%s2023_s23 + $0xc0] sm:$0xff]  ;;  %v361_v13 = vld [vmem:[%s2023_s23 + $0xc8] sm:$0xff] }
  0x18   : > { %v363_v14 = vld [vmem:[%s2023_s23 + $0xe0] sm:$0xff]  ;;  %360 = vst [vmem:[%s2031_s24 + $0x60] sm:$0xff] %v359_v12  ;;  %362 = vst [vmem:[%s2031_s24 + $0x68] sm:$0xff] %v361_v13  ;;  %v365_v15 = vld [vmem:[%s2023_s23 + $0xe8] sm:$0xff] }
  0x19   : > { %364 = vst [vmem:[%s2031_s24 + $0x70] sm:$0xff] %v363_v14  ;;  %v367_v16 = vld [vmem:[%s2023_s23 + $0x100] sm:$0xff]  ;;  %v369_v17 = vld [vmem:[%s2023_s23 + $0x108] sm:$0xff]  ;;  %366 = vst [vmem:[%s2031_s24 + $0x78] sm:$0xff] %v365_v15 }
  0x1a   : > { %368 = vst [vmem:[%s2031_s24 + $0x80] sm:$0xff] %v367_v16  ;;  %370 = vst [vmem:[%s2031_s24 + $0x88] sm:$0xff] %v369_v17  ;;  %v371_v18 = vld [vmem:[%s2023_s23 + $0x120] sm:$0xff]  ;;  %v373_v19 = vld [vmem:[%s2023_s23 + $0x128] sm:$0xff] }
  0x1b   : > { %v375_v20 = vld [vmem:[%s2023_s23 + $0x140] sm:$0xff]  ;;  %372 = vst [vmem:[%s2031_s24 + $0x90] sm:$0xff] %v371_v18  ;;  %374 = vst [vmem:[%s2031_s24 + $0x98] sm:$0xff] %v373_v19  ;;  %v377_v21 = vld [vmem:[%s2023_s23 + $0x148] sm:$0xff] }
  0x1c   : > { %376 = vst [vmem:[%s2031_s24 + $0xa0] sm:$0xff] %v375_v20  ;;  %v379_v22 = vld [vmem:[%s2023_s23 + $0x160] sm:$0xff]  ;;  %v381_v23 = vld [vmem:[%s2023_s23 + $0x168] sm:$0xff]  ;;  %378 = vst [vmem:[%s2031_s24 + $0xa8] sm:$0xff] %v377_v21 }
  0x1d   : > { %380 = vst [vmem:[%s2031_s24 + $0xb0] sm:$0xff] %v379_v22  ;;  %382 = vst [vmem:[%s2031_s24 + $0xb8] sm:$0xff] %v381_v23  ;;  %v383_v24 = vld [vmem:[%s2023_s23 + $0x180] sm:$0xff]  ;;  %v385_v25 = vld [vmem:[%s2023_s23 + $0x188] sm:$0xff] }
  0x1e   : > { %v387_v26 = vld [vmem:[%s2023_s23 + $0x1a0] sm:$0xff]  ;;  %384 = vst [vmem:[%s2031_s24 + $0xc0] sm:$0xff] %v383_v24  ;;  %386 = vst [vmem:[%s2031_s24 + $0xc8] sm:$0xff] %v385_v25  ;;  %v389_v27 = vld [vmem:[%s2023_s23 + $0x1a8] sm:$0xff] }
  0x1f   : > { %388 = vst [vmem:[%s2031_s24 + $0xd0] sm:$0xff] %v387_v26  ;;  %v391_v28 = vld [vmem:[%s2023_s23 + $0x1c0] sm:$0xff]  ;;  %v393_v29 = vld [vmem:[%s2023_s23 + $0x1c8] sm:$0xff]  ;;  %390 = vst [vmem:[%s2031_s24 + $0xd8] sm:$0xff] %v389_v27 }
  0x20   : > { %392 = vst [vmem:[%s2031_s24 + $0xe0] sm:$0xff] %v391_v28  ;;  %394 = vst [vmem:[%s2031_s24 + $0xe8] sm:$0xff] %v393_v29  ;;  %v395_v30 = vld [vmem:[%s2023_s23 + $0x1e0] sm:$0xff]  ;;  %v397_v31 = vld [vmem:[%s2023_s23 + $0x1e8] sm:$0xff] }
  0x21   : > { %v399_v32 = vld [vmem:[%s2023_s23 + $0x200] sm:$0xff]  ;;  %396 = vst [vmem:[%s2031_s24 + $0xf0] sm:$0xff] %v395_v30  ;;  %398 = vst [vmem:[%s2031_s24 + $0xf8] sm:$0xff] %v397_v31  ;;  %v401_v33 = vld [vmem:[%s2023_s23 + $0x208] sm:$0xff] }
  0x22   : > { %400 = vst [vmem:[%s2031_s24 + $0x100] sm:$0xff] %v399_v32  ;;  %v403_v34 = vld [vmem:[%s2023_s23 + $0x220] sm:$0xff]  ;;  %v405_v35 = vld [vmem:[%s2023_s23 + $0x228] sm:$0xff]  ;;  %402 = vst [vmem:[%s2031_s24 + $0x108] sm:$0xff] %v401_v33 }
  0x23   : > { %404 = vst [vmem:[%s2031_s24 + $0x110] sm:$0xff] %v403_v34  ;;  %406 = vst [vmem:[%s2031_s24 + $0x118] sm:$0xff] %v405_v35  ;;  %v407_v36 = vld [vmem:[%s2023_s23 + $0x240] sm:$0xff]  ;;  %v409_v37 = vld [vmem:[%s2023_s23 + $0x248] sm:$0xff] }
  0x24   : > { %v411_v38 = vld [vmem:[%s2023_s23 + $0x260] sm:$0xff]  ;;  %408 = vst [vmem:[%s2031_s24 + $0x120] sm:$0xff] %v407_v36  ;;  %410 = vst [vmem:[%s2031_s24 + $0x128] sm:$0xff] %v409_v37  ;;  %v413_v39 = vld [vmem:[%s2023_s23 + $0x268] sm:$0xff] }
  0x25   : > { %412 = vst [vmem:[%s2031_s24 + $0x130] sm:$0xff] %v411_v38  ;;  %v415_v40 = vld [vmem:[%s2023_s23 + $0x280] sm:$0xff]  ;;  %v417_v41 = vld [vmem:[%s2023_s23 + $0x288] sm:$0xff]  ;;  %414 = vst [vmem:[%s2031_s24 + $0x138] sm:$0xff] %v413_v39 }
  0x26   : > { %416 = vst [vmem:[%s2031_s24 + $0x140] sm:$0xff] %v415_v40  ;;  %418 = vst [vmem:[%s2031_s24 + $0x148] sm:$0xff] %v417_v41  ;;  %v419_v42 = vld [vmem:[%s2023_s23 + $0x2a0] sm:$0xff]  ;;  %v421_v43 = vld [vmem:[%s2023_s23 + $0x2a8] sm:$0xff] }
  0x27   : > { %v423_v44 = vld [vmem:[%s2023_s23 + $0x2c0] sm:$0xff]  ;;  %420 = vst [vmem:[%s2031_s24 + $0x150] sm:$0xff] %v419_v42  ;;  %422 = vst [vmem:[%s2031_s24 + $0x158] sm:$0xff] %v421_v43  ;;  %v425_v45 = vld [vmem:[%s2023_s23 + $0x2c8] sm:$0xff] }
  0x28   : > { %424 = vst [vmem:[%s2031_s24 + $0x160] sm:$0xff] %v423_v44  ;;  %v427_v46 = vld [vmem:[%s2023_s23 + $0x2e0] sm:$0xff]  ;;  %v429_v47 = vld [vmem:[%s2023_s23 + $0x2e8] sm:$0xff]  ;;  %426 = vst [vmem:[%s2031_s24 + $0x168] sm:$0xff] %v425_v45 }
  0x29   : > { %428 = vst [vmem:[%s2031_s24 + $0x170] sm:$0xff] %v427_v46  ;;  %430 = vst [vmem:[%s2031_s24 + $0x178] sm:$0xff] %v429_v47  ;;  %v431_v48 = vld [vmem:[%s2023_s23 + $0x300] sm:$0xff]  ;;  %v433_v49 = vld [vmem:[%s2023_s23 + $0x308] sm:$0xff] }
  0x2a   : > { %v435_v50 = vld [vmem:[%s2023_s23 + $0x320] sm:$0xff]  ;;  %432 = vst [vmem:[%s2031_s24 + $0x180] sm:$0xff] %v431_v48  ;;  %434 = vst [vmem:[%s2031_s24 + $0x188] sm:$0xff] %v433_v49  ;;  %v437_v51 = vld [vmem:[%s2023_s23 + $0x328] sm:$0xff] }
  0x2b   : > { %436 = vst [vmem:[%s2031_s24 + $0x190] sm:$0xff] %v435_v50  ;;  %v439_v52 = vld [vmem:[%s2023_s23 + $0x340] sm:$0xff]  ;;  %v441_v53 = vld [vmem:[%s2023_s23 + $0x348] sm:$0xff]  ;;  %438 = vst [vmem:[%s2031_s24 + $0x198] sm:$0xff] %v437_v51 }
  0x2c   : > { %440 = vst [vmem:[%s2031_s24 + $0x1a0] sm:$0xff] %v439_v52  ;;  %442 = vst [vmem:[%s2031_s24 + $0x1a8] sm:$0xff] %v441_v53  ;;  %v443_v54 = vld [vmem:[%s2023_s23 + $0x360] sm:$0xff]  ;;  %v445_v55 = vld [vmem:[%s2023_s23 + $0x368] sm:$0xff] }
  0x2d   : > { %v447_v56 = vld [vmem:[%s2023_s23 + $0x380] sm:$0xff]  ;;  %444 = vst [vmem:[%s2031_s24 + $0x1b0] sm:$0xff] %v443_v54  ;;  %446 = vst [vmem:[%s2031_s24 + $0x1b8] sm:$0xff] %v445_v55  ;;  %v449_v57 = vld [vmem:[%s2023_s23 + $0x388] sm:$0xff] }
  0x2e   : > { %448 = vst [vmem:[%s2031_s24 + $0x1c0] sm:$0xff] %v447_v56  ;;  %v451_v58 = vld [vmem:[%s2023_s23 + $0x3a0] sm:$0xff]  ;;  %v453_v59 = vld [vmem:[%s2023_s23 + $0x3a8] sm:$0xff]  ;;  %450 = vst [vmem:[%s2031_s24 + $0x1c8] sm:$0xff] %v449_v57 }
  0x2f   : > { %452 = vst [vmem:[%s2031_s24 + $0x1d0] sm:$0xff] %v451_v58  ;;  %454 = vst [vmem:[%s2031_s24 + $0x1d8] sm:$0xff] %v453_v59  ;;  %v455_v60 = vld [vmem:[%s2023_s23 + $0x3c0] sm:$0xff]  ;;  %v457_v61 = vld [vmem:[%s2023_s23 + $0x3c8] sm:$0xff] }
  0x30   : > { %v459_v62 = vld [vmem:[%s2023_s23 + $0x3e0] sm:$0xff]  ;;  %456 = vst [vmem:[%s2031_s24 + $0x1e0] sm:$0xff] %v455_v60  ;;  %458 = vst [vmem:[%s2031_s24 + $0x1e8] sm:$0xff] %v457_v61  ;;  %v461_v63 = vld [vmem:[%s2023_s23 + $0x3e8] sm:$0xff] }
  0x31   : > { %460 = vst [vmem:[%s2031_s24 + $0x1f0] sm:$0xff] %v459_v62  ;;  %v463_v0 = vld [vmem:[%s2023_s23 + $0x400] sm:$0xff]  ;;  %v465_v1 = vld [vmem:[%s2023_s23 + $0x408] sm:$0xff]  ;;  %462 = vst [vmem:[%s2031_s24 + $0x1f8] sm:$0xff] %v461_v63 }
  0x32   : > { %464 = vst [vmem:[%s2031_s24 + $0x200] sm:$0xff] %v463_v0  ;;  %466 = vst [vmem:[%s2031_s24 + $0x208] sm:$0xff] %v465_v1  ;;  %v467_v2 = vld [vmem:[%s2023_s23 + $0x420] sm:$0xff]  ;;  %v469_v3 = vld [vmem:[%s2023_s23 + $0x428] sm:$0xff] }
  0x33   : > { %v471_v4 = vld [vmem:[%s2023_s23 + $0x440] sm:$0xff]  ;;  %468 = vst [vmem:[%s2031_s24 + $0x210] sm:$0xff] %v467_v2  ;;  %470 = vst [vmem:[%s2031_s24 + $0x218] sm:$0xff] %v469_v3  ;;  %v473_v5 = vld [vmem:[%s2023_s23 + $0x448] sm:$0xff] }
  0x34   : > { %472 = vst [vmem:[%s2031_s24 + $0x220] sm:$0xff] %v471_v4  ;;  %v475_v6 = vld [vmem:[%s2023_s23 + $0x460] sm:$0xff]  ;;  %v477_v7 = vld [vmem:[%s2023_s23 + $0x468] sm:$0xff]  ;;  %474 = vst [vmem:[%s2031_s24 + $0x228] sm:$0xff] %v473_v5 }
  0x35   : > { %476 = vst [vmem:[%s2031_s24 + $0x230] sm:$0xff] %v475_v6  ;;  %478 = vst [vmem:[%s2031_s24 + $0x238] sm:$0xff] %v477_v7  ;;  %v479_v8 = vld [vmem:[%s2023_s23 + $0x480] sm:$0xff]  ;;  %v481_v9 = vld [vmem:[%s2023_s23 + $0x488] sm:$0xff] }
  0x36   : > { %v483_v10 = vld [vmem:[%s2023_s23 + $0x4a0] sm:$0xff]  ;;  %480 = vst [vmem:[%s2031_s24 + $0x240] sm:$0xff] %v479_v8  ;;  %482 = vst [vmem:[%s2031_s24 + $0x248] sm:$0xff] %v481_v9  ;;  %v485_v11 = vld [vmem:[%s2023_s23 + $0x4a8] sm:$0xff] }
  0x37   : > { %484 = vst [vmem:[%s2031_s24 + $0x250] sm:$0xff] %v483_v10  ;;  %v487_v12 = vld [vmem:[%s2023_s23 + $0x4c0] sm:$0xff]  ;;  %v489_v13 = vld [vmem:[%s2023_s23 + $0x4c8] sm:$0xff]  ;;  %486 = vst [vmem:[%s2031_s24 + $0x258] sm:$0xff] %v485_v11 }
  0x38   : > { %488 = vst [vmem:[%s2031_s24 + $0x260] sm:$0xff] %v487_v12  ;;  %490 = vst [vmem:[%s2031_s24 + $0x268] sm:$0xff] %v489_v13  ;;  %v491_v14 = vld [vmem:[%s2023_s23 + $0x4e0] sm:$0xff]  ;;  %v493_v15 = vld [vmem:[%s2023_s23 + $0x4e8] sm:$0xff] }
  0x39   : > { %v495_v16 = vld [vmem:[%s2023_s23 + $0x500] sm:$0xff]  ;;  %492 = vst [vmem:[%s2031_s24 + $0x270] sm:$0xff] %v491_v14  ;;  %494 = vst [vmem:[%s2031_s24 + $0x278] sm:$0xff] %v493_v15  ;;  %v497_v17 = vld [vmem:[%s2023_s23 + $0x508] sm:$0xff] }
  0x3a   : > { %496 = vst [vmem:[%s2031_s24 + $0x280] sm:$0xff] %v495_v16  ;;  %v499_v18 = vld [vmem:[%s2023_s23 + $0x520] sm:$0xff]  ;;  %v501_v19 = vld [vmem:[%s2023_s23 + $0x528] sm:$0xff]  ;;  %498 = vst [vmem:[%s2031_s24 + $0x288] sm:$0xff] %v497_v17 }
  0x3b   : > { %500 = vst [vmem:[%s2031_s24 + $0x290] sm:$0xff] %v499_v18  ;;  %502 = vst [vmem:[%s2031_s24 + $0x298] sm:$0xff] %v501_v19  ;;  %v503_v20 = vld [vmem:[%s2023_s23 + $0x540] sm:$0xff]  ;;  %v505_v21 = vld [vmem:[%s2023_s23 + $0x548] sm:$0xff] }
  0x3c   : > { %v507_v22 = vld [vmem:[%s2023_s23 + $0x560] sm:$0xff]  ;;  %504 = vst [vmem:[%s2031_s24 + $0x2a0] sm:$0xff] %v503_v20  ;;  %506 = vst [vmem:[%s2031_s24 + $0x2a8] sm:$0xff] %v505_v21  ;;  %v509_v23 = vld [vmem:[%s2023_s23 + $0x568] sm:$0xff] }
  0x3d   : > { %508 = vst [vmem:[%s2031_s24 + $0x2b0] sm:$0xff] %v507_v22  ;;  %v511_v24 = vld [vmem:[%s2023_s23 + $0x580] sm:$0xff]  ;;  %v513_v25 = vld [vmem:[%s2023_s23 + $0x588] sm:$0xff]  ;;  %510 = vst [vmem:[%s2031_s24 + $0x2b8] sm:$0xff] %v509_v23 }
  0x3e   : > { %512 = vst [vmem:[%s2031_s24 + $0x2c0] sm:$0xff] %v511_v24  ;;  %514 = vst [vmem:[%s2031_s24 + $0x2c8] sm:$0xff] %v513_v25  ;;  %v515_v26 = vld [vmem:[%s2023_s23 + $0x5a0] sm:$0xff]  ;;  %v517_v27 = vld [vmem:[%s2023_s23 + $0x5a8] sm:$0xff] }
  0x3f   : > { %v519_v28 = vld [vmem:[%s2023_s23 + $0x5c0] sm:$0xff]  ;;  %516 = vst [vmem:[%s2031_s24 + $0x2d0] sm:$0xff] %v515_v26  ;;  %518 = vst [vmem:[%s2031_s24 + $0x2d8] sm:$0xff] %v517_v27  ;;  %v521_v29 = vld [vmem:[%s2023_s23 + $0x5c8] sm:$0xff] }
  0x40   : > { %520 = vst [vmem:[%s2031_s24 + $0x2e0] sm:$0xff] %v519_v28  ;;  %v523_v30 = vld [vmem:[%s2023_s23 + $0x5e0] sm:$0xff]  ;;  %v525_v31 = vld [vmem:[%s2023_s23 + $0x5e8] sm:$0xff]  ;;  %522 = vst [vmem:[%s2031_s24 + $0x2e8] sm:$0xff] %v521_v29 }
  0x41   : > { %524 = vst [vmem:[%s2031_s24 + $0x2f0] sm:$0xff] %v523_v30  ;;  %526 = vst [vmem:[%s2031_s24 + $0x2f8] sm:$0xff] %v525_v31  ;;  %v527_v32 = vld [vmem:[%s2023_s23 + $0x600] sm:$0xff]  ;;  %v529_v33 = vld [vmem:[%s2023_s23 + $0x608] sm:$0xff] }
  0x42   : > { %v531_v34 = vld [vmem:[%s2023_s23 + $0x620] sm:$0xff]  ;;  %528 = vst [vmem:[%s2031_s24 + $0x300] sm:$0xff] %v527_v32  ;;  %530 = vst [vmem:[%s2031_s24 + $0x308] sm:$0xff] %v529_v33  ;;  %v533_v35 = vld [vmem:[%s2023_s23 + $0x628] sm:$0xff] }
  0x43   : > { %532 = vst [vmem:[%s2031_s24 + $0x310] sm:$0xff] %v531_v34  ;;  %v535_v36 = vld [vmem:[%s2023_s23 + $0x640] sm:$0xff]  ;;  %v537_v37 = vld [vmem:[%s2023_s23 + $0x648] sm:$0xff]  ;;  %534 = vst [vmem:[%s2031_s24 + $0x318] sm:$0xff] %v533_v35 }
  0x44   : > { %536 = vst [vmem:[%s2031_s24 + $0x320] sm:$0xff] %v535_v36  ;;  %538 = vst [vmem:[%s2031_s24 + $0x328] sm:$0xff] %v537_v37  ;;  %v539_v38 = vld [vmem:[%s2023_s23 + $0x660] sm:$0xff]  ;;  %v541_v39 = vld [vmem:[%s2023_s23 + $0x668] sm:$0xff] }
  0x45   : > { %v543_v40 = vld [vmem:[%s2023_s23 + $0x680] sm:$0xff]  ;;  %540 = vst [vmem:[%s2031_s24 + $0x330] sm:$0xff] %v539_v38  ;;  %542 = vst [vmem:[%s2031_s24 + $0x338] sm:$0xff] %v541_v39  ;;  %v545_v41 = vld [vmem:[%s2023_s23 + $0x688] sm:$0xff] }
  0x46   : > { %544 = vst [vmem:[%s2031_s24 + $0x340] sm:$0xff] %v543_v40  ;;  %v547_v42 = vld [vmem:[%s2023_s23 + $0x6a0] sm:$0xff]  ;;  %v549_v43 = vld [vmem:[%s2023_s23 + $0x6a8] sm:$0xff]  ;;  %546 = vst [vmem:[%s2031_s24 + $0x348] sm:$0xff] %v545_v41 }
  0x47   : > { %548 = vst [vmem:[%s2031_s24 + $0x350] sm:$0xff] %v547_v42  ;;  %550 = vst [vmem:[%s2031_s24 + $0x358] sm:$0xff] %v549_v43  ;;  %v551_v44 = vld [vmem:[%s2023_s23 + $0x6c0] sm:$0xff]  ;;  %v553_v45 = vld [vmem:[%s2023_s23 + $0x6c8] sm:$0xff] }
  0x48   : > { %v555_v46 = vld [vmem:[%s2023_s23 + $0x6e0] sm:$0xff]  ;;  %552 = vst [vmem:[%s2031_s24 + $0x360] sm:$0xff] %v551_v44  ;;  %554 = vst [vmem:[%s2031_s24 + $0x368] sm:$0xff] %v553_v45  ;;  %v557_v47 = vld [vmem:[%s2023_s23 + $0x6e8] sm:$0xff] }
  0x49   : > { %556 = vst [vmem:[%s2031_s24 + $0x370] sm:$0xff] %v555_v46  ;;  %v559_v48 = vld [vmem:[%s2023_s23 + $0x700] sm:$0xff]  ;;  %v561_v49 = vld [vmem:[%s2023_s23 + $0x708] sm:$0xff]  ;;  %558 = vst [vmem:[%s2031_s24 + $0x378] sm:$0xff] %v557_v47 }
  0x4a   : > { %560 = vst [vmem:[%s2031_s24 + $0x380] sm:$0xff] %v559_v48  ;;  %562 = vst [vmem:[%s2031_s24 + $0x388] sm:$0xff] %v561_v49  ;;  %v563_v50 = vld [vmem:[%s2023_s23 + $0x720] sm:$0xff]  ;;  %v565_v51 = vld [vmem:[%s2023_s23 + $0x728] sm:$0xff] }
  0x4b   : > { %v567_v52 = vld [vmem:[%s2023_s23 + $0x740] sm:$0xff]  ;;  %564 = vst [vmem:[%s2031_s24 + $0x390] sm:$0xff] %v563_v50  ;;  %566 = vst [vmem:[%s2031_s24 + $0x398] sm:$0xff] %v565_v51  ;;  %v569_v53 = vld [vmem:[%s2023_s23 + $0x748] sm:$0xff] }
  0x4c   : > { %568 = vst [vmem:[%s2031_s24 + $0x3a0] sm:$0xff] %v567_v52  ;;  %v571_v54 = vld [vmem:[%s2023_s23 + $0x760] sm:$0xff]  ;;  %v573_v55 = vld [vmem:[%s2023_s23 + $0x768] sm:$0xff]  ;;  %570 = vst [vmem:[%s2031_s24 + $0x3a8] sm:$0xff] %v569_v53 }
  0x4d   : > { %572 = vst [vmem:[%s2031_s24 + $0x3b0] sm:$0xff] %v571_v54  ;;  %574 = vst [vmem:[%s2031_s24 + $0x3b8] sm:$0xff] %v573_v55  ;;  %v575_v56 = vld [vmem:[%s2023_s23 + $0x780] sm:$0xff]  ;;  %v577_v57 = vld [vmem:[%s2023_s23 + $0x788] sm:$0xff] }
  0x4e   : > { %v579_v58 = vld [vmem:[%s2023_s23 + $0x7a0] sm:$0xff]  ;;  %576 = vst [vmem:[%s2031_s24 + $0x3c0] sm:$0xff] %v575_v56  ;;  %578 = vst [vmem:[%s2031_s24 + $0x3c8] sm:$0xff] %v577_v57  ;;  %v581_v59 = vld [vmem:[%s2023_s23 + $0x7a8] sm:$0xff] }
  0x4f   : > { %580 = vst [vmem:[%s2031_s24 + $0x3d0] sm:$0xff] %v579_v58  ;;  %v583_v60 = vld [vmem:[%s2023_s23 + $0x7c0] sm:$0xff]  ;;  %v585_v61 = vld [vmem:[%s2023_s23 + $0x7c8] sm:$0xff]  ;;  %582 = vst [vmem:[%s2031_s24 + $0x3d8] sm:$0xff] %v581_v59 }
  0x50   : > { %584 = vst [vmem:[%s2031_s24 + $0x3e0] sm:$0xff] %v583_v60  ;;  %586 = vst [vmem:[%s2031_s24 + $0x3e8] sm:$0xff] %v585_v61  ;;  %v587_v62 = vld [vmem:[%s2023_s23 + $0x7e0] sm:$0xff]  ;;  %v589_v63 = vld [vmem:[%s2023_s23 + $0x7e8] sm:$0xff] }
  0x51   : > { %v591_v0 = vld [vmem:[%s2023_s23 + $0x800] sm:$0xff]  ;;  %588 = vst [vmem:[%s2031_s24 + $0x3f0] sm:$0xff] %v587_v62  ;;  %590 = vst [vmem:[%s2031_s24 + $0x3f8] sm:$0xff] %v589_v63  ;;  %v593_v1 = vld [vmem:[%s2023_s23 + $0x808] sm:$0xff] }
  0x52   : > { %592 = vst [vmem:[%s2031_s24 + $0x400] sm:$0xff] %v591_v0  ;;  %v595_v2 = vld [vmem:[%s2023_s23 + $0x820] sm:$0xff]  ;;  %v597_v3 = vld [vmem:[%s2023_s23 + $0x828] sm:$0xff]  ;;  %594 = vst [vmem:[%s2031_s24 + $0x408] sm:$0xff] %v593_v1 }
  0x53   : > { %596 = vst [vmem:[%s2031_s24 + $0x410] sm:$0xff] %v595_v2  ;;  %598 = vst [vmem:[%s2031_s24 + $0x418] sm:$0xff] %v597_v3  ;;  %v599_v4 = vld [vmem:[%s2023_s23 + $0x840] sm:$0xff]  ;;  %v601_v5 = vld [vmem:[%s2023_s23 + $0x848] sm:$0xff] }
  0x54   : > { %v603_v6 = vld [vmem:[%s2023_s23 + $0x860] sm:$0xff]  ;;  %600 = vst [vmem:[%s2031_s24 + $0x420] sm:$0xff] %v599_v4  ;;  %602 = vst [vmem:[%s2031_s24 + $0x428] sm:$0xff] %v601_v5  ;;  %v605_v7 = vld [vmem:[%s2023_s23 + $0x868] sm:$0xff] }
  0x55   : > { %604 = vst [vmem:[%s2031_s24 + $0x430] sm:$0xff] %v603_v6  ;;  %v607_v8 = vld [vmem:[%s2023_s23 + $0x880] sm:$0xff]  ;;  %v609_v9 = vld [vmem:[%s2023_s23 + $0x888] sm:$0xff]  ;;  %606 = vst [vmem:[%s2031_s24 + $0x438] sm:$0xff] %v605_v7 }
  0x56   : > { %608 = vst [vmem:[%s2031_s24 + $0x440] sm:$0xff] %v607_v8  ;;  %610 = vst [vmem:[%s2031_s24 + $0x448] sm:$0xff] %v609_v9  ;;  %v611_v10 = vld [vmem:[%s2023_s23 + $0x8a0] sm:$0xff]  ;;  %v613_v11 = vld [vmem:[%s2023_s23 + $0x8a8] sm:$0xff] }
  0x57   : > { %v615_v12 = vld [vmem:[%s2023_s23 + $0x8c0] sm:$0xff]  ;;  %612 = vst [vmem:[%s2031_s24 + $0x450] sm:$0xff] %v611_v10  ;;  %614 = vst [vmem:[%s2031_s24 + $0x458] sm:$0xff] %v613_v11  ;;  %v617_v13 = vld [vmem:[%s2023_s23 + $0x8c8] sm:$0xff] }
  0x58   : > { %616 = vst [vmem:[%s2031_s24 + $0x460] sm:$0xff] %v615_v12  ;;  %v619_v14 = vld [vmem:[%s2023_s23 + $0x8e0] sm:$0xff]  ;;  %v621_v15 = vld [vmem:[%s2023_s23 + $0x8e8] sm:$0xff]  ;;  %618 = vst [vmem:[%s2031_s24 + $0x468] sm:$0xff] %v617_v13 }
  0x59   : > { %620 = vst [vmem:[%s2031_s24 + $0x470] sm:$0xff] %v619_v14  ;;  %622 = vst [vmem:[%s2031_s24 + $0x478] sm:$0xff] %v621_v15 }
  0x5a PF: > { %p1509_p6 = scmp.ge.s32.totalorder %s1926_s13, 1  ;;  %p627_p7 = scmp.lt.s32.totalorder %s1926_s13, 3 }
  0x5c   : > { %p628_p8 = pnand %p1509_p6, %p627_p7 }
  0x5d   : > { %s634_s25 = sand.u32 (!%p628_p8), 1, %s1910_s30   ;;  %v2321_v16 = vld [vmem:[%s2539_s3] sm:$0xff] (!%p628_p8)  ;;  %v1928_v61 = vmov (!%p628_p8), 0   ;;  %vm862_vm0 = vcmask (!%p628_p8), 523264   ;;  %vm1369_vm1 = vcmask (!%p628_p8), 1043456   ;;  %s1510_s18 = sshll.u32 (!%p628_p8), %s1918_s11, 1 }
  0x5e   : > { %631 = sbr.rel (%p628_p8) target bundleno = 716 (0x2cc), region = 71  ;;  %v1101_v17 = vcombine.high (!%p628_p8), %v2321_v16, %v2321_v16  ;;  %1866 = vset.pattern.permute.xlu0 (!%p628_p8), %v1928_v61  ;;  %1867 = vset.pattern.permute.xlu1 (!%p628_p8), %v1928_v61  ;;  %p682_p9 = scmp.lt.s32.totalorder (!%p628_p8), %s1510_s18, 3 }
  0x5f   : > { %s1821_s28 = smul.u32 (!%p628_p8), 1152, %s634_s25  ;;  %p698_p10 = scmp.lt.s32.totalorder (!%p628_p8), %s1918_s11, 1 }
  0x60   : > { %1171 = vmatprep.mubr.f32.mxu1 (!%p628_p8), %v1101_v17 }
  0x61   : > { %s2325_s29 = scalar_lea.vmem (!%p628_p8), [#allocation2], %s1821_s28 }
  0x62   : > { %v703_v18 = vld [vmem:[%s2325_s29 + $0x8] sm:$0xff] (!%p628_p8)  ;;  %v705_v19 = vld [vmem:[%s2325_s29 + $0x18] sm:$0xff] (!%p628_p8)  ;;  %v702_v20 = vld [vmem:[%s2325_s29] sm:$0xff] (!%p628_p8) }
  0x63   : > { %v1520_v21 = vpack.c.bf16 (!%p628_p8), %v705_v19, %v703_v18  ;;  %v704_v22 = vld [vmem:[%s2325_s29 + $0x10] sm:$0xff] (!%p628_p8)  ;;  %v707_v23 = vld [vmem:[%s2325_s29 + $0x28] sm:$0xff] (!%p628_p8)  ;;  %v709_v24 = vld [vmem:[%s2325_s29 + $0x38] sm:$0xff] (!%p628_p8) }
  0x64   : > { %v1522_v25 = vpack.c.bf16 (!%p628_p8), %v704_v22, %v702_v20  ;;  %v1524_v26 = vpack.c.bf16 (!%p628_p8), %v709_v24, %v707_v23  ;;  %v706_v27 = vld [vmem:[%s2325_s29 + $0x20] sm:$0xff] (!%p628_p8)  ;;  %v708_v28 = vld [vmem:[%s2325_s29 + $0x30] sm:$0xff] (!%p628_p8)  ;;  %v711_v29 = vld [vmem:[%s2325_s29 + $0x48] sm:$0xff] (!%p628_p8) }
  0x65   : > { %1665 = vmatprep.subr.bf16.mxu1 %v1520_v21  ;;  %v713_v30 = vld [vmem:[%s2325_s29 + $0x58] sm:$0xff]  ;;  %1521 = vmatprep.subr.bf16.mxu0 %v1520_v21  ;;  %v1526_v31 = vpack.c.bf16 %v708_v28, %v706_v27  ;;  %v710_v33 = vld [vmem:[%s2325_s29 + $0x40] sm:$0xff]  ;;  %v712_v34 = vld [vmem:[%s2325_s29 + $0x50] sm:$0xff]  ;;  %s2553_s18 = smov (!%p682_p9, %s1510_s18), 3  ;;  %s2555_s11 = smov (!%p698_p10, %s1918_s11), 1 }
  0x66   : > { %1667 = vmatpush1.bf16.msra.mxu1 %v1522_v25  ;;  %1523 = vmatpush1.bf16.msra.mxu0 %v1522_v25  ;;  %v1528_v32 = vpack.c.bf16 %v713_v30, %v711_v29  ;;  %v715_v35 = vld [vmem:[%s2325_s29 + $0x68] sm:$0xff]  ;;  %v717_v36 = vld [vmem:[%s2325_s29 + $0x78] sm:$0xff]  ;;  %v1530_v37 = vpack.c.bf16 %v712_v34, %v710_v33  ;;  %v714_v39 = vld [vmem:[%s2325_s29 + $0x60] sm:$0xff]  ;;  %s1511_s19 = sshll.u32 %s2553_s18, 2  ;;  %s1514_s26 = sshll.u32 %s2555_s11, 3 }
  0x67   : > { %1669 = vmatprep.subr.bf16.mxu1 %v1524_v26  ;;  %1525 = vmatprep.subr.bf16.mxu0 %v1524_v26  ;;  %v1532_v38 = vpack.c.bf16 %v717_v36, %v715_v35  ;;  %v716_v40 = vld [vmem:[%s2325_s29 + $0x70] sm:$0xff]  ;;  %v719_v41 = vld [vmem:[%s2325_s29 + $0x88] sm:$0xff]  ;;  %v721_v42 = vld [vmem:[%s2325_s29 + $0x98] sm:$0xff]  ;;  %s685_s22 = scalar_lea.vmem %s2536_s0, %s1511_s19  ;;  %s695_s25 = scalar_lea.vmem %s2544_s8, %s1511_s19 }
  0x68   : > { %v1534_v43 = vpack.c.bf16 %v716_v40, %v714_v39  ;;  %v1536_v44 = vpack.c.bf16 %v721_v42, %v719_v41  ;;  %v718_v45 = vld [vmem:[%s2325_s29 + $0x80] sm:$0xff]  ;;  %v720_v46 = vld [vmem:[%s2325_s29 + $0x90] sm:$0xff]  ;;  %v723_v47 = vld [vmem:[%s2325_s29 + $0xa8] sm:$0xff]  ;;  %s701_s15 = scalar_lea.vmem %s2545_s9, %s1514_s26 }
  0x69   : > { %v725_v48 = vld [vmem:[%s2325_s29 + $0xb8] sm:$0xff]  ;;  %v1538_v49 = vpack.c.bf16 %v720_v46, %v718_v45  ;;  %v722_v51 = vld [vmem:[%s2325_s29 + $0xa0] sm:$0xff]  ;;  %v724_v52 = vld [vmem:[%s2325_s29 + $0xb0] sm:$0xff] }
  0x6a   : > { %1671 = vmatpush1.bf16.msra.mxu1 %v1526_v31  ;;  %1527 = vmatpush1.bf16.msra.mxu0 %v1526_v31  ;;  %v1540_v50 = vpack.c.bf16 %v725_v48, %v723_v47  ;;  %v727_v53 = vld [vmem:[%s2325_s29 + $0xc8] sm:$0xff]  ;;  %v729_v54 = vld [vmem:[%s2325_s29 + $0xd8] sm:$0xff]  ;;  %v1542_v55 = vpack.c.bf16 %v724_v52, %v722_v51  ;;  %v726_v57 = vld [vmem:[%s2325_s29 + $0xc0] sm:$0xff] }
  0x6b   : > { %1673 = vmatprep.subr.bf16.mxu1 %v1528_v32  ;;  %1529 = vmatprep.subr.bf16.mxu0 %v1528_v32  ;;  %v1544_v56 = vpack.c.bf16 %v729_v54, %v727_v53  ;;  %v728_v58 = vld [vmem:[%s2325_s29 + $0xd0] sm:$0xff]  ;;  %v731_v59 = vld [vmem:[%s2325_s29 + $0xe8] sm:$0xff]  ;;  %v733_v60 = vld [vmem:[%s2325_s29 + $0xf8] sm:$0xff] }
  0x6c   : > { %v1546_v62 = vpack.c.bf16 %v728_v58, %v726_v57  ;;  %v1548_v63 = vpack.c.bf16 %v733_v60, %v731_v59  ;;  %v730_v0 = vld [vmem:[%s2325_s29 + $0xe0] sm:$0xff]  ;;  %v732_v1 = vld [vmem:[%s2325_s29 + $0xf0] sm:$0xff]  ;;  %v735_v2 = vld [vmem:[%s2325_s29 + $0x108] sm:$0xff] }
  0x6d   : > { %v737_v3 = vld [vmem:[%s2325_s29 + $0x118] sm:$0xff]  ;;  %v1550_v4 = vpack.c.bf16 %v732_v1, %v730_v0  ;;  %v734_v6 = vld [vmem:[%s2325_s29 + $0x100] sm:$0xff]  ;;  %v736_v7 = vld [vmem:[%s2325_s29 + $0x110] sm:$0xff] }
  0x6e   : > { %1675 = vmatpush1.bf16.msra.mxu1 %v1530_v37  ;;  %1531 = vmatpush1.bf16.msra.mxu0 %v1530_v37  ;;  %v1552_v5 = vpack.c.bf16 %v737_v3, %v735_v2  ;;  %v739_v8 = vld [vmem:[%s2325_s29 + $0x128] sm:$0xff]  ;;  %v741_v9 = vld [vmem:[%s2325_s29 + $0x138] sm:$0xff]  ;;  %v1554_v10 = vpack.c.bf16 %v736_v7, %v734_v6  ;;  %v738_v12 = vld [vmem:[%s2325_s29 + $0x120] sm:$0xff] }
  0x6f   : > { %1677 = vmatprep.subr.bf16.mxu1 %v1532_v38  ;;  %1533 = vmatprep.subr.bf16.mxu0 %v1532_v38  ;;  %v1556_v11 = vpack.c.bf16 %v741_v9, %v739_v8  ;;  %v740_v13 = vld [vmem:[%s2325_s29 + $0x130] sm:$0xff]  ;;  %v743_v14 = vld [vmem:[%s2325_s29 + $0x148] sm:$0xff]  ;;  %v745_v15 = vld [vmem:[%s2325_s29 + $0x158] sm:$0xff] }
  0x70   : > { %v1558_v17 = vpack.c.bf16 %v740_v13, %v738_v12  ;;  %v1560_v18 = vpack.c.bf16 %v745_v15, %v743_v14  ;;  %v742_v19 = vld [vmem:[%s2325_s29 + $0x140] sm:$0xff]  ;;  %v744_v20 = vld [vmem:[%s2325_s29 + $0x150] sm:$0xff]  ;;  %v747_v21 = vld [vmem:[%s2325_s29 + $0x168] sm:$0xff] }
  0x71   : > { %v749_v22 = vld [vmem:[%s2325_s29 + $0x178] sm:$0xff]  ;;  %v1562_v23 = vpack.c.bf16 %v744_v20, %v742_v19  ;;  %v746_v25 = vld [vmem:[%s2325_s29 + $0x160] sm:$0xff]  ;;  %v748_v26 = vld [vmem:[%s2325_s29 + $0x170] sm:$0xff] }
  0x72   : > { %1679 = vmatpush1.bf16.msra.mxu1 %v1534_v43  ;;  %1535 = vmatpush1.bf16.msra.mxu0 %v1534_v43  ;;  %v1564_v24 = vpack.c.bf16 %v749_v22, %v747_v21  ;;  %v751_v27 = vld [vmem:[%s2325_s29 + $0x188] sm:$0xff]  ;;  %v753_v28 = vld [vmem:[%s2325_s29 + $0x198] sm:$0xff]  ;;  %v1566_v29 = vpack.c.bf16 %v748_v26, %v746_v25  ;;  %v750_v31 = vld [vmem:[%s2325_s29 + $0x180] sm:$0xff] }
  0x73   : > { %1681 = vmatprep.subr.bf16.mxu1 %v1536_v44  ;;  %1537 = vmatprep.subr.bf16.mxu0 %v1536_v44  ;;  %v1568_v30 = vpack.c.bf16 %v753_v28, %v751_v27  ;;  %v752_v32 = vld [vmem:[%s2325_s29 + $0x190] sm:$0xff]  ;;  %v755_v33 = vld [vmem:[%s2325_s29 + $0x1a8] sm:$0xff]  ;;  %v757_v34 = vld [vmem:[%s2325_s29 + $0x1b8] sm:$0xff] }
  0x74   : > { %v1570_v35 = vpack.c.bf16 %v752_v32, %v750_v31  ;;  %v754_v36 = vld [vmem:[%s2325_s29 + $0x1a0] sm:$0xff]  ;;  %v756_v37 = vld [vmem:[%s2325_s29 + $0x1b0] sm:$0xff]  ;;  %v1572_v39 = vpack.c.bf16 %v757_v34, %v755_v33  ;;  %v759_v43 = vld [vmem:[%s2325_s29 + $0x1c8] sm:$0xff] }
  0x75   : > { %v1092_v38 = vld [vmem:[%s2541_s5] sm:$0xf]  ;;  %v761_v44 = vld [vmem:[%s2325_s29 + $0x1d8] sm:$0xff]  ;;  %v1574_v48 = vpack.c.bf16 %v756_v37, %v754_v36  ;;  %v760_v53 = vld [vmem:[%s2325_s29 + $0x1d0] sm:$0xff] }
  0x76   : > { %1683 = vmatpush1.bf16.msra.mxu1 %v1538_v49  ;;  %1539 = vmatpush1.bf16.msra.mxu0 %v1538_v49  ;;  %v1320_v40 = vld [vmem:[%s2543_s7] sm:$0xf]  ;;  %v1576_v51 = vpack.c.bf16 %v761_v44, %v759_v43  ;;  %v763_v54 = vld [vmem:[%s2325_s29 + $0x1e8] sm:$0xff]  ;;  %v764_v59 = vld [vmem:[%s2325_s29 + $0x1f0] sm:$0xff] }
  0x77   : > { %1685 = vmatprep.subr.bf16.mxu1 %v1540_v50  ;;  %1541 = vmatprep.subr.bf16.mxu0 %v1540_v50  ;;  %v1078_v41 = vld [vmem:[%s2542_s6] sm:$0xf]  ;;  %v1321_v45 = vmul.f32 3.0, %v1320_v40  ;;  %v767_v60 = vld [vmem:[%s2325_s29 + $0x208] sm:$0xff]  ;;  %v769_v61 = vld [vmem:[%s2325_s29 + $0x218] sm:$0xff] }
  0x78   : > { %v846_v42 = vld [vmem:[%s2538_s2] sm:$0xff]  ;;  %1095 = vperm.xlu0 %1866, %v1092_v38   ;;  %v1079_v46 = vmul.f32 3.0, %v1078_v41  ;;  %v768_v1 = vld [vmem:[%s2325_s29 + $0x210] sm:$0xff]  ;;  %v2410_v2 = vld [vmem:[%s2539_s3 + $0x8] sm:$0xff] }
  0x79   : > { %v858_v47 = vcombine.high %v846_v42, %v846_v42  ;;  %v1322_v49 = vmul.f32 1.442695, %v1321_v45  ;;  %v758_v52 = vld [vmem:[%s2325_s29 + $0x1c0] sm:$0xff]  ;;  %v771_v3 = vld [vmem:[%s2325_s29 + $0x228] sm:$0xff]  ;;  %v1102_v8 = vcombine.high %v2410_v2, %v2410_v2  ;;  %v777_v14 = vld [vmem:[%s2325_s29 + $0x258] sm:$0xff] }
  0x7a   : > { %1687 = vmatpush1.bf16.msra.mxu1 %v1542_v55  ;;  %1543 = vmatpush1.bf16.msra.mxu0 %v1542_v55  ;;  %v1080_v50 = vmul.f32 1.442695, %v1079_v46  ;;  %v765_v55 = vld [vmem:[%s2325_s29 + $0x1f8] sm:$0xff]  ;;  %v762_v58 = vld [vmem:[%s2325_s29 + $0x1e0] sm:$0xff]  ;;  %v775_v13 = vld [vmem:[%s2325_s29 + $0x248] sm:$0xff] }
  0x7b   : > { %1689 = vmatprep.subr.bf16.mxu1 %v1544_v56  ;;  %1545 = vmatprep.subr.bf16.mxu0 %v1544_v56  ;;  %1872 = vpow2.f32 %v1322_v49  ;;  %v1578_v56 = vpack.c.bf16 %v760_v53, %v758_v52  ;;  %v1580_v57 = vpack.c.bf16 %v765_v55, %v763_v54  ;;  %v766_v0 = vld [vmem:[%s2325_s29 + $0x200] sm:$0xff]  ;;  %v776_v20 = vld [vmem:[%s2325_s29 + $0x250] sm:$0xff]  ;;  %v779_v21 = vld [vmem:[%s2325_s29 + $0x268] sm:$0xff] }
  0x7c   : > { %929 = vmatprep.mubr.f32.mxu0 %v858_v47  ;;  %1874 = vpow2.f32 %v1080_v50  ;;  %v1586_v7 = vpack.c.bf16 %v768_v1, %v766_v0  ;;  %v774_v19 = vld [vmem:[%s2325_s29 + $0x240] sm:$0xff]  ;;  %v781_v22 = vld [vmem:[%s2325_s29 + $0x278] sm:$0xff]  ;;  %v780_v25 = vld [vmem:[%s2325_s29 + $0x270] sm:$0xff] }
  0x7d   : > { %v783_v26 = vld [vmem:[%s2325_s29 + $0x288] sm:$0xff]  ;;  %v785_v27 = vld [vmem:[%s2325_s29 + $0x298] sm:$0xff]  ;;  %v784_v31 = vld [vmem:[%s2325_s29 + $0x290] sm:$0xff] }
  0x7e   : > { %1691 = vmatpush1.bf16.msra.mxu1 %v1546_v62  ;;  %1547 = vmatpush1.bf16.msra.mxu0 %v1546_v62  ;;  %v1582_v62 = vpack.c.bf16 %v764_v59, %v762_v58  ;;  %v787_v32 = vld [vmem:[%s2325_s29 + $0x2a8] sm:$0xff]  ;;  %v789_v33 = vld [vmem:[%s2325_s29 + $0x2b8] sm:$0xff]  ;;  %v786_v36 = vld [vmem:[%s2325_s29 + $0x2a0] sm:$0xff] }
  0x7f   : > { %1693 = vmatprep.subr.bf16.mxu1 %v1548_v63  ;;  %1549 = vmatprep.subr.bf16.mxu0 %v1548_v63  ;;  %v1584_v63 = vpack.c.bf16 %v769_v61, %v767_v60  ;;  %v788_v37 = vld [vmem:[%s2325_s29 + $0x2b0] sm:$0xff]  ;;  %v791_v38 = vld [vmem:[%s2325_s29 + $0x2c8] sm:$0xff]  ;;  %v797_v45 = vld [vmem:[%s2325_s29 + $0x2f8] sm:$0xff] }
  0x80   : > { %v1606_v40 = vpack.c.bf16 %v788_v37, %v786_v36  ;;  %v792_v43 = vld [vmem:[%s2325_s29 + $0x2d0] sm:$0xff]  ;;  %v795_v44 = vld [vmem:[%s2325_s29 + $0x2e8] sm:$0xff]  ;;  %v798_v54 = vld [vmem:[%s2325_s29 + $0x300] sm:$0xff] }
  0x81   : > { %v1612_v47 = vpack.c.bf16 %v797_v45, %v795_v44  ;;  %v796_v49 = vld [vmem:[%s2325_s29 + $0x2f0] sm:$0xff]  ;;  %v799_v50 = vld [vmem:[%s2325_s29 + $0x308] sm:$0xff]  ;;  %v802_v60 = vld [vmem:[%s2325_s29 + $0x320] sm:$0xff] }
  0x82   : > { %1695 = vmatpush1.bf16.msra.mxu1 %v1550_v4  ;;  %1551 = vmatpush1.bf16.msra.mxu0 %v1550_v4  ;;  %v773_v4 = vld [vmem:[%s2325_s29 + $0x238] sm:$0xff]  ;;  %v800_v55 = vld [vmem:[%s2325_s29 + $0x310] sm:$0xff]  ;;  %v831_v36 = vld [vmem:[%s2325_s29 + $0x408] sm:$0xff] }
  0x83   : > { %1697 = vmatprep.subr.bf16.mxu1 %v1552_v5  ;;  %1553 = vmatprep.subr.bf16.mxu0 %v1552_v5  ;;  %v2417_v5 = vld [vmem:[%s2538_s2 + $0x8] sm:$0xff]  ;;  %v1588_v9 = vpack.c.bf16 %v773_v4, %v771_v3  ;;  %v1618_v58 = vpack.c.bf16 %v800_v55, %v798_v54  ;;  %v804_v61 = vld [vmem:[%s2325_s29 + $0x330] sm:$0xff]  ;;  %v806_v3 = vld [vmem:[%s2325_s29 + $0x340] sm:$0xff] }
  0x84   : > { %v859_v15 = vcombine.high %v2417_v5, %v2417_v5  ;;  %v1622_v0 = vpack.c.bf16 %v804_v61, %v802_v60  ;;  %v808_v4 = vld [vmem:[%s2325_s29 + $0x350] sm:$0xff]  ;;  %v833_v37 = vld [vmem:[%s2325_s29 + $0x418] sm:$0xff]  ;;  %v843_v55 = vld [vmem:[%s2325_s29 + $0x468] sm:$0xff] }
  0x85   : > { %v1873_v6 = vpop.eup %1872  ;;  %v840_v54 = vld [vmem:[%s2325_s29 + $0x450] sm:$0xff] }
  0x86   : > { %1699 = vmatpush1.bf16.msra.mxu1 %v1554_v10  ;;  %1555 = vmatpush1.bf16.msra.mxu0 %v1554_v10  ;;  %v770_v10 = vld [vmem:[%s2325_s29 + $0x220] sm:$0xff]  ;;  %v1875_v12 = vpop.eup %1874  ;;  %v848_v61 = vld [vmem:[%s2538_s2 + $0x10] sm:$0xf] }
  0x87   : > { %1701 = vmatprep.subr.bf16.mxu1 %v1556_v11  ;;  %1557 = vmatprep.subr.bf16.mxu0 %v1556_v11  ;;  %v772_v11 = vld [vmem:[%s2325_s29 + $0x230] sm:$0xff] }
  0x88   : > { %1326 = vperm.xlu0 %1866, %v1873_v6   ;;  %v811_v6 = vld [vmem:[%s2325_s29 + $0x368] sm:$0xff] }
  0x8a   : > { %1703 = vmatpush1.bf16.msra.mxu1 %v1558_v17  ;;  %1559 = vmatpush1.bf16.msra.mxu0 %v1558_v17  ;;  %v1590_v17 = vpack.c.bf16 %v772_v11, %v770_v10  ;;  %v810_v10 = vld [vmem:[%s2325_s29 + $0x360] sm:$0xff]  ;;  %v812_v11 = vld [vmem:[%s2325_s29 + $0x370] sm:$0xff] }
  0x8b   : > { %1705 = vmatprep.subr.bf16.mxu1 %v1560_v18  ;;  %1561 = vmatprep.subr.bf16.mxu0 %v1560_v18  ;;  %v1592_v18 = vpack.c.bf16 %v777_v14, %v775_v13  ;;  %v817_v13 = vld [vmem:[%s2325_s29 + $0x398] sm:$0xff]  ;;  %v1630_v14 = vpack.c.bf16 %v812_v11, %v810_v10 }
  0x8c   : > { %1084 = vperm.xlu0 %1866, %v1875_v12   ;;  %v815_v12 = vld [vmem:[%s2325_s29 + $0x388] sm:$0xff] }
  0x8e   : > { %1707 = vmatpush1.bf16.msra.mxu1 %v1562_v23  ;;  %1563 = vmatpush1.bf16.msra.mxu0 %v1562_v23  ;;  %v1596_v23 = vpack.c.bf16 %v781_v22, %v779_v21 }
  0x8f   : > { %1709 = vmatprep.subr.bf16.mxu1 %v1564_v24  ;;  %1565 = vmatprep.subr.bf16.mxu0 %v1564_v24  ;;  %v778_v24 = vld [vmem:[%s2325_s29 + $0x260] sm:$0xff] }
  0x90   : > { %v1598_v28 = vpack.c.bf16 %v780_v25, %v778_v24  ;;  %v823_v24 = vld [vmem:[%s2325_s29 + $0x3c8] sm:$0xff]  ;;  %v825_v25 = vld [vmem:[%s2325_s29 + $0x3d8] sm:$0xff] }
  0x92   : > { %1711 = vmatpush1.bf16.msra.mxu1 %v1566_v29  ;;  %1567 = vmatpush1.bf16.msra.mxu0 %v1566_v29  ;;  %v1600_v29 = vpack.c.bf16 %v785_v27, %v783_v26  ;;  %v1640_v27 = vpack.c.bf16 %v825_v25, %v823_v24 }
  0x93   : > { %1713 = vmatprep.subr.bf16.mxu1 %v1568_v30  ;;  %1569 = vmatprep.subr.bf16.mxu0 %v1568_v30  ;;  %v782_v30 = vld [vmem:[%s2325_s29 + $0x280] sm:$0xff] }
  0x94   : > { %v1602_v34 = vpack.c.bf16 %v784_v31, %v782_v30  ;;  %v827_v30 = vld [vmem:[%s2325_s29 + $0x3e8] sm:$0xff]  ;;  %v829_v31 = vld [vmem:[%s2325_s29 + $0x3f8] sm:$0xff] }
  0x96   : > { %1715 = vmatpush1.bf16.msra.mxu1 %v1570_v35  ;;  %1571 = vmatpush1.bf16.msra.mxu0 %v1570_v35  ;;  %v1604_v35 = vpack.c.bf16 %v789_v33, %v787_v32  ;;  %v1644_v33 = vpack.c.bf16 %v829_v31, %v827_v30 }
  0x97   : > { %1717 = vmatprep.subr.bf16.mxu1 %v1572_v39  ;;  %1573 = vmatprep.subr.bf16.mxu0 %v1572_v39  ;;  %v793_v39 = vld [vmem:[%s2325_s29 + $0x2d8] sm:$0xff] }
  0x98   : > { %v1608_v41 = vpack.c.bf16 %v793_v39, %v791_v38  ;;  %v1648_v39 = vpack.c.bf16 %v833_v37, %v831_v36 }
  0x9a   : > { %1719 = vmatpush1.bf16.msra.mxu1 %v1574_v48  ;;  %1575 = vmatpush1.bf16.msra.mxu0 %v1574_v48  ;;  %v794_v48 = vld [vmem:[%s2325_s29 + $0x2e0] sm:$0xff] }
  0x9b   : > { %1721 = vmatprep.subr.bf16.mxu1 %v1576_v51  ;;  %1577 = vmatprep.subr.bf16.mxu0 %v1576_v51  ;;  %v801_v51 = vld [vmem:[%s2325_s29 + $0x318] sm:$0xff]  ;;  %v1614_v52 = vpack.c.bf16 %v796_v49, %v794_v48  ;;  %v839_v48 = vld [vmem:[%s2325_s29 + $0x448] sm:$0xff] }
  0x9c   : > { %v1616_v53 = vpack.c.bf16 %v801_v51, %v799_v50  ;;  %v841_v49 = vld [vmem:[%s2325_s29 + $0x458] sm:$0xff]  ;;  %v1929_v51 = vmov 0.0  }
  0x9e   : > { %1723 = vmatpush1.bf16.msra.mxu1 %v1578_v56  ;;  %1579 = vmatpush1.bf16.msra.mxu0 %v1578_v56  ;;  %v803_v56 = vld [vmem:[%s2325_s29 + $0x328] sm:$0xff] }
  0x9f   : > { %1725 = vmatprep.subr.bf16.mxu1 %v1580_v57  ;;  %1581 = vmatprep.subr.bf16.mxu0 %v1580_v57  ;;  %v805_v57 = vld [vmem:[%s2325_s29 + $0x338] sm:$0xff] }
  0xa0   : > { %v1620_v59 = vpack.c.bf16 %v805_v57, %v803_v56  ;;  %v845_v56 = vld [vmem:[%s2325_s29 + $0x478] sm:$0xff] }
  0xa1   : > { %v1660_v57 = vpack.c.bf16 %v845_v56, %v843_v55 }
  0xa2   : > { %1727 = vmatpush1.bf16.msra.mxu1 %v1582_v62  ;;  %1583 = vmatpush1.bf16.msra.mxu0 %v1582_v62  ;;  %v807_v62 = vld [vmem:[%s2325_s29 + $0x348] sm:$0xff] }
  0xa3   : > { %1729 = vmatprep.subr.bf16.mxu1 %v1584_v63  ;;  %1585 = vmatprep.subr.bf16.mxu0 %v1584_v63  ;;  %v809_v63 = vld [vmem:[%s2325_s29 + $0x358] sm:$0xff] }
  0xa4   : > { %v1624_v1 = vpack.c.bf16 %v809_v63, %v807_v62 }
  0xa5   : > { %1172 = vmatmul.mubr.f32.vlgmr.msra.gmra.mrb[0].mxu1 %v2321_v16  ;;  %930 = vmatmul.mubr.f32.vlgmr.msra.gmra.mrb[0].mxu0 %v846_v42  ;;  %v1594_v16 = vpack.c.bf16 %v776_v20, %v774_v19  ;;  %v790_v42 = vld [vmem:[%s2325_s29 + $0x2c0] sm:$0xff]  ;;  %v819_v19 = vld [vmem:[%s2325_s29 + $0x3a8] sm:$0xff]  ;;  %v821_v20 = vld [vmem:[%s2325_s29 + $0x3b8] sm:$0xff] }
  0xa6   : > { %1731 = vmatpush1.bf16.msra.mxu1 %v1586_v7  ;;  %1242 = vmatprep.mubr.f32.mxu1 %v1102_v8  ;;  %v1610_v46 = vpack.c.bf16 %v792_v43, %v790_v42  ;;  %v1626_v8 = vpack.c.bf16 %v808_v4, %v806_v3  ;;  %v1636_v22 = vpack.c.bf16 %v821_v20, %v819_v19  ;;  %v835_v42 = vld [vmem:[%s2325_s29 + $0x428] sm:$0xff]  ;;  %v837_v43 = vld [vmem:[%s2325_s29 + $0x438] sm:$0xff] }
  0xa7   : > { %1733 = vmatprep.subr.bf16.mxu1 %v1588_v9  ;;  %1587 = vmatpush1.bf16.msra.mxu0 %v1586_v7  ;;  %v813_v7 = vld [vmem:[%s2325_s29 + $0x378] sm:$0xff]  ;;  %v1652_v45 = vpack.c.bf16 %v837_v43, %v835_v42 }
  0xa8   : > { %1000 = vmatprep.mubr.f32.mxu0 %v859_v15  ;;  %1589 = vmatprep.subr.bf16.mxu0 %v1588_v9  ;;  %v1628_v9 = vpack.c.bf16 %v813_v7, %v811_v6  ;;  %v1632_v15 = vpack.c.bf16 %v817_v13, %v815_v12 }
  0xaa   : > { %1735 = vmatpush1.bf16.msra.mxu1 %v1590_v17 }
  0xab   : > { %1737 = vmatprep.subr.bf16.mxu1 %v1592_v18  ;;  %1591 = vmatpush1.bf16.msra.mxu0 %v1590_v17  ;;  %v814_v17 = vld [vmem:[%s2325_s29 + $0x380] sm:$0xff] }
  0xac   : > { %1593 = vmatprep.subr.bf16.mxu0 %v1592_v18  ;;  %v816_v18 = vld [vmem:[%s2325_s29 + $0x390] sm:$0xff] }
  0xad   : > { %v1634_v21 = vpack.c.bf16 %v816_v18, %v814_v17 }
  0xae   : > { %1739 = vmatpush1.bf16.msra.mxu1 %v1594_v16 }
  0xaf   : > { %1741 = vmatprep.subr.bf16.mxu1 %v1596_v23  ;;  %1595 = vmatpush1.bf16.msra.mxu0 %v1594_v16  ;;  %v818_v16 = vld [vmem:[%s2325_s29 + $0x3a0] sm:$0xff] }
  0xb0   : > { %1597 = vmatprep.subr.bf16.mxu0 %v1596_v23  ;;  %v820_v23 = vld [vmem:[%s2325_s29 + $0x3b0] sm:$0xff] }
  0xb1   : > { %v1638_v26 = vpack.c.bf16 %v820_v23, %v818_v16 }
  0xb2   : > { %1743 = vmatpush1.bf16.msra.mxu1 %v1598_v28 }
  0xb3   : > { %1745 = vmatprep.subr.bf16.mxu1 %v1600_v29  ;;  %1599 = vmatpush1.bf16.msra.mxu0 %v1598_v28  ;;  %v822_v28 = vld [vmem:[%s2325_s29 + $0x3c0] sm:$0xff] }
  0xb4   : > { %1601 = vmatprep.subr.bf16.mxu0 %v1600_v29  ;;  %v824_v29 = vld [vmem:[%s2325_s29 + $0x3d0] sm:$0xff] }
  0xb5   : > { %v1642_v32 = vpack.c.bf16 %v824_v29, %v822_v28 }
  0xb6   : > { %1747 = vmatpush1.bf16.msra.mxu1 %v1602_v34 }
  0xb7   : > { %1749 = vmatprep.subr.bf16.mxu1 %v1604_v35  ;;  %1603 = vmatpush1.bf16.msra.mxu0 %v1602_v34  ;;  %v826_v34 = vld [vmem:[%s2325_s29 + $0x3e0] sm:$0xff] }
  0xb8   : > { %1605 = vmatprep.subr.bf16.mxu0 %v1604_v35  ;;  %v828_v35 = vld [vmem:[%s2325_s29 + $0x3f0] sm:$0xff] }
  0xb9   : > { %v1646_v38 = vpack.c.bf16 %v828_v35, %v826_v34 }
  0xba   : > { %1751 = vmatpush1.bf16.msra.mxu1 %v1606_v40 }
  0xbb   : > { %1753 = vmatprep.subr.bf16.mxu1 %v1608_v41  ;;  %1607 = vmatpush1.bf16.msra.mxu0 %v1606_v40  ;;  %v830_v40 = vld [vmem:[%s2325_s29 + $0x400] sm:$0xff] }
  0xbc   : > { %1609 = vmatprep.subr.bf16.mxu0 %v1608_v41  ;;  %v832_v41 = vld [vmem:[%s2325_s29 + $0x410] sm:$0xff] }
  0xbd   : > { %v1650_v44 = vpack.c.bf16 %v832_v41, %v830_v40 }
  0xbe   : > { %1755 = vmatpush1.bf16.msra.mxu1 %v1610_v46 }
  0xbf   : > { %1757 = vmatprep.subr.bf16.mxu1 %v1612_v47  ;;  %1611 = vmatpush1.bf16.msra.mxu0 %v1610_v46  ;;  %v834_v46 = vld [vmem:[%s2325_s29 + $0x420] sm:$0xff] }
  0xc0   : > { %1613 = vmatprep.subr.bf16.mxu0 %v1612_v47  ;;  %v836_v47 = vld [vmem:[%s2325_s29 + $0x430] sm:$0xff] }
  0xc1   : > { %v1654_v50 = vpack.c.bf16 %v836_v47, %v834_v46 }
  0xc2   : > { %1759 = vmatpush1.bf16.msra.mxu1 %v1614_v52 }
  0xc3   : > { %1761 = vmatprep.subr.bf16.mxu1 %v1616_v53  ;;  %1615 = vmatpush1.bf16.msra.mxu0 %v1614_v52  ;;  %v1656_v52 = vpack.c.bf16 %v841_v49, %v839_v48 }
  0xc4   : > { %1617 = vmatprep.subr.bf16.mxu0 %v1616_v53  ;;  %v838_v53 = vld [vmem:[%s2325_s29 + $0x440] sm:$0xff] }
  0xc6   : > { %1763 = vmatpush1.bf16.msra.mxu1 %v1618_v58 }
  0xc7   : > { %1765 = vmatprep.subr.bf16.mxu1 %v1620_v59  ;;  %1619 = vmatpush1.bf16.msra.mxu0 %v1618_v58  ;;  %v842_v58 = vld [vmem:[%s2325_s29 + $0x460] sm:$0xff] }
  0xc8   : > { %1621 = vmatprep.subr.bf16.mxu0 %v1620_v59  ;;  %v844_v59 = vld [vmem:[%s2325_s29 + $0x470] sm:$0xff] }
  0xc9   : > { %v1662_v60 = vpack.c.bf16 %v844_v59, %v842_v58 }
  0xca   : > { %1767 = vmatpush1.bf16.msra.mxu1 %v1622_v0 }
  0xcb   : > { %1769 = vmatprep.subr.bf16.mxu1 %v1624_v1  ;;  %1623 = vmatpush1.bf16.msra.mxu0 %v1622_v0 }
  0xcc   : > { %1625 = vmatprep.subr.bf16.mxu0 %v1624_v1 }
  0xce   : > { %1771 = vmatpush1.bf16.msra.mxu1 %v1626_v8 }
  0xcf   : > { %1773 = vmatprep.subr.bf16.mxu1 %v1628_v9  ;;  %1627 = vmatpush1.bf16.msra.mxu0 %v1626_v8 }
  0xd0   : > { %1629 = vmatprep.subr.bf16.mxu0 %v1628_v9 }
  0xd2   : > { %1775 = vmatpush1.bf16.msra.mxu1 %v1630_v14 }
  0xd3   : > { %1777 = vmatprep.subr.bf16.mxu1 %v1632_v15  ;;  %1631 = vmatpush1.bf16.msra.mxu0 %v1630_v14 }
  0xd4   : > { %1633 = vmatprep.subr.bf16.mxu0 %v1632_v15 }
  0xd6   : > { %1779 = vmatpush1.bf16.msra.mxu1 %v1634_v21 }
  0xd7   : > { %1781 = vmatprep.subr.bf16.mxu1 %v1636_v22  ;;  %1635 = vmatpush1.bf16.msra.mxu0 %v1634_v21 }
  0xd8   : > { %1637 = vmatprep.subr.bf16.mxu0 %v1636_v22 }
  0xda   : > { %1783 = vmatpush1.bf16.msra.mxu1 %v1638_v26 }
  0xdb   : > { %1785 = vmatprep.subr.bf16.mxu1 %v1640_v27  ;;  %1639 = vmatpush1.bf16.msra.mxu0 %v1638_v26 }
  0xdc   : > { %1641 = vmatprep.subr.bf16.mxu0 %v1640_v27 }
  0xde   : > { %1787 = vmatpush1.bf16.msra.mxu1 %v1642_v32 }
  0xdf   : > { %1789 = vmatprep.subr.bf16.mxu1 %v1644_v33  ;;  %1643 = vmatpush1.bf16.msra.mxu0 %v1642_v32  ;;  %v849_v32 = vld [vmem:[%s2540_s4] sm:$0xf] }
  0xe0   : > { %1645 = vmatprep.subr.bf16.mxu0 %v1644_v33 }
  0xe2   : > { %1791 = vmatpush1.bf16.msra.mxu1 %v1646_v38 }
  0xe3   : > { %1793 = vmatprep.subr.bf16.mxu1 %v1648_v39  ;;  %1647 = vmatpush1.bf16.msra.mxu0 %v1646_v38 }
  0xe4   : > { %1649 = vmatprep.subr.bf16.mxu0 %v1648_v39 }
  0xe5   : > { %1243 = vmatmul.mubr.f32.vlgmr.msra.gmra.mrb[0].mxu1 %v2410_v2  ;;  %v1658_v2 = vpack.c.bf16 %v840_v54, %v838_v53 }
  0xe6   : > { %1795 = vmatpush1.bf16.msra.mxu1 %v1650_v44  ;;  %1313 = vmatprep.mubr.f32.mxu1 %v1929_v51 }
  0xe7   : > { %1797 = vmatprep.subr.bf16.mxu1 %v1652_v45  ;;  %1001 = vmatmul.mubr.f32.vlgmr.msra.gmra.mrb[0].mxu0 %v2417_v5  ;;  %v1091_v5 = vld [vmem:[%s2539_s3 + $0x10] sm:$0xf] }
  0xe8   : > { %1651 = vmatpush1.bf16.msra.mxu0 %v1650_v44  ;;  %1071 = vmatprep.mubr.f32.mxu0 %v1929_v51  ;;  %v1347_v44 = vld [vmem:[%s685_s22] sm:$0xff] }
  0xe9   : > { %1653 = vmatprep.subr.bf16.mxu0 %v1652_v45 }
  0xea   : > { %1799 = vmatpush1.bf16.msra.mxu1 %v1654_v50 }
  0xeb   : > { %1801 = vmatprep.subr.bf16.mxu1 %v1656_v52 }
  0xec   : > { %1655 = vmatpush1.bf16.msra.mxu0 %v1654_v50 }
  0xed   : > { %1657 = vmatprep.subr.bf16.mxu0 %v1656_v52 }
  0xee   : > { %1803 = vmatpush1.bf16.msra.mxu1 %v1658_v2 }
  0xef   : > { %1805 = vmatprep.subr.bf16.mxu1 %v1660_v57 }
  0xf0   : > { %1659 = vmatpush1.bf16.msra.mxu0 %v1658_v2 }
  0xf1   : > { %1661 = vmatprep.subr.bf16.mxu0 %v1660_v57 }
  0xf2   : > { %1807 = vmatpush1.bf16.msra.mxu1 %v1662_v60 }
  0xf4   : > { %1663 = vmatpush1.bf16.msra.mxu0 %v1662_v60 }
  0xf5   : > { %1516 = vmatmul.mubr.msk.f32.vlgmr.msra.gmra.mrb[0].mxu1 %vm862_vm0, %v1091_v5 }
  0xf7   : > { %1515 = vmatmul.mubr.msk.f32.vlgmr.msra.gmra.mrb[0].mxu0 %vm862_vm0, %v848_v61  ;;  %v1096_v62 = vpop.permute.xlu0 %1095 }
 0x107   : > { %v1327_v3 = vpop.permute.xlu0 %1326 }
 0x10b   : > { %v1085_v40 = vpop.permute.xlu0 %1084 }
 0x1c8   : > { %v1315_v63 = vpop.f32.mrb[0].mxu1 }
 0x1c9   : > { %v1810_v0 = vadd.f32 %v1315_v63, %v1096_v62  ;;  %v1317_v1 = vpop.f32.mrb[1].mxu1 }
 0x1ca   : > { %v1811_v4 = vadd.f32 %v1317_v1, %v1096_v62  ;;  %v1073_v6 = vpop.f32.mrb[0].mxu0 }
 0x1cb   : > { %v1329_v7 = vmul.f32 %v1810_v0, %v1327_v3  ;;  %v1075_v8 = vpop.f32.mrb[1].mxu0 }
 0x1cc   : > { %v1330_v9 = vmul.f32 %v1811_v4, %v1327_v3 }
 0x1cd   : > { %v1331_v10 = vadd.f32 2.0, %v1329_v7 }
 0x1ce   : > { %v1332_v11 = vadd.f32 2.0, %v1330_v9 }
 0x1cf   : > { %v1333_v12 = vsub.f32 0.0, %v1331_v10 }
 0x1d0   : > { %v1334_v13 = vsub.f32 0.0, %v1332_v11 }
 0x1d1   : > { %v1335_v14 = vmul.f32 1.442695, %v1333_v12 }
 0x1d2   : > { %v1337_v15 = vmul.f32 1.442695, %v1334_v13 }
 0x1d3   : > { %1876 = vpow2.f32 %v1335_v14 }
 0x1d4   : > { %1878 = vpow2.f32 %v1337_v15 }
 0x1dd   : > { %v1877_v17 = vpop.eup %1876 }
 0x1de   : > { %v1879_v18 = vpop.eup %1878  ;;  %v1339_v19 = vadd.f32 1.0, %v1877_v17 }
 0x1df   : > { %v1340_v20 = vadd.f32 1.0, %v1879_v18 }
 0x1e0   : > { %1880 = vrcp.f32 %v1339_v19 }
 0x1e1   : > { %1882 = vrcp.f32 %v1340_v20 }
 0x1ea   : > { %v1881_v21 = vpop.eup %1880 }
 0x1eb   : > { %v1883_v22 = vpop.eup %1882  ;;  %v1345_v16 = vadd.f32 0.0001, %v1881_v21 }
 0x1ec   : > { %v1346_v23 = vadd.f32 0.0001, %v1883_v22 }
 0x1ed   : > { %1884 = vlog2.f32 %v1345_v16 }
 0x1ee   : > { %1886 = vlog2.f32 %v1346_v23  ;;  %v1355_v24 = vcombine.low %v1345_v16, %v1346_v23 }
 0x1f7   : > { %v1885_v25 = vpop.eup %1884 }
 0x1f8   : > { %v1887_v26 = vpop.eup %1886  ;;  %v1366_v27 = vmul.f32 0.6931472, %v1885_v25 }
 0x1f9   : > { %v1368_v28 = vmul.f32 0.6931472, %v1887_v26 }
 0x1fa   : > { %v1370_v29 = vsel %vm1369_vm1, %v1366_v27, 0.0 }
 0x1fb   : > { %v1371_v30 = vsel %vm1369_vm1, %v1368_v28, 0.0 }
 0x1fc   : > { %v1372_v31 = vadd.f32 %v1371_v30, %v1370_v29 }
 0x1fe   : > { %1373 = vadd.xlane.f32.xlu1 %v1372_v31 }
 0x20f   : > { %852 = vperm.xlu1 %1867, %v849_v32  }
 0x28b   : > { %v1374_v33 = vpop.xlane.xlu1 %1373 }
 0x28c   : > { %v1375_v34 = vrot.slane %v1374_v33, 4 }
 0x28e   : > { %v1376_v35 = vadd.f32 %v1375_v34, %v1374_v33 }
 0x28f   : > { %v853_v36 = vpop.permute.xlu1 %852 }
 0x290   : > { %v1377_v37 = vrot.slane %v1376_v35, 2  ;;  %v1808_v38 = vadd.f32 %v1073_v6, %v853_v36  ;;  %v1809_v39 = vadd.f32 %v1075_v8, %v853_v36 }
 0x292   : > { %v1087_v41 = vmul.f32 %v1808_v38, %v1085_v40  ;;  %v1088_v42 = vmul.f32 %v1809_v39, %v1085_v40  ;;  %v1378_v43 = vadd.f32 %v1377_v37, %v1376_v35 }
 0x294   : > { %v1350_v45 = vcombine.low %v1087_v41, %v1088_v42  ;;  %v1379_v46 = vrot.slane %v1378_v43, 1 }
 0x296   : > { %v1352_v47 = vadd.f32 %v1350_v45, %v1347_v44  ;;  %v1380_v48 = vadd.f32 %v1379_v46, %v1378_v43 }
 0x298   : > { %v1357_v49 = vmul.f32 %v1355_v24, %v1352_v47  ;;  %1822 = vpush %v1380_v48 }
 0x29a   : > { %1358 = vst [vmem:[%s695_s25] sm:$0xff] %v1357_v49 }
 0x2c9   : > { %s1823_s27 = spop %1822 }
 0x2ca   : > { %v1382_v50 = vstv %s1823_s27 }
 0x2cb   : > { %1384 = vst [vmem:[%s701_s15] sm:$0xff] %v1382_v50 }
 0x2cc PF: > { %s20_s13 = sadd.s32 1, %s1926_s13   ;;  %s2546_s30 = smov %s1914_s10 }
 0x2cd   : > { %p17_p11 = scmp.ge.s32.totalorder %s20_s13, 4   ;;  %s2547_s10 = smov %s2015_s17 }
 0x2ce   : > { %s2548_s11 = smov %s1922_s12  ;;  %s2549_s12 = smov %s2551_s14 }
 0x2cf   :  { %19 = sbr.rel (!%p17_p11) target bundleno = 3 (0x3), region = 129 }

// kernel: custom-call.2
= control target key start
LH: loop header
LB: loop body
LE: loop exit
PB: predicated region body
PF: predicated region fallthrough
CT: control target
= control target key end

     0   :  { %5 = vsyncpa [#allocation1], 0  ;;  %s603_s0 = inlined_call_operand.hbm [shape: f32[8,8], index: 0, kind: input, shape index: {}]   ;;  %s604_s1 = inlined_call_operand.vmem [shape: f32[8,8], index: 1, kind: output, shape index: {0}]   ;;  %s605_s2 = inlined_call_operand.hbm [shape: s32[8], index: 2, kind: output, shape index: {1}]   ;;  %s606_s3 = inlined_call_operand.hbm [shape: s32[8], index: 3, kind: output, shape index: {2}]  }
   0x1   :  { %6 = vsyncpa [#allocation2], 0 }
   0x2   :  { %7 = vsyncpa [#allocation8], 0  ;;  %s505_s12 = smov [#allocation0]   ;;  %s389_s16 = scalar_lea.hbm %s603_s0, 128 }
   0x3   :  { %s11_s13 = sshll.u32 %s505_s12, 4  ;;  %p390_p0 = scmp.ne.s32.totalorder %s603_s0, %s389_s16  ;;  %s12_s13 = int_to_ptr.vmem [resolvable:$true] %s11_s13 }
   0x4   :  { %p393_p1 = scmp.lt.u32.totalorder %s389_s16, %s603_s0 }
   0x6   :  { %p395_p2 = pnand %p393_p1, %p390_p0 }
   0x8   :  { %398 = shalt.err (!%p395_p2)
}
   0x9   :  { %s399_s21 = scalar_lea.vmem %s12_s13, 128  ;;  %p404_p4 = scmp.lt.s32.totalorder %s12_s13, %s12_s13 }
   0xa   :  { %p400_p3 = scmp.ne.s32.totalorder %s12_s13, %s399_s21  ;;  %p405_p5 = scmp.lt.s32.totalorder %s399_s21, %s399_s21 }
   0xc   :  { %p406_p6 = por %p405_p5, %p404_p4 }
   0xe   :  { %p407_p7 = pnand %p406_p6, %p400_p3 }
  0x10   :  { %410 = shalt.err (!%p407_p7)
}
  0x11   :  { %14 = dma.hbm_to_vmem [thread:$0]  %s603_s0, 128, %s12_s13, [#allocation1]  }
  0x12   :  { %487 = dma.done.wait [#allocation1], 128  }
  0x13   :  { %488 = vsyncadd [#allocation1], 4294967168  ;;  %v19_v0 = vlaneseq  ;;  %v506_v1 = vmov 0   ;;  %v16_v3 = vld [vmem:[#allocation0] sm:$0xff]  ;;  %s545_s24 = smov 0  }
  0x14   :  { %18 = vst [vmem:[#allocation4] sm:$0x1] %v506_v1  ;;  %17 = vst [vmem:[#allocation3] sm:$0xff] %v16_v3 }
  0x15   :  { %v542_v2 = vshrl.u32 %v19_v0, 7 }
  0x17   :  { %23 = vst [vmem:[#allocation9] sm:$0xff] %v542_v2 }
  0x18 LB: > { %v551_v6 = vstv %s495_s24  ;;  %s80_s0 = ssub.s32 128, %s495_s24  ;;  %v86_v36 = vand.u32 127, %v19_v0  ;;  %s92_s25 = scalar_lea.vmem [#allocation3], %s495_s24  ;;  %s495_s24 = sphi %s545_s24, %s29_s24  }
  0x19   : > { %vm38_vm0 = vcmp.ge.s32.totalorder %v542_v2, %v551_v6  ;;  %s98_s27 = scalar_lea.vmem [#allocation9], %s495_s24  ;;  %vm118_vm13 = vcmp.gt.s32.totalorder %v542_v2, %v551_v6  ;;  %s29_s24 = sadd.s32 1, %s495_s24  }
  0x1a   : > { %vm110_vm10 = vcmp.gt.s32.totalorder %v86_v36, %v551_v6  ;;  %vm87_vm11 = vcmp.eq.s32.totalorder %v86_v36, %v551_v6  ;;  %p26_p8 = scmp.ge.s32.totalorder %s29_s24, 8  }
  0x1b   : > { %v34_v4 = vld [vmem:[#allocation3] sm:$0xff]  ;;  %v89_v38 = vld [vmem:[#allocation4] ss:$0 sm:$0xff]  ;;  %v94_v39 = vld [vmem:[%s92_s25] ss:$0 sm:$0xff]  ;;  %s497_s5 = smov (%p26_p8), %s604_s1   ;;  %s501_s6 = smov (%p26_p8), [#allocation3]  }
  0x1c   : > { %v35_v5 = vand.u32 2147483647, %v34_v4  ;;  %vm122_vm15 = vmand %vm118_vm13, %vm87_vm11 }
  0x1e   : > { %vm311_vm1 = vcmp.gt.f32.partialorder %v35_v5, -inf  ;;  %v100_v40 = vld [vmem:[%s98_s27] ss:$0 sm:$0xff] }
  0x1f   : > { %vm42_vm2 = vmand %vm38_vm0, %vm311_vm1 }
  0x20   : > { %v43_v7 = vsel %vm42_vm2, %v542_v2, %v551_v6  ;;  %v44_v8 = vsel %vm42_vm2, %v35_v5, -inf }
  0x21   : > { %v45_v9 = vrot.slane %v44_v8, 1  ;;  %v46_v10 = vrot.slane %v43_v7, 1 }
  0x23   : > { %vm47_vm3 = vcmp.ge.f32.partialorder %v45_v9, %v44_v8  ;;  %v50_v11 = vrot.slane %v45_v9, 1  ;;  %v51_v12 = vrot.slane %v46_v10, 1 }
  0x24   : > { %v48_v13 = vsel %vm47_vm3, %v45_v9, %v44_v8  ;;  %v49_v14 = vsel %vm47_vm3, %v46_v10, %v43_v7 }
  0x25   : > { %vm52_vm4 = vcmp.ge.f32.partialorder %v50_v11, %v48_v13  ;;  %v55_v15 = vrot.slane %v50_v11, 1  ;;  %v56_v16 = vrot.slane %v51_v12, 1 }
  0x26   : > { %v53_v17 = vsel %vm52_vm4, %v50_v11, %v48_v13  ;;  %v54_v18 = vsel %vm52_vm4, %v51_v12, %v49_v14 }
  0x27   : > { %vm57_vm5 = vcmp.ge.f32.partialorder %v55_v15, %v53_v17  ;;  %v60_v19 = vrot.slane %v55_v15, 1  ;;  %v61_v20 = vrot.slane %v56_v16, 1 }
  0x28   : > { %v58_v21 = vsel %vm57_vm5, %v55_v15, %v53_v17  ;;  %v59_v22 = vsel %vm57_vm5, %v56_v16, %v54_v18 }
  0x29   : > { %vm62_vm6 = vcmp.ge.f32.partialorder %v60_v19, %v58_v21  ;;  %v65_v23 = vrot.slane %v60_v19, 1  ;;  %v66_v24 = vrot.slane %v61_v20, 1 }
  0x2a   : > { %v63_v25 = vsel %vm62_vm6, %v60_v19, %v58_v21  ;;  %v64_v26 = vsel %vm62_vm6, %v61_v20, %v59_v22 }
  0x2b   : > { %vm67_vm7 = vcmp.ge.f32.partialorder %v65_v23, %v63_v25  ;;  %v70_v27 = vrot.slane %v65_v23, 1  ;;  %v71_v28 = vrot.slane %v66_v24, 1 }
  0x2c   : > { %v68_v29 = vsel %vm67_vm7, %v65_v23, %v63_v25  ;;  %v69_v30 = vsel %vm67_vm7, %v66_v24, %v64_v26 }
  0x2d   : > { %vm72_vm8 = vcmp.ge.f32.partialorder %v70_v27, %v68_v29  ;;  %v75_v31 = vrot.slane %v70_v27, 1  ;;  %v76_v32 = vrot.slane %v71_v28, 1 }
  0x2e   : > { %v73_v33 = vsel %vm72_vm8, %v70_v27, %v68_v29  ;;  %v74_v34 = vsel %vm72_vm8, %v71_v28, %v69_v30 }
  0x2f   : > { %vm77_vm9 = vcmp.ge.f32.partialorder %v75_v31, %v73_v33 }
  0x30   : > { %v79_v35 = vsel %vm77_vm9, %v76_v32, %v74_v34 }
  0x31   : > { %81 = vrot.lane.b32.xlu0 %v79_v35, %s80_s0 }
  0xa3   : > { %v82_v37 = vpop.permute.xlu0 %81 }
  0xa4   : > { %316 = vpush %v82_v37 }
  0xd5   : > { %s317_s26 = spop %316 }
  0xd6   : > { %v88_v41 = vstv %s317_s26  ;;  %s93_s28 = scalar_lea.vmem [#allocation3], %s317_s26  ;;  %s99_s29 = scalar_lea.vmem [#allocation9], %s317_s26 }
  0xd7   : > { %v95_v42 = vld [vmem:[%s93_s28] ss:$0 sm:$0xff]  ;;  %v90_v44 = vsel %vm87_vm11, %v88_v41, %v89_v38 }
  0xd8   : > { %v101_v43 = vld [vmem:[%s99_s29] ss:$0 sm:$0xff]  ;;  %96 = vst [vmem:[%s93_s28] sm:$0x1] %v94_v39  ;;  %vm104_vm12 = vcmp.ne.f32.partialorder %v95_v42, 0.0  ;;  %91 = vst [vmem:[#allocation4] sm:$0x1] %v90_v44 }
  0xd9   : > { %102 = vst [vmem:[%s99_s29] sm:$0x1] %v100_v40  ;;  %97 = vst [vmem:[%s92_s25] sm:$0x1] %v95_v42  ;;  %v111_v51 = vsel %vm110_vm10, %v95_v42, 0.0 }
  0xda   : > { %103 = vst [vmem:[%s98_s27] sm:$0x1] %v101_v43  ;;  %vm105_vm14 = vmand %vm87_vm11, %vm104_vm12 }
  0xdb   : > { %v106_v45 = vsel %vm105_vm14, %v95_v42, 1.0 }
  0xdc   : > { %v119_v46 = vsel %vm118_vm13, %v106_v45, 1.0 }
  0xdd   : > { %387 = vrcp.f32 %v119_v46 }
  0xdf   :  { %v181_v56 = vld [vmem:[#allocation4] sm:$0x1] (%p26_p8) }
  0xe0   : > { %v115_v48 = vld [vmem:[#allocation3] sm:$0xff]  ;;  %183 = vst [vmem:[#allocation5] sm:$0x1] (%p26_p8), %v181_v56 }
  0xe1   :  { %v129_v55 = vld [vmem:[#allocation9] sm:$0xff] (%p26_p8) }
  0xe7   : > { %v388_v47 = vpop.eup %387 }
  0xe8   : > { %v121_v49 = vmul.f32 %v388_v47, %v115_v48 }
  0xea   : > { %v123_v50 = vsel %vm122_vm15, %v121_v49, 0.0 }
  0xeb   : > { %124 = vadd.xlane.f32.xlu0 %v123_v50 }
 0x118   :  { %145 = vxpose.xlu0.b32.start.end [1/1] (short) (narrow) (%p26_p8), %v129_v55, 8 }
 0x177   :  { %28 = sbr.rel (!%p26_p8) target bundleno = 24 (0x18), region = 83 }
 0x178   : > { %v125_v52 = vpop.xlane.xlu0 %124 }
 0x179   : > { %v126_v53 = vmul.f32 %v125_v52, %v111_v51 }
 0x17b   : > { %v127_v54 = vsub.f32 %v121_v49, %v126_v53 }
 0x17d   : > { %128 = vst [vmem:[#allocation3] sm:$0xff] %v127_v54 }
 0x198   :  { %v161_v57 = vpop.trf.xlu0 }
 0x199   :  { %177 = vst [vmem:[#allocation6] sm:$0x1] %v161_v57 }
 0x1a0   :  { %v187_v58 = vld [vmem:[#allocation6] sm:$0x1] }
 0x1a1   :  { %189 = vst [vmem:[#allocation7] sm:$0x1] %v187_v58 }
 0x1a2 LB: > { %v237_v59 = vld [vmem:[%s503_s6] sm:$0xff]  ;;  %s239_s6 = scalar_lea.vmem %s503_s6, 8   ;;  %s503_s6 = sphi %s501_s6, %s239_s6   ;;  %s499_s5 = sphi %s497_s5, %s240_s5  }
 0x1a3   : > { %238 = vst [vmem:[%s499_s5] sm:$0xff] %v237_v59  ;;  %s240_s5 = scalar_lea.vmem %s499_s5, 8   ;;  %p234_p9 = scmp.gt.s32.totalorder %s239_s6, [#allocation3] }
 0x1a4   :  { %s507_s7 = smov (%p234_p9), [#allocation5]   ;;  %s508_s9 = smov (%p234_p9), [#allocation7]  }
 0x1a5   :  { %236 = sbr.rel (!%p234_p9) target bundleno = 418 (0x1a2), region = 105  ;;  %s257_s8 = sshll.u32 (%p234_p9), %s507_s7, 4  ;;  %s258_s8 = int_to_ptr.vmem [resolvable:$true] %s257_s8 }
 0x1a6   :  { %s266_s10 = sshll.u32 (%p234_p9), %s508_s9, 4  ;;  %s411_s1 = scalar_lea.vmem (%p234_p9), %s258_s8, 16  ;;  %s267_s10 = int_to_ptr.vmem [resolvable:$true] %s266_s10 }
 0x1a7   :  { %p412_p10 = scmp.ne.s32.totalorder (%p234_p9), %s258_s8, %s411_s1  ;;  %s415_s11 = scalar_lea.vmem (%p234_p9), %s258_s8, 32 }
 0x1a8   :  { %p416_p11 = scmp.lt.s32.totalorder (%p234_p9), %s258_s8, %s258_s8  ;;  %p417_p12 = scmp.lt.s32.totalorder (%p234_p9), %s415_s11, %s411_s1 }
 0x1aa   :  { %p418_p13 = por (%p234_p9), %p417_p12, %p416_p11 }
 0x1ac   :  { %p419_p0 = pnand %p418_p13, %p412_p10 }
 0x1ae   :  { %422 = shalt.err (!%p419_p0)
}
 0x1af   :  { %s423_s14 = scalar_lea.hbm %s605_s2, 16 }
 0x1b0   :  { %p424_p1 = scmp.ne.s32.totalorder %s605_s2, %s423_s14  ;;  %p427_p2 = scmp.lt.u32.totalorder %s423_s14, %s605_s2 }
 0x1b2   :  { %p429_p3 = pnand %p427_p2, %p424_p1 }
 0x1b4   :  { %432 = shalt.err (!%p429_p3)
}
 0x1b5   :  { %260 = dma.vmem_to_hbm [thread:$0]  %s258_s8, 16, %s605_s2, [#allocation2]  }
 0x1b6   :  { %s433_s21 = scalar_lea.vmem %s267_s10, 16  ;;  %s437_s22 = scalar_lea.vmem %s267_s10, 32 }
 0x1b7   :  { %p434_p4 = scmp.ne.s32.totalorder %s267_s10, %s433_s21  ;;  %p438_p5 = scmp.lt.s32.totalorder %s267_s10, %s267_s10 }
 0x1b8   :  { %p439_p6 = scmp.lt.s32.totalorder %s437_s22, %s433_s21 }
 0x1ba   :  { %p440_p7 = por %p439_p6, %p438_p5 }
 0x1bc   :  { %p441_p8 = pnand %p440_p7, %p434_p4 }
 0x1be   :  { %444 = shalt.err (!%p441_p8)
}
 0x1bf   :  { %s445_s0 = scalar_lea.hbm %s606_s3, 16 }
 0x1c0   :  { %p446_p9 = scmp.ne.s32.totalorder %s606_s3, %s445_s0  ;;  %p449_p10 = scmp.lt.u32.totalorder %s445_s0, %s606_s3 }
 0x1c2   :  { %p451_p11 = pnand %p449_p10, %p446_p9 }
 0x1c4   :  { %454 = shalt.err (!%p451_p11)
}
 0x1c5   :  { %269 = dma.vmem_to_hbm [thread:$0]  %s267_s10, 16, %s606_s3, [#allocation8]  }
 0x1c6   :  { %489 = dma.done.wait [#allocation2], 16  }
 0x1c7   :  { %490 = vsyncadd [#allocation2], 4294967280 }
 0x1c8   :  { %491 = dma.done.wait [#allocation8], 16  }
 0x1c9   :  { %492 = vsyncadd [#allocation8], 4294967280 }
 0x1ca   :  { %276 = vsyncpa [#allocation1], 1 }
 0x1cb   :  { %277 = vsyncpa [#allocation2], 1 }
 0x1cc   :  { %278 = vsyncpa [#allocation8], 1 }

</bundles_post_ra>
